<compile_context>
chip_gen: v5e
topology: v5e:2x2
jax: 0.10.0
libtpu: 0.0.40
codegen_flags: <defaults>
</compile_context>

<pallas_src>
import functools
import math

import jax
import jax.numpy as jnp
from jax.experimental import pallas as pl
from jax.experimental.pallas import tpu as pltpu

PROJ_EPS = 1e-5  # max norm in Poincare ball = 1 - PROJ_EPS (matches hype proj_)


def hyla_kernel(e_ref, bT_ref, lam_ref, bias_ref, out_ref, *, dim):
    """One (tile_n, tile_f) block of the eigs output.

    e_ref    : (tile_n, dim)      embedding rows
    bT_ref   : (dim, tile_f)      boundary points, transposed (unit-norm rows)
    lam_ref  : (1, tile_f)        Lambdas
    bias_ref : (1, tile_f)        bias
    out_ref  : (tile_n, tile_f)   eigs output block
    """
    e = e_ref[...].astype(jnp.float32)                      # (tn, d)

    # Row squared norms: single cross-lane reduce over dim.
    sqn = jnp.sum(e * e, axis=-1, keepdims=True)            # (tn, 1)

    # proj_(): clip row norm to 1 - PROJ_EPS.  Do NOT rewrite e; fold the scale
    # into the per-row scalars and into the matmul result instead.
    max_norm = 1.0 - PROJ_EPS
    sq_max = max_norm * max_norm
    scale = jnp.where(sqn > sq_max, max_norm * jax.lax.rsqrt(sqn), 1.0)  # (tn, 1)
    sqn_p = sqn * (scale * scale)                           # ||proj(e)||^2, (tn, 1)

    # Cross term on the MXU with un-projected e; scale folded in afterwards.
    xb = jnp.dot(e, bT_ref[...].astype(jnp.float32),
                 preferred_element_type=jnp.float32)        # (tn, tf)

    # ||x - b||^2 = ||x||^2 + ||b||^2 - 2 x.b, with ||b||^2 == 1 (unit-norm
    # boundary enforced by the wrapper).  Clamp to avoid log of <= 0 from
    # catastrophic cancellation when x approaches a boundary point.
    one_p_sqn = 1.0 + sqn_p                                 # (tn, 1)
    two_scale = 2.0 * scale                                 # (tn, 1)
    dist_sq = jnp.maximum(one_p_sqn - two_scale * xb, 1e-12)

    # log PsK = log(1 - ||x||^2) - log ||x - b||^2
    #   -> only the per-element log, exp, cos hit the EUP slot per element.
    log_num = jnp.log(1.0 - sqn_p)                          # (tn, 1), per-row only
    log_psk = log_num - jnp.log(dist_sq)                    # (tn, tf)

    lam_half = lam_ref[...].astype(jnp.float32) * 0.5       # (1, tf)
    bias = bias_ref[...].astype(jnp.float32)                # (1, tf)

    angles = lam_half * log_psk + bias
    amp = jnp.exp((0.5 * (dim - 1)) * log_psk)              # sqrt(PsK)^(dim-1)
    out_ref[...] = (jnp.cos(angles) * amp).astype(out_ref.dtype)


def _pick_tile(total, cap, align):
    """Largest multiple of `align` <= cap that evenly divides `total`.
    Falls back to the full extent if none exists (single block along that axis)."""
    if total <= cap:
        return total
    t = (cap // align) * align
    while t >= align:
        if total % t == 0:
            return t
        t -= align
    return total


def hyla_forward(weight, boundary, lambdas, bias, *,
                 tile_n=None, tile_f=None, out_dtype=jnp.float32):
    """weight: (size, dim), boundary: (HyLa_fdim, dim), lambdas/bias: (HyLa_fdim,)."""
    size, dim = weight.shape
    fdim = boundary.shape[0]

    # Enforce the unit-norm boundary invariant (sample_boundary guarantees it;
    # idempotent here) so the in-kernel ||b||^2 == 1 shortcut is always valid.
    boundary = boundary / jnp.linalg.norm(boundary, axis=-1, keepdims=True)
    boundary_t = boundary.T                                 # (dim, fdim)
    lam2d = lambdas.reshape(1, fdim)
    bias2d = bias.reshape(1, fdim)

    # ---- tile selection ----------------------------------------------------
    # Output tile is the dominant VMEM consumer (inputs are tiny since dim is
    # small).  Cap the double-buffered f32 output tile at ~16 MiB so the same
    # sizing fits v7x (64 MiB physical / 32 MiB scoped default) as well as
    # v5e/v6e; keep tile_f a multiple of 128 for unmasked lane-dense stores.
    MAX_TILE_ELEMS = 2 * 1024 * 1024        # 8 MiB per buffer of f32
    MAX_TILE_F = 2048
    if tile_f is None:
        tile_f = _pick_tile(fdim, MAX_TILE_F, 128)
    if tile_n is None:
        cap_n = max(8, MAX_TILE_ELEMS // max(tile_f, 1))
        tile_n = _pick_tile(size, cap_n, 8)

    assert size % tile_n == 0 and fdim % tile_f == 0

    # VMEM budget: double-buffered output + inputs, with headroom; capped well
    # below v7x's 64 MiB physical VMEM.
    vmem_needed = 2 * 4 * (tile_n * tile_f + tile_n * dim + dim * tile_f + 2 * tile_f)
    vmem_limit = min(max(int(vmem_needed * 1.5) + (4 << 20), 16 << 20), 48 << 20)

    kernel = functools.partial(hyla_kernel, dim=dim)

    return pl.pallas_call(
        kernel,
        out_shape=jax.ShapeDtypeStruct((size, fdim), out_dtype),
        grid=(size // tile_n, fdim // tile_f),
        in_specs=[
            pl.BlockSpec((tile_n, dim), lambda i, j: (i, 0)),
            pl.BlockSpec((dim, tile_f), lambda i, j: (0, j)),
            pl.BlockSpec((1, tile_f), lambda i, j: (0, j)),
            pl.BlockSpec((1, tile_f), lambda i, j: (0, j)),
        ],
        out_specs=pl.BlockSpec((tile_n, tile_f), lambda i, j: (i, j)),
        compiler_params=pltpu.CompilerParams(
            dimension_semantics=("parallel", "parallel"),
            vmem_limit_bytes=vmem_limit,
        ),
    )(weight, boundary_t, lam2d, bias2d)


def hyla_reference(weight, boundary, lambdas, bias, dim):
    """Pure-JAX reference mirroring the PyTorch forward."""
    e = weight
    norm = jnp.linalg.norm(e, axis=-1, keepdims=True)
    max_norm = 1.0 - PROJ_EPS
    e = jnp.where(norm > max_norm, e * (max_norm / norm), e)
    diff = e[:, None, :] - boundary[None, :, :]             # (N, F, d)
    psk = (1.0 - jnp.sum(e * e, axis=-1, keepdims=True)) / jnp.sum(diff * diff, axis=-1)
    angles = lambdas / 2.0 * jnp.log(psk)
    return jnp.cos(angles + bias) * jnp.sqrt(psk) ** (dim - 1)


if __name__ == "__main__":
    # Deterministic "module init" (synthetic parameters, not a checkpoint load).
    size = 128          # number of embedded nodes
    dim = 16            # hyperbolic embedding dimension
    HyLa_fdim = 256     # number of HyLa features
    scale = 0.1

    key = jax.random.PRNGKey(0)
    k_w, k_l, k_b, k_ph = jax.random.split(key, 4)

    # lt.weight.init_weights(irange=1e-5) -> uniform(-1e-5, 1e-5)
    weight = jax.random.uniform(
        k_w, (size, dim), jnp.float32, minval=-1e-5, maxval=1e-5
    )
    # Lambdas = scale * randn(HyLa_fdim)
    lambdas = scale * jax.random.normal(k_l, (HyLa_fdim,), jnp.float32)
    # boundary = sample_boundary(..., 'RandomUniform'): normalized Gaussians on unit sphere
    pre_b = jax.random.normal(k_b, (HyLa_fdim, dim), jnp.float32)
    boundary = pre_b / jnp.linalg.norm(pre_b, axis=-1, keepdims=True)
    # bias = 2*pi*rand(HyLa_fdim)
    bias = 2.0 * math.pi * jax.random.uniform(k_ph, (HyLa_fdim,), jnp.float32)

    eigs = hyla_forward(weight, boundary, lambdas, bias)
    eigs = jax.block_until_ready(eigs)

    ref = hyla_reference(weight, boundary, lambdas, bias, dim)
    assert eigs.shape == (size, HyLa_fdim)
    assert jnp.allclose(eigs, ref, atol=1e-4, rtol=1e-4), "mismatch vs reference"

    print("KERNEL_OK")
</pallas_src>

<mosaic_0001>
module attributes {stable_mosaic.version = 11 : i64} {
  func.func @hyla_kernel(%arg0: i32, %arg1: i32, %arg2: memref<128x16xf32, #tpu.memory_space<vmem>>, %arg3: memref<16x256xf32, #tpu.memory_space<vmem>>, %arg4: memref<1x256xf32, #tpu.memory_space<vmem>>, %arg5: memref<1x256xf32, #tpu.memory_space<vmem>>, %arg6: memref<128x256xf32, #tpu.memory_space<vmem>>) attributes {dimension_semantics = [#tpu.dimension_semantics<parallel>, #tpu.dimension_semantics<parallel>], iteration_bounds = array<i64: 1, 1>, scalar_prefetch = 0 : i64, scratch_operands = 0 : i64, tpu.core_type = #tpu.core_type<tc>, window_params = [{transform_indices = @transform_0, window_bounds = array<i64: 128, 16>}, {transform_indices = @transform_1, window_bounds = array<i64: 16, 256>}, {transform_indices = @transform_2, window_bounds = array<i64: 1, 256>}, {transform_indices = @transform_3, window_bounds = array<i64: 1, 256>}, {transform_indices = @transform_4, window_bounds = array<i64: 128, 256>}]} {
    %c0 = arith.constant 0 : index
    %c0_0 = arith.constant 0 : index
    %0 = vector.load %arg2[%c0, %c0_0] : memref<128x16xf32, #tpu.memory_space<vmem>>, vector<128x16xf32>
    %1 = arith.mulf %0, %0 : vector<128x16xf32>
    %cst = arith.constant dense<0.000000e+00> : vector<128xf32>
    %2 = vector.multi_reduction <add>, %1, %cst [1] : vector<128x16xf32> to vector<128xf32>
    %3 = vector.shape_cast %2 : vector<128xf32> to vector<128x1xf32>
    %cst_1 = arith.constant 0.999979972 : f32
    %4 = vector.broadcast %cst_1 : f32 to vector<128x1xf32>
    %5 = arith.cmpf ogt, %3, %4 : vector<128x1xf32>
    %6 = math.rsqrt %3 : vector<128x1xf32>
    %cst_2 = arith.constant 0.999989986 : f32
    %7 = vector.broadcast %cst_2 : f32 to vector<128x1xf32>
    %8 = arith.mulf %7, %6 : vector<128x1xf32>
    %cst_3 = arith.constant 1.000000e+00 : f32
    %9 = vector.broadcast %cst_3 : f32 to vector<128x1xf32>
    %10 = arith.select %5, %8, %9 : vector<128x1xi1>, vector<128x1xf32>
    %11 = arith.mulf %10, %10 : vector<128x1xf32>
    %12 = arith.mulf %3, %11 : vector<128x1xf32>
    %c0_4 = arith.constant 0 : index
    %c0_5 = arith.constant 0 : index
    %13 = vector.load %arg3[%c0_4, %c0_5] : memref<16x256xf32, #tpu.memory_space<vmem>>, vector<16x256xf32>
    %cst_6 = arith.constant dense<0.000000e+00> : vector<128x256xf32>
    %14 = tpu.matmul %0, %13, %cst_6 {dimension_numbers = #tpu.dot_dimension_numbers<[1], [0], [0], [1], [0, 0, 1, 1], [], []>} : vector<128x16xf32>, vector<16x256xf32>, vector<128x256xf32> -> vector<128x256xf32>
    %cst_7 = arith.constant 1.000000e+00 : f32
    %15 = vector.broadcast %cst_7 : f32 to vector<128x1xf32>
    %16 = arith.addf %15, %12 : vector<128x1xf32>
    %cst_8 = arith.constant 2.000000e+00 : f32
    %17 = vector.broadcast %cst_8 : f32 to vector<128x1xf32>
    %18 = arith.mulf %17, %10 : vector<128x1xf32>
    %19 = vector.broadcast %18 : vector<128x1xf32> to vector<128x256xf32>
    %20 = arith.mulf %19, %14 : vector<128x256xf32>
    %21 = vector.broadcast %16 : vector<128x1xf32> to vector<128x256xf32>
    %22 = arith.subf %21, %20 : vector<128x256xf32>
    %cst_9 = arith.constant 9.99999996E-13 : f32
    %23 = vector.broadcast %cst_9 : f32 to vector<128x256xf32>
    %24 = arith.maximumf %22, %23 : vector<128x256xf32>
    %cst_10 = arith.constant 1.000000e+00 : f32
    %25 = vector.broadcast %cst_10 : f32 to vector<128x1xf32>
    %26 = arith.subf %25, %12 : vector<128x1xf32>
    %27 = math.log %26 : vector<128x1xf32>
    %28 = math.log %24 : vector<128x256xf32>
    %29 = vector.broadcast %27 : vector<128x1xf32> to vector<128x256xf32>
    %30 = arith.subf %29, %28 : vector<128x256xf32>
    %c0_11 = arith.constant 0 : index
    %c0_12 = arith.constant 0 : index
    %31 = vector.load %arg4[%c0_11, %c0_12] : memref<1x256xf32, #tpu.memory_space<vmem>>, vector<1x256xf32>
    %cst_13 = arith.constant 5.000000e-01 : f32
    %32 = vector.broadcast %cst_13 : f32 to vector<1x256xf32>
    %33 = arith.mulf %31, %32 : vector<1x256xf32>
    %c0_14 = arith.constant 0 : index
    %c0_15 = arith.constant 0 : index
    %34 = vector.load %arg5[%c0_14, %c0_15] : memref<1x256xf32, #tpu.memory_space<vmem>>, vector<1x256xf32>
    %35 = vector.broadcast %33 : vector<1x256xf32> to vector<128x256xf32>
    %36 = arith.mulf %35, %30 : vector<128x256xf32>
    %37 = vector.broadcast %34 : vector<1x256xf32> to vector<128x256xf32>
    %38 = arith.addf %36, %37 : vector<128x256xf32>
    %cst_16 = arith.constant 7.500000e+00 : f32
    %39 = vector.broadcast %cst_16 : f32 to vector<128x256xf32>
    %40 = arith.mulf %39, %30 : vector<128x256xf32>
    %41 = math.exp %40 : vector<128x256xf32>
    %42 = math.cos %38 : vector<128x256xf32>
    %43 = arith.mulf %42, %41 : vector<128x256xf32>
    %c0_17 = arith.constant 0 : index
    %c0_18 = arith.constant 0 : index
    %44 = vector.load %arg6[%c0_17, %c0_18] : memref<128x256xf32, #tpu.memory_space<vmem>>, vector<128x256xf32>
    tpu.vector_store %arg6[%c0_17, %c0_18], %43 {strides = array<i32>} : memref<128x256xf32, #tpu.memory_space<vmem>>, vector<128x256xf32>,
    return
  }
  func.func @transform_0(%arg0: i32, %arg1: i32) -> (i32, i32) {
    %c0_i32 = arith.constant 0 : i32
    %c0_i32_0 = arith.constant 0 : i32
    return %arg0, %c0_i32 : i32, i32
  }
  func.func @transform_1(%arg0: i32, %arg1: i32) -> (i32, i32) {
    %c0_i32 = arith.constant 0 : i32
    %c0_i32_0 = arith.constant 0 : i32
    return %c0_i32, %arg1 : i32, i32
  }
  func.func @transform_2(%arg0: i32, %arg1: i32) -> (i32, i32) {
    %c0_i32 = arith.constant 0 : i32
    %c0_i32_0 = arith.constant 0 : i32
    return %c0_i32, %arg1 : i32, i32
  }
  func.func @transform_3(%arg0: i32, %arg1: i32) -> (i32, i32) {
    %c0_i32 = arith.constant 0 : i32
    %c0_i32_0 = arith.constant 0 : i32
    return %c0_i32, %arg1 : i32, i32
  }
  func.func @transform_4(%arg0: i32, %arg1: i32) -> (i32, i32) {
    %c0_i32 = arith.constant 0 : i32
    return %arg0, %arg1 : i32, i32
  }
}

</mosaic_0001>

<bundles_post_ra>
// kernel: tpu_custom_call.1
= control target key start
LH: loop header
LB: loop body
LE: loop exit
PB: predicated region body
PF: predicated region fallthrough
CT: control target
= control target key end

     0   :  { %vm50_vm0 = vcmask 130048   ;;  %s10656_s0 = inlined_call_operand.vmem [shape: f32[128,16], index: 0, kind: input, shape index: {}]   ;;  %s10657_s1 = inlined_call_operand.vmem [shape: f32[16,256], index: 1, kind: input, shape index: {}]   ;;  %s10658_s2 = inlined_call_operand.vmem [shape: f32[1,256], index: 2, kind: input, shape index: {}]   ;;  %s10659_s3 = inlined_call_operand.vmem [shape: f32[1,256], index: 3, kind: input, shape index: {}]   ;;  %s10660_s4 = inlined_call_operand.hbm [shape: f32[128,256], index: 4, kind: output, shape index: {}]  }
   0x1   :  { %v341_v0 = vld [vmem:[%s10657_s1 + $0x10] sm:$0xff]  ;;  %v342_v1 = vld [vmem:[%s10657_s1 + $0x18] sm:$0xff]  ;;  %v339_v2 = vld [vmem:[%s10657_s1] sm:$0xff] }
   0x2   :  { %405 = vmatpush.msra.mxu0 %v341_v0  ;;  %6104 = vmatpush.msra.mxu2 %v341_v0  ;;  %v340_v3 = vld [vmem:[%s10657_s1 + $0x8] sm:$0xff]  ;;  %v6386_v4 = vld [vmem:[%s10656_s0 + $0x20] sm:$0xff]  ;;  %v20_v7 = vld [vmem:[%s10656_s0 + $0x10] sm:$0xff] }
   0x3   :  { %470 = vmatpush.msra.mxu1 %v342_v1  ;;  %6106 = vmatpush.msra.mxu3 %v342_v1  ;;  %v26_v5 = vld [vmem:[%s10656_s0 + $0x40] sm:$0xff]  ;;  %v38_v6 = vmul.f32 %v6386_v4, %v6386_v4  ;;  %v36_v9 = vmul.f32 %v20_v7, %v20_v7  ;;  %v6403_v12 = vld [vmem:[%s10656_s0 + $0x28] sm:$0xff]  ;;  %v21_v13 = vld [vmem:[%s10656_s0 + $0x18] sm:$0xff] }
   0x4   :  { %v18_v8 = vld [vmem:[%s10656_s0] sm:$0xff]  ;;  %406 = vmatpush.msra.mxu0 %v339_v2  ;;  %6105 = vmatpush.msra.mxu2 %v339_v2  ;;  %v19_v16 = vld [vmem:[%s10656_s0 + $0x8] sm:$0xff] }
   0x5   :  { %v34_v10 = vmul.f32 %v18_v8, %v18_v8  ;;  %471 = vmatpush.msra.mxu1 %v340_v3  ;;  %6107 = vmatpush.msra.mxu3 %v340_v3  ;;  %v63_v11 = vsel %vm50_vm0, %v38_v6, 0.0  ;;  %v57_v14 = vsel %vm50_vm0, %v36_v9, 0.0 }
   0x6   :  { %5984 = vmatmul.msk.f32.vlgmr.msra.gmra.mxu2 %vm50_vm0, %v26_v5  ;;  %6000 = vmatmul.msk.f32.vlgmr.msra.gmra.mxu3 %vm50_vm0, %v26_v5 }
   0x7   :  { %v51_v15 = vsel %vm50_vm0, %v34_v10, 0.0  ;;  %64 = vadd.xlane.f32.xlu2 %v63_v11  ;;  %58 = vadd.xlane.f32.xlu1 %v57_v14 }
   0x8   :  { %9 = vsyncpa [#allocation3], 0  ;;  %5976 = vmatmul.msk.f32.vlgmr.msra.gmra.mxu0 %vm50_vm0, %v18_v8  ;;  %5992 = vmatmul.msk.f32.vlgmr.msra.gmra.mxu1 %vm50_vm0, %v18_v8  ;;  %v39_v17 = vmul.f32 %v6403_v12, %v6403_v12  ;;  %v37_v18 = vmul.f32 %v21_v13, %v21_v13  ;;  %v35_v19 = vmul.f32 %v19_v16, %v19_v16  ;;  %v27_v20 = vld [vmem:[%s10656_s0 + $0x48] sm:$0xff]  ;;  %v6427_v23 = vld [vmem:[%s10656_s0 + $0x38] sm:$0xff]  ;;  %s5964_s6 = sshll.u32 %s10660_s4, 4  ;;  %s6344_s7 = smov 256   ;;  %s5965_s6 = int_to_ptr.hbm [resolvable:$true] %s5964_s6 }
   0x9   :  { %52 = vadd.xlane.f32.xlu0 %v51_v15  ;;  %v24_v25 = vld [vmem:[%s10656_s0 + $0x30] sm:$0xff]  ;;  %v42_v26 = vmul.f32 %v26_v5, %v26_v5  ;;  %v41_v27 = vmul.f32 %v6427_v23, %v6427_v23  ;;  %v29_v32 = vld [vmem:[%s10656_s0 + $0x58] sm:$0xff]  ;;  %v43_v36 = vmul.f32 %v27_v20, %v27_v20  ;;  %v31_v40 = vld [vmem:[%s10656_s0 + $0x68] sm:$0xff]  ;;  %s6345_s8 = smov 16  }
   0xa   :  { %v66_v21 = vsel %vm50_vm0, %v39_v17, 0.0  ;;  %v60_v22 = vsel %vm50_vm0, %v37_v18, 0.0  ;;  %v54_v24 = vsel %vm50_vm0, %v35_v19, 0.0  ;;  %v40_v28 = vmul.f32 %v24_v25, %v24_v25  ;;  %v28_v29 = vld [vmem:[%s10656_s0 + $0x50] sm:$0xff]  ;;  %v30_v42 = vld [vmem:[%s10656_s0 + $0x60] sm:$0xff]  ;;  %v33_v49 = vld [vmem:[%s10656_s0 + $0x78] sm:$0xff] }
   0xb   :  { %v75_v30 = vsel %vm50_vm0, %v42_v26, 0.0  ;;  %v72_v31 = vsel %vm50_vm0, %v41_v27, 0.0  ;;  %v45_v34 = vmul.f32 %v29_v32, %v29_v32  ;;  %v44_v35 = vmul.f32 %v28_v29, %v28_v29  ;;  %v32_v39 = vld [vmem:[%s10656_s0 + $0x70] sm:$0xff]  ;;  %v793_v19 = vld [vmem:[%s10658_s2] sm:$0x3]  ;;  %s6343_s2 = smov [#allocation2]  }
   0xc   :  { %v69_v33 = vsel %vm50_vm0, %v40_v28, 0.0  ;;  %v78_v41 = vsel %vm50_vm0, %v43_v36, 0.0  ;;  %v48_v43 = vmul.f32 %v32_v39, %v32_v39  ;;  %v47_v44 = vmul.f32 %v31_v40, %v31_v40  ;;  %v795_v27 = vld [vmem:[%s10659_s3] sm:$0x3]  ;;  %s5962_s3 = sshll.u32 %s6343_s2, 4  ;;  %s5963_s3 = int_to_ptr.vmem [resolvable:$true] %s5962_s3 }
   0xd   :  { %v84_v37 = vsel %vm50_vm0, %v45_v34, 0.0  ;;  %v81_v38 = vsel %vm50_vm0, %v44_v35, 0.0  ;;  %v46_v45 = vmul.f32 %v30_v42, %v30_v42  ;;  %v49_v50 = vmul.f32 %v33_v49, %v33_v49 }
   0xe   :  { %5985 = vmatmul.msk.f32.gmra.mxu2 %vm50_vm0, %v27_v20  ;;  %6001 = vmatmul.msk.f32.gmra.mxu3 %vm50_vm0, %v27_v20  ;;  %v93_v46 = vsel %vm50_vm0, %v48_v43, 0.0  ;;  %v90_v47 = vsel %vm50_vm0, %v47_v44, 0.0 }
   0xf   :  { %67 = vadd.xlane.f32.xlu2 %v66_v21  ;;  %61 = vadd.xlane.f32.xlu1 %v60_v22  ;;  %v87_v48 = vsel %vm50_vm0, %v46_v45, 0.0  ;;  %v96_v51 = vsel %vm50_vm0, %v49_v50, 0.0  ;;  %v794_v22 = vmul.f32 0.5, %v793_v19 }
  0x10   :  { %5977 = vmatmul.msk.f32.gmra.mxu0 %vm50_vm0, %v19_v16  ;;  %5993 = vmatmul.msk.f32.gmra.mxu1 %vm50_vm0, %v19_v16 }
  0x11   :  { %55 = vadd.xlane.f32.xlu0 %v54_v24  ;;  %v6509_v34 = vperm.slane %v794_v22, 1 }
  0x16   :  { %5986 = vmatmul.msk.f32.gmra.mxu2 %vm50_vm0, %v28_v29  ;;  %6002 = vmatmul.msk.f32.gmra.mxu3 %vm50_vm0, %v28_v29 }
  0x17   :  { %76 = vadd.xlane.f32.xlu2 %v75_v30  ;;  %73 = vadd.xlane.f32.xlu1 %v72_v31 }
  0x18   :  { %5978 = vmatmul.msk.f32.gmra.mxu0 %vm50_vm0, %v20_v7  ;;  %5994 = vmatmul.msk.f32.gmra.mxu1 %vm50_vm0, %v20_v7 }
  0x19   :  { %70 = vadd.xlane.f32.xlu0 %v69_v33 }
  0x1e   :  { %5987 = vmatmul.msk.f32.gmra.mxu2 %vm50_vm0, %v29_v32  ;;  %6003 = vmatmul.msk.f32.gmra.mxu3 %vm50_vm0, %v29_v32  ;;  %v6507_v32 = vperm.slane %v794_v22, 0  ;;  %v6338_v22 = vmov 2131351028  }
  0x1f   :  { %85 = vadd.xlane.f32.xlu2 %v84_v37  ;;  %82 = vadd.xlane.f32.xlu1 %v81_v38  ;;  %v6513_v37 = vperm.slane %v795_v27, 0 }
  0x20   :  { %5979 = vmatmul.msk.f32.gmra.mxu0 %vm50_vm0, %v21_v13  ;;  %5995 = vmatmul.msk.f32.gmra.mxu1 %vm50_vm0, %v21_v13 }
  0x21   :  { %79 = vadd.xlane.f32.xlu0 %v78_v41 }
  0x26   :  { %5988 = vmatmul.msk.f32.gmra.mxu2 %vm50_vm0, %v30_v42  ;;  %6004 = vmatmul.msk.f32.gmra.mxu3 %vm50_vm0, %v30_v42 }
  0x27   :  { %94 = vadd.xlane.f32.xlu2 %v93_v46  ;;  %91 = vadd.xlane.f32.xlu1 %v90_v47 }
  0x28   :  { %5980 = vmatmul.msk.f32.gmra.mxu0 %vm50_vm0, %v6386_v4  ;;  %5996 = vmatmul.msk.f32.gmra.mxu1 %vm50_vm0, %v6386_v4 }
  0x29   :  { %88 = vadd.xlane.f32.xlu0 %v87_v48 }
  0x2e   :  { %5989 = vmatmul.msk.f32.gmra.mxu2 %vm50_vm0, %v31_v40  ;;  %6005 = vmatmul.msk.f32.gmra.mxu3 %vm50_vm0, %v31_v40 }
  0x30   :  { %5981 = vmatmul.msk.f32.gmra.mxu0 %vm50_vm0, %v6403_v12  ;;  %5997 = vmatmul.msk.f32.gmra.mxu1 %vm50_vm0, %v6403_v12 }
  0x31   :  { %97 = vadd.xlane.f32.xlu0 %v96_v51 }
  0x36   :  { %5990 = vmatmul.msk.f32.gmra.mxu2 %vm50_vm0, %v32_v39  ;;  %6006 = vmatmul.msk.f32.gmra.mxu3 %vm50_vm0, %v32_v39  ;;  %v6517_v39 = vperm.slane %v795_v27, 1 }
  0x38   :  { %5982 = vmatmul.msk.f32.gmra.mxu0 %vm50_vm0, %v24_v25  ;;  %5998 = vmatmul.msk.f32.gmra.mxu1 %vm50_vm0, %v24_v25 }
  0x3e   :  { %5991 = vmatmul.msk.f32.gmra.mxu2 %vm50_vm0, %v33_v49  ;;  %6007 = vmatmul.msk.f32.gmra.mxu3 %vm50_vm0, %v33_v49 }
  0x40   :  { %5983 = vmatmul.msk.f32.gmra.mxu0 %vm50_vm0, %v6427_v23  ;;  %5999 = vmatmul.msk.f32.gmra.mxu1 %vm50_vm0, %v6427_v23 }
  0x7a   :  { %v6497_v52 = vpop.xlane.xlu2 %64 }
  0x7c   :  { %v53_v53 = vpop.xlane.xlu0 %52 }
  0x7d   :  { %6118 = vrsqrt.f32 %v53_v53  ;;  %vm121_vm1 = vweird.f32 %v53_v53  ;;  %vm99_vm4 = vcmp.gt.f32.partialorder %v53_v53, 0.99998 }
  0x82   :  { %v6499_v54 = vpop.xlane.xlu2 %67 }
  0x83   :  { %v6119_v55 = vpop.eup %6118 }
  0x84   :  { %v116_v56 = vmul.f32 %v6119_v55, %v53_v53  ;;  %vm122_vm2 = vweird.f32 %v6119_v55 }
  0x85   :  { %vm123_vm3 = vmor %vm121_vm1, %vm122_vm2  ;;  %v408_v7 = vpop.f32.mrf.mxu0  ;;  %v473_v8 = vpop.f32.mrf.mxu1 }
  0x86   :  { %v117_v57 = vmul.f32 %v6119_v55, %v116_v56 }
  0x88   :  { %v118_v58 = vmul.f32 0.5, %v117_v57 }
  0x89   :  { %v432_v45 = vpop.f32.mrf.mxu2  ;;  %v497_v51 = vpop.f32.mrf.mxu3 }
  0x8a   :  { %v119_v59 = vsub.f32 1.5, %v118_v58  ;;  %v77_v60 = vpop.xlane.xlu2 %76 }
  0x8b   :  { %6120 = vrsqrt.f32 %v77_v60  ;;  %vm201_vm5 = vweird.f32 %v77_v60  ;;  %vm107_vm8 = vcmp.gt.f32.partialorder %v77_v60, 0.99998 }
  0x8c   :  { %v120_v61 = vmul.f32 %v6119_v55, %v119_v59 }
  0x8e   :  { %v124_v62 = vsel %vm123_vm3, %v6119_v55, %v120_v61 }
  0x8f   :  { %v275_v63 = vmul.f32 0.99999, %v124_v62 }
  0x91   :  { %v6121_v0 = vpop.eup %6120  ;;  %v291_v1 = vsel %vm99_vm4, %v275_v63, 1.0 }
  0x92   :  { %v307_v2 = vmul.f32 %v291_v1, %v291_v1  ;;  %v537_v3 = vmul.f32 2.0, %v291_v1  ;;  %v196_v4 = vmul.f32 %v6121_v0, %v77_v60  ;;  %vm202_vm6 = vweird.f32 %v6121_v0 }
  0x93   :  { %vm203_vm7 = vmor %vm201_vm5, %vm202_vm6 }
  0x94   :  { %v323_v5 = vmul.f32 %v307_v2, %v53_v53  ;;  %v197_v6 = vmul.f32 %v6121_v0, %v196_v4  ;;  %v553_v10 = vmul.f32 %v537_v3, %v408_v7  ;;  %v554_v12 = vmul.f32 %v537_v3, %v473_v8 }
  0x96   :  { %v521_v9 = vadd.f32 1.0, %v323_v5  ;;  %v649_v11 = vsub.f32 1.0, %v323_v5  ;;  %v198_v15 = vmul.f32 0.5, %v197_v6 }
  0x98   :  { %v585_v13 = vsub.f32 %v521_v9, %v553_v10  ;;  %v586_v14 = vsub.f32 %v521_v9, %v554_v12  ;;  %6122 = vlog2.f32 %v649_v11  ;;  %v199_v18 = vsub.f32 1.5, %v198_v15 }
  0x9a   :  { %v617_v16 = vmax.f32 %v585_v13, 1e-12  ;;  %v618_v17 = vmax.f32 %v586_v14, 1e-12  ;;  %v200_v20 = vmul.f32 %v6121_v0, %v199_v18  ;;  %v6337_v18 = vmov 2475754826  }
  0x9c   :  { %6124 = vlog2.f32 %v617_v16  ;;  %v204_v21 = vsel %vm203_vm7, %v6121_v0, %v200_v20  ;;  %v6336_v16 = vmov 683565275  }
  0x9d   :  { %6126 = vlog2.f32 %v618_v17  ;;  %v283_v23 = vmul.f32 0.99999, %v204_v21 }
  0x9e   :  { %v6123_v24 = vpop.eup %6122 }
  0x9f   :  { %v299_v25 = vsel %vm107_vm8, %v283_v23, 1.0  ;;  %v666_v30 = vmul.f32 0.6931472, %v6123_v24 }
  0xa0   :  { %v315_v28 = vmul.f32 %v299_v25, %v299_v25  ;;  %v545_v40 = vmul.f32 2.0, %v299_v25  ;;  %v6339_v25 = vmov 2102212464  }
  0xa2   :  { %v6125_v26 = vpop.eup %6124  ;;  %v331_v35 = vmul.f32 %v315_v28, %v77_v60  ;;  %v569_v47 = vmul.f32 %v545_v40, %v432_v45  ;;  %v570_v55 = vmul.f32 %v545_v40, %v497_v51 }
  0xa3   :  { %v6127_v29 = vpop.eup %6126  ;;  %v698_v31 = vmul.f32 0.6931472, %v6125_v26 }
  0xa4   :  { %v700_v33 = vmul.f32 0.6931472, %v6127_v29  ;;  %v529_v43 = vadd.f32 1.0, %v331_v35  ;;  %v657_v48 = vsub.f32 1.0, %v331_v35  ;;  %v10665_v29 = vmov 920167782  }
  0xa5   :  { %v6511_v36 = vsub.f32 %v666_v30, %v698_v31 }
  0xa6   :  { %v6515_v38 = vsub.f32 %v666_v30, %v700_v33  ;;  %v601_v56 = vsub.f32 %v529_v43, %v569_v47  ;;  %v602_v60 = vsub.f32 %v529_v43, %v570_v55  ;;  %6128 = vlog2.f32 %v657_v48 }
  0xa7   :  { %v801_v41 = vmul.f32 %v6507_v32, %v6511_v36  ;;  %v10663_v33 = vmov 1326507024  }
  0xa8   :  { %v802_v42 = vmul.f32 %v6509_v34, %v6515_v38  ;;  %v633_v1 = vmax.f32 %v601_v56, 1e-12  ;;  %v634_v4 = vmax.f32 %v602_v60, 1e-12 }
  0xa9   :  { %v6524_v44 = vadd.f32 %v6513_v37, %v801_v41 }
  0xaa   :  { %v6527_v46 = vadd.f32 %v6517_v39, %v802_v42  ;;  %6130 = vlog2.f32 %v633_v1 }
  0xab   :  { %v966_v49 = vand.u32 2147483647, %v6524_v44  ;;  %v969_v50 = vand.u32 2139095040, %v6524_v44  ;;  %6132 = vlog2.f32 %v634_v4 }
  0xac   :  { %v1120_v53 = vand.u32 2147483647, %v6527_v46  ;;  %v1123_v59 = vand.u32 2139095040, %v6527_v46  ;;  %v6129_v8 = vpop.eup %6128 }
  0xad   :  { %v970_v57 = vshrl.u32 %v969_v50, 23  ;;  %v973_v58 = vand.u32 8388607, %v966_v49  ;;  %v6544_v14 = vmul.f32 0.6931472, %v6129_v8 }
  0xae   :  { %v1124_v63 = vshrl.u32 %v1123_v59, 23  ;;  %v1127_v0 = vand.u32 8388607, %v1120_v53 }
  0xaf   :  { %v6008_v61 = vadd.s32 4294967169, %v970_v57  ;;  %v974_v62 = vor.u32 8388608, %v973_v58 }
  0xb0   :  { %v6011_v3 = vadd.s32 4294967169, %v1124_v63  ;;  %v1128_v6 = vor.u32 8388608, %v1127_v0  ;;  %v6131_v27 = vpop.eup %6130 }
  0xb1   :  { %v976_v2 = vadd.s32 1, %v6008_v61  ;;  %v6537_v5 = vshll.u32 %v974_v62, 8  ;;  %v6559_v45 = vpop.eup %6132  ;;  %v6569_v56 = vmul.f32 0.6931472, %v6131_v27 }
  0xb2   :  { %v1130_v7 = vadd.s32 1, %v6011_v3  ;;  %v6542_v13 = vshll.u32 %v1128_v6, 8 }
  0xb3   :  { %vm977_vm9 = vcmp.gt.s32.totalorder %v976_v2, 0  ;;  %v6540_v12 = vand.u32 65535, %v6537_v5  ;;  %v1016_v43 = vshrl.u32 %v6537_v5, 16 }
  0xb4   :  { %v978_v9 = vsel %vm977_vm9, %v976_v2, 0  ;;  %vm1131_vm10 = vcmp.gt.s32.totalorder %v1130_v7, 0 }
  0xb5   :  { %v980_v10 = vand.u32 31, %v978_v9  ;;  %v6546_v15 = vshrl.u32 %v978_v9, 5  ;;  %v1132_v20 = vsel %vm1131_vm10, %v1130_v7, 0 }
  0xb6   :  { %v6562_v50 = vand.u32 31, %v1132_v20  ;;  %v6585_v2 = vshrl.u32 %v1132_v20, 5 }
  0xb7   :  { %v981_v11 = vsub.s32 32, %v980_v10  ;;  %v983_v17 = vshll.u32 %v6336_v16, %v980_v10  ;;  %v986_v19 = vshll.u32 %v6337_v18, %v980_v10  ;;  %v989_v24 = vshll.u32 %v6338_v22, %v980_v10 }
  0xb8   :  { %v992_v28 = vshll.u32 %v6339_v25, %v980_v10  ;;  %v995_v31 = vshll.u32 %v10665_v29, %v980_v10  ;;  %vm998_vm11 = vcmp.lt.s32.totalorder %v6546_v15, 1  ;;  %vm1001_vm12 = vcmp.lt.s32.totalorder %v6546_v15, 4 }
  0xb9   :  { %v984_v21 = vshrl.u32 %v6337_v18, %v981_v11  ;;  %v987_v23 = vshrl.u32 %v6338_v22, %v981_v11  ;;  %v990_v26 = vshrl.u32 %v6339_v25, %v981_v11  ;;  %v993_v30 = vshrl.u32 %v10665_v29, %v981_v11 }
  0xba   :  { %v996_v35 = vshrl.u32 %v10663_v33, %v981_v11  ;;  %vm1000_vm13 = vcmp.lt.s32.totalorder %v6546_v15, 3  ;;  %v6573_v59 = vsub.s32 32, %v6562_v50  ;;  %vm999_vm14 = vcmp.lt.s32.totalorder %v6546_v15, 2 }
  0xbb   :  { %v985_v40 = vor.u32 %v984_v21, %v983_v17  ;;  %v988_v41 = vor.u32 %v987_v23, %v986_v19  ;;  %v991_v42 = vor.u32 %v990_v26, %v989_v24  ;;  %v994_v47 = vor.u32 %v993_v30, %v992_v28 }
  0xbc   :  { %v997_v48 = vor.u32 %v996_v35, %v995_v31  ;;  %v982_v63 = vshrl.u32 %v6336_v16, %v981_v11  ;;  %v1137_v10 = vshll.u32 %v6336_v16, %v6562_v50  ;;  %v1138_v11 = vshrl.u32 %v6337_v18, %v6573_v59 }
  0xbd   :  { %v1006_v51 = vsel %vm998_vm11, %v985_v40, %v988_v41  ;;  %v1010_v55 = vsel %vm998_vm11, %v988_v41, %v991_v42  ;;  %v1007_v57 = vsel %vm1001_vm12, %v994_v47, 920167782  ;;  %v1003_v60 = vsel %vm1001_vm12, %v991_v42, 2102212464 }
  0xbe   :  { %v1011_v58 = vsel %vm1001_vm12, %v997_v48, 1326507024  ;;  %v1008_v61 = vsel %vm1000_vm13, %v991_v42, %v1007_v57  ;;  %v1002_v8 = vsel %vm998_vm11, %v982_v63, %v985_v40  ;;  %v1004_v9 = vsel %vm1000_vm13, %v988_v41, %v1003_v60 }
  0xbf   :  { %v1012_v62 = vsel %vm1000_vm13, %v994_v47, %v1011_v58  ;;  %v1009_v0 = vsel %vm999_vm14, %v1006_v51, %v1008_v61  ;;  %v1140_v20 = vshll.u32 %v6337_v18, %v6562_v50  ;;  %v1141_v21 = vshrl.u32 %v6338_v22, %v6573_v59 }
  0xc0   :  { %v1013_v1 = vsel %vm999_vm14, %v1010_v55, %v1012_v62  ;;  %v1039_v6 = vand.u32 65535, %v1009_v0  ;;  %v1040_v7 = vshrl.u32 %v1009_v0, 16  ;;  %v1143_v27 = vshll.u32 %v6338_v22, %v6562_v50 }
  0xc1   :  { %v1017_v3 = vand.u32 65535, %v1013_v1  ;;  %v1018_v4 = vshrl.u32 %v1013_v1, 16  ;;  %v6342_v57 = vmov 0   ;;  %v1144_v61 = vshrl.u32 %v6339_v25, %v6573_v59 }
  0xc2   :  { %v1042_v24 = vmul.u32 %v1040_v7, %v6540_v12  ;;  %v1043_v26 = vmul.u32 %v1039_v6, %v1016_v43  ;;  %v1041_v31 = vmul.u32 %v1039_v6, %v6540_v12  ;;  %v1044_v35 = vmul.u32 %v1040_v7, %v1016_v43 }
  0xc3   :  { %v1020_v17 = vmul.u32 %v1018_v4, %v6540_v12  ;;  %v1021_v19 = vmul.u32 %v1017_v3, %v1016_v43  ;;  %v1019_v23 = vmul.u32 %v1017_v3, %v6540_v12  ;;  %v1022_v28 = vmul.u32 %v1018_v4, %v1016_v43 }
  0xc4   :  { %v1045_v47 = vshll.u32 %v1042_v24, 16  ;;  %v1046_v51 = vshrl.u32 %v1042_v24, 16  ;;  %v1047_v55 = vshll.u32 %v1043_v26, 16  ;;  %v6609_v43 = vor.u32 %v1138_v11, %v1137_v10 }
  0xc5   :  { %v1023_v30 = vshll.u32 %v1020_v17, 16  ;;  %v1024_v40 = vshrl.u32 %v1020_v17, 16  ;;  %v1025_v41 = vshll.u32 %v1021_v19, 16  ;;  %v1026_v42 = vshrl.u32 %v1021_v19, 16 }
  0xc6   :  { %vm1049_vm0 = vc.u32 %v1041_v31, %v1045_v47  ;;  %v1051_v60 = vadd.s32 %v1045_v47, %v1041_v31  ;;  %v6612_v1 = vor.u32 %v1141_v21, %v1140_v20  ;;  %v1146_v6 = vshll.u32 %v6339_v25, %v6562_v50 }
  0xc7   :  { %vm1027_vm15 = vc.u32 %v1019_v23, %v1023_v30  ;;  %v1029_v48 = vadd.s32 %v1023_v30, %v1019_v23  ;;  %v1050_v12 = vsel %vm1049_vm0, 1, %v6342_v57  ;;  %v1147_v7 = vshrl.u32 %v10665_v29, %v6573_v59 }
  0xc8   :  { %v1028_v58 = vsel %vm1027_vm15, 1, %v6342_v57  ;;  %v1052_v0 = vadd.s32 %v1050_v12, %v1044_v35  ;;  %vm1053_vm2 = vc.u32 %v1051_v60, %v1047_v55  ;;  %v1145_v19 = vor.u32 %v1144_v61, %v1143_v27 }
  0xc9   :  { %v1030_v62 = vadd.s32 %v1028_v58, %v1022_v28  ;;  %vm1031_vm1 = vc.u32 %v1029_v48, %v1025_v41  ;;  %v1054_v4 = vsel %vm1053_vm2, 1, %v6342_v57  ;;  %v1149_v10 = vshll.u32 %v10665_v29, %v6562_v50 }
  0xca   :  { %v1032_v63 = vsel %vm1031_vm1, 1, %v6342_v57  ;;  %v1056_v17 = vadd.s32 %v1054_v4, %v1052_v0  ;;  %v1150_v11 = vshrl.u32 %v10663_v33, %v6573_v59  ;;  %v1048_v20 = vshrl.u32 %v1043_v26, 16 }
  0xcb   :  { %v1034_v3 = vadd.s32 %v1032_v63, %v1030_v62  ;;  %v6623_v21 = vadd.s32 %v1051_v60, %v1047_v55  ;;  %v1148_v24 = vor.u32 %v1147_v7, %v1146_v6  ;;  %vm1152_vm3 = vcmp.lt.s32.totalorder %v6585_v2, 1 }
  0xcc   :  { %v1057_v28 = vadd.s32 %v1056_v17, %v1046_v51  ;;  %v1151_v30 = vor.u32 %v1150_v11, %v1149_v10  ;;  %vm1155_vm4 = vcmp.lt.s32.totalorder %v6585_v2, 4  ;;  %vm1154_vm5 = vcmp.lt.s32.totalorder %v6585_v2, 3 }
  0xcd   :  { %v1035_v23 = vadd.s32 %v1034_v3, %v1024_v40  ;;  %v1160_v50 = vsel %vm1152_vm3, %v6609_v43, %v6612_v1  ;;  %v1161_v26 = vsel %vm1155_vm4, %v1148_v24, 920167782  ;;  %v1005_v27 = vsel %vm999_vm14, %v1002_v8, %v1004_v9 }
  0xce   :  { %v1058_v35 = vadd.s32 %v1057_v28, %v1048_v20  ;;  %vm1153_vm6 = vcmp.lt.s32.totalorder %v6585_v2, 2  ;;  %v1162_v40 = vsel %vm1154_vm5, %v1145_v19, %v1161_v26  ;;  %v1169_v47 = vand.u32 65535, %v6542_v13 }
  0xcf   :  { %v6627_v31 = vadd.s32 %v1035_v23, %v1026_v42  ;;  %v1163_v41 = vsel %vm1153_vm6, %v1160_v50, %v1162_v40  ;;  %v1164_v42 = vsel %vm1152_vm3, %v6612_v1, %v1145_v19  ;;  %v1165_v8 = vsel %vm1155_vm4, %v1151_v30, 1326507024 }
  0xd0   :  { %v1062_v15 = vadd.s32 1, %v1058_v35  ;;  %v1193_v9 = vand.u32 65535, %v1163_v41  ;;  %v1194_v48 = vshrl.u32 %v1163_v41, 16  ;;  %v1059_v51 = vmul.u32 %v6537_v5, %v1005_v27 }
  0xd1   :  { %vm1061_vm7 = vc.u32 %v6627_v31, %v6623_v21  ;;  %v1166_v55 = vsel %vm1154_vm5, %v1148_v24, %v1165_v8  ;;  %v1170_v58 = vshrl.u32 %v6542_v13, 16  ;;  %v6659_v12 = vsub.f32 %v6544_v14, %v6569_v56 }
  0xd2   :  { %v1063_v60 = vsel %vm1061_vm7, %v1062_v15, %v1058_v35  ;;  %v1167_v61 = vsel %vm1153_vm6, %v1164_v42, %v1166_v55  ;;  %v1196_v62 = vmul.u32 %v1194_v48, %v1169_v47  ;;  %v1195_v4 = vmul.u32 %v1193_v9, %v1169_v47 }
  0xd3   :  { %v1064_v63 = vadd.s32 %v1063_v60, %v1059_v51  ;;  %v1171_v0 = vand.u32 65535, %v1167_v61  ;;  %v1172_v3 = vshrl.u32 %v1167_v61, 16  ;;  %v1197_v6 = vmul.u32 %v1193_v9, %v1170_v58 }
  0xd4   :  { %v1199_v5 = vshll.u32 %v1196_v62, 16  ;;  %v1136_v11 = vshrl.u32 %v6336_v16, %v6573_v59  ;;  %v732_v23 = vmul.f32 0.6931472, %v6559_v45  ;;  %v817_v20 = vmul.f32 %v6507_v32, %v6659_v12 }
  0xd5   :  { %v1065_v7 = vadd.s32 536870912, %v1064_v63  ;;  %v1174_v17 = vmul.u32 %v1172_v3, %v1169_v47  ;;  %v1175_v10 = vmul.u32 %v1171_v0, %v1170_v58  ;;  %v1173_v24 = vmul.u32 %v1171_v0, %v1169_v47 }
  0xd6   :  { %vm1203_vm8 = vc.u32 %v1195_v4, %v1199_v5  ;;  %v1198_v30 = vmul.u32 %v1194_v48, %v1170_v58  ;;  %v1176_v50 = vmul.u32 %v1172_v3, %v1170_v58  ;;  %v1201_v26 = vshll.u32 %v1197_v6, 16 }
  0xd7   :  { %v1066_v56 = vshrl.u32 %v1065_v7, 30  ;;  %v1177_v28 = vshll.u32 %v1174_v17, 16  ;;  %v1204_v27 = vsel %vm1203_vm8, 1, %v6342_v57  ;;  %v1205_v35 = vadd.s32 %v1199_v5, %v1195_v4 }
  0xd8   :  { %v1179_v41 = vshll.u32 %v1175_v10, 16  ;;  %v1157_v59 = vsel %vm1155_vm4, %v1145_v19, 2102212464  ;;  %v1206_v15 = vadd.s32 %v1204_v27, %v1198_v30  ;;  %v6671_v9 = vadd.f32 %v6513_v37, %v817_v20 }
  0xd9   :  { %v1067_v40 = vshll.u32 %v1066_v56, 30  ;;  %vm1181_vm9 = vc.u32 %v1173_v24, %v1177_v28  ;;  %v1183_v42 = vadd.s32 %v1177_v28, %v1173_v24  ;;  %vm1207_vm10 = vc.u32 %v1205_v35, %v1201_v26 }
  0xda   :  { %v1182_v45 = vsel %vm1181_vm9, 1, %v6342_v57  ;;  %v1208_v51 = vsel %vm1207_vm10, 1, %v6342_v57  ;;  %v1156_v19 = vsel %vm1152_vm3, %v1136_v11, %v6609_v43  ;;  %v1158_v60 = vsel %vm1154_vm5, %v6612_v1, %v1157_v59 }
  0xdb   :  { %v1068_v8 = vsub.s32 %v1064_v63, %v1067_v40  ;;  %v1184_v47 = vadd.s32 %v1182_v45, %v1176_v50  ;;  %vm1185_vm11 = vc.u32 %v1183_v42, %v1179_v41  ;;  %v1178_v61 = vshrl.u32 %v1174_v17, 16 }
  0xdc   :  { %v1186_v48 = vsel %vm1185_vm11, 1, %v6342_v57  ;;  %v1200_v63 = vshrl.u32 %v1196_v62, 16  ;;  %v1210_v0 = vadd.s32 %v1208_v51, %v1206_v15  ;;  %v1202_v4 = vshrl.u32 %v1197_v6, 16 }
  0xdd   :  { %vm1069_vm12 = vcmp.lt.s32.totalorder %v1068_v8, 0  ;;  %v1070_v55 = vsub.s32 0, %v1068_v8  ;;  %v1188_v58 = vadd.s32 %v1186_v48, %v1184_v47  ;;  %v6682_v5 = vsub.f32 %v6544_v14, %v732_v23 }
  0xde   :  { %v10661_v7 = vand.u32 2147483647, %v6671_v9  ;;  %v1180_v24 = vshrl.u32 %v1175_v10, 16  ;;  %v1211_v30 = vadd.s32 %v1210_v0, %v1200_v63  ;;  %v1159_v43 = vsel %vm1153_vm6, %v1156_v19, %v1158_v60 }
  0xdf   :  { %v1071_v3 = vsel %vm1069_vm12, %v1070_v55, %v1068_v8  ;;  %v1189_v28 = vadd.s32 %v1188_v58, %v1178_v61  ;;  %v3433_v11 = vand.u32 2139095040, %v6671_v9  ;;  %v1209_v62 = vadd.s32 %v1205_v35, %v1201_v26 }
  0xe0   :  { %v1072_v20 = vclz %v1071_v3  ;;  %v1212_v50 = vadd.s32 %v1211_v30, %v1202_v4  ;;  %v870_v6 = vmul.f32 7.5, %v6511_v36  ;;  %v1090_v27 = vsub.s32 4, %v1066_v56 }
  0xe1   :  { %v1190_v17 = vadd.s32 %v1189_v28, %v1180_v24  ;;  %v3434_v14 = vshrl.u32 %v3433_v11, 23  ;;  %v3437_v23 = vand.u32 8388607, %v10661_v7  ;;  %v818_v2 = vmul.f32 %v6509_v34, %v6682_v5 }
  0xe2   :  { %v6009_v1 = vadd.s32 4294967294, %v1072_v20  ;;  %v1216_v10 = vadd.s32 1, %v1212_v50  ;;  %vm968_vm15 = vcmp.lt.s32.totalorder %v6524_v44, 0  ;;  %v1213_v41 = vmul.u32 %v6542_v13, %v1159_v43  ;;  %v6702_v13 = vpop.xlane.xlu0 %55 }
  0xe3   :  { %vm1215_vm14 = vc.u32 %v1190_v17, %v1209_v62  ;;  %v6056_v26 = vadd.s32 4294967169, %v3434_v14  ;;  %v1060_v36 = vadd.s32 %v6623_v21, %v6627_v31  ;;  %v1091_v45 = vsel %vm968_vm15, %v1090_v27, %v1066_v56 }
  0xe4   :  { %vm6010_vm13 = vcmp.lt.s32.totalorder %v6009_v1, 0  ;;  %v1217_v59 = vsel %vm1215_vm14, %v1216_v10, %v1212_v50  ;;  %v3438_v47 = vor.u32 8388608, %v3437_v23  ;;  %v6700_v58 = vadd.f32 %v6517_v39, %v818_v2 }
  0xe5   :  { %v1075_v40 = vsel %vm6010_vm13, 0, %v6009_v1  ;;  %v1218_v15 = vadd.s32 %v1217_v59, %v1213_v41  ;;  %v3440_v48 = vadd.s32 1, %v6056_v26  ;;  %v902_v60 = vmul.f32 1.442695, %v870_v6 }
  0xe6   :  { %v1076_v35 = vsub.s32 32, %v1075_v40  ;;  %v1080_v42 = vsub.s32 4294967266, %v1075_v40  ;;  %v1077_v51 = vshll.u32 %v1068_v8, %v1075_v40  ;;  %v871_v21 = vmul.f32 7.5, %v6515_v38 }
  0xe7   :  { %v1219_v31 = vadd.s32 536870912, %v1218_v15  ;;  %vm3441_vm0 = vcmp.gt.s32.totalorder %v3440_v48, 0  ;;  %vm6707_vm1 = vcmp.le.f32.partialorder %v966_v49, 0.7853982  ;;  %v6713_v20 = vshll.u32 %v3438_v47, 8 }
  0xe8   :  { %v1078_v55 = vshrl.u32 %v1060_v36, %v1076_v35  ;;  %v1081_v19 = vadd.s32 127, %v1080_v42  ;;  %v3442_v63 = vsel %vm3441_vm0, %v3440_v48, 0  ;;  %v1093_v0 = vsel %vm6707_vm1, 0, %v1091_v45 }
  0xe9   :  { %v1220_v3 = vshrl.u32 %v1219_v31, 30  ;;  %v3444_v4 = vand.u32 31, %v3442_v63  ;;  %6134 = vrsqrt.f32 %v6702_v13  ;;  %v3587_v24 = vand.u32 2139095040, %v6700_v58 }
  0xea   :  { %v1079_v61 = vor.u32 %v1078_v55, %v1077_v51  ;;  %v1082_v8 = vshll.u32 %v1081_v19, 23  ;;  %6136 = vpow2.f32 %v902_v60  ;;  %v6717_v49 = vmul.f32 1.442695, %v871_v21 }
  0xeb   :  { %v1221_v28 = vshll.u32 %v1220_v3, 30  ;;  %v6719_v30 = vsub.s32 32, %v3444_v4  ;;  %v6721_v1 = vand.u32 3, %v1093_v0  ;;  %vm1122_vm2 = vcmp.lt.s32.totalorder %v6527_v46, 0 }
  0xec   :  { %v1083_v38 = vor.u32 4788187, %v1082_v8  ;;  %v1086_v11 = vcvt.s32.f32 %v1079_v61  ;;  %v1214_v50 = vadd.s32 %v1209_v62, %v1190_v17  ;;  %v6727_v27 = vand.u32 65535, %v6713_v20 }
  0xed   :  { %v6724_v6 = vsub.s32 %v1218_v15, %v1221_v28  ;;  %v6730_v14 = vshrl.u32 %v6713_v20, 16  ;;  %v3584_v23 = vand.u32 2147483647, %v6700_v58  ;;  %v3448_v2 = vshrl.u32 %v6337_v18, %v6719_v30 }
  0xee   :  { %v1084_v43 = vand.u32 2147483647, %v1083_v38  ;;  %v3451_v40 = vshrl.u32 %v6338_v22, %v6719_v30  ;;  %v3588_v41 = vshrl.u32 %v3587_v24, 23  ;;  %v6739_v62 = vshrl.u32 %v3442_v63, 5 }
  0xef   :  { %vm1223_vm3 = vcmp.lt.s32.totalorder %v6724_v6, 0  ;;  %v1224_v17 = vsub.s32 0, %v6724_v6  ;;  %v3447_v26 = vshll.u32 %v6336_v16, %v3444_v4  ;;  %v6742_v36 = vpop.eup %6134  ;;  %v3450_v42 = vshll.u32 %v6337_v18, %v3444_v4 }
  0xf0   :  { %v1087_v10 = vmul.f32 %v1086_v11, %v1084_v43  ;;  %v3454_v59 = vshrl.u32 %v6339_v25, %v6719_v30  ;;  %v3457_v45 = vshrl.u32 %v10665_v29, %v6719_v30  ;;  %v6749_v15 = vpop.eup %6136  ;;  %v1244_v48 = vsub.s32 4, %v1220_v3 }
  0xf1   :  { %v1225_v47 = vsel %vm1223_vm3, %v1224_v17, %v6724_v6  ;;  %v3453_v51 = vshll.u32 %v6338_v22, %v3444_v4  ;;  %v3456_v55 = vshll.u32 %v6339_v25, %v3444_v4  ;;  %v6756_v21 = vor.u32 %v3448_v2, %v3447_v26 }
  0xf2   :  { %v1088_v35 = vxor.u32 2147483648, %v1087_v10  ;;  %v1226_v60 = vclz %v1225_v47  ;;  %v6758_v31 = vor.u32 %v3451_v40, %v3450_v42  ;;  %v3459_v63 = vshll.u32 %v10665_v29, %v3444_v4 }
  0xf3   :  { %v3458_v8 = vor.u32 %v3457_v45, %v3456_v55  ;;  %v3460_v0 = vshrl.u32 %v10663_v33, %v6719_v30  ;;  %v3455_v28 = vor.u32 %v3454_v59, %v3453_v51  ;;  %v6770_v43 = vadd.s32 4294967169, %v3588_v41 }
  0xf4   :  { %v1089_v19 = vsel %vm968_vm15, %v1088_v35, %v1087_v10  ;;  %v6012_v24 = vadd.s32 4294967294, %v1226_v60  ;;  %vm6774_vm4 = vcmp.le.f32.partialorder %v1120_v53, 0.7853982  ;;  %v6780_v56 = vsel %vm1122_vm2, %v1244_v48, %v1220_v3 }
  0xf5   :  { %v6763_v61 = vsel %vm6707_vm1, %v6524_v44, %v1089_v19  ;;  %v3461_v4 = vor.u32 %v3460_v0, %v3459_v63  ;;  %vm3462_vm5 = vcmp.lt.s32.totalorder %v6739_v62, 1  ;;  %vm3463_vm6 = vcmp.lt.s32.totalorder %v6739_v62, 2 }
  0xf6   :  { %v1094_v38 = vmul.f32 %v6763_v61, %v6763_v61  ;;  %vm6013_vm7 = vcmp.lt.s32.totalorder %v6012_v24, 0  ;;  %vm3465_vm8 = vcmp.lt.s32.totalorder %v6739_v62, 4  ;;  %vm3464_vm9 = vcmp.lt.s32.totalorder %v6739_v62, 3 }
  0xf7   :  { %v1229_v40 = vsel %vm6013_vm7, 0, %v6012_v24  ;;  %v3470_v53 = vsel %vm3462_vm5, %v6756_v21, %v6758_v31  ;;  %v3471_v3 = vsel %vm3465_vm8, %v3458_v8, 920167782  ;;  %v3474_v35 = vsel %vm3462_vm5, %v6758_v31, %v3455_v28 }
  0xf8   :  { %v1095_v10 = vmul.f32 -0.001358992, %v1094_v38  ;;  %v1102_v2 = vmul.f32 -0.00019511016, %v1094_v38  ;;  %v1230_v26 = vsub.s32 32, %v1229_v40  ;;  %v1231_v42 = vshll.u32 %v6724_v6, %v1229_v40 }
  0xf9   :  { %v1234_v59 = vsub.s32 4294967266, %v1229_v40  ;;  %v3472_v45 = vsel %vm3464_vm9, %v3455_v28, %v3471_v3  ;;  %v3475_v47 = vsel %vm3465_vm8, %v3461_v4, 1326507024  ;;  %vm1115_vm10 = vcmp.eq.s32.totalorder %v6721_v1, 2 }
  0xfa   :  { %v1096_v41 = vadd.f32 0.041655596, %v1095_v10  ;;  %v1103_v17 = vadd.f32 0.008332121, %v1102_v2  ;;  %v1232_v55 = vshrl.u32 %v1214_v50, %v1230_v26  ;;  %v3473_v19 = vsel %vm3463_vm6, %v3470_v53, %v3472_v45 }
  0xfb   :  { %v1235_v60 = vadd.s32 127, %v1234_v59  ;;  %v3476_v63 = vsel %vm3464_vm9, %v3458_v8, %v3475_v47  ;;  %v3503_v0 = vand.u32 65535, %v3473_v19  ;;  %v3504_v24 = vshrl.u32 %v3473_v19, 16 }
  0xfc   :  { %v1097_v48 = vmul.f32 %v1096_v41, %v1094_v38  ;;  %v1104_v51 = vmul.f32 %v1103_v17, %v1094_v38  ;;  %v1233_v2 = vor.u32 %v1232_v55, %v1231_v42  ;;  %v3477_v4 = vsel %vm3463_vm6, %v3474_v35, %v3476_v63 }
  0xfd   :  { %vm1112_vm11 = vcmp.eq.s32.totalorder %v6721_v1, 0  ;;  %v1236_v50 = vshll.u32 %v1235_v60, 23  ;;  %v3446_v40 = vshrl.u32 %v6336_v16, %v6719_v30  ;;  %v3481_v53 = vand.u32 65535, %v3477_v4 }
  0xfe   :  { %v1098_v6 = vadd.f32 -0.4999988, %v1097_v48  ;;  %v1105_v10 = vadd.f32 -0.16666654, %v1104_v51  ;;  %v3482_v3 = vshrl.u32 %v3477_v4, 16  ;;  %vm1111_vm12 = vcmp.lt.s32.totalorder %v6721_v1, 2 }
  0xff   :  { %v1247_v17 = vsel %vm6774_vm4, 0, %v6780_v56  ;;  %v3467_v26 = vsel %vm3465_vm8, %v3455_v28, 2102212464  ;;  %vm1109_vm13 = vweird.f32 %v6524_v44  ;;  %v1237_v35 = vor.u32 4788187, %v1236_v50 }
 0x100   :  { %v1099_v41 = vmul.f32 %v1098_v6, %v1094_v38  ;;  %v1106_v8 = vmul.f32 %v1105_v10, %v1094_v38  ;;  %v3484_v42 = vmul.u32 %v3482_v3, %v6727_v27  ;;  %v3485_v30 = vmul.u32 %v3481_v53, %v6730_v14 }
 0x101   :  { %v3506_v59 = vmul.u32 %v3504_v24, %v6727_v27  ;;  %v1240_v47 = vcvt.s32.f32 %v1233_v2  ;;  %v3505_v48 = vmul.u32 %v3503_v0, %v6727_v27  ;;  %v1238_v51 = vand.u32 2147483647, %v1237_v35 }
 0x102   :  { %v1100_v45 = vadd.f32 1.0, %v1099_v41  ;;  %v1107_v38 = vadd.f32 1.0, %v1106_v8  ;;  %v3483_v55 = vmul.u32 %v3481_v53, %v6727_v27  ;;  %v3486_v19 = vmul.u32 %v3482_v3, %v6730_v14 }
 0x103   :  { %v3487_v28 = vshll.u32 %v3484_v42, 16  ;;  %v3489_v6 = vshll.u32 %v3485_v30, 16  ;;  %v3507_v10 = vmul.u32 %v3503_v0, %v6730_v14  ;;  %v1241_v4 = vmul.f32 %v1240_v47, %v1238_v51 }
 0x104   :  { %v1108_v60 = vmul.f32 %v1107_v38, %v6763_v61  ;;  %v1116_v63 = vxor.u32 2147483648, %v1100_v45  ;;  %v3509_v41 = vshll.u32 %v3506_v59, 16  ;;  %v3488_v2 = vshrl.u32 %v3484_v42, 16 }
 0x105   :  { %vm3491_vm14 = vc.u32 %v3483_v55, %v3487_v28  ;;  %v3493_v50 = vadd.s32 %v3487_v28, %v3483_v55  ;;  %v3508_v35 = vmul.u32 %v3504_v24, %v6730_v14  ;;  %v1242_v53 = vxor.u32 2147483648, %v1241_v4 }
 0x106   :  { %v1113_v8 = vxor.u32 2147483648, %v1108_v60  ;;  %v3492_v7 = vsel %vm3491_vm14, 1, %v6342_v57  ;;  %v1117_v27 = vsel %vm1115_vm10, %v1116_v63, %v1108_v60  ;;  %v3511_v38 = vshll.u32 %v3507_v10, 16 }
 0x107   :  { %v3494_v3 = vadd.s32 %v3492_v7, %v3486_v19  ;;  %vm3495_vm15 = vc.u32 %v3493_v50, %v3489_v6  ;;  %vm3513_vm0 = vc.u32 %v3505_v48, %v3509_v41  ;;  %v1243_v47 = vsel %vm1122_vm2, %v1242_v53, %v1241_v4 }
 0x108   :  { %v1114_v61 = vsel %vm1112_vm11, %v1100_v45, %v1113_v8  ;;  %v3496_v0 = vsel %vm3495_vm15, 1, %v6342_v57  ;;  %v3514_v24 = vsel %vm3513_vm0, 1, %v6342_v57  ;;  %v1246_v45 = vsel %vm6774_vm4, %v6527_v46, %v1243_v47 }
 0x109   :  { %v1118_v42 = vsel %vm1111_vm12, %v1114_v61, %v1117_v27  ;;  %v3498_v14 = vadd.s32 %v3496_v0, %v3494_v3  ;;  %v3515_v51 = vadd.s32 %v3509_v41, %v3505_v48  ;;  %v3516_v55 = vadd.s32 %v3514_v24, %v3508_v35 }
 0x10a   :  { %v1119_v7 = vsel %vm1109_vm13, nan, %v1118_v42  ;;  %v1248_v28 = vmul.f32 %v1246_v45, %v1246_v45  ;;  %v3466_v1 = vsel %vm3462_vm5, %v3446_v40, %v6756_v21  ;;  %v3468_v63 = vsel %vm3464_vm9, %v6758_v31, %v3467_v26 }
 0x10b   :  { %v5894_v19 = vmul.f32 %v6749_v15, %v1119_v7  ;;  %v3499_v60 = vadd.s32 %v3498_v14, %v3488_v2  ;;  %v3490_v44 = vshrl.u32 %v3485_v30, 16  ;;  %vm3517_vm1 = vc.u32 %v3515_v51, %v3511_v38 }
 0x10c   :  { %v3594_v6 = vadd.s32 1, %v6770_v43  ;;  %v126_v48 = vmul.f32 %v6742_v36, %v6702_v13  ;;  %v1249_v4 = vmul.f32 -0.001358992, %v1248_v28  ;;  %v1256_v15 = vmul.f32 -0.00019511016, %v1248_v28 }
 0x10d   :  { %5926 = vst [vmem:[#allocation2] sm:$0xff] %v5894_v19  ;;  %v3518_v50 = vsel %vm3517_vm1, 1, %v6342_v57  ;;  %v3510_v41 = vshrl.u32 %v3506_v59, 16  ;;  %v3591_v21 = vand.u32 8388607, %v3584_v23  ;;  %v3469_v26 = vsel %vm3463_vm6, %v3466_v1, %v3468_v63 }
 0x10e   :  { %v3520_v8 = vadd.s32 %v3518_v50, %v3516_v55  ;;  %vm3595_vm2 = vcmp.gt.s32.totalorder %v3594_v6, 0  ;;  %v1250_v40 = vadd.f32 0.041655596, %v1249_v4  ;;  %v1257_v31 = vadd.f32 0.008332121, %v1256_v15 }
 0x10f   :  { %v6857_v43 = vadd.s32 %v3499_v60, %v3490_v44  ;;  %v1264_v30 = vand.u32 3, %v1247_v17  ;;  %v3512_v2 = vshrl.u32 %v3507_v10, 16  ;;  %v3596_v59 = vsel %vm3595_vm2, %v3594_v6, 0 }
 0x110   :  { %v3521_v35 = vadd.s32 %v3520_v8, %v3510_v41  ;;  %v1251_v27 = vmul.f32 %v1250_v40, %v1248_v28  ;;  %v1258_v53 = vmul.f32 %v1257_v31, %v1248_v28  ;;  %v6863_v3 = vadd.s32 %v3515_v51, %v3511_v38 }
 0x111   :  { %v3598_v61 = vand.u32 31, %v3596_v59  ;;  %v127_v0 = vmul.f32 %v6742_v36, %v126_v48  ;;  %6138 = vpow2.f32 %v6717_v49  ;;  %v3523_v42 = vmul.u32 %v6713_v20, %v3469_v26 }
 0x112   :  { %v3522_v62 = vadd.s32 %v3521_v35, %v3512_v2  ;;  %v1252_v47 = vadd.f32 -0.4999988, %v1251_v27  ;;  %v1259_v11 = vadd.f32 -0.16666654, %v1258_v53  ;;  %vm3525_vm3 = vc.u32 %v6857_v43, %v6863_v3 }
 0x113   :  { %v6870_v56 = vsub.s32 32, %v3598_v61  ;;  %v3592_v10 = vor.u32 8388608, %v3591_v21  ;;  %v3601_v38 = vshll.u32 %v6336_v16, %v3598_v61  ;;  %v3604_v14 = vshll.u32 %v6337_v18, %v3598_v61 }
 0x114   :  { %v3526_v17 = vadd.s32 1, %v3522_v62  ;;  %v1253_v24 = vmul.f32 %v1252_v47, %v1248_v28  ;;  %v1260_v7 = vmul.f32 %v1259_v11, %v1248_v28  ;;  %vm1265_vm4 = vcmp.lt.s32.totalorder %v1264_v30, 2 }
 0x115   :  { %v3602_v49 = vshrl.u32 %v6337_v18, %v6870_v56  ;;  %v3610_v20 = vshll.u32 %v6339_v25, %v3598_v61  ;;  %v3605_v55 = vshrl.u32 %v6338_v22, %v6870_v56  ;;  %v3608_v19 = vshrl.u32 %v6339_v25, %v6870_v56 }
 0x116   :  { %v3527_v51 = vsel %vm3525_vm3, %v3526_v17, %v3522_v62  ;;  %v3611_v1 = vshrl.u32 %v10665_v29, %v6870_v56  ;;  %v1254_v60 = vadd.f32 1.0, %v1253_v24  ;;  %v1261_v63 = vadd.f32 1.0, %v1260_v7 }
 0x117   :  { %v3528_v44 = vadd.s32 %v3527_v51, %v3523_v42  ;;  %v6883_v28 = vshrl.u32 %v3596_v59, 5  ;;  %v6139_v6 = vpop.eup %6138  ;;  %v6885_v48 = vor.u32 %v3602_v49, %v3601_v38  ;;  %v6887_v4 = vor.u32 %v3605_v55, %v3604_v14 }
 0x118   :  { %v3607_v15 = vshll.u32 %v6338_v22, %v3598_v61  ;;  %v3612_v50 = vor.u32 %v3611_v1, %v3610_v20  ;;  %v1262_v41 = vmul.f32 %v1261_v63, %v1246_v45  ;;  %v1270_v8 = vxor.u32 2147483648, %v1254_v60 }
 0x119   :  { %v3529_v21 = vadd.s32 536870912, %v3528_v44  ;;  %v3614_v40 = vshrl.u32 %v10663_v33, %v6870_v56  ;;  %vm1266_vm5 = vcmp.eq.s32.totalorder %v1264_v30, 0  ;;  %vm1269_vm6 = vcmp.eq.s32.totalorder %v1264_v30, 2 }
 0x11a   :  { %v3609_v31 = vor.u32 %v3608_v19, %v3607_v15  ;;  %v3613_v26 = vshll.u32 %v10665_v29, %v3598_v61  ;;  %v1267_v2 = vxor.u32 2147483648, %v1262_v41  ;;  %vm3616_vm7 = vcmp.lt.s32.totalorder %v6883_v28, 1 }
 0x11b   :  { %v6893_v35 = vshrl.u32 %v3529_v21, 30  ;;  %vm3619_vm8 = vcmp.lt.s32.totalorder %v6883_v28, 4  ;;  %v3624_v45 = vsel %vm3616_vm7, %v6885_v48, %v6887_v4  ;;  %v6903_v53 = vshll.u32 %v3592_v10, 8 }
 0x11c   :  { %v3615_v59 = vor.u32 %v3614_v40, %v3613_v26  ;;  %v3625_v27 = vsel %vm3619_vm8, %v3612_v50, 920167782  ;;  %v1268_v62 = vsel %vm1266_vm5, %v1254_v60, %v1267_v2  ;;  %v1271_v61 = vsel %vm1269_vm6, %v1270_v8, %v1262_v41 }
 0x11d   :  { %v3531_v42 = vshll.u32 %v6893_v35, 30  ;;  %vm3618_vm9 = vcmp.lt.s32.totalorder %v6883_v28, 3  ;;  %vm1263_vm10 = vweird.f32 %v6527_v46  ;;  %v1272_v47 = vsel %vm1265_vm4, %v1268_v62, %v1271_v61 }
 0x11e   :  { %vm3617_vm11 = vcmp.lt.s32.totalorder %v6883_v28, 2  ;;  %v3626_v11 = vsel %vm3618_vm9, %v3609_v31, %v3625_v27  ;;  %v1273_v17 = vsel %vm1263_vm10, nan, %v1272_v47  ;;  %v3628_v14 = vsel %vm3616_vm7, %v6887_v4, %v3609_v31 }
 0x11f   :  { %v3532_v38 = vsub.s32 %v3528_v44, %v3531_v42  ;;  %v3627_v10 = vsel %vm3617_vm11, %v3624_v45, %v3626_v11  ;;  %v6917_v24 = vmul.f32 0.5, %v127_v0  ;;  %v5895_v7 = vmul.f32 %v6139_v6, %v1273_v17 }
 0x120   :  { %v3629_v46 = vsel %vm3619_vm8, %v3615_v59, 1326507024  ;;  %v3657_v30 = vand.u32 65535, %v3627_v10  ;;  %v3634_v51 = vshrl.u32 %v6903_v53, 16  ;;  %v3633_v19 = vand.u32 65535, %v6903_v53 }
 0x121   :  { %vm3533_vm12 = vcmp.lt.s32.totalorder %v3532_v38, 0  ;;  %v3534_v49 = vsub.s32 0, %v3532_v38  ;;  %v3630_v20 = vsel %vm3618_vm9, %v3612_v50, %v3629_v46  ;;  %5927 = vst [vmem:[#allocation2 + $0x8] sm:$0xff] %v5895_v7  ;;  %v3658_v0 = vshrl.u32 %v3627_v10, 16  ;;  %v6938_v7 = vpop.xlane.xlu0 %70 }
 0x122   :  { %v3631_v55 = vsel %vm3617_vm11, %v3628_v14, %v3630_v20  ;;  %v6927_v60 = vmul.u32 %v3657_v30, %v3634_v51  ;;  %v129_v41 = vsub.f32 1.5, %v6917_v24  ;;  %v3524_v50 = vadd.s32 %v6863_v3, %v6857_v43 }
 0x123   :  { %v3535_v1 = vsel %vm3533_vm12, %v3534_v49, %v3532_v38  ;;  %v3635_v44 = vand.u32 65535, %v3631_v55  ;;  %v3636_v6 = vshrl.u32 %v3631_v55, 16  ;;  %v3660_v15 = vmul.u32 %v3658_v0, %v3633_v19 }
 0x124   :  { %v3536_v63 = vclz %v3535_v1  ;;  %v3621_v21 = vsel %vm3619_vm8, %v3609_v31, 2102212464  ;;  %vm131_vm13 = vweird.f32 %v6702_v13  ;;  %v3659_v2 = vmul.u32 %v3657_v30, %v3633_v19 }
 0x125   :  { %v3638_v40 = vmul.u32 %v3636_v6, %v3633_v19  ;;  %v3639_v26 = vmul.u32 %v3635_v44, %v3634_v51  ;;  %v3662_v59 = vmul.u32 %v3658_v0, %v3634_v51  ;;  %v3663_v45 = vshll.u32 %v3660_v15, 16 }
 0x126   :  { %v6057_v8 = vadd.s32 4294967294, %v3536_v63  ;;  %v3665_v27 = vshll.u32 %v6927_v60, 16  ;;  %v3637_v62 = vmul.u32 %v3635_v44, %v3633_v19  ;;  %v3640_v61 = vmul.u32 %v3636_v6, %v3634_v51 }
 0x127   :  { %v3641_v42 = vshll.u32 %v3638_v40, 16  ;;  %v3643_v11 = vshll.u32 %v3639_v26, 16  ;;  %vm3667_vm15 = vc.u32 %v3659_v2, %v3663_v45  ;;  %v3669_v43 = vadd.s32 %v3663_v45, %v3659_v2 }
 0x128   :  { %vm6058_vm14 = vcmp.lt.s32.totalorder %v6057_v8, 0  ;;  %v3668_v24 = vsel %vm3667_vm15, 1, %v6342_v57  ;;  %v3600_v51 = vshrl.u32 %v6336_v16, %v6870_v56  ;;  %v3664_v55 = vshrl.u32 %v3660_v15, 16 }
 0x129   :  { %v3539_v47 = vsel %vm6058_vm14, 0, %v6057_v8  ;;  %vm3645_vm0 = vc.u32 %v3637_v62, %v3641_v42  ;;  %v3647_v14 = vadd.s32 %v3641_v42, %v3637_v62  ;;  %vm3671_vm1 = vc.u32 %v3669_v43, %v3665_v27  ;;  %v6966_v28 = vpop.xlane.xlu0 %79 }
 0x12a   :  { %v3540_v3 = vsub.s32 32, %v3539_v47  ;;  %v3541_v17 = vshll.u32 %v3532_v38, %v3539_v47  ;;  %v3544_v31 = vsub.s32 4294967266, %v3539_v47  ;;  %v3646_v10 = vsel %vm3645_vm0, 1, %v6342_v57 }
 0x12b   :  { %v3648_v49 = vadd.s32 %v3646_v10, %v3640_v61  ;;  %v3670_v20 = vadd.s32 %v3668_v24, %v3662_v59  ;;  %vm3649_vm2 = vc.u32 %v3647_v14, %v3643_v11  ;;  %v3672_v38 = vsel %vm3671_vm1, 1, %v6342_v57 }
 0x12c   :  { %v3542_v46 = vshrl.u32 %v3524_v50, %v3540_v3  ;;  %v3545_v30 = vadd.s32 127, %v3544_v31  ;;  %v3650_v1 = vsel %vm3649_vm2, 1, %v6342_v57  ;;  %v3620_v44 = vsel %vm3616_vm7, %v3600_v51, %v6885_v48  ;;  %v411_v51 = vpop.f32.mrf.mxu0 }
 0x12d   :  { %v3674_v63 = vadd.s32 %v3672_v38, %v3670_v20  ;;  %v3622_v6 = vsel %vm3618_vm9, %v6887_v4, %v3621_v21  ;;  %v3642_v50 = vshrl.u32 %v3638_v40, 16  ;;  %v3652_v8 = vadd.s32 %v3650_v1, %v3648_v49  ;;  %v476_v1 = vpop.f32.mrf.mxu1 }
 0x12e   :  { %v3543_v19 = vor.u32 %v3542_v46, %v3541_v17  ;;  %v3546_v0 = vshll.u32 %v3545_v30, 23  ;;  %v3666_v15 = vshrl.u32 %v6927_v60, 16  ;;  %v130_v59 = vmul.f32 %v6742_v36, %v129_v41 }
 0x12f   :  { %v3675_v2 = vadd.s32 %v3674_v63, %v3664_v55  ;;  %v3644_v45 = vshrl.u32 %v3639_v26, 16  ;;  %v3653_v62 = vadd.s32 %v3652_v8, %v3642_v50  ;;  %vm132_vm3 = vweird.f32 %v6742_v36 }
 0x130   :  { %v3547_v56 = vor.u32 4788187, %v3546_v0  ;;  %v3550_v42 = vcvt.s32.f32 %v3543_v19  ;;  %v3623_v48 = vsel %vm3617_vm11, %v3620_v44, %v3622_v6  ;;  %vm133_vm4 = vmor %vm131_vm13, %vm132_vm3  ;;  %v6959_v21 = vadd.s32 %v3669_v43, %v3665_v27 }
 0x131   :  { %v3676_v47 = vadd.s32 %v3675_v2, %v3666_v15  ;;  %v6957_v4 = vadd.s32 %v3653_v62, %v3644_v45  ;;  %v134_v60 = vsel %vm133_vm4, %v6742_v36, %v130_v59  ;;  %v3677_v11 = vmul.u32 %v6903_v53, %v3623_v48 }
 0x132   :  { %v3548_v61 = vand.u32 2147483647, %v3547_v56  ;;  %v276_v26 = vmul.f32 0.99999, %v134_v60  ;;  %vm100_vm6 = vcmp.gt.f32.partialorder %v6702_v13, 0.99998  ;;  %6140 = vrsqrt.f32 %v6966_v28 }
 0x133   :  { %v3680_v40 = vadd.s32 1, %v3676_v47  ;;  %vm3679_vm5 = vc.u32 %v6957_v4, %v6959_v21  ;;  %vm3432_vm7 = vcmp.lt.s32.totalorder %v6671_v9, 0  ;;  %v3554_v43 = vsub.s32 4, %v6893_v35 }
 0x134   :  { %v3551_v41 = vmul.f32 %v3550_v42, %v3548_v61  ;;  %v292_v27 = vsel %vm100_vm6, %v276_v26, 1.0  ;;  %v10674_v14 = vand.u32 2147483647, %v6671_v9  ;;  %v886_v45 = vmul.f32 7.5, %v6659_v12 }
 0x135   :  { %v3681_v17 = vsel %vm3679_vm5, %v3680_v40, %v3676_v47  ;;  %v308_v31 = vmul.f32 %v292_v27, %v292_v27  ;;  %v538_v10 = vmul.f32 2.0, %v292_v27  ;;  %v3555_v55 = vsel %vm3432_vm7, %v3554_v43, %v6893_v35 }
 0x136   :  { %v3552_v3 = vxor.u32 2147483648, %v3551_v41  ;;  %v3682_v36 = vadd.s32 %v3681_v17, %v3677_v11  ;;  %vm6972_vm8 = vcmp.le.f32.partialorder %v10674_v14, 0.7853982  ;;  %v934_v11 = vmul.f32 1.442695, %v886_v45 }
 0x137   :  { %v324_v49 = vmul.f32 %v308_v31, %v6702_v13  ;;  %v555_v0 = vmul.f32 %v538_v10, %v411_v51  ;;  %v556_v50 = vmul.f32 %v538_v10, %v476_v1  ;;  %v3557_v35 = vsel %vm6972_vm8, 0, %v3555_v55 }
 0x138   :  { %v3553_v24 = vsel %vm3432_vm7, %v3552_v3, %v3551_v41  ;;  %v3683_v30 = vadd.s32 536870912, %v3682_v36  ;;  %v6989_v15 = vpop.eup %6140  ;;  %v3574_v12 = vand.u32 3, %v3557_v35  ;;  %vm3573_vm10 = vweird.f32 %v6671_v9 }
 0x139   :  { %v3556_v46 = vsel %vm6972_vm8, %v6671_v9, %v3553_v24  ;;  %v522_v19 = vadd.f32 1.0, %v324_v49  ;;  %v650_v6 = vsub.f32 1.0, %v324_v49  ;;  %v206_v41 = vmul.f32 %v6989_v15, %v6966_v28 }
 0x13a   :  { %v3558_v20 = vmul.f32 %v3556_v46, %v3556_v46  ;;  %v6986_v38 = vshrl.u32 %v3683_v30, 30  ;;  %vm3575_vm11 = vcmp.lt.s32.totalorder %v3574_v12, 2  ;;  %vm3576_vm13 = vcmp.eq.s32.totalorder %v3574_v12, 0 }
 0x13b   :  { %v587_v56 = vsub.f32 %v522_v19, %v555_v0  ;;  %v588_v59 = vsub.f32 %v522_v19, %v556_v50  ;;  %6142 = vlog2.f32 %v650_v6  ;;  %vm3579_vm14 = vcmp.eq.s32.totalorder %v3574_v12, 2 }
 0x13c   :  { %v3559_v63 = vmul.f32 -0.001358992, %v3558_v20  ;;  %v3566_v44 = vmul.f32 -0.00019511016, %v3558_v20  ;;  %v3685_v8 = vshll.u32 %v6986_v38, 30  ;;  %vm211_vm15 = vweird.f32 %v6966_v28 }
 0x13d   :  { %v619_v61 = vmax.f32 %v587_v56, 1e-12  ;;  %v620_v47 = vmax.f32 %v588_v59, 1e-12  ;;  %vm212_vm0 = vweird.f32 %v6989_v15  ;;  %vm3586_vm2 = vcmp.lt.s32.totalorder %v6700_v58, 0 }
 0x13e   :  { %v3560_v13 = vadd.f32 0.041655596, %v3559_v63  ;;  %v3567_v2 = vadd.f32 0.008332121, %v3566_v44  ;;  %v3686_v62 = vsub.s32 %v3682_v36, %v3685_v8  ;;  %v207_v36 = vmul.f32 %v6989_v15, %v206_v41  ;;  %vm213_vm1 = vmor %vm211_vm15, %vm212_vm0 }
 0x13f   :  { %6144 = vlog2.f32 %v619_v61  ;;  %v3678_v44 = vadd.s32 %v6959_v21, %v6957_v4  ;;  %v7008_v21 = vpop.xlane.xlu1 %58  ;;  %vm7040_vm3 = vcmp.le.f32.partialorder %v3584_v23, 0.7853982  ;;  %vm108_vm4 = vcmp.gt.f32.partialorder %v6966_v28, 0.99998 }
 0x140   :  { %v3561_v42 = vmul.f32 %v3560_v13, %v3558_v20  ;;  %v3568_v48 = vmul.f32 %v3567_v2, %v3558_v20  ;;  %vm3687_vm9 = vcmp.lt.s32.totalorder %v3686_v62, 0  ;;  %v3688_v60 = vsub.s32 0, %v3686_v62 }
 0x141   :  { %6146 = vlog2.f32 %v620_v47  ;;  %v6143_v31 = vpop.eup %6142  ;;  %v208_v30 = vmul.f32 0.5, %v207_v36 }
 0x142   :  { %v3562_v40 = vadd.f32 -0.4999988, %v3561_v42  ;;  %v3569_v26 = vadd.f32 -0.16666654, %v3568_v48  ;;  %v3689_v3 = vsel %vm3687_vm9, %v3688_v60, %v3686_v62  ;;  %6148 = vpow2.f32 %v934_v11 }
 0x143   :  { %v3690_v43 = vclz %v3689_v3  ;;  %v668_v0 = vmul.f32 0.6931472, %v6143_v31  ;;  %v209_v50 = vsub.f32 1.5, %v208_v30  ;;  %v3708_v11 = vsub.s32 4, %v6986_v38 }
 0x144   :  { %v3563_v17 = vmul.f32 %v3562_v40, %v3558_v20  ;;  %v3570_v27 = vmul.f32 %v3569_v26, %v3558_v20  ;;  %6150 = vrsqrt.f32 %v7008_v21 }
 0x145   :  { %v6060_v53 = vadd.s32 4294967294, %v3690_v43  ;;  %v6145_v24 = vpop.eup %6144  ;;  %v210_v60 = vmul.f32 %v6989_v15, %v209_v50 }
 0x146   :  { %v3564_v10 = vadd.f32 1.0, %v3563_v17  ;;  %v3571_v14 = vadd.f32 1.0, %v3570_v27  ;;  %v702_v19 = vmul.f32 0.6931472, %v6145_v24  ;;  %v887_v17 = vmul.f32 7.5, %v6682_v5 }
 0x147   :  { %v6147_v49 = vpop.eup %6146  ;;  %vm6061_vm12 = vcmp.lt.s32.totalorder %v6060_v53, 0  ;;  %v214_v43 = vsel %vm213_vm1, %v6989_v15, %v210_v60 }
 0x148   :  { %v3572_v51 = vmul.f32 %v3571_v14, %v3556_v46  ;;  %v3580_v55 = vxor.u32 2147483648, %v3564_v10  ;;  %v3693_v20 = vsel %vm6061_vm12, 0, %v6060_v53  ;;  %v704_v1 = vmul.f32 0.6931472, %v6147_v49  ;;  %v6149_v45 = vpop.eup %6148 }
 0x149   :  { %v3694_v6 = vsub.s32 32, %v3693_v20  ;;  %v3698_v8 = vsub.s32 4294967266, %v3693_v20  ;;  %v7000_v56 = vsub.f32 %v668_v0, %v702_v19  ;;  %v3695_v61 = vshll.u32 %v3686_v62, %v3693_v20 }
 0x14a   :  { %v3577_v63 = vxor.u32 2147483648, %v3572_v51  ;;  %v7002_v13 = vsub.f32 %v668_v0, %v704_v1  ;;  %v3581_v2 = vsel %vm3579_vm14, %v3580_v55, %v3572_v51  ;;  %v3709_v14 = vsel %vm3586_vm2, %v3708_v11, %v6986_v38  ;;  %v7044_v20 = vpop.eup %6150 }
 0x14b   :  { %v3696_v59 = vshrl.u32 %v3678_v44, %v3694_v6  ;;  %v3699_v42 = vadd.s32 127, %v3698_v8  ;;  %v803_v4 = vmul.f32 %v6507_v32, %v7000_v56  ;;  %v284_v51 = vmul.f32 0.99999, %v214_v43 }
 0x14c   :  { %v3578_v46 = vsel %vm3576_vm13, %v3564_v10, %v3577_v63  ;;  %v804_v47 = vmul.f32 %v6509_v34, %v7002_v13  ;;  %v936_v0 = vmul.f32 1.442695, %v887_v17  ;;  %v3711_v1 = vsel %vm7040_vm3, 0, %v3709_v14 }
 0x14d   :  { %v3582_v35 = vsel %vm3575_vm11, %v3578_v46, %v3581_v2  ;;  %v3697_v41 = vor.u32 %v3696_v59, %v3695_v61  ;;  %v3700_v40 = vshll.u32 %v3699_v42, 23  ;;  %v7017_v62 = vadd.f32 %v6513_v37, %v803_v4 }
 0x14e   :  { %v3583_v48 = vsel %vm3573_vm10, nan, %v3582_v35  ;;  %v7021_v12 = vadd.f32 %v6517_v39, %v804_v47  ;;  %v7057_v8 = vsel %vm108_vm4, %v284_v51, 1.0  ;;  %v7061_v46 = vmul.f32 %v7044_v20, %v7008_v21 }
 0x14f   :  { %v5910_v26 = vmul.f32 %v6149_v45, %v3583_v48  ;;  %v3701_v9 = vor.u32 4788187, %v3700_v40  ;;  %v1274_v3 = vand.u32 2147483647, %v7017_v62  ;;  %v1277_v27 = vand.u32 2139095040, %v7017_v62 }
 0x150   :  { %v3704_v31 = vcvt.s32.f32 %v3697_v41  ;;  %v1428_v24 = vand.u32 2147483647, %v7021_v12  ;;  %v1431_v5 = vand.u32 2139095040, %v7021_v12  ;;  %6152 = vpow2.f32 %v936_v0 }
 0x151   :  { %5942 = vst [vmem:[#allocation2 + $0x80] sm:$0xff] %v5910_v26  ;;  %v3702_v36 = vand.u32 2147483647, %v3701_v9  ;;  %v1281_v10 = vand.u32 8388607, %v1274_v3  ;;  %v1278_v53 = vshrl.u32 %v1277_v27, 23  ;;  %v7078_v47 = vmul.f32 %v7057_v8, %v7057_v8 }
 0x152   :  { %v1432_v19 = vshrl.u32 %v1431_v5, 23  ;;  %v7053_v23 = vand.u32 8388607, %v1428_v24  ;;  %v7070_v35 = vand.u32 3, %v3711_v1  ;;  %vm3727_vm14 = vweird.f32 %v6700_v58 }
 0x153   :  { %v3705_v30 = vmul.f32 %v3704_v31, %v3702_v36  ;;  %v1282_v49 = vor.u32 8388608, %v1281_v10  ;;  %v6014_v55 = vadd.s32 4294967169, %v1278_v53 }
 0x154   :  { %v6017_v6 = vadd.s32 4294967169, %v1432_v19  ;;  %v1436_v48 = vor.u32 8388608, %v7053_v23  ;;  %vm3733_vm7 = vcmp.eq.s32.totalorder %v7070_v35, 2  ;;  %vm3730_vm8 = vcmp.eq.s32.totalorder %v7070_v35, 0 }
 0x155   :  { %v3706_v38 = vxor.u32 2147483648, %v3705_v30  ;;  %v1284_v63 = vadd.s32 1, %v6014_v55  ;;  %v7049_v44 = vshll.u32 %v1282_v49, 8  ;;  %vm3729_vm13 = vcmp.lt.s32.totalorder %v7070_v35, 2 }
 0x156   :  { %v1438_v59 = vadd.s32 1, %v6017_v6 }
 0x157   :  { %v3707_v50 = vsel %vm3586_vm2, %v3706_v38, %v3705_v30  ;;  %vm1285_vm5 = vcmp.gt.s32.totalorder %v1284_v63, 0  ;;  %v7073_v4 = vand.u32 65535, %v7049_v44  ;;  %v7081_v26 = vshrl.u32 %v7049_v44, 16  ;;  %v7091_v30 = vpop.eup %6152 }
 0x158   :  { %v7066_v2 = vsel %vm7040_vm3, %v6700_v58, %v3707_v50  ;;  %v1286_v61 = vsel %vm1285_vm5, %v1284_v63, 0  ;;  %vm1439_vm6 = vcmp.gt.s32.totalorder %v1438_v59, 0 }
 0x159   :  { %v3712_v45 = vmul.f32 %v7066_v2, %v7066_v2  ;;  %v1288_v42 = vand.u32 31, %v1286_v61  ;;  %v1287_v40 = vshrl.u32 %v1286_v61, 5 }
 0x15b   :  { %v3713_v60 = vmul.f32 -0.001358992, %v3712_v45  ;;  %v3720_v41 = vmul.f32 -0.00019511016, %v3712_v45  ;;  %v1289_v11 = vsub.s32 32, %v1288_v42  ;;  %v1291_v9 = vshll.u32 %v6336_v16, %v1288_v42 }
 0x15c   :  { %v1294_v17 = vshll.u32 %v6337_v18, %v1288_v42  ;;  %v1297_v36 = vshll.u32 %v6338_v22, %v1288_v42  ;;  %v1300_v31 = vshll.u32 %v6339_v25, %v1288_v42  ;;  %v1303_v5 = vshll.u32 %v10665_v29, %v1288_v42 }
 0x15d   :  { %v3714_v27 = vadd.f32 0.041655596, %v3713_v60  ;;  %v3721_v43 = vadd.f32 0.008332121, %v3720_v41  ;;  %v1292_v10 = vshrl.u32 %v6337_v18, %v1289_v11  ;;  %v1295_v14 = vshrl.u32 %v6338_v22, %v1289_v11 }
 0x15e   :  { %v1298_v53 = vshrl.u32 %v6339_v25, %v1289_v11  ;;  %v1301_v15 = vshrl.u32 %v10665_v29, %v1289_v11  ;;  %v1304_v55 = vshrl.u32 %v10663_v33, %v1289_v11  ;;  %v1290_v19 = vshrl.u32 %v6336_v16, %v1289_v11 }
 0x15f   :  { %v3715_v49 = vmul.f32 %v3714_v27, %v3712_v45  ;;  %v3722_v51 = vmul.f32 %v3721_v43, %v3712_v45  ;;  %v1293_v0 = vor.u32 %v1292_v10, %v1291_v9  ;;  %v1296_v38 = vor.u32 %v1295_v14, %v1294_v17 }
 0x160   :  { %v1299_v1 = vor.u32 %v1298_v53, %v1297_v36  ;;  %v1302_v23 = vor.u32 %v1301_v15, %v1300_v31  ;;  %v1305_v50 = vor.u32 %v1304_v55, %v1303_v5  ;;  %vm1306_vm9 = vcmp.lt.s32.totalorder %v1287_v40, 1 }
 0x161   :  { %v3716_v63 = vadd.f32 -0.4999988, %v3715_v49  ;;  %v3723_v6 = vadd.f32 -0.16666654, %v3722_v51  ;;  %vm1307_vm10 = vcmp.lt.s32.totalorder %v1287_v40, 2  ;;  %vm1308_vm11 = vcmp.lt.s32.totalorder %v1287_v40, 3 }
 0x162   :  { %vm1309_vm12 = vcmp.lt.s32.totalorder %v1287_v40, 4  ;;  %v1314_v41 = vsel %vm1306_vm9, %v1293_v0, %v1296_v38  ;;  %v1310_v11 = vsel %vm1306_vm9, %v1290_v19, %v1293_v0  ;;  %v1318_v17 = vsel %vm1306_vm9, %v1296_v38, %v1299_v1 }
 0x163   :  { %v3717_v61 = vmul.f32 %v3716_v63, %v3712_v45  ;;  %v3724_v42 = vmul.f32 %v3723_v6, %v3712_v45  ;;  %v1311_v60 = vsel %vm1309_vm12, %v1299_v1, 2102212464  ;;  %v1315_v9 = vsel %vm1309_vm12, %v1302_v23, 920167782 }
 0x164   :  { %v1319_v27 = vsel %vm1309_vm12, %v1305_v50, 1326507024  ;;  %v1312_v31 = vsel %vm1308_vm11, %v1296_v38, %v1311_v60  ;;  %v1316_v10 = vsel %vm1308_vm11, %v1299_v1, %v1315_v9  ;;  %v1440_v53 = vsel %vm1439_vm6, %v1438_v59, 0 }
 0x165   :  { %v3718_v43 = vadd.f32 1.0, %v3717_v61  ;;  %v3725_v36 = vadd.f32 1.0, %v3724_v42  ;;  %v1317_v14 = vsel %vm1307_vm10, %v1314_v41, %v1316_v10  ;;  %v1320_v45 = vsel %vm1308_vm11, %v1302_v23, %v1319_v27 }
 0x166   :  { %v7105_v5 = vshll.u32 %v1436_v48, 8  ;;  %v1321_v15 = vsel %vm1307_vm10, %v1318_v17, %v1320_v45  ;;  %v1347_v55 = vand.u32 65535, %v1317_v14  ;;  %v7110_v19 = vsel %vm1307_vm10, %v1310_v11, %v1312_v31 }
 0x167   :  { %v3726_v49 = vmul.f32 %v3725_v36, %v7066_v2  ;;  %v3734_v51 = vxor.u32 2147483648, %v3718_v43  ;;  %v1325_v0 = vand.u32 65535, %v1321_v15  ;;  %v1326_v38 = vshrl.u32 %v1321_v15, 16 }
 0x168   :  { %v1348_v1 = vshrl.u32 %v1317_v14, 16  ;;  %v1351_v6 = vmul.u32 %v1347_v55, %v7081_v26  ;;  %v7113_v23 = vshrl.u32 %v1440_v53, 5  ;;  %v1442_v59 = vand.u32 31, %v1440_v53 }
 0x169   :  { %v3731_v63 = vxor.u32 2147483648, %v3726_v49  ;;  %v3735_v48 = vsel %vm3733_vm7, %v3734_v51, %v3726_v49  ;;  %v1328_v2 = vmul.u32 %v1326_v38, %v7073_v4  ;;  %v1329_v50 = vmul.u32 %v1325_v0, %v7081_v26 }
 0x16a   :  { %v1349_v40 = vmul.u32 %v1347_v55, %v7073_v4  ;;  %v1327_v42 = vmul.u32 %v1325_v0, %v7073_v4  ;;  %v1330_v60 = vmul.u32 %v1326_v38, %v7081_v26  ;;  %v1350_v41 = vmul.u32 %v1348_v1, %v7073_v4 }
 0x16b   :  { %v3732_v61 = vsel %vm3730_vm8, %v3718_v43, %v3731_v63  ;;  %v1331_v9 = vshll.u32 %v1328_v2, 16  ;;  %v1352_v17 = vmul.u32 %v1348_v1, %v7081_v26  ;;  %v1355_v27 = vshll.u32 %v1351_v6, 16 }
 0x16c   :  { %v3736_v11 = vsel %vm3729_vm13, %v3732_v61, %v3735_v48  ;;  %v1332_v31 = vshrl.u32 %v1328_v2, 16  ;;  %v1333_v10 = vshll.u32 %v1329_v50, 16  ;;  %v1353_v14 = vshll.u32 %v1350_v41, 16 }
 0x16d   :  { %v3737_v36 = vsel %vm3727_vm14, nan, %v3736_v11  ;;  %v1334_v45 = vshrl.u32 %v1329_v50, 16  ;;  %vm1335_vm15 = vc.u32 %v1327_v42, %v1331_v9  ;;  %v1337_v53 = vadd.s32 %v1331_v9, %v1327_v42 }
 0x16e   :  { %v5911_v43 = vmul.f32 %v7091_v30, %v3737_v36  ;;  %v1336_v4 = vsel %vm1335_vm15, 1, %v6342_v57  ;;  %vm1357_vm0 = vc.u32 %v1349_v40, %v1353_v14  ;;  %v1359_v35 = vadd.s32 %v1353_v14, %v1349_v40 }
 0x16f   :  { %v7132_v49 = vsub.s32 32, %v1442_v59  ;;  %v1338_v26 = vadd.s32 %v1336_v4, %v1330_v60  ;;  %vm1339_vm1 = vc.u32 %v1337_v53, %v1333_v10  ;;  %v1354_v51 = vshrl.u32 %v1350_v41, 16 }
 0x170   :  { %5943 = vst [vmem:[#allocation2 + $0x88] sm:$0xff] %v5911_v43  ;;  %v1358_v58 = vsel %vm1357_vm0, 1, %v6342_v57  ;;  %v1340_v15 = vsel %vm1339_vm1, 1, %v6342_v57  ;;  %v1356_v55 = vshrl.u32 %v1351_v6, 16  ;;  %vm1361_vm2 = vc.u32 %v1359_v35, %v1355_v27 }
 0x171   :  { %v1360_v0 = vadd.s32 %v1358_v58, %v1352_v17  ;;  %v1342_v30 = vadd.s32 %v1340_v15, %v1338_v26  ;;  %v1362_v38 = vsel %vm1361_vm2, 1, %v6342_v57  ;;  %v1445_v1 = vshll.u32 %v6336_v16, %v1442_v59 }
 0x172   :  { %v1446_v63 = vshrl.u32 %v6337_v18, %v7132_v49  ;;  %v7140_v48 = vadd.s32 %v1359_v35, %v1355_v27  ;;  %v1448_v50 = vshll.u32 %v6337_v18, %v1442_v59  ;;  %v1449_v40 = vshrl.u32 %v6338_v22, %v7132_v49 }
 0x173   :  { %v1364_v2 = vadd.s32 %v1362_v38, %v1360_v0  ;;  %v1343_v61 = vadd.s32 %v1342_v30, %v1332_v31  ;;  %v1451_v42 = vshll.u32 %v6338_v22, %v1442_v59  ;;  %v1452_v60 = vshrl.u32 %v6339_v25, %v7132_v49 }
 0x174   :  { %v7145_v6 = vor.u32 %v1446_v63, %v1445_v1  ;;  %v7150_v11 = vor.u32 %v1449_v40, %v1448_v50  ;;  %v1454_v9 = vshll.u32 %v6339_v25, %v1442_v59  ;;  %v1455_v17 = vshrl.u32 %v10665_v29, %v7132_v49 }
 0x175   :  { %v1365_v41 = vadd.s32 %v1364_v2, %v1354_v51  ;;  %v7155_v27 = vadd.s32 %v1343_v61, %v1334_v45  ;;  %v7157_v36 = vor.u32 %v1452_v60, %v1451_v42  ;;  %v1457_v31 = vshll.u32 %v10665_v29, %v1442_v59  ;;  %v435_v61 = vpop.f32.mrf.mxu2 }
 0x176   :  { %v1458_v10 = vshrl.u32 %v10663_v33, %v7132_v49  ;;  %v1456_v43 = vor.u32 %v1455_v17, %v1454_v9  ;;  %v7164_v53 = vmul.f32 %v7078_v47, %v6966_v28  ;;  %v546_v4 = vmul.f32 2.0, %v7057_v8 }
 0x177   :  { %v1366_v14 = vadd.s32 %v1365_v41, %v1356_v55  ;;  %vm1369_vm3 = vc.u32 %v7155_v27, %v7140_v48  ;;  %vm1460_vm4 = vcmp.lt.s32.totalorder %v7113_v23, 1  ;;  %v1477_v35 = vand.u32 65535, %v7105_v5 }
 0x178   :  { %v1459_v45 = vor.u32 %v1458_v10, %v1457_v31  ;;  %v1367_v59 = vmul.u32 %v7049_v44, %v7110_v19  ;;  %vm1463_vm5 = vcmp.lt.s32.totalorder %v7113_v23, 4  ;;  %v1468_v28 = vsel %vm1460_vm4, %v7145_v6, %v7150_v11  ;;  %v500_v10 = vpop.f32.mrf.mxu3 }
 0x179   :  { %v1370_v26 = vadd.s32 1, %v1366_v14  ;;  %vm1462_vm6 = vcmp.lt.s32.totalorder %v7113_v23, 3  ;;  %v1469_v8 = vsel %vm1463_vm5, %v1456_v43, 920167782  ;;  %v1472_v47 = vsel %vm1460_vm4, %v7150_v11, %v7157_v36 }
 0x17a   :  { %v1473_v44 = vsel %vm1463_vm5, %v1459_v45, 1326507024  ;;  %vm1461_vm7 = vcmp.lt.s32.totalorder %v7113_v23, 2  ;;  %v1470_v51 = vsel %vm1462_vm6, %v7157_v36, %v1469_v8  ;;  %v1478_v30 = vshrl.u32 %v7105_v5, 16 }
 0x17b   :  { %v1371_v19 = vsel %vm1369_vm3, %v1370_v26, %v1366_v14  ;;  %v1474_v58 = vsel %vm1462_vm6, %v1456_v43, %v1473_v44  ;;  %v1471_v55 = vsel %vm1461_vm7, %v1468_v28, %v1470_v51  ;;  %v530_v2 = vadd.f32 1.0, %v7164_v53 }
 0x17c   :  { %v1372_v15 = vadd.s32 %v1371_v19, %v1367_v59  ;;  %v1475_v0 = vsel %vm1461_vm7, %v1472_v47, %v1474_v58  ;;  %v1502_v63 = vshrl.u32 %v1471_v55, 16  ;;  %v1501_v40 = vand.u32 65535, %v1471_v55 }
 0x17d   :  { %v1479_v38 = vand.u32 65535, %v1475_v0  ;;  %v1480_v1 = vshrl.u32 %v1475_v0, 16  ;;  %v571_v41 = vmul.f32 %v546_v4, %v435_v61  ;;  %v137_v9 = vmul.f32 %v7044_v20, %v7061_v46 }
 0x17e   :  { %v1373_v50 = vadd.s32 536870912, %v1372_v15  ;;  %v1504_v31 = vmul.u32 %v1502_v63, %v1477_v35  ;;  %v572_v45 = vmul.f32 %v546_v4, %v500_v10  ;;  %v1505_v8 = vmul.u32 %v1501_v40, %v1478_v30 }
 0x17f   :  { %v1482_v42 = vmul.u32 %v1480_v1, %v1477_v35  ;;  %v1483_v60 = vmul.u32 %v1479_v38, %v1478_v30  ;;  %v1481_v14 = vmul.u32 %v1479_v38, %v1477_v35  ;;  %v603_v59 = vsub.f32 %v530_v2, %v571_v41 }
 0x180   :  { %v7201_v17 = vshrl.u32 %v1373_v50, 30  ;;  %v1484_v28 = vmul.u32 %v1480_v1, %v1478_v30  ;;  %v1507_v47 = vshll.u32 %v1504_v31, 16  ;;  %v1503_v51 = vmul.u32 %v1501_v40, %v1477_v35 }
 0x181   :  { %v1485_v43 = vshll.u32 %v1482_v42, 16  ;;  %v1487_v44 = vshll.u32 %v1483_v60, 16  ;;  %v1486_v55 = vshrl.u32 %v1482_v42, 16  ;;  %v658_v0 = vsub.f32 1.0, %v7164_v53 }
 0x182   :  { %v1375_v26 = vshll.u32 %v7201_v17, 30  ;;  %v1506_v38 = vmul.u32 %v1502_v63, %v1478_v30  ;;  %vm1511_vm10 = vc.u32 %v1503_v51, %v1507_v47  ;;  %v1509_v61 = vshll.u32 %v1505_v8, 16 }
 0x183   :  { %vm1489_vm8 = vc.u32 %v1481_v14, %v1485_v43  ;;  %v1491_v19 = vadd.s32 %v1485_v43, %v1481_v14  ;;  %v1512_v10 = vsel %vm1511_vm10, 1, %v6342_v57  ;;  %v1513_v14 = vadd.s32 %v1507_v47, %v1503_v51 }
 0x184   :  { %v1376_v58 = vsub.s32 %v1372_v15, %v1375_v26  ;;  %v1490_v46 = vsel %vm1489_vm8, 1, %v6342_v57  ;;  %v604_v35 = vsub.f32 %v530_v2, %v572_v45  ;;  %v138_v15 = vmul.f32 0.5, %v137_v9 }
 0x185   :  { %v1492_v50 = vadd.s32 %v1490_v46, %v1484_v28  ;;  %vm1493_vm9 = vc.u32 %v1491_v19, %v1487_v44  ;;  %v1444_v42 = vshrl.u32 %v6336_v16, %v7132_v49  ;;  %v1465_v53 = vsel %vm1463_vm5, %v7157_v36, 2102212464 }
 0x186   :  { %vm1377_vm11 = vcmp.lt.s32.totalorder %v1376_v58, 0  ;;  %v1378_v4 = vsub.s32 0, %v1376_v58  ;;  %v1494_v1 = vsel %vm1493_vm9, 1, %v6342_v57  ;;  %v1514_v43 = vadd.s32 %v1512_v10, %v1506_v38 }
 0x187   :  { %v1496_v41 = vadd.s32 %v1494_v1, %v1492_v50  ;;  %vm1515_vm12 = vc.u32 %v1513_v14, %v1509_v61  ;;  %v1488_v26 = vshrl.u32 %v1483_v60, 16  ;;  %v635_v44 = vmax.f32 %v603_v59, 1e-12 }
 0x188   :  { %v1379_v40 = vsel %vm1377_vm11, %v1378_v4, %v1376_v58  ;;  %v1516_v28 = vsel %vm1515_vm12, 1, %v6342_v57  ;;  %v636_v19 = vmax.f32 %v604_v35, 1e-12  ;;  %v1508_v2 = vshrl.u32 %v1504_v31, 16 }
 0x189   :  { %v1380_v30 = vclz %v1379_v40  ;;  %v1497_v63 = vadd.s32 %v1496_v41, %v1486_v55  ;;  %v1518_v9 = vadd.s32 %v1516_v28, %v1514_v43  ;;  %6154 = vlog2.f32 %v658_v0 }
 0x18a   :  { %v1464_v49 = vsel %vm1460_vm4, %v1444_v42, %v7145_v6  ;;  %v1466_v36 = vsel %vm1462_vm6, %v7150_v11, %v1465_v53  ;;  %6156 = vlog2.f32 %v635_v44  ;;  %v1510_v60 = vshrl.u32 %v1505_v8, 16 }
 0x18b   :  { %v6015_v47 = vadd.s32 4294967294, %v1380_v30  ;;  %v7220_v45 = vadd.s32 %v1497_v63, %v1488_v26  ;;  %v1519_v51 = vadd.s32 %v1518_v9, %v1508_v2  ;;  %v1368_v59 = vadd.s32 %v7140_v48, %v7155_v27 }
 0x18c   :  { %v7224_v55 = vadd.s32 %v1513_v14, %v1509_v61  ;;  %6158 = vlog2.f32 %v636_v19  ;;  %v1467_v6 = vsel %vm1461_vm7, %v1464_v49, %v1466_v36  ;;  %v139_v11 = vsub.f32 1.5, %v138_v15 }
 0x18d   :  { %vm6016_vm13 = vcmp.lt.s32.totalorder %v6015_v47, 0  ;;  %v1520_v50 = vadd.s32 %v1519_v51, %v1510_v60  ;;  %vm141_vm15 = vweird.f32 %v7008_v21  ;;  %v1521_v27 = vmul.u32 %v7105_v5, %v1467_v6 }
 0x18e   :  { %v1383_v31 = vsel %vm6016_vm13, 0, %v6015_v47  ;;  %vm1523_vm14 = vc.u32 %v7220_v45, %v7224_v55  ;;  %vm142_vm0 = vweird.f32 %v7044_v20  ;;  %v140_v42 = vmul.f32 %v7044_v20, %v139_v11 }
 0x18f   :  { %v1384_v46 = vsub.s32 32, %v1383_v31  ;;  %v1388_v0 = vsub.s32 4294967266, %v1383_v31  ;;  %v6155_v38 = vpop.eup %6154  ;;  %v1385_v8 = vshll.u32 %v1376_v58, %v1383_v31  ;;  %v1524_v41 = vadd.s32 1, %v1520_v50  ;;  %vm7239_vm1 = vmor %vm141_vm15, %vm142_vm0 }
 0x190   :  { %v6157_v48 = vpop.eup %6156  ;;  %v684_v61 = vmul.f32 0.6931472, %v6155_v38  ;;  %v872_v58 = vmul.f32 7.5, %v7000_v56  ;;  %v1398_v43 = vsub.s32 4, %v7201_v17  ;;  %v873_v47 = vmul.f32 7.5, %v7002_v13 }
 0x191   :  { %v1386_v4 = vshrl.u32 %v1368_v59, %v1384_v46  ;;  %v1389_v1 = vadd.s32 127, %v1388_v0  ;;  %v1525_v14 = vsel %vm1523_vm14, %v1524_v41, %v1520_v50  ;;  %v734_v35 = vmul.f32 0.6931472, %v6157_v48 }
 0x192   :  { %v6159_v15 = vpop.eup %6158  ;;  %v1526_v40 = vadd.s32 %v1525_v14, %v1521_v27  ;;  %v144_v9 = vsel %vm7239_vm1, %v7044_v20, %v140_v42  ;;  %v906_v49 = vmul.f32 1.442695, %v872_v58  ;;  %vm1276_vm2 = vcmp.lt.s32.totalorder %v7017_v62, 0 }
 0x193   :  { %v1387_v23 = vor.u32 %v1386_v4, %v1385_v8  ;;  %v1390_v10 = vshll.u32 %v1389_v1, 23  ;;  %v736_v30 = vmul.f32 0.6931472, %v6159_v15  ;;  %v7235_v63 = vsub.f32 %v684_v61, %v734_v35 }
 0x194   :  { %v1527_v26 = vadd.s32 536870912, %v1526_v40  ;;  %v1399_v51 = vsel %vm1276_vm2, %v1398_v43, %v7201_v17  ;;  %v277_v0 = vmul.f32 0.99999, %v144_v9  ;;  %vm7262_vm3 = vcmp.le.f32.partialorder %v1274_v3, 0.7853982 }
 0x195   :  { %v1391_v53 = vor.u32 4788187, %v1390_v10  ;;  %v1394_v44 = vcvt.s32.f32 %v1387_v23  ;;  %v7244_v19 = vsub.f32 %v684_v61, %v736_v30  ;;  %v819_v56 = vmul.f32 %v6507_v32, %v7235_v63 }
 0x196   :  { %v1528_v2 = vshrl.u32 %v1527_v26, 30  ;;  %v908_v6 = vmul.f32 1.442695, %v873_v47  ;;  %6160 = vpow2.f32 %v906_v49  ;;  %v1401_v17 = vsel %vm7262_vm3, 0, %v1399_v51 }
 0x197   :  { %v1392_v28 = vand.u32 2147483647, %v1391_v53  ;;  %v7254_v60 = vadd.f32 %v6513_v37, %v819_v56  ;;  %v820_v31 = vmul.f32 %v6509_v34, %v7244_v19  ;;  %vm101_vm4 = vcmp.gt.f32.partialorder %v7008_v21, 0.99998 }
 0x198   :  { %v1529_v59 = vshll.u32 %v1528_v2, 30  ;;  %v293_v48 = vsel %vm101_vm4, %v277_v0, 1.0  ;;  %6162 = vpow2.f32 %v908_v6  ;;  %vm1430_vm6 = vcmp.lt.s32.totalorder %v7021_v12, 0 }
 0x199   :  { %v1395_v36 = vmul.f32 %v1394_v44, %v1392_v28  ;;  %v3738_v13 = vand.u32 2147483647, %v7254_v60  ;;  %v7279_v8 = vadd.f32 %v6517_v39, %v820_v31  ;;  %v3741_v1 = vand.u32 2139095040, %v7254_v60 }
 0x19a   :  { %v7266_v50 = vsub.s32 %v1526_v40, %v1529_v59  ;;  %v1552_v61 = vsub.s32 4, %v1528_v2  ;;  %v7288_v15 = vand.u32 3, %v1401_v17  ;;  %v309_v58 = vmul.f32 %v293_v48, %v293_v48 }
 0x19b   :  { %v1396_v46 = vxor.u32 2147483648, %v1395_v36  ;;  %v3745_v41 = vand.u32 8388607, %v3738_v13  ;;  %v3742_v35 = vshrl.u32 %v3741_v1, 23  ;;  %v3895_v42 = vand.u32 2139095040, %v7279_v8 }
 0x19c   :  { %vm1531_vm5 = vcmp.lt.s32.totalorder %v7266_v50, 0  ;;  %v1532_v3 = vsub.s32 0, %v7266_v50  ;;  %v7291_v53 = vpop.eup %6160  ;;  %vm7295_vm7 = vcmp.le.f32.partialorder %v1428_v24, 0.7853982  ;;  %v1522_v44 = vadd.s32 %v7224_v55, %v7220_v45 }
 0x19d   :  { %v1397_v11 = vsel %vm1276_vm2, %v1396_v46, %v1395_v36  ;;  %v3746_v40 = vor.u32 8388608, %v3745_v41  ;;  %v6062_v26 = vadd.s32 4294967169, %v3742_v35  ;;  %v7303_v56 = vsel %vm1430_vm6, %v1552_v61, %v1528_v2 }
 0x19e   :  { %v7274_v38 = vsel %vm7262_vm3, %v7017_v62, %v1397_v11  ;;  %v1533_v27 = vsel %vm1531_vm5, %v1532_v3, %v7266_v50  ;;  %v3896_v47 = vshrl.u32 %v3895_v42, 23  ;;  %v7305_v51 = vpop.eup %6162  ;;  %vm1423_vm9 = vcmp.eq.s32.totalorder %v7288_v15, 2 }
 0x19f   :  { %v1402_v4 = vmul.f32 %v7274_v38, %v7274_v38  ;;  %v1534_v14 = vclz %v1533_v27  ;;  %v3748_v36 = vadd.s32 1, %v6062_v26  ;;  %v7308_v59 = vshll.u32 %v3746_v40, 8 }
 0x1a0   :  { %v7311_v31 = vmul.f32 %v309_v58, %v7008_v21  ;;  %v7313_v45 = vmul.f32 2.0, %v293_v48  ;;  %v6065_v0 = vadd.s32 4294967169, %v3896_v47  ;;  %vm1420_vm10 = vcmp.eq.s32.totalorder %v7288_v15, 0 }
 0x1a1   :  { %v1403_v23 = vmul.f32 -0.001358992, %v1402_v4  ;;  %v1410_v10 = vmul.f32 -0.00019511016, %v1402_v4  ;;  %v6018_v43 = vadd.s32 4294967294, %v1534_v14  ;;  %v1555_v11 = vsel %vm7295_vm7, 0, %v7303_v56 }
 0x1a2   :  { %vm3749_vm11 = vcmp.gt.s32.totalorder %v3748_v36, 0  ;;  %vm1419_vm12 = vcmp.lt.s32.totalorder %v7288_v15, 2  ;;  %vm1417_vm13 = vweird.f32 %v7017_v62  ;;  %v7323_v27 = vand.u32 65535, %v7308_v59 }
 0x1a3   :  { %v1404_v30 = vadd.f32 0.041655596, %v1403_v23  ;;  %v1411_v5 = vadd.f32 0.008332121, %v1410_v10  ;;  %vm6019_vm8 = vcmp.lt.s32.totalorder %v6018_v43, 0  ;;  %v3750_v1 = vsel %vm3749_vm11, %v3748_v36, 0 }
 0x1a4   :  { %v1537_v24 = vsel %vm6019_vm8, 0, %v6018_v43  ;;  %v3752_v48 = vand.u32 31, %v3750_v1  ;;  %v7326_v14 = vadd.s32 1, %v6065_v0 }
 0x1a5   :  { %v1405_v9 = vmul.f32 %v1404_v30, %v1402_v4  ;;  %v1412_v49 = vmul.f32 %v1411_v5, %v1402_v4  ;;  %v1538_v46 = vsub.s32 32, %v1537_v24  ;;  %v1539_v20 = vshll.u32 %v7266_v50, %v1537_v24 }
 0x1a6   :  { %v1542_v6 = vsub.s32 4294967266, %v1537_v24  ;;  %v3892_v50 = vand.u32 2147483647, %v7279_v8  ;;  %v3753_v40 = vsub.s32 32, %v3752_v48  ;;  %v3755_v42 = vshll.u32 %v6336_v16, %v3752_v48 }
 0x1a7   :  { %v1406_v55 = vadd.f32 -0.4999988, %v1405_v9  ;;  %v1413_v2 = vadd.f32 -0.16666654, %v1412_v49  ;;  %v1540_v21 = vshrl.u32 %v1522_v44, %v1538_v46  ;;  %v3758_v43 = vshll.u32 %v6337_v18, %v3752_v48 }
 0x1a8   :  { %v1543_v41 = vadd.s32 127, %v1542_v6  ;;  %v3756_v44 = vshrl.u32 %v6337_v18, %v3753_v40  ;;  %v3759_v47 = vshrl.u32 %v6338_v22, %v3753_v40  ;;  %v3761_v9 = vshll.u32 %v6338_v22, %v3752_v48 }
 0x1a9   :  { %v1407_v17 = vmul.f32 %v1406_v55, %v1402_v4  ;;  %v1414_v3 = vmul.f32 %v1413_v2, %v1402_v4  ;;  %v1541_v10 = vor.u32 %v1540_v21, %v1539_v20  ;;  %v7328_v4 = vshrl.u32 %v3750_v1, 5 }
 0x1aa   :  { %v1544_v35 = vshll.u32 %v1543_v41, 23  ;;  %v3762_v24 = vshrl.u32 %v6339_v25, %v3753_v40  ;;  %v3764_v55 = vshll.u32 %v6339_v25, %v3752_v48  ;;  %v3757_v2 = vor.u32 %v3756_v44, %v3755_v42 }
 0x1ab   :  { %v1408_v61 = vadd.f32 1.0, %v1407_v17  ;;  %v1415_v23 = vadd.f32 1.0, %v1414_v3  ;;  %v1548_v5 = vcvt.s32.f32 %v1541_v10  ;;  %v3760_v46 = vor.u32 %v3759_v47, %v3758_v43 }
 0x1ac   :  { %v1545_v26 = vor.u32 4788187, %v1544_v35  ;;  %v3765_v0 = vshrl.u32 %v10665_v29, %v3753_v40  ;;  %vm3903_vm14 = vcmp.gt.s32.totalorder %v7326_v14, 0  ;;  %v3763_v6 = vor.u32 %v3762_v24, %v3761_v9 }
 0x1ad   :  { %v1416_v58 = vmul.f32 %v1415_v23, %v7274_v38  ;;  %v1424_v30 = vxor.u32 2147483648, %v1408_v61  ;;  %v3767_v17 = vshll.u32 %v10665_v29, %v3752_v48  ;;  %v3768_v3 = vshrl.u32 %v10663_v33, %v3753_v40 }
 0x1ae   :  { %v1546_v38 = vand.u32 2147483647, %v1545_v26  ;;  %v3754_v41 = vshrl.u32 %v6336_v16, %v3753_v40  ;;  %v3766_v23 = vor.u32 %v3765_v0, %v3764_v55  ;;  %vm3770_vm15 = vcmp.lt.s32.totalorder %v7328_v4, 1 }
 0x1af   :  { %v1421_v49 = vxor.u32 2147483648, %v1416_v58  ;;  %v1425_v36 = vsel %vm1423_vm9, %v1424_v30, %v1416_v58  ;;  %v3769_v35 = vor.u32 %v3768_v3, %v3767_v17  ;;  %vm3771_vm0 = vcmp.lt.s32.totalorder %v7328_v4, 2 }
 0x1b0   :  { %v1549_v1 = vmul.f32 %v1548_v5, %v1546_v38  ;;  %vm3772_vm1 = vcmp.lt.s32.totalorder %v7328_v4, 3  ;;  %vm3773_vm2 = vcmp.lt.s32.totalorder %v7328_v4, 4  ;;  %v3778_v42 = vsel %vm3770_vm15, %v3757_v2, %v3760_v46 }
 0x1b1   :  { %v1422_v20 = vsel %vm1420_vm10, %v1408_v61, %v1421_v49  ;;  %v3775_v15 = vsel %vm3773_vm2, %v3763_v6, 2102212464  ;;  %v3779_v58 = vsel %vm3773_vm2, %v3766_v23, 920167782  ;;  %v3782_v40 = vsel %vm3770_vm15, %v3760_v46, %v3763_v6 }
 0x1b2   :  { %v1426_v21 = vsel %vm1419_vm12, %v1422_v20, %v1425_v36  ;;  %v1550_v48 = vxor.u32 2147483648, %v1549_v1  ;;  %v3774_v30 = vsel %vm3770_vm15, %v3754_v41, %v3757_v2  ;;  %v3780_v5 = vsel %vm3772_vm1, %v3763_v6, %v3779_v58 }
 0x1b3   :  { %v1427_v10 = vsel %vm1417_vm13, nan, %v1426_v21  ;;  %v3783_v43 = vsel %vm3773_vm2, %v3769_v35, 1326507024  ;;  %v3776_v26 = vsel %vm3772_vm1, %v3760_v46, %v3775_v15  ;;  %v3781_v44 = vsel %vm3771_vm0, %v3778_v42, %v3780_v5 }
 0x1b4   :  { %v5896_v61 = vmul.f32 %v7291_v53, %v1427_v10  ;;  %v1551_v62 = vsel %vm1430_vm6, %v1550_v48, %v1549_v1  ;;  %v3784_v47 = vsel %vm3772_vm1, %v3766_v23, %v3783_v43  ;;  %v3811_v36 = vand.u32 65535, %v3781_v44 }
 0x1b5   :  { %v7361_v53 = vsel %vm7295_vm7, %v7021_v12, %v1551_v62  ;;  %v3785_v49 = vsel %vm3771_vm0, %v3782_v40, %v3784_v47  ;;  %v3812_v24 = vshrl.u32 %v3781_v44, 16  ;;  %v7373_v55 = vand.u32 3, %v1555_v11  ;;  %v7391_v40 = vpop.xlane.xlu1 %61 }
 0x1b6   :  { %5928 = vst [vmem:[#allocation2 + $0x10] sm:$0xff] %v5896_v61  ;;  %v1556_v9 = vmul.f32 %v7361_v53, %v7361_v53  ;;  %v3788_v38 = vshrl.u32 %v7308_v59, 16  ;;  %v3789_v2 = vand.u32 65535, %v3785_v49  ;;  %v3790_v46 = vshrl.u32 %v3785_v49, 16 }
 0x1b7   :  { %v3814_v6 = vmul.u32 %v3812_v24, %v7323_v27  ;;  %v7379_v17 = vand.u32 8388607, %v3892_v50  ;;  %v7383_v3 = vsel %vm3771_vm0, %v3774_v30, %v3776_v26  ;;  %v3904_v11 = vsel %vm3903_vm14, %v7326_v14, 0 }
 0x1b8   :  { %v1557_v0 = vmul.f32 -0.001358992, %v1556_v9  ;;  %v1564_v20 = vmul.f32 -0.00019511016, %v1556_v9  ;;  %v3792_v28 = vmul.u32 %v3790_v46, %v7323_v27  ;;  %v3793_v56 = vmul.u32 %v3789_v2, %v3788_v38 }
 0x1b9   :  { %v3813_v41 = vmul.u32 %v3811_v36, %v7323_v27  ;;  %v3815_v23 = vmul.u32 %v3811_v36, %v3788_v38  ;;  %v3791_v10 = vmul.u32 %v3789_v2, %v7323_v27  ;;  %v3794_v35 = vmul.u32 %v3790_v46, %v3788_v38 }
 0x1ba   :  { %v1558_v21 = vadd.f32 0.041655596, %v1557_v0  ;;  %v1565_v1 = vadd.f32 0.008332121, %v1564_v20  ;;  %v3795_v61 = vshll.u32 %v3792_v28, 16  ;;  %v3816_v48 = vmul.u32 %v3812_v24, %v3788_v38 }
 0x1bb   :  { %v3796_v42 = vshrl.u32 %v3792_v28, 16  ;;  %v3817_v58 = vshll.u32 %v3814_v6, 16  ;;  %v3797_v62 = vshll.u32 %v3793_v56, 16  ;;  %v3819_v14 = vshll.u32 %v3815_v23, 16 }
 0x1bc   :  { %v1559_v4 = vmul.f32 %v1558_v21, %v1556_v9  ;;  %v1566_v15 = vmul.f32 %v1565_v1, %v1556_v9  ;;  %vm3799_vm3 = vc.u32 %v3791_v10, %v3795_v61  ;;  %v3801_v30 = vadd.s32 %v3795_v61, %v3791_v10 }
 0x1bd   :  { %vm1577_vm4 = vcmp.eq.s32.totalorder %v7373_v55, 2  ;;  %v3800_v26 = vsel %vm3799_vm3, 1, %v6342_v57  ;;  %vm3821_vm5 = vc.u32 %v3813_v41, %v3817_v58  ;;  %vm1574_vm6 = vcmp.eq.s32.totalorder %v7373_v55, 0 }
 0x1be   :  { %v1560_v5 = vadd.f32 -0.4999988, %v1559_v4  ;;  %v1567_v43 = vadd.f32 -0.16666654, %v1566_v15  ;;  %v3802_v27 = vadd.s32 %v3800_v26, %v3794_v35  ;;  %vm3803_vm7 = vc.u32 %v3801_v30, %v3797_v62 }
 0x1bf   :  { %v3822_v44 = vsel %vm3821_vm5, 1, %v6342_v57  ;;  %v3823_v47 = vadd.s32 %v3817_v58, %v3813_v41  ;;  %vm1573_vm8 = vcmp.lt.s32.totalorder %v7373_v55, 2  ;;  %v3804_v24 = vsel %vm3803_vm7, 1, %v6342_v57 }
 0x1c0   :  { %v1561_v49 = vmul.f32 %v1560_v5, %v1556_v9  ;;  %v1568_v36 = vmul.f32 %v1567_v43, %v1556_v9  ;;  %v3824_v38 = vadd.s32 %v3822_v44, %v3816_v48  ;;  %vm1571_vm9 = vweird.f32 %v7021_v12  ;;  %v414_v12 = vpop.f32.mrf.mxu0 }
 0x1c1   :  { %v3798_v2 = vshrl.u32 %v3793_v56, 16  ;;  %v3806_v46 = vadd.s32 %v3804_v24, %v3802_v27  ;;  %vm3825_vm10 = vc.u32 %v3823_v47, %v3819_v14  ;;  %v3906_v0 = vand.u32 31, %v3904_v11 }
 0x1c2   :  { %v1562_v20 = vadd.f32 1.0, %v1561_v49  ;;  %v1569_v28 = vadd.f32 1.0, %v1568_v36  ;;  %v3818_v21 = vshrl.u32 %v3814_v6, 16  ;;  %v3826_v1 = vsel %vm3825_vm10, 1, %v6342_v57 }
 0x1c3   :  { %v3807_v10 = vadd.s32 %v3806_v46, %v3796_v42  ;;  %v3820_v41 = vshrl.u32 %v3815_v23, 16  ;;  %v3828_v35 = vadd.s32 %v3826_v1, %v3824_v38  ;;  %v7401_v9 = vsub.s32 32, %v3906_v0 }
 0x1c4   :  { %v1570_v61 = vmul.f32 %v1569_v28, %v7361_v53  ;;  %v1578_v4 = vxor.u32 2147483648, %v1562_v20  ;;  %v7404_v48 = vadd.s32 %v3823_v47, %v3819_v14  ;;  %v3909_v56 = vshll.u32 %v6336_v16, %v3906_v0  ;;  %v7417_v14 = vpop.xlane.xlu1 %73 }
 0x1c5   :  { %v7407_v15 = vadd.s32 %v3807_v10, %v3798_v2  ;;  %v3829_v58 = vadd.s32 %v3828_v35, %v3818_v21  ;;  %v3910_v6 = vshrl.u32 %v6337_v18, %v7401_v9  ;;  %v3912_v62 = vshll.u32 %v6337_v18, %v3906_v0 }
 0x1c6   :  { %v1575_v42 = vxor.u32 2147483648, %v1570_v61  ;;  %v3913_v23 = vshrl.u32 %v6338_v22, %v7401_v9  ;;  %v3915_v30 = vshll.u32 %v6338_v22, %v3906_v0  ;;  %v3916_v53 = vshrl.u32 %v6339_v25, %v7401_v9 }
 0x1c7   :  { %v1579_v5 = vsel %vm1577_vm4, %v1578_v4, %v1570_v61  ;;  %v3830_v43 = vadd.s32 %v3829_v58, %v3820_v41  ;;  %vm3833_vm11 = vc.u32 %v7407_v15, %v7404_v48  ;;  %v7423_v26 = vshrl.u32 %v3904_v11, 5 }
 0x1c8   :  { %v1576_v27 = vsel %vm1574_vm6, %v1562_v20, %v1575_v42  ;;  %v3911_v44 = vor.u32 %v3910_v6, %v3909_v56  ;;  %v3914_v47 = vor.u32 %v3913_v23, %v3912_v62  ;;  %v3917_v49 = vor.u32 %v3916_v53, %v3915_v30 }
 0x1c9   :  { %v1580_v36 = vsel %vm1573_vm8, %v1576_v27, %v1579_v5  ;;  %v3834_v24 = vadd.s32 1, %v3830_v43  ;;  %v3918_v38 = vshll.u32 %v6339_v25, %v3906_v0  ;;  %v3919_v2 = vshrl.u32 %v10665_v29, %v7401_v9 }
 0x1ca   :  { %v1581_v46 = vsel %vm1571_vm9, nan, %v1580_v36  ;;  %v3831_v11 = vmul.u32 %v7308_v59, %v7383_v3  ;;  %v3921_v20 = vshll.u32 %v10665_v29, %v3906_v0  ;;  %v3922_v28 = vshrl.u32 %v10663_v33, %v7401_v9 }
 0x1cb   :  { %v5897_v55 = vmul.f32 %v7305_v51, %v1581_v46  ;;  %v3835_v21 = vsel %vm3833_vm11, %v3834_v24, %v3830_v43  ;;  %v3900_v1 = vor.u32 8388608, %v7379_v17  ;;  %v3920_v10 = vor.u32 %v3919_v2, %v3918_v38 }
 0x1cc   :  { %v3836_v41 = vadd.s32 %v3835_v21, %v3831_v11  ;;  %v3923_v35 = vor.u32 %v3922_v28, %v3921_v20  ;;  %vm3924_vm12 = vcmp.lt.s32.totalorder %v7423_v26, 1  ;;  %vm3927_vm13 = vcmp.lt.s32.totalorder %v7423_v26, 4  ;;  %v7469_v53 = vpop.xlane.xlu1 %82 }
 0x1cd   :  { %5929 = vst [vmem:[#allocation2 + $0x18] sm:$0xff] %v5897_v55  ;;  %vm3926_vm14 = vcmp.lt.s32.totalorder %v7423_v26, 3  ;;  %v3932_v59 = vsel %vm3924_vm12, %v3911_v44, %v3914_v47  ;;  %v3933_v51 = vsel %vm3927_vm13, %v3920_v10, 920167782  ;;  %v3936_v17 = vsel %vm3924_vm12, %v3914_v47, %v3917_v49 }
 0x1ce   :  { %v3837_v3 = vadd.s32 536870912, %v3836_v41  ;;  %vm3925_vm15 = vcmp.lt.s32.totalorder %v7423_v26, 2  ;;  %v3934_v0 = vsel %vm3926_vm14, %v3917_v49, %v3933_v51  ;;  %v3937_v61 = vsel %vm3927_vm13, %v3923_v35, 1326507024 }
 0x1cf   :  { %v3935_v4 = vsel %vm3925_vm15, %v3932_v59, %v3934_v0  ;;  %v3938_v56 = vsel %vm3926_vm14, %v3920_v10, %v3937_v61  ;;  %v7459_v58 = vshll.u32 %v3900_v1, 8  ;;  %v557_v6 = vmul.f32 %v7313_v45, %v414_v12 }
 0x1d0   :  { %v7462_v62 = vshrl.u32 %v3837_v3, 30  ;;  %v3939_v42 = vsel %vm3925_vm15, %v3936_v17, %v3938_v56  ;;  %v3966_v23 = vshrl.u32 %v3935_v4, 16  ;;  %v7467_v30 = vadd.f32 1.0, %v7311_v31 }
 0x1d1   :  { %v3941_v5 = vand.u32 65535, %v7459_v58  ;;  %v3942_v43 = vshrl.u32 %v7459_v58, 16  ;;  %v3943_v27 = vand.u32 65535, %v3939_v42  ;;  %v3944_v36 = vshrl.u32 %v3939_v42, 16 }
 0x1d2   :  { %v3839_v24 = vshll.u32 %v7462_v62, 30  ;;  %v3929_v38 = vsel %vm3927_vm13, %v3917_v49, 2102212464  ;;  %v3965_v11 = vand.u32 65535, %v3935_v4  ;;  %6164 = vrsqrt.f32 %v7469_v53 }
 0x1d3   :  { %v3946_v2 = vmul.u32 %v3944_v36, %v3941_v5  ;;  %v3947_v46 = vmul.u32 %v3943_v27, %v3942_v43  ;;  %v3908_v28 = vshrl.u32 %v6336_v16, %v7401_v9  ;;  %v589_v55 = vsub.f32 %v7467_v30, %v557_v6 }
 0x1d4   :  { %v3840_v20 = vsub.s32 %v3836_v41, %v3839_v24  ;;  %v3832_v21 = vadd.s32 %v7404_v48, %v7407_v15  ;;  %v3945_v1 = vmul.u32 %v3943_v27, %v3941_v5  ;;  %v3968_v35 = vmul.u32 %v3966_v23, %v3941_v5 }
 0x1d5   :  { %v3949_v10 = vshll.u32 %v3946_v2, 16  ;;  %v3928_v49 = vsel %vm3924_vm12, %v3908_v28, %v3911_v44  ;;  %v3930_v59 = vsel %vm3926_vm14, %v3914_v47, %v3929_v38  ;;  %v3951_v41 = vshll.u32 %v3947_v46, 16 }
 0x1d6   :  { %vm3841_vm0 = vcmp.lt.s32.totalorder %v3840_v20, 0  ;;  %v3842_v12 = vsub.s32 0, %v3840_v20  ;;  %v3969_v9 = vmul.u32 %v3965_v11, %v3942_v43  ;;  %v3948_v3 = vmul.u32 %v3944_v36, %v3942_v43 }
 0x1d7   :  { %vm3953_vm1 = vc.u32 %v3945_v1, %v3949_v10  ;;  %v3955_v51 = vadd.s32 %v3949_v10, %v3945_v1  ;;  %v3967_v0 = vmul.u32 %v3965_v11, %v3941_v5  ;;  %v621_v61 = vmax.f32 %v589_v55, 1e-12 }
 0x1d8   :  { %v3843_v17 = vsel %vm3841_vm0, %v3842_v12, %v3840_v20  ;;  %v3954_v15 = vsel %vm3953_vm1, 1, %v6342_v57  ;;  %v3971_v4 = vshll.u32 %v3968_v35, 16  ;;  %v7487_v56 = vpop.eup %6164  ;;  %v3950_v6 = vshrl.u32 %v3946_v2, 16 }
 0x1d9   :  { %v3844_v48 = vclz %v3843_v17  ;;  %vm3957_vm2 = vc.u32 %v3955_v51, %v3951_v41  ;;  %v3956_v44 = vadd.s32 %v3954_v15, %v3948_v3  ;;  %v3970_v47 = vmul.u32 %v3966_v23, %v3942_v43  ;;  %v479_v23 = vpop.f32.mrf.mxu1 }
 0x1da   :  { %v3958_v42 = vsel %vm3957_vm2, 1, %v6342_v57  ;;  %v3973_v24 = vshll.u32 %v3969_v9, 16  ;;  %vm3975_vm3 = vc.u32 %v3967_v0, %v3971_v4  ;;  %v3977_v38 = vadd.s32 %v3971_v4, %v3967_v0 }
 0x1db   :  { %v6063_v27 = vadd.s32 4294967294, %v3844_v48  ;;  %v3960_v28 = vadd.s32 %v3958_v42, %v3956_v44  ;;  %v3976_v5 = vsel %vm3975_vm3, 1, %v6342_v57  ;;  %v651_v36 = vsub.f32 1.0, %v7311_v31 }
 0x1dc   :  { %6166 = vlog2.f32 %v621_v61  ;;  %v3952_v11 = vshrl.u32 %v3947_v46, 16  ;;  %v3978_v55 = vadd.s32 %v3976_v5, %v3970_v47  ;;  %vm3979_vm5 = vc.u32 %v3977_v38, %v3973_v24 }
 0x1dd   :  { %vm6064_vm4 = vcmp.lt.s32.totalorder %v6063_v27, 0  ;;  %v3961_v2 = vadd.s32 %v3960_v28, %v3950_v6  ;;  %v3980_v10 = vsel %vm3979_vm5, 1, %v6342_v57  ;;  %6168 = vlog2.f32 %v651_v36 }
 0x1de   :  { %v3847_v1 = vsel %vm6064_vm4, 0, %v6063_v27  ;;  %v3972_v41 = vshrl.u32 %v3968_v35, 16  ;;  %v3982_v51 = vadd.s32 %v3980_v10, %v3978_v55  ;;  %v3974_v0 = vshrl.u32 %v3969_v9, 16 }
 0x1df   :  { %v3848_v43 = vsub.s32 32, %v3847_v1  ;;  %v3852_v12 = vsub.s32 4294967266, %v3847_v1  ;;  %v3849_v17 = vshll.u32 %v3840_v20, %v3847_v1  ;;  %v7493_v3 = vadd.s32 %v3961_v2, %v3952_v11 }
 0x1e0   :  { %v3983_v48 = vadd.s32 %v3982_v51, %v3972_v41  ;;  %v558_v46 = vmul.f32 %v7313_v45, %v479_v23  ;;  %v3931_v4 = vsel %vm3925_vm15, %v3928_v49, %v3930_v59  ;;  %v7498_v6 = vadd.s32 %v3977_v38, %v3973_v24 }
 0x1e1   :  { %v3850_v31 = vshrl.u32 %v3832_v21, %v3848_v43  ;;  %v3853_v61 = vadd.s32 127, %v3852_v12  ;;  %v3985_v28 = vmul.u32 %v7459_v58, %v3931_v4  ;;  %v216_v38 = vmul.f32 %v7487_v56, %v7469_v53 }
 0x1e2   :  { %v6167_v15 = vpop.eup %6166  ;;  %v3984_v47 = vadd.s32 %v3983_v48, %v3974_v0  ;;  %vm3987_vm6 = vc.u32 %v7493_v3, %v7498_v6  ;;  %v590_v45 = vsub.f32 %v7467_v30, %v558_v46  ;;  %v3862_v11 = vsub.s32 4, %v7462_v62 }
 0x1e3   :  { %v3851_v44 = vor.u32 %v3850_v31, %v3849_v17  ;;  %v3854_v42 = vshll.u32 %v3853_v61, 23  ;;  %v706_v35 = vmul.f32 0.6931472, %v6167_v15  ;;  %v6169_v27 = vpop.eup %6168  ;;  %v217_v10 = vmul.f32 %v7487_v56, %v216_v38 }
 0x1e4   :  { %v3988_v21 = vadd.s32 1, %v3984_v47  ;;  %v7502_v9 = vmul.f32 0.6931472, %v6169_v27  ;;  %v622_v1 = vmax.f32 %v590_v45, 1e-12  ;;  %v888_v23 = vmul.f32 7.5, %v7235_v63 }
 0x1e5   :  { %v3855_v20 = vor.u32 4788187, %v3854_v42  ;;  %v3858_v49 = vcvt.s32.f32 %v3851_v44  ;;  %vm3740_vm7 = vcmp.lt.s32.totalorder %v7254_v60, 0  ;;  %vm7522_vm8 = vcmp.le.f32.partialorder %v3738_v13, 0.7853982 }
 0x1e6   :  { %v3989_v59 = vsel %vm3987_vm6, %v3988_v21, %v3984_v47  ;;  %v7507_v24 = vsub.f32 %v7502_v9, %v706_v35  ;;  %v3863_v51 = vsel %vm3740_vm7, %v3862_v11, %v7462_v62  ;;  %6170 = vlog2.f32 %v622_v1 }
 0x1e7   :  { %v3856_v26 = vand.u32 2147483647, %v3855_v20  ;;  %v3990_v5 = vadd.s32 %v3989_v59, %v3985_v28  ;;  %v7532_v48 = vmul.f32 0.5, %v217_v10  ;;  %v938_v13 = vmul.f32 1.442695, %v888_v23 }
 0x1e8   :  { %v805_v55 = vmul.f32 %v6507_v32, %v7507_v24  ;;  %v3865_v4 = vsel %vm7522_vm8, 0, %v3863_v51  ;;  %v7540_v28 = vmul.f32 7.5, %v7244_v19  ;;  %vm3894_vm13 = vcmp.lt.s32.totalorder %v7279_v8, 0 }
 0x1e9   :  { %v3859_v36 = vmul.f32 %v3858_v49, %v3856_v26  ;;  %v3991_v30 = vadd.s32 536870912, %v3990_v5  ;;  %v219_v45 = vsub.f32 1.5, %v7532_v48  ;;  %v3882_v26 = vand.u32 3, %v3865_v4 }
 0x1ea   :  { %v7515_v58 = vadd.f32 %v6513_v37, %v805_v55  ;;  %6172 = vpow2.f32 %v938_v13  ;;  %vm3881_vm0 = vweird.f32 %v7254_v60  ;;  %vm7557_vm1 = vcmp.le.f32.partialorder %v3892_v50, 0.7853982 }
 0x1eb   :  { %v3860_v2 = vxor.u32 2147483648, %v3859_v36  ;;  %v3992_v43 = vshrl.u32 %v3991_v30, 30  ;;  %vm3884_vm11 = vcmp.eq.s32.totalorder %v3882_v26, 0  ;;  %vm3887_vm12 = vcmp.eq.s32.totalorder %v3882_v26, 2 }
 0x1ec   :  { %v10662_v63 = vand.u32 2147483647, %v7515_v58  ;;  %v1585_v31 = vand.u32 2139095040, %v7515_v58  ;;  %v6171_v27 = vpop.eup %6170  ;;  %vm3883_vm14 = vcmp.lt.s32.totalorder %v3882_v26, 2  ;;  %v7593_v26 = vmul.f32 1.442695, %v7540_v28 }
 0x1ed   :  { %v3861_v41 = vsel %vm3740_vm7, %v3860_v2, %v3859_v36  ;;  %v3993_v0 = vshll.u32 %v3992_v43, 30  ;;  %v4016_v11 = vsub.s32 4, %v3992_v43  ;;  %v708_v1 = vmul.f32 0.6931472, %v6171_v27 }
 0x1ee   :  { %v3864_v17 = vsel %vm7522_vm8, %v7254_v60, %v3861_v41  ;;  %v1586_v15 = vshrl.u32 %v1585_v31, 23  ;;  %v1589_v35 = vand.u32 8388607, %v10662_v63  ;;  %v3986_v41 = vadd.s32 %v7498_v6, %v7493_v3 }
 0x1ef   :  { %v3866_v61 = vmul.f32 %v3864_v17, %v3864_v17  ;;  %v3994_v46 = vsub.s32 %v3990_v5, %v3993_v0  ;;  %v7548_v0 = vsel %vm3894_vm13, %v4016_v11, %v3992_v43  ;;  %6174 = vpow2.f32 %v7593_v26 }
 0x1f0   :  { %v6020_v47 = vadd.s32 4294967169, %v1586_v15  ;;  %v1590_v55 = vor.u32 8388608, %v1589_v35  ;;  %6176 = vrsqrt.f32 %v7391_v40 }
 0x1f1   :  { %v3867_v62 = vmul.f32 -0.001358992, %v3866_v61  ;;  %v3874_v44 = vmul.f32 -0.00019511016, %v3866_v61  ;;  %vm3995_vm9 = vcmp.lt.s32.totalorder %v3994_v46, 0  ;;  %v3996_v42 = vsub.s32 0, %v3994_v46 }
 0x1f2   :  { %v1592_v36 = vadd.s32 1, %v6020_v47  ;;  %v7550_v13 = vshll.u32 %v1590_v55, 8 }
 0x1f3   :  { %v3868_v20 = vadd.f32 0.041655596, %v3867_v62  ;;  %v3875_v21 = vadd.f32 0.008332121, %v3874_v44  ;;  %v3997_v49 = vsel %vm3995_vm9, %v3996_v42, %v3994_v46  ;;  %v6173_v44 = vpop.eup %6172 }
 0x1f4   :  { %v3998_v5 = vclz %v3997_v49  ;;  %vm1593_vm10 = vcmp.gt.s32.totalorder %v1592_v36, 0 }
 0x1f5   :  { %v3869_v59 = vmul.f32 %v3868_v20, %v3866_v61  ;;  %v3876_v38 = vmul.f32 %v3875_v21, %v3866_v61  ;;  %v1594_v19 = vsel %vm1593_vm10, %v1592_v36, 0 }
 0x1f6   :  { %v6066_v10 = vadd.s32 4294967294, %v3998_v5  ;;  %v1596_v31 = vand.u32 31, %v1594_v19  ;;  %v7561_v43 = vshrl.u32 %v1594_v19, 5 }
 0x1f7   :  { %v3870_v30 = vadd.f32 -0.4999988, %v3869_v59  ;;  %v3877_v2 = vadd.f32 -0.16666654, %v3876_v38 }
 0x1f8   :  { %vm6067_vm15 = vcmp.lt.s32.totalorder %v6066_v10, 0  ;;  %v7563_v47 = vsub.s32 32, %v1596_v31  ;;  %v1599_v21 = vshll.u32 %v6336_v16, %v1596_v31  ;;  %v1602_v50 = vshll.u32 %v6337_v18, %v1596_v31 }
 0x1f9   :  { %v3871_v23 = vmul.f32 %v3870_v30, %v3866_v61  ;;  %v3878_v12 = vmul.f32 %v3877_v2, %v3866_v61  ;;  %v4001_v51 = vsel %vm6067_vm15, 0, %v6066_v10  ;;  %v7553_v61 = vsub.f32 %v7502_v9, %v708_v1 }
 0x1fa   :  { %v4002_v62 = vsub.s32 32, %v4001_v51  ;;  %v4003_v6 = vshll.u32 %v3994_v46, %v4001_v51  ;;  %v4006_v42 = vsub.s32 4294967266, %v4001_v51  ;;  %v1600_v49 = vshrl.u32 %v6337_v18, %v7563_v47 }
 0x1fb   :  { %v3872_v15 = vadd.f32 1.0, %v3871_v23  ;;  %v3879_v4 = vadd.f32 1.0, %v3878_v12  ;;  %v1603_v59 = vshrl.u32 %v6338_v22, %v7563_v47  ;;  %v1605_v5 = vshll.u32 %v6338_v22, %v1596_v31 }
 0x1fc   :  { %v4004_v20 = vshrl.u32 %v3986_v41, %v4002_v62  ;;  %v4007_v9 = vadd.s32 127, %v4006_v42  ;;  %v7575_v55 = vor.u32 %v1600_v49, %v1599_v21  ;;  %v1608_v10 = vshll.u32 %v6339_v25, %v1596_v31 }
 0x1fd   :  { %v3880_v35 = vmul.f32 %v3879_v4, %v3864_v17  ;;  %v3888_v27 = vxor.u32 2147483648, %v3872_v15  ;;  %v1606_v17 = vshrl.u32 %v6339_v25, %v7563_v47  ;;  %v7577_v1 = vor.u32 %v1603_v59, %v1602_v50 }
 0x1fe   :  { %v4005_v38 = vor.u32 %v4004_v20, %v4003_v6  ;;  %v4008_v11 = vshll.u32 %v4007_v9, 23  ;;  %v1609_v19 = vshrl.u32 %v10665_v29, %v7563_v47  ;;  %v1611_v41 = vshll.u32 %v10665_v29, %v1596_v31 }
 0x1ff   :  { %v3885_v46 = vxor.u32 2147483648, %v3880_v35  ;;  %v3889_v36 = vsel %vm3887_vm12, %v3888_v27, %v3880_v35  ;;  %v1607_v2 = vor.u32 %v1606_v17, %v1605_v5  ;;  %v1612_v51 = vshrl.u32 %v10663_v33, %v7563_v47 }
 0x200   :  { %v4009_v12 = vor.u32 4788187, %v4008_v11  ;;  %v4012_v62 = vcvt.s32.f32 %v4005_v38  ;;  %v1610_v6 = vor.u32 %v1609_v19, %v1608_v10  ;;  %vm1614_vm2 = vcmp.lt.s32.totalorder %v7561_v43, 1 }
 0x201   :  { %v3886_v30 = vsel %vm3884_vm11, %v3872_v15, %v3885_v46  ;;  %v806_v15 = vmul.f32 %v6509_v34, %v7553_v61  ;;  %v1613_v27 = vor.u32 %v1612_v51, %v1611_v41  ;;  %v4019_v31 = vsel %vm7557_vm1, 0, %v7548_v0 }
 0x202   :  { %v3890_v23 = vsel %vm3883_vm14, %v3886_v30, %v3889_v36  ;;  %v4010_v42 = vand.u32 2147483647, %v4009_v12  ;;  %vm1617_vm3 = vcmp.lt.s32.totalorder %v7561_v43, 4  ;;  %v1622_v60 = vsel %vm1614_vm2, %v7575_v55, %v7577_v1 }
 0x203   :  { %v3891_v4 = vsel %vm3881_vm0, nan, %v3890_v23  ;;  %vm1616_vm4 = vcmp.lt.s32.totalorder %v7561_v43, 3  ;;  %v1626_v28 = vsel %vm1614_vm2, %v7577_v1, %v1607_v2  ;;  %vm1615_vm5 = vcmp.lt.s32.totalorder %v7561_v43, 2 }
 0x204   :  { %v5912_v35 = vmul.f32 %v6173_v44, %v3891_v4  ;;  %v4013_v20 = vmul.f32 %v4012_v62, %v4010_v42  ;;  %v1623_v44 = vsel %vm1617_vm3, %v1610_v6, 920167782  ;;  %v1627_v21 = vsel %vm1617_vm3, %v1613_v27, 1326507024 }
 0x205   :  { %v1624_v0 = vsel %vm1616_vm4, %v1607_v2, %v1623_v44  ;;  %v7615_v9 = vadd.f32 %v6517_v39, %v806_v15  ;;  %v1628_v59 = vsel %vm1616_vm4, %v1610_v6, %v1627_v21  ;;  %v1631_v46 = vand.u32 65535, %v7550_v13 }
 0x206   :  { %5944 = vst [vmem:[#allocation2 + $0x90] sm:$0xff] %v5912_v35  ;;  %v4014_v49 = vxor.u32 2147483648, %v4013_v20  ;;  %v1625_v50 = vsel %vm1615_vm5, %v1622_v60, %v1624_v0  ;;  %v1629_v38 = vsel %vm1615_vm5, %v1626_v28, %v1628_v59  ;;  %v1632_v5 = vshrl.u32 %v7550_v13, 16 }
 0x207   :  { %v1655_v17 = vand.u32 65535, %v1625_v50  ;;  %v1656_v36 = vshrl.u32 %v1625_v50, 16  ;;  %v7627_v30 = vand.u32 3, %v4019_v31  ;;  %v1633_v10 = vand.u32 65535, %v1629_v38 }
 0x208   :  { %v4015_v11 = vsel %vm3894_vm13, %v4014_v49, %v4013_v20  ;;  %v1634_v19 = vshrl.u32 %v1629_v38, 16  ;;  %v1736_v51 = vand.u32 2147483647, %v7615_v9  ;;  %v1598_v62 = vshrl.u32 %v6336_v16, %v7563_v47 }
 0x209   :  { %v4018_v23 = vsel %vm7557_vm1, %v7279_v8, %v4015_v11  ;;  %v1658_v12 = vmul.u32 %v1656_v36, %v1631_v46  ;;  %v1659_v41 = vmul.u32 %v1655_v17, %v1632_v5  ;;  %v1637_v15 = vmul.u32 %v1633_v10, %v1632_v5 }
 0x20a   :  { %v4020_v4 = vmul.f32 %v4018_v23, %v4018_v23  ;;  %v1636_v6 = vmul.u32 %v1634_v19, %v1631_v46  ;;  %v1619_v42 = vsel %vm1617_vm3, %v1607_v2, 2102212464  ;;  %v1657_v35 = vmul.u32 %v1655_v17, %v1631_v46 }
 0x20b   :  { %v1661_v27 = vshll.u32 %v1658_v12, 16  ;;  %v1739_v31 = vand.u32 2139095040, %v7615_v9  ;;  %v1635_v20 = vmul.u32 %v1633_v10, %v1631_v46  ;;  %v1638_v28 = vmul.u32 %v1634_v19, %v1632_v5 }
 0x20c   :  { %v4021_v60 = vmul.f32 -0.001358992, %v4020_v4  ;;  %v4028_v3 = vmul.f32 -0.00019511016, %v4020_v4  ;;  %v1639_v44 = vshll.u32 %v1636_v6, 16  ;;  %v1641_v0 = vshll.u32 %v1637_v15, 16 }
 0x20d   :  { %v1660_v21 = vmul.u32 %v1656_v36, %v1632_v5  ;;  %v1663_v49 = vshll.u32 %v1659_v41, 16  ;;  %vm1665_vm7 = vc.u32 %v1657_v35, %v1661_v27  ;;  %v1667_v2 = vadd.s32 %v1661_v27, %v1657_v35 }
 0x20e   :  { %v4022_v50 = vadd.f32 0.041655596, %v4021_v60  ;;  %v4029_v59 = vadd.f32 0.008332121, %v4028_v3  ;;  %vm1643_vm6 = vc.u32 %v1635_v20, %v1639_v44  ;;  %v1645_v47 = vadd.s32 %v1639_v44, %v1635_v20 }
 0x20f   :  { %v1644_v38 = vsel %vm1643_vm6, 1, %v6342_v57  ;;  %v1740_v17 = vshrl.u32 %v1739_v31, 23  ;;  %v1640_v29 = vshrl.u32 %v1636_v6, 16  ;;  %v1666_v10 = vsel %vm1665_vm7, 1, %v6342_v57 }
 0x210   :  { %v4023_v11 = vmul.f32 %v4022_v50, %v4020_v4  ;;  %v4030_v63 = vmul.f32 %v4029_v59, %v4020_v4  ;;  %v1646_v33 = vadd.s32 %v1644_v38, %v1638_v28  ;;  %vm1647_vm8 = vc.u32 %v1645_v47, %v1641_v0 }
 0x211   :  { %v1648_v46 = vsel %vm1647_vm8, 1, %v6342_v57  ;;  %vm1669_vm9 = vc.u32 %v1667_v2, %v1663_v49  ;;  %v1668_v60 = vadd.s32 %v1666_v10, %v1660_v21  ;;  %v1642_v3 = vshrl.u32 %v1637_v15, 16 }
 0x212   :  { %v4024_v5 = vadd.f32 -0.4999988, %v4023_v11  ;;  %v4031_v36 = vadd.f32 -0.16666654, %v4030_v63  ;;  %v1650_v19 = vadd.s32 %v1648_v46, %v1646_v33  ;;  %v1662_v20 = vshrl.u32 %v1658_v12, 16  ;;  %v6175_v46 = vpop.eup %6174 }
 0x213   :  { %v1670_v44 = vsel %vm1669_vm9, 1, %v6342_v57  ;;  %v6023_v35 = vadd.s32 4294967169, %v1740_v17  ;;  %v1618_v6 = vsel %vm1614_vm2, %v1598_v62, %v7575_v55  ;;  %v1620_v0 = vsel %vm1616_vm4, %v7577_v1, %v1619_v42 }
 0x214   :  { %v4025_v27 = vmul.f32 %v4024_v5, %v4020_v4  ;;  %v4032_v31 = vmul.f32 %v4031_v36, %v4020_v4  ;;  %v1651_v50 = vadd.s32 %v1650_v19, %v1640_v29  ;;  %v1672_v28 = vadd.s32 %v1670_v44, %v1668_v60 }
 0x215   :  { %v1664_v63 = vshrl.u32 %v1659_v41, 16  ;;  %v1746_v33 = vadd.s32 1, %v6023_v35  ;;  %v7651_v4 = vadd.s32 %v1667_v2, %v1663_v49  ;;  %v1743_v29 = vand.u32 8388607, %v1736_v51 }
 0x216   :  { %v4026_v21 = vadd.f32 1.0, %v4025_v27  ;;  %v4033_v15 = vadd.f32 1.0, %v4032_v31  ;;  %v7648_v12 = vadd.s32 %v1651_v50, %v1642_v3  ;;  %v1673_v59 = vadd.s32 %v1672_v28, %v1662_v20 }
 0x217   :  { %vm1747_vm10 = vcmp.gt.s32.totalorder %v1746_v33, 0  ;;  %v1621_v1 = vsel %vm1615_vm5, %v1618_v6, %v1620_v0  ;;  %vm221_vm11 = vweird.f32 %v7469_v53  ;;  %vm4035_vm12 = vweird.f32 %v7279_v8 }
 0x218   :  { %v4034_v55 = vmul.f32 %v4033_v15, %v4018_v23  ;;  %v4042_v62 = vxor.u32 2147483648, %v4026_v21  ;;  %v1674_v41 = vadd.s32 %v1673_v59, %v1664_v63  ;;  %vm1677_vm13 = vc.u32 %v7648_v12, %v7651_v4 }
 0x219   :  { %v1748_v26 = vsel %vm1747_vm10, %v1746_v33, 0  ;;  %vm4037_vm14 = vcmp.lt.s32.totalorder %v7627_v30, 2  ;;  %vm4038_vm15 = vcmp.eq.s32.totalorder %v7627_v30, 0  ;;  %vm4041_vm0 = vcmp.eq.s32.totalorder %v7627_v30, 2 }
 0x21a   :  { %v4039_v42 = vxor.u32 2147483648, %v4034_v55  ;;  %v1678_v49 = vadd.s32 1, %v1674_v41  ;;  %v1675_v43 = vmul.u32 %v7550_v13, %v1621_v1  ;;  %v1744_v23 = vor.u32 8388608, %v1743_v29 }
 0x21b   :  { %v1750_v47 = vand.u32 31, %v1748_v26  ;;  %v4043_v2 = vsel %vm4041_vm0, %v4042_v62, %v4034_v55  ;;  %v220_v11 = vmul.f32 %v7487_v56, %v219_v45  ;;  %vm222_vm1 = vweird.f32 %v7487_v56 }
 0x21c   :  { %v4040_v38 = vsel %vm4038_vm15, %v4026_v21, %v4039_v42  ;;  %v1679_v17 = vsel %vm1677_vm13, %v1678_v49, %v1674_v41  ;;  %v7671_v19 = vshrl.u32 %v1748_v26, 5  ;;  %v10689_v8 = vmov 920167782   ;;  %vm7694_vm4 = vmor %vm221_vm11, %vm222_vm1 }
 0x21d   :  { %v4044_v10 = vsel %vm4037_vm14, %v4040_v38, %v4043_v2  ;;  %v1680_v5 = vadd.s32 %v1679_v17, %v1675_v43  ;;  %v1751_v36 = vsub.s32 32, %v1750_v47  ;;  %v1753_v13 = vshll.u32 %v6336_v16, %v1750_v47 }
 0x21e   :  { %v4045_v30 = vsel %vm4035_vm12, nan, %v4044_v10  ;;  %v1756_v60 = vshll.u32 %v6337_v18, %v1750_v47  ;;  %v1759_v45 = vshll.u32 %v6338_v22, %v1750_v47  ;;  %v1762_v27 = vshll.u32 %v6339_v25, %v1750_v47 }
 0x21f   :  { %v5913_v3 = vmul.f32 %v6175_v46, %v4045_v30  ;;  %v1681_v20 = vadd.s32 536870912, %v1680_v5  ;;  %v1754_v48 = vshrl.u32 %v6337_v18, %v1751_v36  ;;  %v1757_v44 = vshrl.u32 %v6338_v22, %v1751_v36 }
 0x220   :  { %v1760_v35 = vshrl.u32 %v6339_v25, %v1751_v36  ;;  %v1763_v31 = vshrl.u32 %v10689_v8, %v1751_v36  ;;  %v1765_v6 = vshll.u32 %v10689_v8, %v1750_v47  ;;  %v10690_v0 = vmov 1326507024  }
 0x221   :  { %5945 = vst [vmem:[#allocation2 + $0x98] sm:$0xff] %v5913_v3  ;;  %v7681_v50 = vshrl.u32 %v1681_v20, 30  ;;  %v1755_v28 = vor.u32 %v1754_v48, %v1753_v13  ;;  %v1766_v63 = vshrl.u32 %v10690_v0, %v1751_v36  ;;  %v1758_v33 = vor.u32 %v1757_v44, %v1756_v60  ;;  %v7726_v3 = vpop.eup %6176 }
 0x222   :  { %v1761_v21 = vor.u32 %v1760_v35, %v1759_v45  ;;  %v1764_v15 = vor.u32 %v1763_v31, %v1762_v27  ;;  %v7685_v59 = vshll.u32 %v1744_v23, 8  ;;  %vm1768_vm2 = vcmp.lt.s32.totalorder %v7671_v19, 1 }
 0x223   :  { %v1683_v29 = vshll.u32 %v7681_v50, 30  ;;  %v1767_v55 = vor.u32 %v1766_v63, %v1765_v6  ;;  %vm1771_vm3 = vcmp.lt.s32.totalorder %v7671_v19, 4  ;;  %vm1770_vm5 = vcmp.lt.s32.totalorder %v7671_v19, 3 }
 0x224   :  { %v1776_v1 = vsel %vm1768_vm2, %v1755_v28, %v1758_v33  ;;  %v1777_v41 = vsel %vm1771_vm3, %v1764_v15, 920167782  ;;  %vm1769_vm6 = vcmp.lt.s32.totalorder %v7671_v19, 2  ;;  %v1780_v49 = vsel %vm1768_vm2, %v1758_v33, %v1761_v21 }
 0x225   :  { %v1684_v26 = vsub.s32 %v1680_v5, %v1683_v29  ;;  %v1778_v42 = vsel %vm1770_vm5, %v1761_v21, %v1777_v41  ;;  %v1781_v23 = vsel %vm1771_vm3, %v1767_v55, 1326507024  ;;  %vm109_vm7 = vcmp.gt.f32.partialorder %v7469_v53, 0.99998 }
 0x226   :  { %v1779_v43 = vsel %vm1769_vm6, %v1776_v1, %v1778_v42  ;;  %v224_v47 = vsel %vm7694_vm4, %v7487_v56, %v220_v11  ;;  %v1782_v2 = vsel %vm1770_vm5, %v1764_v15, %v1781_v23  ;;  %v1785_v17 = vand.u32 65535, %v7685_v59 }
 0x227   :  { %vm1685_vm8 = vcmp.lt.s32.totalorder %v1684_v26, 0  ;;  %v1686_v38 = vsub.s32 0, %v1684_v26  ;;  %v1773_v46 = vsel %vm1771_vm3, %v1761_v21, 2102212464  ;;  %v1783_v10 = vsel %vm1769_vm6, %v1780_v49, %v1782_v2 }
 0x228   :  { %v1809_v5 = vand.u32 65535, %v1779_v43  ;;  %v1810_v30 = vshrl.u32 %v1779_v43, 16  ;;  %v1752_v60 = vshrl.u32 %v6336_v16, %v1751_v36  ;;  %v1786_v56 = vshrl.u32 %v7685_v59, 16 }
 0x229   :  { %v1687_v13 = vsel %vm1685_vm8, %v1686_v38, %v1684_v26  ;;  %v285_v11 = vmul.f32 0.99999, %v224_v47  ;;  %v1676_v20 = vadd.s32 %v7651_v4, %v7648_v12  ;;  %v1787_v45 = vand.u32 65535, %v1783_v10 }
 0x22a   :  { %v1688_v48 = vclz %v1687_v13  ;;  %v1788_v44 = vshrl.u32 %v1783_v10, 16  ;;  %v1772_v35 = vsel %vm1768_vm2, %v1752_v60, %v1755_v28  ;;  %v1774_v27 = vsel %vm1770_vm5, %v1758_v33, %v1773_v46 }
 0x22b   :  { %v1812_v31 = vmul.u32 %v1810_v30, %v1785_v17  ;;  %v1813_v6 = vmul.u32 %v1809_v5, %v1786_v56  ;;  %v1791_v21 = vmul.u32 %v1787_v45, %v1786_v56  ;;  %v1811_v15 = vmul.u32 %v1809_v5, %v1785_v17 }
 0x22c   :  { %v6021_v36 = vadd.s32 4294967294, %v1688_v48  ;;  %v1790_v63 = vmul.u32 %v1788_v44, %v1785_v17  ;;  %v1789_v29 = vmul.u32 %v1787_v45, %v1785_v17  ;;  %v1814_v55 = vmul.u32 %v1810_v30, %v1786_v56 }
 0x22d   :  { %v1815_v62 = vshll.u32 %v1812_v31, 16  ;;  %v301_v12 = vsel %vm109_vm7, %v285_v11, 1.0  ;;  %v1792_v4 = vmul.u32 %v1788_v44, %v1786_v56  ;;  %v1816_v41 = vshrl.u32 %v1812_v31, 16 }
 0x22e   :  { %vm6022_vm9 = vcmp.lt.s32.totalorder %v6021_v36, 0  ;;  %v1793_v1 = vshll.u32 %v1790_v63, 16  ;;  %v1795_v42 = vshll.u32 %v1791_v21, 16  ;;  %v1817_v49 = vshll.u32 %v1813_v6, 16 }
 0x22f   :  { %v1691_v28 = vsel %vm6022_vm9, 0, %v6021_v36  ;;  %vm1819_vm10 = vc.u32 %v1811_v15, %v1815_v62  ;;  %v1821_v17 = vadd.s32 %v1815_v62, %v1811_v15  ;;  %v1794_v13 = vshrl.u32 %v1790_v63, 16 }
 0x230   :  { %v1692_v33 = vsub.s32 32, %v1691_v28  ;;  %v1693_v43 = vshll.u32 %v1684_v26, %v1691_v28  ;;  %v1696_v23 = vsub.s32 4294967266, %v1691_v28  ;;  %vm1797_vm11 = vc.u32 %v1789_v29, %v1793_v1 }
 0x231   :  { %v1798_v47 = vsel %vm1797_vm11, 1, %v6342_v57  ;;  %v1799_v38 = vadd.s32 %v1793_v1, %v1789_v29  ;;  %v1820_v2 = vsel %vm1819_vm10, 1, %v6342_v57  ;;  %vm1823_vm13 = vc.u32 %v1821_v17, %v1817_v49 }
 0x232   :  { %v1694_v46 = vshrl.u32 %v1676_v20, %v1692_v33  ;;  %v1697_v10 = vadd.s32 127, %v1696_v23  ;;  %v1800_v5 = vadd.s32 %v1798_v47, %v1792_v4  ;;  %v1822_v30 = vadd.s32 %v1820_v2, %v1814_v55  ;;  %v438_v55 = vpop.f32.mrf.mxu2 }
 0x233   :  { %vm1801_vm12 = vc.u32 %v1799_v38, %v1795_v42  ;;  %v317_v60 = vmul.f32 %v301_v12, %v301_v12  ;;  %v1824_v48 = vsel %vm1823_vm13, 1, %v6342_v57  ;;  %v547_v36 = vmul.f32 2.0, %v301_v12  ;;  %v503_v42 = vpop.f32.mrf.mxu3 }
 0x234   :  { %v1695_v56 = vor.u32 %v1694_v46, %v1693_v43  ;;  %v1698_v11 = vshll.u32 %v1697_v10, 23  ;;  %v1802_v26 = vsel %vm1801_vm12, 1, %v6342_v57  ;;  %v1826_v44 = vadd.s32 %v1824_v48, %v1822_v30 }
 0x235   :  { %v1804_v45 = vadd.s32 %v1802_v26, %v1800_v5  ;;  %v333_v31 = vmul.f32 %v317_v60, %v7469_v53  ;;  %v1775_v20 = vsel %vm1769_vm6, %v1772_v35, %v1774_v27  ;;  %v1796_v29 = vshrl.u32 %v1791_v21, 16 }
 0x236   :  { %v1699_v15 = vor.u32 4788187, %v1698_v11  ;;  %v1818_v63 = vshrl.u32 %v1813_v6, 16  ;;  %v1827_v4 = vadd.s32 %v1826_v44, %v1816_v41  ;;  %v573_v28 = vmul.f32 %v547_v36, %v438_v55 }
 0x237   :  { %v1805_v62 = vadd.s32 %v1804_v45, %v1794_v13  ;;  %v531_v1 = vadd.f32 1.0, %v333_v31  ;;  %v1702_v43 = vcvt.s32.f32 %v1695_v56  ;;  %v659_v23 = vsub.f32 1.0, %v333_v31 }
 0x238   :  { %v1700_v33 = vand.u32 2147483647, %v1699_v15  ;;  %v574_v47 = vmul.f32 %v547_v36, %v503_v42  ;;  %v7745_v53 = vadd.s32 %v1821_v17, %v1817_v49  ;;  %v1828_v12 = vadd.s32 %v1827_v4, %v1818_v63 }
 0x239   :  { %v7743_v38 = vadd.s32 %v1805_v62, %v1796_v29  ;;  %v605_v2 = vsub.f32 %v531_v1, %v573_v28  ;;  %v146_v27 = vmul.f32 %v7726_v3, %v7391_v40  ;;  %v1829_v46 = vmul.u32 %v7685_v59, %v1775_v20 }
 0x23a   :  { %v1703_v19 = vmul.f32 %v1702_v43, %v1700_v33  ;;  %v606_v35 = vsub.f32 %v531_v1, %v574_v47  ;;  %v1832_v6 = vadd.s32 1, %v1828_v12  ;;  %6178 = vlog2.f32 %v659_v23 }
 0x23b   :  { %vm1831_vm14 = vc.u32 %v7743_v38, %v7745_v53  ;;  %v637_v21 = vmax.f32 %v605_v2, 1e-12  ;;  %vm1584_vm15 = vcmp.lt.s32.totalorder %v7515_v58, 0  ;;  %v10693_v17 = vand.u32 2147483647, %v7515_v58 }
 0x23c   :  { %v1704_v41 = vxor.u32 2147483648, %v1703_v19  ;;  %v638_v10 = vmax.f32 %v606_v35, 1e-12  ;;  %v1833_v49 = vsel %vm1831_vm14, %v1832_v6, %v1828_v12  ;;  %v147_v60 = vmul.f32 %v7726_v3, %v146_v27 }
 0x23d   :  { %6180 = vlog2.f32 %v637_v21  ;;  %vm7755_vm0 = vcmp.le.f32.partialorder %v10693_v17, 0.7853982  ;;  %v1834_v13 = vadd.s32 %v1833_v49, %v1829_v46  ;;  %v1706_v59 = vsub.s32 4, %v7681_v50 }
 0x23e   :  { %v1705_v30 = vsel %vm1584_vm15, %v1704_v41, %v1703_v19  ;;  %6182 = vlog2.f32 %v638_v10  ;;  %v148_v15 = vmul.f32 0.5, %v147_v60  ;;  %v874_v20 = vmul.f32 7.5, %v7507_v24 }
 0x23f   :  { %v1708_v56 = vsel %vm7755_vm0, %v7515_v58, %v1705_v30  ;;  %v1835_v26 = vadd.s32 536870912, %v1834_v13  ;;  %v1707_v29 = vsel %vm1584_vm15, %v1706_v59, %v7681_v50  ;;  %v875_v2 = vmul.f32 7.5, %v7553_v61 }
 0x240   :  { %v1710_v11 = vmul.f32 %v1708_v56, %v1708_v56  ;;  %v6179_v48 = vpop.eup %6178  ;;  %v1709_v33 = vsel %vm7755_vm0, 0, %v1707_v29  ;;  %v149_v12 = vsub.f32 1.5, %v148_v15  ;;  %v910_v24 = vmul.f32 1.442695, %v874_v20 }
 0x241   :  { %v7766_v31 = vshrl.u32 %v1835_v26, 30  ;;  %v686_v1 = vmul.f32 0.6931472, %v6179_v48  ;;  %vm151_vm2 = vweird.f32 %v7391_v40  ;;  %v1726_v6 = vand.u32 3, %v1709_v33 }
 0x242   :  { %v1711_v45 = vmul.f32 -0.001358992, %v1710_v11  ;;  %v1718_v44 = vmul.f32 -0.00019511016, %v1710_v11  ;;  %vm152_vm3 = vweird.f32 %v7726_v3  ;;  %6184 = vpow2.f32 %v910_v24 }
 0x243   :  { %v6181_v36 = vpop.eup %6180  ;;  %v1837_v4 = vshll.u32 %v7766_v31, 30  ;;  %vm1725_vm4 = vweird.f32 %v7515_v58  ;;  %v912_v61 = vmul.f32 1.442695, %v875_v2  ;;  %v150_v60 = vmul.f32 %v7726_v3, %v149_v12  ;;  %vm7794_vm7 = vmor %vm151_vm2, %vm152_vm3 }
 0x244   :  { %v6183_v63 = vpop.eup %6182  ;;  %v1712_v55 = vadd.f32 0.041655596, %v1711_v45  ;;  %v1719_v62 = vadd.f32 0.008332121, %v1718_v44  ;;  %v738_v28 = vmul.f32 0.6931472, %v6181_v36  ;;  %v1830_v36 = vadd.s32 %v7745_v53, %v7743_v38 }
 0x245   :  { %v740_v42 = vmul.f32 0.6931472, %v6183_v63  ;;  %v1838_v47 = vsub.s32 %v1834_v13, %v1837_v4  ;;  %vm1727_vm5 = vcmp.lt.s32.totalorder %v1726_v6, 2  ;;  %vm1738_vm6 = vcmp.lt.s32.totalorder %v7615_v9, 0 }
 0x246   :  { %v1713_v43 = vmul.f32 %v1712_v55, %v1710_v11  ;;  %v1720_v23 = vmul.f32 %v1719_v62, %v1710_v11  ;;  %v7776_v19 = vsub.f32 %v686_v1, %v738_v28  ;;  %vm1728_vm8 = vcmp.eq.s32.totalorder %v1726_v6, 0 }
 0x247   :  { %vm1839_vm1 = vcmp.lt.s32.totalorder %v1838_v47, 0  ;;  %v1840_v27 = vsub.s32 0, %v1838_v47  ;;  %v7781_v41 = vsub.f32 %v686_v1, %v740_v42  ;;  %vm1731_vm9 = vcmp.eq.s32.totalorder %v1726_v6, 2 }
 0x248   :  { %v1714_v50 = vadd.f32 -0.4999988, %v1713_v43  ;;  %v1721_v35 = vadd.f32 -0.16666654, %v1720_v23  ;;  %v821_v21 = vmul.f32 %v6507_v32, %v7776_v19  ;;  %v1860_v63 = vsub.s32 4, %v7766_v31 }
 0x249   :  { %v1841_v49 = vsel %vm1839_vm1, %v1840_v27, %v1838_v47  ;;  %v154_v55 = vsel %vm7794_vm7, %v7726_v3, %v150_v60  ;;  %vm7817_vm11 = vcmp.le.f32.partialorder %v1736_v51, 0.7853982  ;;  %6186 = vpow2.f32 %v912_v61 }
 0x24a   :  { %v1715_v46 = vmul.f32 %v1714_v50, %v1710_v11  ;;  %v1722_v10 = vmul.f32 %v1721_v35, %v1710_v11  ;;  %v1842_v17 = vclz %v1841_v49  ;;  %v7786_v13 = vadd.f32 %v6513_v37, %v821_v21 }
 0x24b   :  { %v822_v11 = vmul.f32 %v6509_v34, %v7781_v41  ;;  %vm102_vm13 = vcmp.gt.f32.partialorder %v7391_v40, 0.99998 }
 0x24c   :  { %v1716_v5 = vadd.f32 1.0, %v1715_v46  ;;  %v1723_v30 = vadd.f32 1.0, %v1722_v10  ;;  %v6024_v59 = vadd.s32 4294967294, %v1842_v17  ;;  %v4046_v44 = vand.u32 2147483647, %v7786_v13 }
 0x24d   :  { %v4049_v15 = vand.u32 2139095040, %v7786_v13  ;;  %v7807_v28 = vadd.f32 %v6517_v39, %v822_v11  ;;  %v278_v10 = vmul.f32 0.99999, %v154_v55 }
 0x24e   :  { %v1724_v48 = vmul.f32 %v1723_v30, %v1708_v56  ;;  %v1732_v45 = vxor.u32 2147483648, %v1716_v5  ;;  %vm6025_vm10 = vcmp.lt.s32.totalorder %v6024_v59, 0  ;;  %v6185_v56 = vpop.eup %6184  ;;  %v4053_v33 = vand.u32 8388607, %v4046_v44 }
 0x24f   :  { %v1845_v29 = vsel %vm6025_vm10, 0, %v6024_v59  ;;  %v4050_v1 = vshrl.u32 %v4049_v15, 23  ;;  %v4200_v46 = vand.u32 2147483647, %v7807_v28  ;;  %v4203_v58 = vand.u32 2139095040, %v7807_v28 }
 0x250   :  { %v1729_v20 = vxor.u32 2147483648, %v1724_v48  ;;  %v1846_v62 = vsub.s32 32, %v1845_v29  ;;  %v1850_v4 = vsub.s32 4294967266, %v1845_v29  ;;  %v1733_v53 = vsel %vm1731_vm9, %v1732_v45, %v1724_v48 }
 0x251   :  { %v1847_v42 = vshll.u32 %v1838_v47, %v1845_v29  ;;  %v6068_v24 = vadd.s32 4294967169, %v4050_v1  ;;  %v1861_v47 = vsel %vm1738_vm6, %v1860_v63, %v7766_v31  ;;  %v4054_v50 = vor.u32 8388608, %v4053_v33 }
 0x252   :  { %v1730_v38 = vsel %vm1728_vm8, %v1716_v5, %v1729_v20  ;;  %v1848_v23 = vshrl.u32 %v1830_v36, %v1846_v62  ;;  %v1851_v12 = vadd.s32 127, %v1850_v4  ;;  %v1863_v51 = vsel %vm7817_vm11, 0, %v1861_v47 }
 0x253   :  { %v1734_v43 = vsel %vm1727_vm5, %v1730_v38, %v1733_v53  ;;  %v4056_v21 = vadd.s32 1, %v6068_v24  ;;  %v7828_v17 = vshll.u32 %v4054_v50, 8  ;;  %v4204_v5 = vshrl.u32 %v4203_v58, 23  ;;  %v7849_v53 = vpop.eup %6186 }
 0x254   :  { %v1735_v3 = vsel %vm1725_vm4, nan, %v1734_v43  ;;  %v1849_v27 = vor.u32 %v1848_v23, %v1847_v42  ;;  %v1852_v6 = vshll.u32 %v1851_v12, 23  ;;  %v7831_v11 = vand.u32 3, %v1863_v51 }
 0x255   :  { %v5898_v35 = vmul.f32 %v6185_v56, %v1735_v3  ;;  %vm4057_vm12 = vcmp.gt.s32.totalorder %v4056_v21, 0  ;;  %v7835_v48 = vand.u32 8388607, %v4200_v46  ;;  %v7837_v45 = vsel %vm102_vm13, %v278_v10, 1.0 }
 0x256   :  { %v1853_v49 = vor.u32 4788187, %v1852_v6  ;;  %v4058_v31 = vsel %vm4057_vm12, %v4056_v21, 0  ;;  %v1856_v60 = vcvt.s32.f32 %v1849_v27  ;;  %v7840_v61 = vand.u32 65535, %v7828_v17 }
 0x257   :  { %5930 = vst [vmem:[#allocation2 + $0x20] sm:$0xff] %v5898_v35  ;;  %v4060_v59 = vand.u32 31, %v4058_v31  ;;  %v4059_v26 = vshrl.u32 %v4058_v31, 5  ;;  %v6071_v20 = vadd.s32 4294967169, %v4204_v5  ;;  %vm1882_vm2 = vcmp.eq.s32.totalorder %v7831_v11, 0 }
 0x258   :  { %v1854_v30 = vand.u32 2147483647, %v1853_v49  ;;  %vm1885_vm3 = vcmp.eq.s32.totalorder %v7831_v11, 2  ;;  %vm1881_vm4 = vcmp.lt.s32.totalorder %v7831_v11, 2  ;;  %vm1879_vm5 = vweird.f32 %v7615_v9 }
 0x259   :  { %v4061_v15 = vsub.s32 32, %v4060_v59  ;;  %v4063_v29 = vshll.u32 %v6336_v16, %v4060_v59  ;;  %v4066_v63 = vshll.u32 %v6337_v18, %v4060_v59  ;;  %v4069_v55 = vshll.u32 %v6338_v22, %v4060_v59 }
 0x25a   :  { %v1857_v36 = vmul.f32 %v1856_v60, %v1854_v30  ;;  %v4072_v56 = vshll.u32 %v6339_v25, %v4060_v59  ;;  %v4075_v38 = vshll.u32 %v10689_v8, %v4060_v59  ;;  %vm4078_vm14 = vcmp.lt.s32.totalorder %v4059_v26, 1 }
 0x25b   :  { %v4064_v4 = vshrl.u32 %v6337_v18, %v4061_v15  ;;  %v4067_v1 = vshrl.u32 %v6338_v22, %v4061_v15  ;;  %v4070_v42 = vshrl.u32 %v6339_v25, %v4061_v15  ;;  %v4073_v33 = vshrl.u32 %v10689_v8, %v4061_v15 }
 0x25c   :  { %v1858_v62 = vxor.u32 2147483648, %v1857_v36  ;;  %v4076_v43 = vshrl.u32 %v10690_v0, %v4061_v15  ;;  %v4062_v12 = vshrl.u32 %v6336_v16, %v4061_v15  ;;  %vm4080_vm15 = vcmp.lt.s32.totalorder %v4059_v26, 3 }
 0x25d   :  { %v4065_v24 = vor.u32 %v4064_v4, %v4063_v29  ;;  %v4068_v3 = vor.u32 %v4067_v1, %v4066_v63  ;;  %v4071_v50 = vor.u32 %v4070_v42, %v4069_v55  ;;  %v4074_v35 = vor.u32 %v4073_v33, %v4072_v56 }
 0x25e   :  { %v1859_v23 = vsel %vm1738_vm6, %v1858_v62, %v1857_v36  ;;  %v4077_v27 = vor.u32 %v4076_v43, %v4075_v38  ;;  %vm4081_vm0 = vcmp.lt.s32.totalorder %v4059_v26, 4  ;;  %vm4079_vm1 = vcmp.lt.s32.totalorder %v4059_v26, 2 }
 0x25f   :  { %v7860_v47 = vsel %vm7817_vm11, %v7615_v9, %v1859_v23  ;;  %v4086_v21 = vsel %vm4078_vm14, %v4065_v24, %v4068_v3  ;;  %v4083_v58 = vsel %vm4081_vm0, %v4071_v50, 2102212464  ;;  %v4087_v10 = vsel %vm4081_vm0, %v4074_v35, 920167782 }
 0x260   :  { %v1864_v6 = vmul.f32 %v7860_v47, %v7860_v47  ;;  %v4090_v49 = vsel %vm4078_vm14, %v4068_v3, %v4071_v50  ;;  %v4091_v51 = vsel %vm4081_vm0, %v4077_v27, 1326507024  ;;  %v4088_v2 = vsel %vm4080_vm15, %v4071_v50, %v4087_v10 }
 0x261   :  { %v4082_v30 = vsel %vm4078_vm14, %v4062_v12, %v4065_v24  ;;  %v4084_v60 = vsel %vm4080_vm15, %v4068_v3, %v4083_v58  ;;  %v4089_v59 = vsel %vm4079_vm1, %v4086_v21, %v4088_v2  ;;  %v4092_v36 = vsel %vm4080_vm15, %v4074_v35, %v4091_v51 }
 0x262   :  { %v1865_v31 = vmul.f32 -0.001358992, %v1864_v6  ;;  %v1872_v5 = vmul.f32 -0.00019511016, %v1864_v6  ;;  %v4093_v63 = vsel %vm4079_vm1, %v4090_v49, %v4092_v36  ;;  %v4119_v55 = vand.u32 65535, %v4089_v59 }
 0x263   :  { %v4096_v56 = vshrl.u32 %v7828_v17, 16  ;;  %v4097_v62 = vand.u32 65535, %v4093_v63  ;;  %v4098_v4 = vshrl.u32 %v4093_v63, 16  ;;  %v4120_v1 = vshrl.u32 %v4089_v59, 16 }
 0x264   :  { %v1866_v15 = vadd.f32 0.041655596, %v1865_v31  ;;  %v1873_v29 = vadd.f32 0.008332121, %v1872_v5  ;;  %v4208_v33 = vor.u32 8388608, %v7835_v48  ;;  %v7873_v43 = vmul.f32 %v7837_v45, %v7837_v45 }
 0x265   :  { %v7876_v23 = vsel %vm4079_vm1, %v4082_v30, %v4084_v60  ;;  %v4100_v12 = vmul.u32 %v4098_v4, %v7840_v61  ;;  %v4101_v24 = vmul.u32 %v4097_v62, %v4096_v56  ;;  %v4123_v3 = vmul.u32 %v4119_v55, %v4096_v56 }
 0x266   :  { %v1867_v38 = vmul.f32 %v1866_v15, %v1864_v6  ;;  %v1874_v42 = vmul.f32 %v1873_v29, %v1864_v6  ;;  %v4122_v27 = vmul.u32 %v4120_v1, %v7840_v61  ;;  %v4210_v21 = vadd.s32 1, %v6071_v20 }
 0x267   :  { %v4099_v58 = vmul.u32 %v4097_v62, %v7840_v61  ;;  %v4102_v10 = vmul.u32 %v4098_v4, %v4096_v56  ;;  %v4103_v49 = vshll.u32 %v4100_v12, 16  ;;  %v4121_v26 = vmul.u32 %v4119_v55, %v7840_v61 }
 0x268   :  { %v1868_v50 = vadd.f32 -0.4999988, %v1867_v38  ;;  %v1875_v35 = vadd.f32 -0.16666654, %v1874_v42  ;;  %v4124_v5 = vmul.u32 %v4120_v1, %v4096_v56  ;;  %v4125_v2 = vshll.u32 %v4122_v27, 16 }
 0x269   :  { %v4105_v30 = vshll.u32 %v4101_v24, 16  ;;  %vm4107_vm6 = vc.u32 %v4099_v58, %v4103_v49  ;;  %v4109_v20 = vadd.s32 %v4103_v49, %v4099_v58  ;;  %v4127_v60 = vshll.u32 %v4123_v3, 16 }
 0x26a   :  { %v1869_v51 = vmul.f32 %v1868_v50, %v1864_v6  ;;  %v1876_v31 = vmul.f32 %v1875_v35, %v1864_v6  ;;  %v4108_v15 = vsel %vm4107_vm6, 1, %v6342_v57  ;;  %vm4129_vm7 = vc.u32 %v4121_v26, %v4125_v2 }
 0x26b   :  { %v4110_v29 = vadd.s32 %v4108_v15, %v4102_v10  ;;  %vm4111_vm8 = vc.u32 %v4109_v20, %v4105_v30  ;;  %v4130_v61 = vsel %vm4129_vm7, 1, %v6342_v57  ;;  %v4131_v6 = vadd.s32 %v4125_v2, %v4121_v26 }
 0x26c   :  { %v1870_v59 = vadd.f32 1.0, %v1869_v51  ;;  %v1877_v36 = vadd.f32 1.0, %v1876_v31  ;;  %v4112_v56 = vsel %vm4111_vm8, 1, %v6342_v57  ;;  %v4132_v62 = vadd.s32 %v4130_v61, %v4124_v5 }
 0x26d   :  { %v4104_v4 = vshrl.u32 %v4100_v12, 16  ;;  %v4114_v1 = vadd.s32 %v4112_v56, %v4110_v29  ;;  %vm4133_vm9 = vc.u32 %v4131_v6, %v4127_v60  ;;  %vm4211_vm10 = vcmp.gt.s32.totalorder %v4210_v21, 0 }
 0x26e   :  { %v1878_v63 = vmul.f32 %v1877_v36, %v7860_v47  ;;  %v1886_v55 = vxor.u32 2147483648, %v1870_v59  ;;  %v4106_v42 = vshrl.u32 %v4101_v24, 16  ;;  %v4134_v50 = vsel %vm4133_vm9, 1, %v6342_v57 }
 0x26f   :  { %v4212_v35 = vsel %vm4211_vm10, %v4210_v21, 0  ;;  %v4115_v58 = vadd.s32 %v4114_v1, %v4104_v4  ;;  %v4126_v10 = vshrl.u32 %v4122_v27, 16  ;;  %v4136_v49 = vadd.s32 %v4134_v50, %v4132_v62 }
 0x270   :  { %v1883_v38 = vxor.u32 2147483648, %v1878_v63  ;;  %v4214_v51 = vand.u32 31, %v4212_v35  ;;  %v1887_v26 = vsel %vm1885_vm3, %v1886_v55, %v1878_v63  ;;  %v4128_v31 = vshrl.u32 %v4123_v3, 16 }
 0x271   :  { %v4139_v12 = vmul.u32 %v7828_v17, %v7876_v23  ;;  %v4116_v5 = vadd.s32 %v4115_v58, %v4106_v42  ;;  %v4137_v2 = vadd.s32 %v4136_v49, %v4126_v10  ;;  %v4135_v30 = vadd.s32 %v4131_v6, %v4127_v60 }
 0x272   :  { %v1884_v47 = vsel %vm1882_vm2, %v1870_v59, %v1883_v38  ;;  %v4215_v21 = vsub.s32 32, %v4214_v51  ;;  %v7901_v20 = vshrl.u32 %v4212_v35, 5  ;;  %v4217_v59 = vshll.u32 %v6336_v16, %v4214_v51 }
 0x273   :  { %v1888_v24 = vsel %vm1881_vm4, %v1884_v47, %v1887_v26  ;;  %v4138_v3 = vadd.s32 %v4137_v2, %v4128_v31  ;;  %v4220_v15 = vshll.u32 %v6337_v18, %v4214_v51  ;;  %v4223_v17 = vshll.u32 %v6338_v22, %v4214_v51 }
 0x274   :  { %v1889_v27 = vsel %vm1879_vm5, nan, %v1888_v24  ;;  %vm4141_vm11 = vc.u32 %v4116_v5, %v4135_v30  ;;  %v4218_v11 = vshrl.u32 %v6337_v18, %v4215_v21  ;;  %v4221_v23 = vshrl.u32 %v6338_v22, %v4215_v21 }
 0x275   :  { %v5899_v36 = vmul.f32 %v7849_v53, %v1889_v27  ;;  %v4224_v9 = vshrl.u32 %v6339_v25, %v4215_v21  ;;  %v4142_v60 = vadd.s32 1, %v4138_v3  ;;  %v4226_v29 = vshll.u32 %v6339_v25, %v4214_v51 }
 0x276   :  { %v4227_v61 = vshrl.u32 %v10689_v8, %v4215_v21  ;;  %v4229_v53 = vshll.u32 %v10689_v8, %v4214_v51  ;;  %v4219_v6 = vor.u32 %v4218_v11, %v4217_v59  ;;  %v4222_v63 = vor.u32 %v4221_v23, %v4220_v15 }
 0x277   :  { %5931 = vst [vmem:[#allocation2 + $0x28] sm:$0xff] %v5899_v36  ;;  %v4225_v55 = vor.u32 %v4224_v9, %v4223_v17  ;;  %v4230_v56 = vshrl.u32 %v10690_v0, %v4215_v21  ;;  %v4143_v62 = vsel %vm4141_vm11, %v4142_v60, %v4138_v3  ;;  %v7916_v1 = vmul.f32 %v7873_v43, %v7391_v40 }
 0x278   :  { %v4228_v4 = vor.u32 %v4227_v61, %v4226_v29  ;;  %v4144_v38 = vadd.s32 %v4143_v62, %v4139_v12  ;;  %vm4232_vm12 = vcmp.lt.s32.totalorder %v7901_v20, 1  ;;  %vm4235_vm13 = vcmp.lt.s32.totalorder %v7901_v20, 4  ;;  %v7948_v12 = vpop.xlane.xlu2 %85 }
 0x279   :  { %v4231_v42 = vor.u32 %v4230_v56, %v4229_v53  ;;  %vm4234_vm14 = vcmp.lt.s32.totalorder %v7901_v20, 3  ;;  %v4240_v50 = vsel %vm4232_vm12, %v4219_v6, %v4222_v63  ;;  %v7927_v58 = vshll.u32 %v4208_v33, 8  ;;  %v417_v33 = vpop.f32.mrf.mxu0 }
 0x27a   :  { %v4241_v35 = vsel %vm4235_vm13, %v4228_v4, 920167782  ;;  %v4145_v40 = vadd.s32 536870912, %v4144_v38  ;;  %vm4233_vm15 = vcmp.lt.s32.totalorder %v7901_v20, 2  ;;  %v4244_v10 = vsel %vm4232_vm12, %v4222_v63, %v4225_v55 }
 0x27b   :  { %v4242_v43 = vsel %vm4234_vm14, %v4225_v55, %v4241_v35  ;;  %v4245_v51 = vsel %vm4235_vm13, %v4231_v42, 1326507024  ;;  %v7943_v26 = vadd.f32 1.0, %v7916_v1  ;;  %v7946_v31 = vmul.f32 2.0, %v7837_v45 }
 0x27c   :  { %v4243_v49 = vsel %vm4233_vm15, %v4240_v50, %v4242_v43  ;;  %v7938_v47 = vshrl.u32 %v4145_v40, 30  ;;  %v4246_v48 = vsel %vm4234_vm14, %v4228_v4, %v4245_v51  ;;  %v4249_v2 = vand.u32 65535, %v7927_v58 }
 0x27d   :  { %v4247_v24 = vsel %vm4233_vm15, %v4244_v10, %v4246_v48  ;;  %v4273_v27 = vand.u32 65535, %v4243_v49  ;;  %v4274_v59 = vshrl.u32 %v4243_v49, 16  ;;  %v4237_v3 = vsel %vm4235_vm13, %v4225_v55, 2102212464 }
 0x27e   :  { %v4147_v36 = vshll.u32 %v7938_v47, 30  ;;  %v4251_v15 = vand.u32 65535, %v4247_v24  ;;  %v4252_v17 = vshrl.u32 %v4247_v24, 16  ;;  %v4216_v11 = vshrl.u32 %v6336_v16, %v4215_v21 }
 0x27f   :  { %v4250_v45 = vshrl.u32 %v7927_v58, 16  ;;  %v4276_v23 = vmul.u32 %v4274_v59, %v4249_v2  ;;  %v559_v9 = vmul.f32 %v7946_v31, %v417_v33  ;;  %6188 = vrsqrt.f32 %v7948_v12 }
 0x280   :  { %v4140_v60 = vadd.s32 %v4135_v30, %v4116_v5  ;;  %v4148_v29 = vsub.s32 %v4144_v38, %v4147_v36  ;;  %v4254_v61 = vmul.u32 %v4252_v17, %v4249_v2  ;;  %v4236_v53 = vsel %vm4232_vm12, %v4216_v11, %v4219_v6 }
 0x281   :  { %v4238_v55 = vsel %vm4234_vm14, %v4222_v63, %v4237_v3  ;;  %v4255_v56 = vmul.u32 %v4251_v15, %v4250_v45  ;;  %v4277_v62 = vmul.u32 %v4273_v27, %v4250_v45  ;;  %v4279_v42 = vshll.u32 %v4276_v23, 16 }
 0x282   :  { %vm4149_vm0 = vcmp.lt.s32.totalorder %v4148_v29, 0  ;;  %v4150_v21 = vsub.s32 0, %v4148_v29  ;;  %v4257_v4 = vshll.u32 %v4254_v61, 16  ;;  %v4253_v50 = vmul.u32 %v4251_v15, %v4249_v2 }
 0x283   :  { %v4275_v35 = vmul.u32 %v4273_v27, %v4249_v2  ;;  %v4278_v40 = vmul.u32 %v4274_v59, %v4250_v45  ;;  %v591_v43 = vsub.f32 %v7943_v26, %v559_v9  ;;  %v4256_v30 = vmul.u32 %v4252_v17, %v4250_v45  ;;  %v482_v17 = vpop.f32.mrf.mxu1 }
 0x284   :  { %v4151_v5 = vsel %vm4149_vm0, %v4150_v21, %v4148_v29  ;;  %v4258_v38 = vshrl.u32 %v4254_v61, 16  ;;  %v4259_v10 = vshll.u32 %v4255_v56, 16  ;;  %v4260_v6 = vshrl.u32 %v4255_v56, 16 }
 0x285   :  { %v4152_v49 = vclz %v4151_v5  ;;  %vm4261_vm1 = vc.u32 %v4253_v50, %v4257_v4  ;;  %v4263_v51 = vadd.s32 %v4257_v4, %v4253_v50  ;;  %v7965_v63 = vpop.eup %6188  ;;  %v4281_v33 = vshll.u32 %v4277_v62, 16 }
 0x286   :  { %v4262_v48 = vsel %vm4261_vm1, 1, %v6342_v57  ;;  %vm4283_vm2 = vc.u32 %v4275_v35, %v4279_v42  ;;  %v4285_v24 = vadd.s32 %v4279_v42, %v4275_v35  ;;  %v4280_v3 = vshrl.u32 %v4276_v23, 16 }
 0x287   :  { %v6069_v36 = vadd.s32 4294967294, %v4152_v49  ;;  %v4264_v2 = vadd.s32 %v4262_v48, %v4256_v30  ;;  %vm4265_vm3 = vc.u32 %v4263_v51, %v4259_v10  ;;  %v4284_v27 = vsel %vm4283_vm2, 1, %v6342_v57 }
 0x288   :  { %v4266_v59 = vsel %vm4265_vm3, 1, %v6342_v57  ;;  %v4286_v15 = vadd.s32 %v4284_v27, %v4278_v40  ;;  %vm4287_vm4 = vc.u32 %v4285_v24, %v4281_v33  ;;  %v623_v9 = vmax.f32 %v591_v43, 1e-12 }
 0x289   :  { %vm6070_vm5 = vcmp.lt.s32.totalorder %v6069_v36, 0  ;;  %v4268_v11 = vadd.s32 %v4266_v59, %v4264_v2  ;;  %v4288_v45 = vsel %vm4287_vm4, 1, %v6342_v57  ;;  %v4282_v56 = vshrl.u32 %v4277_v62, 16 }
 0x28a   :  { %v4155_v61 = vsel %vm6070_vm5, 0, %v6069_v36  ;;  %v4290_v21 = vadd.s32 %v4288_v45, %v4286_v15  ;;  %v652_v4 = vsub.f32 1.0, %v7916_v1  ;;  %v560_v5 = vmul.f32 %v7946_v31, %v482_v17 }
 0x28b   :  { %v4156_v42 = vsub.s32 32, %v4155_v61  ;;  %v4160_v50 = vsub.s32 4294967266, %v4155_v61  ;;  %v4269_v35 = vadd.s32 %v4268_v11, %v4258_v38  ;;  %v4157_v30 = vshll.u32 %v4148_v29, %v4155_v61 }
 0x28c   :  { %v7973_v23 = vadd.s32 %v4285_v24, %v4281_v33  ;;  %v4291_v40 = vadd.s32 %v4290_v21, %v4280_v3  ;;  %6190 = vlog2.f32 %v652_v4  ;;  %v4239_v62 = vsel %vm4233_vm15, %v4236_v53, %v4238_v55 }
 0x28d   :  { %v4158_v10 = vshrl.u32 %v4140_v60, %v4156_v42  ;;  %v4161_v49 = vadd.s32 127, %v4160_v50  ;;  %v7975_v51 = vadd.s32 %v4269_v35, %v4260_v6  ;;  %6192 = vlog2.f32 %v623_v9 }
 0x28e   :  { %v4292_v43 = vadd.s32 %v4291_v40, %v4282_v56  ;;  %v592_v31 = vsub.f32 %v7943_v26, %v560_v5  ;;  %v226_v29 = vmul.f32 %v7965_v63, %v7948_v12  ;;  %v4293_v6 = vmul.u32 %v7927_v58, %v4239_v62 }
 0x28f   :  { %v4159_v1 = vor.u32 %v4158_v10, %v4157_v30  ;;  %v4162_v48 = vshll.u32 %v4161_v49, 23  ;;  %vm4295_vm6 = vc.u32 %v7975_v51, %v7973_v23  ;;  %v4170_v26 = vsub.s32 4, %v7938_v47 }
 0x290   :  { %v4296_v38 = vadd.s32 1, %v4292_v43  ;;  %v624_v2 = vmax.f32 %v592_v31, 1e-12  ;;  %v227_v27 = vmul.f32 %v7965_v63, %v226_v29  ;;  %v890_v11 = vmul.f32 7.5, %v7776_v19 }
 0x291   :  { %v4163_v60 = vor.u32 4788187, %v4162_v48  ;;  %v4166_v53 = vcvt.s32.f32 %v4159_v1  ;;  %v891_v9 = vmul.f32 7.5, %v7781_v41  ;;  %vm4048_vm7 = vcmp.lt.s32.totalorder %v7786_v13, 0 }
 0x292   :  { %v6191_v33 = vpop.eup %6190  ;;  %v4297_v24 = vsel %vm4295_vm6, %v4296_v38, %v4292_v43  ;;  %6194 = vlog2.f32 %v624_v2  ;;  %v228_v56 = vmul.f32 0.5, %v227_v27  ;;  %vm7998_vm8 = vcmp.le.f32.partialorder %v4046_v44, 0.7853982 }
 0x293   :  { %v6193_v36 = vpop.eup %6192  ;;  %v4164_v20 = vand.u32 2147483647, %v4163_v60  ;;  %v4298_v55 = vadd.s32 %v4297_v24, %v4293_v6  ;;  %v672_v59 = vmul.f32 0.6931472, %v6191_v33  ;;  %v4171_v42 = vsel %vm4048_vm7, %v4170_v26, %v7938_v47 }
 0x294   :  { %v710_v3 = vmul.f32 0.6931472, %v6193_v36  ;;  %v942_v50 = vmul.f32 1.442695, %v890_v11  ;;  %v944_v40 = vmul.f32 1.442695, %v891_v9  ;;  %vm231_vm10 = vweird.f32 %v7948_v12 }
 0x295   :  { %v4167_v15 = vmul.f32 %v4166_v53, %v4164_v20  ;;  %v4299_v17 = vadd.s32 536870912, %v4298_v55  ;;  %v229_v44 = vsub.f32 1.5, %v228_v56  ;;  %v4173_v49 = vsel %vm7998_vm8, 0, %v4171_v42 }
 0x296   :  { %v7988_v45 = vsub.f32 %v672_v59, %v710_v3  ;;  %6196 = vpow2.f32 %v942_v50  ;;  %v8020_v6 = vand.u32 3, %v4173_v49  ;;  %vm232_vm11 = vweird.f32 %v7965_v63 }
 0x297   :  { %v4168_v58 = vxor.u32 2147483648, %v4167_v15  ;;  %v7991_v61 = vshrl.u32 %v4299_v17, 30  ;;  %6198 = vpow2.f32 %v944_v40  ;;  %vm8025_vm12 = vcmp.le.f32.partialorder %v4200_v46, 0.7853982  ;;  %vm8038_vm14 = vmor %vm231_vm10, %vm232_vm11 }
 0x298   :  { %v807_v21 = vmul.f32 %v6507_v32, %v7988_v45  ;;  %v6195_v62 = vpop.eup %6194  ;;  %vm4202_vm13 = vcmp.lt.s32.totalorder %v7807_v28, 0  ;;  %v8033_v3 = vmul.f32 %v7965_v63, %v229_v44  ;;  %vm4192_vm15 = vcmp.eq.s32.totalorder %v8020_v6, 0 }
 0x299   :  { %v4169_v19 = vsel %vm4048_vm7, %v4168_v58, %v4167_v15  ;;  %v4301_v41 = vshll.u32 %v7991_v61, 30  ;;  %v712_v24 = vmul.f32 0.6931472, %v6195_v62  ;;  %v4324_v17 = vsub.s32 4, %v7991_v61 }
 0x29a   :  { %v4172_v35 = vsel %vm7998_vm8, %v7786_v13, %v4169_v19  ;;  %v8008_v5 = vadd.f32 %v6513_v37, %v807_v21  ;;  %vm4195_vm0 = vcmp.eq.s32.totalorder %v8020_v6, 2  ;;  %v4294_v9 = vadd.s32 %v7973_v23, %v7975_v51 }
 0x29b   :  { %v4174_v30 = vmul.f32 %v4172_v35, %v4172_v35  ;;  %v8010_v10 = vsub.s32 %v4298_v55, %v4301_v41  ;;  %v8046_v56 = vsub.f32 %v672_v59, %v712_v24  ;;  %vm4191_vm2 = vcmp.lt.s32.totalorder %v8020_v6, 2 }
 0x29c   :  { %v10667_v48 = vand.u32 2147483647, %v8008_v5  ;;  %v1893_v31 = vand.u32 2139095040, %v8008_v5  ;;  %v6197_v58 = vpop.eup %6196  ;;  %vm4189_vm3 = vweird.f32 %v7786_v13  ;;  %v234_v23 = vsel %vm8038_vm14, %v7965_v63, %v8033_v3 }
 0x29d   :  { %v4175_v47 = vmul.f32 -0.001358992, %v4174_v30  ;;  %v4182_v43 = vmul.f32 -0.00019511016, %v4174_v30  ;;  %vm4303_vm9 = vcmp.lt.s32.totalorder %v8010_v10, 0  ;;  %v4304_v1 = vsub.s32 0, %v8010_v10  ;;  %v8048_v21 = vpop.eup %6198 }
 0x29e   :  { %v1894_v55 = vshrl.u32 %v1893_v31, 23  ;;  %v1897_v27 = vand.u32 8388607, %v10667_v48  ;;  %6200 = vrsqrt.f32 %v6497_v52 }
 0x29f   :  { %v4176_v29 = vadd.f32 0.041655596, %v4175_v47  ;;  %v4183_v38 = vadd.f32 0.008332121, %v4182_v43  ;;  %v4305_v60 = vsel %vm4303_vm9, %v4304_v1, %v8010_v10 }
 0x2a0   :  { %v4306_v33 = vclz %v4305_v60  ;;  %v6026_v11 = vadd.s32 4294967169, %v1894_v55  ;;  %v1898_v44 = vor.u32 8388608, %v1897_v27 }
 0x2a1   :  { %v4177_v36 = vmul.f32 %v4176_v29, %v4174_v30  ;;  %v4184_v20 = vmul.f32 %v4183_v38, %v4174_v30  ;;  %v808_v38 = vmul.f32 %v6509_v34, %v8046_v56 }
 0x2a2   :  { %v6072_v2 = vadd.s32 4294967294, %v4306_v33  ;;  %v1900_v41 = vadd.s32 1, %v6026_v11 }
 0x2a3   :  { %v4178_v15 = vadd.f32 -0.4999988, %v4177_v36  ;;  %v4185_v26 = vadd.f32 -0.16666654, %v4184_v20  ;;  %v8064_v36 = vshll.u32 %v1898_v44, 8 }
 0x2a4   :  { %vm6073_vm1 = vcmp.lt.s32.totalorder %v6072_v2, 0  ;;  %vm1901_vm4 = vcmp.gt.s32.totalorder %v1900_v41, 0 }
 0x2a5   :  { %v4179_v4 = vmul.f32 %v4178_v15, %v4174_v30  ;;  %v4186_v19 = vmul.f32 %v4185_v26, %v4174_v30  ;;  %v4309_v42 = vsel %vm6073_vm1, 0, %v6072_v2  ;;  %v4325_v30 = vsel %vm4202_vm13, %v4324_v17, %v7991_v61 }
 0x2a6   :  { %v4310_v50 = vsub.s32 32, %v4309_v42  ;;  %v4314_v40 = vsub.s32 4294967266, %v4309_v42  ;;  %v4311_v49 = vshll.u32 %v8010_v10, %v4309_v42  ;;  %v1902_v43 = vsel %vm1901_vm4, %v1900_v41, 0 }
 0x2a7   :  { %v4180_v51 = vadd.f32 1.0, %v4179_v4  ;;  %v4187_v59 = vadd.f32 1.0, %v4186_v19  ;;  %v1904_v29 = vand.u32 31, %v1902_v43  ;;  %v4327_v24 = vsel %vm8025_vm12, 0, %v4325_v30 }
 0x2a8   :  { %v4312_v62 = vshrl.u32 %v4294_v9, %v4310_v50  ;;  %v4315_v47 = vadd.s32 127, %v4314_v40  ;;  %v8068_v20 = vshrl.u32 %v1902_v43, 5  ;;  %vm110_vm4 = vcmp.gt.f32.partialorder %v7948_v12, 0.99998 }
 0x2a9   :  { %v4188_v1 = vmul.f32 %v4187_v59, %v4172_v35  ;;  %v4196_v31 = vxor.u32 2147483648, %v4180_v51  ;;  %v1905_v55 = vsub.s32 32, %v1904_v29  ;;  %v1907_v27 = vshll.u32 %v6336_v16, %v1904_v29 }
 0x2aa   :  { %v4313_v60 = vor.u32 %v4312_v62, %v4311_v49  ;;  %v4316_v33 = vshll.u32 %v4315_v47, 23  ;;  %v1910_v15 = vshll.u32 %v6337_v18, %v1904_v29  ;;  %v1913_v9 = vshll.u32 %v6338_v22, %v1904_v29 }
 0x2ab   :  { %v4193_v61 = vxor.u32 2147483648, %v4188_v1  ;;  %v4197_v10 = vsel %vm4195_vm0, %v4196_v31, %v4188_v1  ;;  %v1908_v17 = vshrl.u32 %v6337_v18, %v1905_v55  ;;  %v1911_v11 = vshrl.u32 %v6338_v22, %v1905_v55 }
 0x2ac   :  { %v4317_v35 = vor.u32 4788187, %v4316_v33  ;;  %v4320_v2 = vcvt.s32.f32 %v4313_v60  ;;  %v1914_v42 = vshrl.u32 %v6339_v25, %v1905_v55  ;;  %v1916_v41 = vshll.u32 %v6339_v25, %v1904_v29 }
 0x2ad   :  { %v4194_v26 = vsel %vm4192_vm15, %v4180_v51, %v4193_v61  ;;  %v1909_v40 = vor.u32 %v1908_v17, %v1907_v27  ;;  %v1912_v44 = vor.u32 %v1911_v11, %v1910_v15  ;;  %v1917_v51 = vshrl.u32 %v10689_v8, %v1905_v55 }
 0x2ae   :  { %v4198_v4 = vsel %vm4191_vm2, %v4194_v26, %v4197_v10  ;;  %v4318_v19 = vand.u32 2147483647, %v4317_v35  ;;  %v8084_v49 = vand.u32 3, %v4327_v24  ;;  %v1915_v62 = vor.u32 %v1914_v42, %v1913_v9 }
 0x2af   :  { %v4199_v50 = vsel %vm4189_vm3, nan, %v4198_v4  ;;  %v1918_v47 = vor.u32 %v1917_v51, %v1916_v41  ;;  %v1919_v6 = vshll.u32 %v10689_v8, %v1904_v29  ;;  %v1920_v43 = vshrl.u32 %v10690_v0, %v1905_v55 }
 0x2b0   :  { %v5914_v59 = vmul.f32 %v6197_v58, %v4199_v50  ;;  %v4321_v30 = vmul.f32 %v4320_v2, %v4318_v19  ;;  %v8089_v1 = vadd.f32 %v6517_v39, %v808_v38  ;;  %vm1922_vm5 = vcmp.lt.s32.totalorder %v8068_v20, 1 }
 0x2b1   :  { %vm1925_vm6 = vcmp.lt.s32.totalorder %v8068_v20, 4  ;;  %v1939_v58 = vand.u32 65535, %v8064_v36  ;;  %v1921_v31 = vor.u32 %v1920_v43, %v1919_v6  ;;  %vm1924_vm7 = vcmp.lt.s32.totalorder %v8068_v20, 3 }
 0x2b2   :  { %5946 = vst [vmem:[#allocation2 + $0xa0] sm:$0xff] %v5914_v59  ;;  %v4322_v13 = vxor.u32 2147483648, %v4321_v30  ;;  %v1930_v60 = vsel %vm1922_vm5, %v1909_v40, %v1912_v44  ;;  %v1931_v29 = vsel %vm1925_vm6, %v1918_v47, 920167782  ;;  %vm1923_vm8 = vcmp.lt.s32.totalorder %v8068_v20, 2 }
 0x2b3   :  { %v1932_v33 = vsel %vm1924_vm7, %v1915_v62, %v1931_v29  ;;  %v1934_v24 = vsel %vm1922_vm5, %v1912_v44, %v1915_v62  ;;  %v1935_v35 = vsel %vm1925_vm6, %v1921_v31, 1326507024  ;;  %v1940_v2 = vshrl.u32 %v8064_v36, 16 }
 0x2b4   :  { %v4323_v38 = vsel %vm4202_vm13, %v4322_v13, %v4321_v30  ;;  %v1933_v10 = vsel %vm1923_vm8, %v1930_v60, %v1932_v33  ;;  %v1936_v15 = vsel %vm1924_vm7, %v1918_v47, %v1935_v35  ;;  %v1906_v11 = vshrl.u32 %v6336_v16, %v1905_v55 }
 0x2b5   :  { %v4326_v61 = vsel %vm8025_vm12, %v7807_v28, %v4323_v38  ;;  %v1963_v26 = vand.u32 65535, %v1933_v10  ;;  %v1964_v17 = vshrl.u32 %v1933_v10, 16  ;;  %v1927_v53 = vsel %vm1925_vm6, %v1915_v62, 2102212464 }
 0x2b6   :  { %v4328_v27 = vmul.f32 %v4326_v61, %v4326_v61  ;;  %v1937_v9 = vsel %vm1923_vm8, %v1934_v24, %v1936_v15  ;;  %v2047_v4 = vand.u32 2139095040, %v8089_v1  ;;  %v1926_v51 = vsel %vm1922_vm5, %v1906_v11, %v1909_v40 }
 0x2b7   :  { %v1941_v41 = vand.u32 65535, %v1937_v9  ;;  %v1942_v50 = vshrl.u32 %v1937_v9, 16  ;;  %v1966_v59 = vmul.u32 %v1964_v17, %v1939_v58  ;;  %v8124_v30 = vmul.u32 %v1963_v26, %v1940_v2 }
 0x2b8   :  { %v4329_v19 = vmul.f32 -0.001358992, %v4328_v27  ;;  %v4336_v42 = vmul.f32 -0.00019511016, %v4328_v27  ;;  %v2044_v55 = vand.u32 2147483647, %v8089_v1  ;;  %v1928_v62 = vsel %vm1924_vm7, %v1912_v44, %v1927_v53 }
 0x2b9   :  { %v1944_v43 = vmul.u32 %v1942_v50, %v1939_v58  ;;  %v1945_v13 = vmul.u32 %v1941_v41, %v1940_v2  ;;  %v1965_v31 = vmul.u32 %v1963_v26, %v1939_v58  ;;  %v1969_v60 = vshll.u32 %v1966_v59, 16 }
 0x2ba   :  { %v4330_v47 = vadd.f32 0.041655596, %v4329_v19  ;;  %v4337_v6 = vadd.f32 0.008332121, %v4336_v42  ;;  %v2048_v29 = vshrl.u32 %v2047_v4, 23  ;;  %v1943_v24 = vmul.u32 %v1941_v41, %v1939_v58 }
 0x2bb   :  { %v1947_v10 = vshll.u32 %v1944_v43, 16  ;;  %v1946_v40 = vmul.u32 %v1942_v50, %v1940_v2  ;;  %v1949_v35 = vshll.u32 %v1945_v13, 16  ;;  %v1968_v15 = vmul.u32 %v1964_v17, %v1940_v2 }
 0x2bc   :  { %v4331_v38 = vmul.f32 %v4330_v47, %v4328_v27  ;;  %v4338_v33 = vmul.f32 %v4337_v6, %v4328_v27  ;;  %v1971_v11 = vshll.u32 %v8124_v30, 16  ;;  %vm1973_vm10 = vc.u32 %v1965_v31, %v1969_v60 }
 0x2bd   :  { %vm1951_vm9 = vc.u32 %v1943_v24, %v1947_v10  ;;  %v1953_v42 = vadd.s32 %v1947_v10, %v1943_v24  ;;  %v1975_v53 = vadd.s32 %v1969_v60, %v1965_v31  ;;  %v6029_v26 = vadd.s32 4294967169, %v2048_v29 }
 0x2be   :  { %v4332_v9 = vadd.f32 -0.4999988, %v4331_v38  ;;  %v4339_v19 = vadd.f32 -0.16666654, %v4338_v33  ;;  %v1952_v44 = vsel %vm1951_vm9, 1, %v6342_v57  ;;  %vm4343_vm12 = vweird.f32 %v7807_v28 }
 0x2bf   :  { %v1954_v47 = vadd.s32 %v1952_v44, %v1946_v40  ;;  %vm1955_vm11 = vc.u32 %v1953_v42, %v1949_v35  ;;  %v1948_v58 = vshrl.u32 %v1944_v43, 16  ;;  %v1974_v17 = vsel %vm1973_vm10, 1, %v6342_v57 }
 0x2c0   :  { %v4333_v48 = vmul.f32 %v4332_v9, %v4328_v27  ;;  %v4340_v4 = vmul.f32 %v4339_v19, %v4328_v27  ;;  %v1956_v2 = vsel %vm1955_vm11, 1, %v6342_v57  ;;  %vm1977_vm13 = vc.u32 %v1975_v53, %v1971_v11 }
 0x2c1   :  { %v1958_v6 = vadd.s32 %v1956_v2, %v1954_v47  ;;  %v1976_v38 = vadd.s32 %v1974_v17, %v1968_v15  ;;  %v1950_v33 = vshrl.u32 %v1945_v13, 16  ;;  %v1970_v24 = vshrl.u32 %v1966_v59, 16 }
 0x2c2   :  { %v4334_v41 = vadd.f32 1.0, %v4333_v48  ;;  %v4341_v50 = vadd.f32 1.0, %v4340_v4  ;;  %v1978_v31 = vsel %vm1977_vm13, 1, %v6342_v57  ;;  %v2054_v60 = vadd.s32 1, %v6029_v26 }
 0x2c3   :  { %v1959_v10 = vadd.s32 %v1958_v6, %v1948_v58  ;;  %v1980_v40 = vadd.s32 %v1978_v31, %v1976_v38  ;;  %vm4346_vm15 = vcmp.eq.s32.totalorder %v8084_v49, 0  ;;  %vm4349_vm0 = vcmp.eq.s32.totalorder %v8084_v49, 2 }
 0x2c4   :  { %v4342_v27 = vmul.f32 %v4341_v50, %v4326_v61  ;;  %v4350_v29 = vxor.u32 2147483648, %v4334_v41  ;;  %v2051_v43 = vand.u32 8388607, %v2044_v55  ;;  %vm2055_vm1 = vcmp.gt.s32.totalorder %v2054_v60, 0 }
 0x2c5   :  { %v8139_v35 = vadd.s32 %v1959_v10, %v1950_v33  ;;  %v1972_v59 = vshrl.u32 %v8124_v30, 16  ;;  %v1981_v13 = vadd.s32 %v1980_v40, %v1970_v24  ;;  %v1929_v61 = vsel %vm1923_vm8, %v1926_v51, %v1928_v62 }
 0x2c6   :  { %v4347_v48 = vxor.u32 2147483648, %v4342_v27  ;;  %v8144_v15 = vadd.s32 %v1975_v53, %v1971_v11  ;;  %v2056_v9 = vsel %vm2055_vm1, %v2054_v60, 0  ;;  %v286_v19 = vmul.f32 0.99999, %v234_v23 }
 0x2c7   :  { %vm4345_vm2 = vcmp.lt.s32.totalorder %v8084_v49, 2  ;;  %v4351_v44 = vsel %vm4349_vm0, %v4350_v29, %v4342_v27  ;;  %v1982_v26 = vadd.s32 %v1981_v13, %v1972_v59  ;;  %v2058_v20 = vand.u32 31, %v2056_v9 }
 0x2c8   :  { %v4348_v42 = vsel %vm4346_vm15, %v4334_v41, %v4347_v48  ;;  %vm1985_vm3 = vc.u32 %v8139_v35, %v8144_v15  ;;  %v1983_v46 = vmul.u32 %v8064_v36, %v1929_v61  ;;  %v2052_v63 = vor.u32 8388608, %v2051_v43 }
 0x2c9   :  { %v4352_v4 = vsel %vm4345_vm2, %v4348_v42, %v4351_v44  ;;  %v1986_v30 = vadd.s32 1, %v1982_v26  ;;  %v8159_v23 = vshrl.u32 %v2056_v9, 5  ;;  %v2059_v49 = vsub.s32 32, %v2058_v20 }
 0x2ca   :  { %v4353_v51 = vsel %vm4343_vm12, nan, %v4352_v4  ;;  %v302_v62 = vsel %vm110_vm4, %v286_v19, 1.0  ;;  %v2061_v53 = vshll.u32 %v6336_v16, %v2058_v20  ;;  %v2064_v47 = vshll.u32 %v6337_v18, %v2058_v20 }
 0x2cb   :  { %v5915_v3 = vmul.f32 %v8048_v21, %v4353_v51  ;;  %v1987_v11 = vsel %vm1985_vm3, %v1986_v30, %v1982_v26  ;;  %v2067_v58 = vshll.u32 %v6338_v22, %v2058_v20  ;;  %v2062_v2 = vshrl.u32 %v6337_v18, %v2059_v49 }
 0x2cc   :  { %v1988_v28 = vadd.s32 %v1987_v11, %v1983_v46  ;;  %v2065_v36 = vshrl.u32 %v6338_v22, %v2059_v49  ;;  %v2070_v17 = vshll.u32 %v6339_v25, %v2058_v20  ;;  %v2068_v21 = vshrl.u32 %v6339_v25, %v2059_v49 }
 0x2cd   :  { %5947 = vst [vmem:[#allocation2 + $0xa8] sm:$0xff] %v5915_v3  ;;  %v2071_v41 = vshrl.u32 %v10689_v8, %v2059_v49  ;;  %v2073_v50 = vshll.u32 %v10689_v8, %v2058_v20  ;;  %v2074_v6 = vshrl.u32 %v10690_v0, %v2059_v49  ;;  %v2063_v33 = vor.u32 %v2062_v2, %v2061_v53 }
 0x2ce   :  { %v1989_v38 = vadd.s32 536870912, %v1988_v28  ;;  %v2066_v24 = vor.u32 %v2065_v36, %v2064_v47  ;;  %v8171_v31 = vshll.u32 %v2052_v63, 8  ;;  %v2069_v60 = vor.u32 %v2068_v21, %v2067_v58 }
 0x2cf   :  { %v2072_v27 = vor.u32 %v2071_v41, %v2070_v17  ;;  %v2075_v29 = vor.u32 %v2074_v6, %v2073_v50  ;;  %vm2076_vm14 = vcmp.lt.s32.totalorder %v8159_v23, 1  ;;  %vm2079_vm5 = vcmp.lt.s32.totalorder %v8159_v23, 4 }
 0x2d0   :  { %v8174_v10 = vshrl.u32 %v1989_v38, 30  ;;  %v2084_v40 = vsel %vm2076_vm14, %v2063_v33, %v2066_v24  ;;  %v318_v43 = vmul.f32 %v302_v62, %v302_v62  ;;  %vm2078_vm6 = vcmp.lt.s32.totalorder %v8159_v23, 3 }
 0x2d1   :  { %v2085_v48 = vsel %vm2079_vm5, %v2072_v27, 920167782  ;;  %v2088_v59 = vsel %vm2076_vm14, %v2066_v24, %v2069_v60  ;;  %v2089_v13 = vsel %vm2079_vm5, %v2075_v29, 1326507024  ;;  %vm2077_vm7 = vcmp.lt.s32.totalorder %v8159_v23, 2 }
 0x2d2   :  { %v1991_v61 = vshll.u32 %v8174_v10, 30  ;;  %v2086_v9 = vsel %vm2078_vm6, %v2069_v60, %v2085_v48  ;;  %v2090_v42 = vsel %vm2078_vm6, %v2072_v27, %v2089_v13  ;;  %v2093_v44 = vand.u32 65535, %v8171_v31 }
 0x2d3   :  { %v2087_v19 = vsel %vm2077_vm7, %v2084_v40, %v2086_v9  ;;  %v2091_v4 = vsel %vm2077_vm7, %v2088_v59, %v2090_v42  ;;  %v2094_v20 = vshrl.u32 %v8171_v31, 16  ;;  %v8201_v51 = vmul.f32 %v318_v43, %v7948_v12 }
 0x2d4   :  { %v8195_v26 = vsub.s32 %v1988_v28, %v1991_v61  ;;  %v2060_v46 = vshrl.u32 %v6336_v16, %v2059_v49  ;;  %v2081_v30 = vsel %vm2079_vm5, %v2069_v60, 2102212464  ;;  %v2095_v63 = vand.u32 65535, %v2091_v4 }
 0x2d5   :  { %v2096_v3 = vshrl.u32 %v2091_v4, 16  ;;  %v2117_v53 = vand.u32 65535, %v2087_v19  ;;  %v2118_v47 = vshrl.u32 %v2087_v19, 16  ;;  %v1984_v58 = vadd.s32 %v8144_v15, %v8139_v35 }
 0x2d6   :  { %vm1993_vm8 = vcmp.lt.s32.totalorder %v8195_v26, 0  ;;  %v1994_v11 = vsub.s32 0, %v8195_v26  ;;  %v2099_v28 = vmul.u32 %v2095_v63, %v2094_v20  ;;  %v8214_v2 = vsel %vm2076_vm14, %v2060_v46, %v2063_v33 }
 0x2d7   :  { %v2098_v12 = vmul.u32 %v2096_v3, %v2093_v44  ;;  %v2082_v36 = vsel %vm2078_vm6, %v2066_v24, %v2081_v30  ;;  %v548_v17 = vmul.f32 2.0, %v302_v62  ;;  %v2097_v41 = vmul.u32 %v2095_v63, %v2093_v44  ;;  %v8220_v24 = vpop.eup %6200  ;;  %v441_v30 = vpop.f32.mrf.mxu2 }
 0x2d8   :  { %v1995_v49 = vsel %vm1993_vm8, %v1994_v11, %v8195_v26  ;;  %v532_v6 = vadd.f32 1.0, %v8201_v51  ;;  %v2100_v38 = vmul.u32 %v2096_v3, %v2094_v20  ;;  %v2119_v60 = vmul.u32 %v2117_v53, %v2093_v44 }
 0x2d9   :  { %v1996_v21 = vclz %v1995_v49  ;;  %v2101_v50 = vshll.u32 %v2098_v12, 16  ;;  %v2120_v35 = vmul.u32 %v2118_v47, %v2093_v44  ;;  %v2121_v15 = vmul.u32 %v2117_v53, %v2094_v20 }
 0x2da   :  { %v2103_v29 = vshll.u32 %v2099_v28, 16  ;;  %v2102_v43 = vshrl.u32 %v2098_v12, 16  ;;  %v2104_v33 = vshrl.u32 %v2099_v28, 16  ;;  %v2122_v46 = vmul.u32 %v2118_v47, %v2094_v20 }
 0x2db   :  { %v6027_v27 = vadd.s32 4294967294, %v1996_v21  ;;  %vm2105_vm9 = vc.u32 %v2097_v41, %v2101_v50  ;;  %v2107_v40 = vadd.s32 %v2101_v50, %v2097_v41  ;;  %v2123_v59 = vshll.u32 %v2120_v35, 16  ;;  %v506_v21 = vpop.f32.mrf.mxu3 }
 0x2dc   :  { %v2106_v48 = vsel %vm2105_vm9, 1, %v6342_v57  ;;  %v2125_v13 = vshll.u32 %v2121_v15, 16  ;;  %v575_v11 = vmul.f32 %v548_v17, %v441_v30  ;;  %v2124_v47 = vshrl.u32 %v2120_v35, 16 }
 0x2dd   :  { %vm6028_vm10 = vcmp.lt.s32.totalorder %v6027_v27, 0  ;;  %v2108_v62 = vadd.s32 %v2106_v48, %v2100_v38  ;;  %vm2109_vm11 = vc.u32 %v2107_v40, %v2103_v29  ;;  %vm2127_vm12 = vc.u32 %v2119_v60, %v2123_v59 }
 0x2de   :  { %v1999_v61 = vsel %vm6028_vm10, 0, %v6027_v27  ;;  %v2110_v9 = vsel %vm2109_vm11, 1, %v6342_v57  ;;  %v2129_v19 = vadd.s32 %v2123_v59, %v2119_v60  ;;  %v2128_v3 = vsel %vm2127_vm12, 1, %v6342_v57 }
 0x2df   :  { %v2000_v42 = vsub.s32 32, %v1999_v61  ;;  %v2004_v44 = vsub.s32 4294967266, %v1999_v61  ;;  %v2112_v4 = vadd.s32 %v2110_v9, %v2108_v62  ;;  %v2001_v63 = vshll.u32 %v8195_v26, %v1999_v61 }
 0x2e0   :  { %vm2131_vm13 = vc.u32 %v2129_v19, %v2125_v13  ;;  %v2130_v49 = vadd.s32 %v2128_v3, %v2122_v46  ;;  %v607_v50 = vsub.f32 %v532_v6, %v575_v11  ;;  %v660_v38 = vsub.f32 1.0, %v8201_v51 }
 0x2e1   :  { %v2002_v53 = vshrl.u32 %v1984_v58, %v2000_v42  ;;  %v2005_v12 = vadd.s32 127, %v2004_v44  ;;  %v2113_v28 = vadd.s32 %v2112_v4, %v2102_v43  ;;  %v2132_v41 = vsel %vm2131_vm13, 1, %v6342_v57 }
 0x2e2   :  { %v576_v60 = vmul.f32 %v548_v17, %v506_v21  ;;  %v2134_v29 = vadd.s32 %v2132_v41, %v2130_v49  ;;  %v639_v40 = vmax.f32 %v607_v50, 1e-12  ;;  %6202 = vlog2.f32 %v660_v38 }
 0x2e3   :  { %v2003_v27 = vor.u32 %v2002_v53, %v2001_v63  ;;  %v2006_v20 = vshll.u32 %v2005_v12, 23  ;;  %v8227_v26 = vadd.s32 %v2113_v28, %v2104_v33  ;;  %v2126_v59 = vshrl.u32 %v2121_v15, 16 }
 0x2e4   :  { %v608_v48 = vsub.f32 %v532_v6, %v576_v60  ;;  %v2135_v43 = vadd.s32 %v2134_v29, %v2124_v47  ;;  %v8229_v62 = vadd.s32 %v2129_v19, %v2125_v13  ;;  %6204 = vlog2.f32 %v639_v40 }
 0x2e5   :  { %v2007_v58 = vor.u32 4788187, %v2006_v20  ;;  %v2010_v42 = vcvt.s32.f32 %v2003_v27  ;;  %v2083_v51 = vsel %vm2077_vm7, %v8214_v2, %v2082_v36  ;;  %v156_v13 = vmul.f32 %v8220_v24, %v6497_v52 }
 0x2e6   :  { %v640_v61 = vmax.f32 %v608_v48, 1e-12  ;;  %v2136_v17 = vadd.s32 %v2135_v43, %v2126_v59  ;;  %vm2139_vm15 = vc.u32 %v8227_v26, %v8229_v62  ;;  %v2137_v15 = vmul.u32 %v8171_v31, %v2083_v51 }
 0x2e7   :  { %v2008_v9 = vand.u32 2147483647, %v2007_v58  ;;  %vm1892_vm0 = vcmp.lt.s32.totalorder %v8008_v5, 0  ;;  %v10706_v2 = vand.u32 2147483647, %v8008_v5  ;;  %v2014_v63 = vsub.s32 4, %v8174_v10 }
 0x2e8   :  { %v2140_v33 = vadd.s32 1, %v2136_v17  ;;  %6206 = vlog2.f32 %v640_v61  ;;  %v6203_v6 = vpop.eup %6202  ;;  %v157_v12 = vmul.f32 %v8220_v24, %v156_v13  ;;  %v876_v21 = vmul.f32 7.5, %v7988_v45 }
 0x2e9   :  { %v2011_v35 = vmul.f32 %v2010_v42, %v2008_v9  ;;  %vm8242_vm1 = vcmp.le.f32.partialorder %v10706_v2, 0.7853982  ;;  %v688_v30 = vmul.f32 0.6931472, %v6203_v6  ;;  %v2015_v27 = vsel %vm1892_vm0, %v2014_v63, %v8174_v10 }
 0x2ea   :  { %v2141_v44 = vsel %vm2139_vm15, %v2140_v33, %v2136_v17  ;;  %v6205_v4 = vpop.eup %6204  ;;  %v8261_v29 = vmul.f32 0.5, %v157_v12  ;;  %v914_v45 = vmul.f32 1.442695, %v876_v21  ;;  %v877_v59 = vmul.f32 7.5, %v8046_v56 }
 0x2eb   :  { %v2012_v19 = vxor.u32 2147483648, %v2011_v35  ;;  %v2142_v23 = vadd.s32 %v2141_v44, %v2137_v15  ;;  %v742_v31 = vmul.f32 0.6931472, %v6205_v4  ;;  %v2017_v61 = vsel %vm8242_vm1, 0, %v2015_v27 }
 0x2ec   :  { %6208 = vpow2.f32 %v914_v45  ;;  %v2034_v15 = vand.u32 3, %v2017_v61  ;;  %v916_v13 = vmul.f32 1.442695, %v877_v59  ;;  %vm2033_vm3 = vweird.f32 %v8008_v5 }
 0x2ed   :  { %v2013_v46 = vsel %vm1892_vm0, %v2012_v19, %v2011_v35  ;;  %v2143_v11 = vadd.s32 536870912, %v2142_v23  ;;  %v8253_v49 = vsub.f32 %v688_v30, %v742_v31  ;;  %v159_v35 = vsub.f32 1.5, %v8261_v29 }
 0x2ee   :  { %v2016_v3 = vsel %vm8242_vm1, %v8008_v5, %v2013_v46  ;;  %v6207_v53 = vpop.eup %6206  ;;  %vm2046_vm4 = vcmp.lt.s32.totalorder %v8089_v1, 0  ;;  %vm2035_vm14 = vcmp.lt.s32.totalorder %v2034_v15, 2  ;;  %6210 = vpow2.f32 %v916_v13 }
 0x2ef   :  { %v2018_v28 = vmul.f32 %v2016_v3, %v2016_v3  ;;  %v2144_v41 = vshrl.u32 %v2143_v11, 30  ;;  %v823_v60 = vmul.f32 %v6507_v32, %v8253_v49  ;;  %v744_v47 = vmul.f32 0.6931472, %v6207_v53 }
 0x2f0   :  { %vm8287_vm5 = vcmp.le.f32.partialorder %v2044_v55, 0.7853982  ;;  %vm2036_vm7 = vcmp.eq.s32.totalorder %v2034_v15, 0  ;;  %vm2039_vm8 = vcmp.eq.s32.totalorder %v2034_v15, 2 }
 0x2f1   :  { %v2019_v50 = vmul.f32 -0.001358992, %v2018_v28  ;;  %v2026_v38 = vmul.f32 -0.00019511016, %v2018_v28  ;;  %v2145_v20 = vshll.u32 %v2144_v41, 30  ;;  %v8264_v58 = vadd.f32 %v6513_v37, %v823_v60 }
 0x2f2   :  { %v8274_v17 = vsub.f32 %v688_v30, %v744_v47  ;;  %v2168_v2 = vsub.s32 4, %v2144_v41  ;;  %v2138_v60 = vadd.s32 %v8229_v62, %v8227_v26 }
 0x2f3   :  { %v2020_v40 = vadd.f32 0.041655596, %v2019_v50  ;;  %v2027_v48 = vadd.f32 0.008332121, %v2026_v38  ;;  %v8267_v43 = vsub.s32 %v2142_v23, %v2145_v20  ;;  %v4354_v51 = vand.u32 2147483647, %v8264_v58  ;;  %v6209_v38 = vpop.eup %6208 }
 0x2f4   :  { %v4357_v56 = vand.u32 2139095040, %v8264_v58  ;;  %v824_v46 = vmul.f32 %v6509_v34, %v8274_v17  ;;  %v2169_v50 = vsel %vm2046_vm4, %v2168_v2, %v2144_v41 }
 0x2f5   :  { %v2021_v9 = vmul.f32 %v2020_v40, %v2018_v28  ;;  %v2028_v42 = vmul.f32 %v2027_v48, %v2018_v28  ;;  %vm2147_vm2 = vcmp.lt.s32.totalorder %v8267_v43, 0  ;;  %v2148_v10 = vsub.s32 0, %v8267_v43 }
 0x2f6   :  { %v4358_v36 = vshrl.u32 %v4357_v56, 23  ;;  %v4361_v11 = vand.u32 8388607, %v4354_v51  ;;  %v8296_v48 = vadd.f32 %v6517_v39, %v824_v46  ;;  %v2171_v45 = vsel %vm8287_vm5, 0, %v2169_v50 }
 0x2f7   :  { %v2022_v33 = vadd.f32 -0.4999988, %v2021_v9  ;;  %v2029_v6 = vadd.f32 -0.16666654, %v2028_v42  ;;  %v2149_v19 = vsel %vm2147_vm2, %v2148_v10, %v8267_v43  ;;  %v8300_v42 = vpop.eup %6210  ;;  %v8306_v56 = vand.u32 3, %v2171_v45 }
 0x2f8   :  { %v2150_v23 = vclz %v2149_v19  ;;  %v6074_v12 = vadd.s32 4294967169, %v4358_v36  ;;  %v4362_v55 = vor.u32 8388608, %v4361_v11  ;;  %v10668_v19 = vand.u32 2147483647, %v8296_v48 }
 0x2f9   :  { %v2023_v44 = vmul.f32 %v2022_v33, %v2018_v28  ;;  %v2030_v4 = vmul.f32 %v2029_v6, %v2018_v28  ;;  %vm2190_vm2 = vcmp.eq.s32.totalorder %v8306_v56, 0 }
 0x2fa   :  { %v6030_v63 = vadd.s32 4294967294, %v2150_v23  ;;  %v4364_v20 = vadd.s32 1, %v6074_v12  ;;  %v8308_v13 = vshll.u32 %v4362_v55, 8  ;;  %v4511_v55 = vand.u32 2139095040, %v8296_v48 }
 0x2fb   :  { %v2024_v30 = vadd.f32 1.0, %v2023_v44  ;;  %v2031_v31 = vadd.f32 1.0, %v2030_v4 }
 0x2fc   :  { %vm6031_vm6 = vcmp.lt.s32.totalorder %v6030_v63, 0  ;;  %vm4365_vm9 = vcmp.gt.s32.totalorder %v4364_v20, 0  ;;  %v4403_v45 = vand.u32 65535, %v8308_v13 }
 0x2fd   :  { %v2032_v28 = vmul.f32 %v2031_v31, %v2016_v3  ;;  %v2040_v21 = vxor.u32 2147483648, %v2024_v30  ;;  %v2153_v27 = vsel %vm6031_vm6, 0, %v6030_v63  ;;  %v4366_v9 = vsel %vm4365_vm9, %v4364_v20, 0 }
 0x2fe   :  { %v2154_v40 = vsub.s32 32, %v2153_v27  ;;  %v2158_v3 = vsub.s32 4294967266, %v2153_v27  ;;  %v2155_v62 = vshll.u32 %v8267_v43, %v2153_v27  ;;  %v4368_v33 = vand.u32 31, %v4366_v9 }
 0x2ff   :  { %v2037_v47 = vxor.u32 2147483648, %v2032_v28  ;;  %v2041_v59 = vsel %vm2039_vm8, %v2040_v21, %v2032_v28  ;;  %v8311_v36 = vshrl.u32 %v4366_v9, 5  ;;  %vm161_vm6 = vweird.f32 %v6497_v52 }
 0x300   :  { %v2156_v61 = vshrl.u32 %v2138_v60, %v2154_v40  ;;  %v2159_v10 = vadd.s32 127, %v2158_v3  ;;  %v4369_v2 = vsub.s32 32, %v4368_v33  ;;  %v4371_v15 = vshll.u32 %v6336_v16, %v4368_v33 }
 0x301   :  { %v2038_v41 = vsel %vm2036_vm7, %v2024_v30, %v2037_v47  ;;  %v4374_v43 = vshll.u32 %v6337_v18, %v4368_v33  ;;  %v4377_v46 = vshll.u32 %v6338_v22, %v4368_v33  ;;  %v4380_v63 = vshll.u32 %v6339_v25, %v4368_v33 }
 0x302   :  { %v2042_v26 = vsel %vm2035_vm14, %v2038_v41, %v2041_v59  ;;  %v2157_v4 = vor.u32 %v2156_v61, %v2155_v62  ;;  %v2160_v23 = vshll.u32 %v2159_v10, 23  ;;  %v4372_v30 = vshrl.u32 %v6337_v18, %v4369_v2 }
 0x303   :  { %v2043_v6 = vsel %vm2033_vm3, nan, %v2042_v26  ;;  %v4375_v31 = vshrl.u32 %v6338_v22, %v4369_v2  ;;  %v4378_v11 = vshrl.u32 %v6339_v25, %v4369_v2  ;;  %v4381_v12 = vshrl.u32 %v10689_v8, %v4369_v2 }
 0x304   :  { %v5900_v44 = vmul.f32 %v6209_v38, %v2043_v6  ;;  %v2161_v5 = vor.u32 4788187, %v2160_v23  ;;  %v4383_v28 = vshll.u32 %v10689_v8, %v4368_v33  ;;  %v4384_v21 = vshrl.u32 %v10690_v0, %v4369_v2 }
 0x305   :  { %v2164_v38 = vcvt.s32.f32 %v2157_v4  ;;  %v4373_v60 = vor.u32 %v4372_v30, %v4371_v15  ;;  %v8323_v27 = vor.u32 %v4375_v31, %v4374_v43  ;;  %v4379_v20 = vor.u32 %v4378_v11, %v4377_v46 }
 0x306   :  { %5932 = vst [vmem:[#allocation2 + $0x30] sm:$0xff] %v5900_v44  ;;  %v2162_v50 = vand.u32 2147483647, %v2161_v5  ;;  %v4382_v47 = vor.u32 %v4381_v12, %v4380_v63  ;;  %v4385_v40 = vor.u32 %v4384_v21, %v4383_v28  ;;  %vm4386_vm10 = vcmp.lt.s32.totalorder %v8311_v36, 1 }
 0x307   :  { %vm4389_vm11 = vcmp.lt.s32.totalorder %v8311_v36, 4  ;;  %vm4388_vm12 = vcmp.lt.s32.totalorder %v8311_v36, 3  ;;  %v4394_v41 = vsel %vm4386_vm10, %v4373_v60, %v8323_v27  ;;  %v4398_v61 = vsel %vm4386_vm10, %v8323_v27, %v4379_v20 }
 0x308   :  { %v2165_v3 = vmul.f32 %v2164_v38, %v2162_v50  ;;  %v4395_v59 = vsel %vm4389_vm11, %v4382_v47, 920167782  ;;  %vm4387_vm13 = vcmp.lt.s32.totalorder %v8311_v36, 2  ;;  %v4399_v62 = vsel %vm4389_vm11, %v4385_v40, 1326507024 }
 0x309   :  { %v4396_v26 = vsel %vm4388_vm12, %v4379_v20, %v4395_v59  ;;  %v4370_v10 = vshrl.u32 %v6336_v16, %v4369_v2  ;;  %v4400_v6 = vsel %vm4388_vm12, %v4382_v47, %v4399_v62  ;;  %v4512_v44 = vshrl.u32 %v4511_v55, 23 }
 0x30a   :  { %v2166_v9 = vxor.u32 2147483648, %v2165_v3  ;;  %v4397_v33 = vsel %vm4387_vm13, %v4394_v41, %v4396_v26  ;;  %v4401_v23 = vsel %vm4387_vm13, %v4398_v61, %v4400_v6  ;;  %v4404_v2 = vshrl.u32 %v8308_v13, 16 }
 0x30b   :  { %v4427_v15 = vand.u32 65535, %v4397_v33  ;;  %v4428_v43 = vshrl.u32 %v4397_v33, 16  ;;  %v4405_v5 = vand.u32 65535, %v4401_v23  ;;  %v4406_v30 = vshrl.u32 %v4401_v23, 16 }
 0x30c   :  { %v2167_v4 = vsel %vm2046_vm4, %v2166_v9, %v2165_v3  ;;  %v4390_v63 = vsel %vm4386_vm10, %v4370_v10, %v4373_v60  ;;  %v8364_v12 = vand.u32 8388607, %v10668_v19  ;;  %v4391_v53 = vsel %vm4389_vm11, %v4379_v20, 2102212464 }
 0x30d   :  { %v8355_v46 = vsel %vm8287_vm5, %v8089_v1, %v2167_v4  ;;  %v4430_v11 = vmul.u32 %v4428_v43, %v4403_v45  ;;  %v4408_v28 = vmul.u32 %v4406_v30, %v4403_v45  ;;  %v4409_v21 = vmul.u32 %v4405_v5, %v4404_v2 }
 0x30e   :  { %v2172_v31 = vmul.f32 %v8355_v46, %v8355_v46  ;;  %v4431_v50 = vmul.u32 %v4427_v15, %v4404_v2  ;;  %v6077_v55 = vadd.s32 4294967169, %v4512_v44  ;;  %v4407_v3 = vmul.u32 %v4405_v5, %v4403_v45 }
 0x30f   :  { %v4433_v40 = vshll.u32 %v4430_v11, 16  ;;  %v4410_v41 = vmul.u32 %v4406_v30, %v4404_v2  ;;  %v4411_v59 = vshll.u32 %v4408_v28, 16  ;;  %v4429_v61 = vmul.u32 %v4427_v15, %v4403_v45 }
 0x310   :  { %v2173_v38 = vmul.f32 -0.001358992, %v2172_v31  ;;  %v2180_v47 = vmul.f32 -0.00019511016, %v2172_v31  ;;  %v4413_v26 = vshll.u32 %v4409_v21, 16  ;;  %v4432_v62 = vmul.u32 %v4428_v43, %v4404_v2 }
 0x311   :  { %vm4415_vm15 = vc.u32 %v4407_v3, %v4411_v59  ;;  %v4417_v10 = vadd.s32 %v4411_v59, %v4407_v3  ;;  %v4435_v33 = vshll.u32 %v4431_v50, 16  ;;  %vm4437_vm0 = vc.u32 %v4429_v61, %v4433_v40 }
 0x312   :  { %v2174_v60 = vadd.f32 0.041655596, %v2173_v38  ;;  %v2181_v9 = vadd.f32 0.008332121, %v2180_v47  ;;  %v4416_v4 = vsel %vm4415_vm15, 1, %v6342_v57  ;;  %v4438_v23 = vsel %vm4437_vm0, 1, %v6342_v57 }
 0x313   :  { %v4418_v19 = vadd.s32 %v4416_v4, %v4410_v41  ;;  %vm4419_vm1 = vc.u32 %v4417_v10, %v4413_v26  ;;  %v4439_v44 = vadd.s32 %v4433_v40, %v4429_v61  ;;  %v4440_v5 = vadd.s32 %v4438_v23, %v4432_v62 }
 0x314   :  { %v2175_v20 = vmul.f32 %v2174_v60, %v2172_v31  ;;  %v2182_v6 = vmul.f32 %v2181_v9, %v2172_v31  ;;  %v4392_v15 = vsel %vm4388_vm12, %v8323_v27, %v4391_v53  ;;  %v4420_v43 = vsel %vm4419_vm1, 1, %v6342_v57 }
 0x315   :  { %v4412_v2 = vshrl.u32 %v4408_v28, 16  ;;  %v4422_v38 = vadd.s32 %v4420_v43, %v4418_v19  ;;  %vm4441_vm3 = vc.u32 %v4439_v44, %v4435_v33  ;;  %v4518_v47 = vadd.s32 1, %v6077_v55 }
 0x316   :  { %v2176_v30 = vadd.f32 -0.4999988, %v2175_v20  ;;  %v2183_v45 = vadd.f32 -0.16666654, %v2182_v6  ;;  %vm2189_vm4 = vcmp.lt.s32.totalorder %v8306_v56, 2  ;;  %v4414_v40 = vshrl.u32 %v4409_v21, 16 }
 0x317   :  { %v4442_v41 = vsel %vm4441_vm3, 1, %v6342_v57  ;;  %vm2187_vm14 = vweird.f32 %v8089_v1  ;;  %v4423_v61 = vadd.s32 %v4422_v38, %v4412_v2  ;;  %v4434_v60 = vshrl.u32 %v4430_v11, 16 }
 0x318   :  { %v2177_v3 = vmul.f32 %v2176_v30, %v2172_v31  ;;  %v2184_v59 = vmul.f32 %v2183_v45, %v2172_v31  ;;  %v4444_v27 = vadd.s32 %v4442_v41, %v4440_v5  ;;  %vm4519_vm5 = vcmp.gt.s32.totalorder %v4518_v47, 0 }
 0x319   :  { %v4393_v19 = vsel %vm4387_vm13, %v4390_v63, %v4392_v15  ;;  %v4520_v28 = vsel %vm4519_vm5, %v4518_v47, 0  ;;  %v8381_v31 = vadd.s32 %v4423_v61, %v4414_v40  ;;  %v4436_v55 = vshrl.u32 %v4431_v50, 16 }
 0x31a   :  { %v2178_v53 = vadd.f32 1.0, %v2177_v3  ;;  %v2185_v9 = vadd.f32 1.0, %v2184_v59  ;;  %v4445_v21 = vadd.s32 %v4444_v27, %v4434_v60  ;;  %v4522_v26 = vand.u32 31, %v4520_v28 }
 0x31b   :  { %vm162_vm7 = vweird.f32 %v8220_v24  ;;  %vm2193_vm8 = vcmp.eq.s32.totalorder %v8306_v56, 2  ;;  %v8386_v10 = vadd.s32 %v4439_v44, %v4435_v33  ;;  %v4447_v36 = vmul.u32 %v8308_v13, %v4393_v19 }
 0x31c   :  { %v2186_v62 = vmul.f32 %v2185_v9, %v8355_v46  ;;  %v2194_v11 = vxor.u32 2147483648, %v2178_v53  ;;  %v4446_v20 = vadd.s32 %v4445_v21, %v4436_v55  ;;  %v4516_v63 = vor.u32 8388608, %v8364_v12  ;;  %vm8431_vm13 = vmor %vm161_vm6, %vm162_vm7 }
 0x31d   :  { %v4523_v6 = vsub.s32 32, %v4522_v26  ;;  %vm4449_vm9 = vc.u32 %v8381_v31, %v8386_v10  ;;  %v8392_v50 = vshrl.u32 %v4520_v28, 5  ;;  %v4525_v23 = vshll.u32 %v6336_v16, %v4522_v26 }
 0x31e   :  { %v2191_v4 = vxor.u32 2147483648, %v2186_v62  ;;  %v4450_v46 = vadd.s32 1, %v4446_v20  ;;  %v4528_v33 = vshll.u32 %v6337_v18, %v4522_v26  ;;  %v2195_v12 = vsel %vm2193_vm8, %v2194_v11, %v2186_v62 }
 0x31f   :  { %v4526_v5 = vshrl.u32 %v6337_v18, %v4523_v6  ;;  %v4529_v44 = vshrl.u32 %v6338_v22, %v4523_v6  ;;  %v4531_v30 = vshll.u32 %v6338_v22, %v4522_v26  ;;  %v4532_v45 = vshrl.u32 %v6339_v25, %v4523_v6 }
 0x320   :  { %v2192_v13 = vsel %vm2190_vm2, %v2178_v53, %v2191_v4  ;;  %v4451_v43 = vsel %vm4449_vm9, %v4450_v46, %v4446_v20  ;;  %v4534_v59 = vshll.u32 %v6339_v25, %v4522_v26  ;;  %v4535_v40 = vshrl.u32 %v10689_v8, %v4523_v6  ;;  %v8450_v4 = vpop.xlane.xlu0 %88 }
 0x321   :  { %v2196_v15 = vsel %vm2189_vm4, %v2192_v13, %v2195_v12  ;;  %v4527_v2 = vor.u32 %v4526_v5, %v4525_v23  ;;  %v4530_v38 = vor.u32 %v4529_v44, %v4528_v33  ;;  %v4452_v3 = vadd.s32 %v4451_v43, %v4447_v36 }
 0x322   :  { %v2197_v47 = vsel %vm2187_vm14, nan, %v2196_v15  ;;  %v4533_v61 = vor.u32 %v4532_v45, %v4531_v30  ;;  %v4537_v60 = vshll.u32 %v10689_v8, %v4522_v26  ;;  %v4538_v27 = vshrl.u32 %v10690_v0, %v4523_v6 }
 0x323   :  { %v5901_v41 = vmul.f32 %v8300_v42, %v2197_v47  ;;  %v4453_v56 = vadd.s32 536870912, %v4452_v3  ;;  %v4536_v53 = vor.u32 %v4535_v40, %v4534_v59  ;;  %vm4540_vm10 = vcmp.lt.s32.totalorder %v8392_v50, 1 }
 0x324   :  { %v4539_v9 = vor.u32 %v4538_v27, %v4537_v60  ;;  %vm4543_vm11 = vcmp.lt.s32.totalorder %v8392_v50, 4  ;;  %v4548_v1 = vsel %vm4540_vm10, %v4527_v2, %v4530_v38  ;;  %v160_v42 = vmul.f32 %v8220_v24, %v159_v35 }
 0x325   :  { %5933 = vst [vmem:[#allocation2 + $0x38] sm:$0xff] %v5901_v41  ;;  %v8420_v19 = vshrl.u32 %v4453_v56, 30  ;;  %vm4542_vm12 = vcmp.lt.s32.totalorder %v8392_v50, 3  ;;  %v4549_v28 = vsel %vm4543_vm11, %v4536_v53, 920167782  ;;  %v8425_v55 = vshll.u32 %v4516_v63, 8 }
 0x326   :  { %vm4541_vm15 = vcmp.lt.s32.totalorder %v8392_v50, 2  ;;  %v4550_v29 = vsel %vm4542_vm12, %v4533_v61, %v4549_v28  ;;  %v4552_v35 = vsel %vm4540_vm10, %v4530_v38, %v4533_v61  ;;  %v4553_v26 = vsel %vm4543_vm11, %v4539_v9, 1326507024 }
 0x327   :  { %v4455_v62 = vshll.u32 %v8420_v19, 30  ;;  %v4551_v11 = vsel %vm4541_vm15, %v4548_v1, %v4550_v29  ;;  %v4554_v20 = vsel %vm4542_vm12, %v4536_v53, %v4553_v26  ;;  %v164_v63 = vsel %vm8431_vm13, %v8220_v24, %v160_v42 }
 0x328   :  { %v4582_v36 = vshrl.u32 %v4551_v11, 16  ;;  %v4555_v46 = vsel %vm4541_vm15, %v4552_v35, %v4554_v20  ;;  %v4557_v5 = vand.u32 65535, %v8425_v55  ;;  %v4558_v33 = vshrl.u32 %v8425_v55, 16 }
 0x329   :  { %v8452_v23 = vsub.s32 %v4452_v3, %v4455_v62  ;;  %v4524_v44 = vshrl.u32 %v6336_v16, %v4523_v6  ;;  %v4545_v13 = vsel %vm4543_vm11, %v4533_v61, 2102212464  ;;  %v4559_v12 = vand.u32 65535, %v4555_v46 }
 0x32a   :  { %v4560_v30 = vshrl.u32 %v4555_v46, 16  ;;  %v4581_v45 = vand.u32 65535, %v4551_v11  ;;  %v4584_v15 = vmul.u32 %v4582_v36, %v4557_v5  ;;  %6212 = vrsqrt.f32 %v8450_v4 }
 0x32b   :  { %vm4457_vm0 = vcmp.lt.s32.totalorder %v8452_v23, 0  ;;  %v4458_v24 = vsub.s32 0, %v8452_v23  ;;  %v4563_v47 = vmul.u32 %v4559_v12, %v4558_v33  ;;  %vm103_vm1 = vcmp.gt.f32.partialorder %v6497_v52, 0.99998 }
 0x32c   :  { %v4562_v43 = vmul.u32 %v4560_v30, %v4557_v5  ;;  %v4448_v6 = vadd.s32 %v8386_v10, %v8381_v31  ;;  %v4544_v59 = vsel %vm4540_vm10, %v4524_v44, %v4527_v2  ;;  %v279_v40 = vmul.f32 0.99999, %v164_v63 }
 0x32d   :  { %v4459_v3 = vsel %vm4457_vm0, %v4458_v24, %v8452_v23  ;;  %v4546_v61 = vsel %vm4542_vm12, %v4530_v38, %v4545_v13  ;;  %v4561_v60 = vmul.u32 %v4559_v12, %v4557_v5  ;;  %v4564_v56 = vmul.u32 %v4560_v30, %v4558_v33 }
 0x32e   :  { %v4460_v41 = vclz %v4459_v3  ;;  %v4565_v27 = vshll.u32 %v4562_v43, 16  ;;  %v4583_v53 = vmul.u32 %v4581_v45, %v4557_v5  ;;  %v4585_v9 = vmul.u32 %v4581_v45, %v4558_v33  ;;  %v420_v3 = vpop.f32.mrf.mxu0 }
 0x32f   :  { %v4587_v1 = vshll.u32 %v4584_v15, 16  ;;  %v4567_v28 = vshll.u32 %v4563_v47, 16  ;;  %v4586_v21 = vmul.u32 %v4582_v36, %v4558_v33  ;;  %v4566_v5 = vshrl.u32 %v4562_v43, 16 }
 0x330   :  { %v6075_v42 = vadd.s32 4294967294, %v4460_v41  ;;  %vm4569_vm2 = vc.u32 %v4561_v60, %v4565_v27  ;;  %v4571_v31 = vadd.s32 %v4565_v27, %v4561_v60  ;;  %v4589_v29 = vshll.u32 %v4585_v9, 16  ;;  %v8473_v2 = vpop.eup %6212  ;;  %v485_v41 = vpop.f32.mrf.mxu1 }
 0x331   :  { %v4570_v10 = vsel %vm4569_vm2, 1, %v6342_v57  ;;  %vm4591_vm3 = vc.u32 %v4583_v53, %v4587_v1  ;;  %v4593_v11 = vadd.s32 %v4587_v1, %v4583_v53  ;;  %v4568_v33 = vshrl.u32 %v4563_v47, 16 }
 0x332   :  { %vm6076_vm4 = vcmp.lt.s32.totalorder %v6075_v42, 0  ;;  %v4572_v35 = vadd.s32 %v4570_v10, %v4564_v56  ;;  %vm4573_vm14 = vc.u32 %v4571_v31, %v4567_v28  ;;  %v4592_v38 = vsel %vm4591_vm3, 1, %v6342_v57 }
 0x333   :  { %v4463_v26 = vsel %vm6076_vm4, 0, %v6075_v42  ;;  %v4574_v62 = vsel %vm4573_vm14, 1, %v6342_v57  ;;  %v4594_v20 = vadd.s32 %v4592_v38, %v4586_v21  ;;  %vm4595_vm5 = vc.u32 %v4593_v11, %v4589_v29 }
 0x334   :  { %v4464_v63 = vsub.s32 32, %v4463_v26  ;;  %v4468_v46 = vsub.s32 4294967266, %v4463_v26  ;;  %v4576_v44 = vadd.s32 %v4574_v62, %v4572_v35  ;;  %v4465_v36 = vshll.u32 %v8452_v23, %v4463_v26 }
 0x335   :  { %v295_v13 = vsel %vm103_vm1, %v279_v40, 1.0  ;;  %v4596_v45 = vsel %vm4595_vm5, 1, %v6342_v57  ;;  %v4588_v60 = vshrl.u32 %v4584_v15, 16  ;;  %v4590_v23 = vshrl.u32 %v4585_v9, 16 }
 0x336   :  { %v4466_v12 = vshrl.u32 %v4448_v6, %v4464_v63  ;;  %v4469_v30 = vadd.s32 127, %v4468_v46  ;;  %v4577_v24 = vadd.s32 %v4576_v44, %v4566_v5  ;;  %v4598_v27 = vadd.s32 %v4596_v45, %v4594_v20 }
 0x337   :  { %v311_v56 = vmul.f32 %v295_v13, %v295_v13  ;;  %v541_v53 = vmul.f32 2.0, %v295_v13  ;;  %v8484_v10 = vadd.s32 %v4593_v11, %v4589_v29  ;;  %v4547_v21 = vsel %vm4541_vm15, %v4544_v59, %v4546_v61 }
 0x338   :  { %v4467_v43 = vor.u32 %v4466_v12, %v4465_v36  ;;  %v4470_v1 = vshll.u32 %v4469_v30, 23  ;;  %v8481_v42 = vadd.s32 %v4577_v24, %v4568_v33  ;;  %v4599_v47 = vadd.s32 %v4598_v27, %v4588_v60 }
 0x339   :  { %v327_v28 = vmul.f32 %v311_v56, %v6497_v52  ;;  %v561_v40 = vmul.f32 %v541_v53, %v420_v3  ;;  %v562_v6 = vmul.f32 %v541_v53, %v485_v41  ;;  %v4601_v46 = vmul.u32 %v8425_v55, %v4547_v21 }
 0x33a   :  { %v4471_v31 = vor.u32 4788187, %v4470_v1  ;;  %v4600_v15 = vadd.s32 %v4599_v47, %v4590_v23  ;;  %v4474_v26 = vcvt.s32.f32 %v4467_v43  ;;  %vm4603_vm6 = vc.u32 %v8481_v42, %v8484_v10 }
 0x33b   :  { %v525_v35 = vadd.f32 1.0, %v327_v28  ;;  %v653_v62 = vsub.f32 1.0, %v327_v28  ;;  %v236_v29 = vmul.f32 %v8473_v2, %v8450_v4  ;;  %vm4356_vm7 = vcmp.lt.s32.totalorder %v8264_v58, 0 }
 0x33c   :  { %v4472_v38 = vand.u32 2147483647, %v4471_v31  ;;  %v4604_v9 = vadd.s32 1, %v4600_v15  ;;  %v4478_v44 = vsub.s32 4, %v8420_v19  ;;  %vm8497_vm8 = vcmp.le.f32.partialorder %v4354_v51, 0.7853982 }
 0x33d   :  { %v593_v20 = vsub.f32 %v525_v35, %v561_v40  ;;  %v594_v63 = vsub.f32 %v525_v35, %v562_v6  ;;  %6214 = vlog2.f32 %v653_v62  ;;  %v237_v13 = vmul.f32 %v8473_v2, %v236_v29 }
 0x33e   :  { %v4475_v52 = vmul.f32 %v4474_v26, %v4472_v38  ;;  %v4605_v11 = vsel %vm4603_vm6, %v4604_v9, %v4600_v15  ;;  %v4479_v45 = vsel %vm4356_vm7, %v4478_v44, %v8420_v19  ;;  %v892_v53 = vmul.f32 7.5, %v8253_v49 }
 0x33f   :  { %v625_v50 = vmax.f32 %v593_v20, 1e-12  ;;  %v626_v59 = vmax.f32 %v594_v63, 1e-12  ;;  %v4606_v5 = vadd.s32 %v4605_v11, %v4601_v46  ;;  %v8507_v56 = vmul.f32 0.5, %v237_v13 }
 0x340   :  { %v4476_v61 = vxor.u32 2147483648, %v4475_v52  ;;  %v4481_v1 = vsel %vm8497_vm8, 0, %v4479_v45  ;;  %v946_v38 = vmul.f32 1.442695, %v892_v53  ;;  %vm4497_vm10 = vweird.f32 %v8264_v58 }
 0x341   :  { %6216 = vlog2.f32 %v625_v50  ;;  %v4607_v33 = vadd.s32 536870912, %v4606_v5  ;;  %v239_v63 = vsub.f32 1.5, %v8507_v56  ;;  %vm241_vm11 = vweird.f32 %v8450_v4 }
 0x342   :  { %v4477_v55 = vsel %vm4356_vm7, %v4476_v61, %v4475_v52  ;;  %6218 = vlog2.f32 %v626_v59  ;;  %v4498_v52 = vand.u32 3, %v4481_v1  ;;  %v893_v61 = vmul.f32 7.5, %v8274_v17 }
 0x343   :  { %v4480_v12 = vsel %vm8497_vm8, %v8264_v58, %v4477_v55  ;;  %6220 = vrsqrt.f32 %v6499_v54  ;;  %v4608_v24 = vshrl.u32 %v4607_v33, 30  ;;  %v6215_v3 = vpop.eup %6214  ;;  %vm4510_vm15 = vcmp.lt.s32.totalorder %v8296_v48, 0 }
 0x344   :  { %v4482_v30 = vmul.f32 %v4480_v12, %v4480_v12  ;;  %v674_v40 = vmul.f32 0.6931472, %v6215_v3  ;;  %6222 = vpow2.f32 %v946_v38  ;;  %vm4499_vm12 = vcmp.lt.s32.totalorder %v4498_v52, 2 }
 0x345   :  { %v4609_v60 = vshll.u32 %v4608_v24, 30  ;;  %v4632_v55 = vsub.s32 4, %v4608_v24  ;;  %vm4500_vm13 = vcmp.eq.s32.totalorder %v4498_v52, 0  ;;  %v4602_v3 = vadd.s32 %v8484_v10, %v8481_v42 }
 0x346   :  { %v4483_v51 = vmul.f32 -0.001358992, %v4482_v30  ;;  %v4490_v41 = vmul.f32 -0.00019511016, %v4482_v30  ;;  %vm4503_vm1 = vcmp.eq.s32.totalorder %v4498_v52, 2  ;;  %v240_v38 = vmul.f32 %v8473_v2, %v239_v63 }
 0x347   :  { %v6217_v27 = vpop.eup %6216  ;;  %v4610_v28 = vsub.s32 %v4606_v5, %v4609_v60  ;;  %v4633_v56 = vsel %vm4510_vm15, %v4632_v55, %v4608_v24  ;;  %vm242_vm2 = vweird.f32 %v8473_v2  ;;  %vm111_vm6 = vcmp.gt.f32.partialorder %v8450_v4, 0.99998 }
 0x348   :  { %v6219_v43 = vpop.eup %6218  ;;  %v4484_v23 = vadd.f32 0.041655596, %v4483_v51  ;;  %v4491_v47 = vadd.f32 0.008332121, %v4490_v41  ;;  %v714_v6 = vmul.f32 0.6931472, %v6217_v27  ;;  %vm243_vm4 = vmor %vm241_vm11, %vm242_vm2 }
 0x349   :  { %v716_v31 = vmul.f32 0.6931472, %v6219_v43  ;;  %v8512_v19 = vpop.eup %6220  ;;  %vm4611_vm9 = vcmp.lt.s32.totalorder %v4610_v28, 0  ;;  %v4612_v35 = vsub.s32 0, %v4610_v28 }
 0x34a   :  { %v4485_v21 = vmul.f32 %v4484_v23, %v4482_v30  ;;  %v4492_v15 = vmul.f32 %v4491_v47, %v4482_v30  ;;  %v8514_v26 = vsub.f32 %v674_v40, %v714_v6  ;;  %v166_v20 = vmul.f32 %v8512_v19, %v6499_v54 }
 0x34b   :  { %v4613_v9 = vsel %vm4611_vm9, %v4612_v35, %v4610_v28  ;;  %v8521_v59 = vsub.f32 %v674_v40, %v716_v31 }
 0x34c   :  { %v4486_v49 = vadd.f32 -0.4999988, %v4485_v21  ;;  %v4493_v62 = vadd.f32 -0.16666654, %v4492_v15  ;;  %v4614_v46 = vclz %v4613_v9  ;;  %v809_v50 = vmul.f32 %v6507_v32, %v8514_v26 }
 0x34d   :  { %v810_v17 = vmul.f32 %v6509_v34, %v8521_v59  ;;  %v10715_v9 = vand.u32 2147483647, %v8296_v48 }
 0x34e   :  { %v4487_v29 = vmul.f32 %v4486_v49, %v4482_v30  ;;  %v4494_v11 = vmul.f32 %v4493_v62, %v4482_v30  ;;  %v6078_v5 = vadd.s32 4294967294, %v4614_v46  ;;  %v8527_v33 = vadd.f32 %v6513_v37, %v809_v50 }
 0x34f   :  { %v8542_v6 = vadd.f32 %v6517_v39, %v810_v17  ;;  %v167_v49 = vmul.f32 %v8512_v19, %v166_v20  ;;  %vm8552_vm3 = vcmp.le.f32.partialorder %v10715_v9, 0.7853982 }
 0x350   :  { %v4488_v44 = vadd.f32 1.0, %v4487_v29  ;;  %v4495_v36 = vadd.f32 1.0, %v4494_v11  ;;  %vm6079_vm0 = vcmp.lt.s32.totalorder %v6078_v5, 0  ;;  %v2198_v60 = vand.u32 2147483647, %v8527_v33 }
 0x351   :  { %v4617_v45 = vsel %vm6079_vm0, 0, %v6078_v5  ;;  %v2201_v53 = vand.u32 2139095040, %v8527_v33  ;;  %v948_v29 = vmul.f32 1.442695, %v893_v61  ;;  %v4635_v58 = vsel %vm8552_vm3, 0, %v4633_v56 }
 0x352   :  { %v4496_v13 = vmul.f32 %v4495_v36, %v4480_v12  ;;  %v4504_v30 = vxor.u32 2147483648, %v4488_v44  ;;  %v4618_v51 = vsub.s32 32, %v4617_v45  ;;  %v4622_v41 = vsub.s32 4294967266, %v4617_v45  ;;  %v6223_v12 = vpop.eup %6222 }
 0x353   :  { %v4619_v43 = vshll.u32 %v4610_v28, %v4617_v45  ;;  %v2205_v47 = vand.u32 8388607, %v2198_v60  ;;  %v2202_v40 = vshrl.u32 %v2201_v53, 23  ;;  %v2355_v50 = vand.u32 2139095040, %v8542_v6 }
 0x354   :  { %v4501_v27 = vxor.u32 2147483648, %v4496_v13  ;;  %v4620_v1 = vshrl.u32 %v4602_v3, %v4618_v51  ;;  %v4623_v23 = vadd.s32 127, %v4622_v41  ;;  %v4505_v10 = vsel %vm4503_vm1, %v4504_v30, %v4496_v13 }
 0x355   :  { %v2206_v15 = vor.u32 8388608, %v2205_v47  ;;  %v6032_v35 = vadd.s32 4294967169, %v2202_v40  ;;  %v2352_v20 = vand.u32 2147483647, %v8542_v6  ;;  %v2356_v36 = vshrl.u32 %v2355_v50, 23 }
 0x356   :  { %v4502_v42 = vsel %vm4500_vm13, %v4488_v44, %v4501_v27  ;;  %v4621_v21 = vor.u32 %v4620_v1, %v4619_v43  ;;  %v4624_v24 = vshll.u32 %v4623_v23, 23  ;;  %v244_v61 = vsel %vm243_vm4, %v8473_v2, %v240_v38 }
 0x357   :  { %v4506_v31 = vsel %vm4499_vm12, %v4502_v42, %v4505_v10  ;;  %v2208_v11 = vadd.s32 1, %v6032_v35  ;;  %v8559_v44 = vshll.u32 %v2206_v15, 8  ;;  %v8565_v30 = vmul.f32 0.5, %v167_v49 }
 0x358   :  { %v4507_v28 = vsel %vm4497_vm10, nan, %v4506_v31  ;;  %v4625_v52 = vor.u32 4788187, %v4624_v24  ;;  %v4628_v5 = vcvt.s32.f32 %v4621_v21  ;;  %6224 = vpow2.f32 %v948_v29 }
 0x359   :  { %v5916_v62 = vmul.f32 %v6223_v12, %v4507_v28  ;;  %vm2209_vm14 = vcmp.gt.s32.totalorder %v2208_v11, 0  ;;  %v8567_v45 = vand.u32 3, %v4635_v58  ;;  %v8570_v51 = vand.u32 65535, %v8559_v44 }
 0x35a   :  { %v4626_v63 = vand.u32 2147483647, %v4625_v52  ;;  %v2210_v13 = vsel %vm2209_vm14, %v2208_v11, 0  ;;  %v8574_v41 = vand.u32 8388607, %v2352_v20  ;;  %v6035_v12 = vadd.s32 4294967169, %v2356_v36 }
 0x35b   :  { %5948 = vst [vmem:[#allocation2 + $0xb0] sm:$0xff] %v5916_v62  ;;  %v2212_v17 = vand.u32 31, %v2210_v13  ;;  %v287_v27 = vmul.f32 0.99999, %v244_v61  ;;  %v8576_v56 = vshrl.u32 %v2210_v13, 5  ;;  %vm4654_vm11 = vcmp.eq.s32.totalorder %v8567_v45, 0 }
 0x35c   :  { %v4629_v55 = vmul.f32 %v4628_v5, %v4626_v63  ;;  %v2362_v13 = vadd.s32 1, %v6035_v12  ;;  %vm4657_vm12 = vcmp.eq.s32.totalorder %v8567_v45, 2  ;;  %vm4653_vm13 = vcmp.lt.s32.totalorder %v8567_v45, 2 }
 0x35d   :  { %v2213_v2 = vsub.s32 32, %v2212_v17  ;;  %v2215_v53 = vshll.u32 %v6336_v16, %v2212_v17  ;;  %v2218_v1 = vshll.u32 %v6337_v18, %v2212_v17  ;;  %v2221_v23 = vshll.u32 %v6338_v22, %v2212_v17 }
 0x35e   :  { %v4630_v3 = vxor.u32 2147483648, %v4629_v55  ;;  %v2224_v47 = vshll.u32 %v6339_v25, %v2212_v17  ;;  %v2227_v31 = vshll.u32 %v10689_v8, %v2212_v17  ;;  %v8597_v35 = vpop.eup %6224  ;;  %vm2230_vm5 = vcmp.lt.s32.totalorder %v8576_v56, 1 }
 0x35f   :  { %v2216_v10 = vshrl.u32 %v6337_v18, %v2213_v2  ;;  %v2219_v40 = vshrl.u32 %v6338_v22, %v2213_v2  ;;  %v2222_v24 = vshrl.u32 %v6339_v25, %v2213_v2  ;;  %v2225_v15 = vshrl.u32 %v10689_v8, %v2213_v2 }
 0x360   :  { %v4631_v43 = vsel %vm4510_vm15, %v4630_v3, %v4629_v55  ;;  %v2228_v28 = vshrl.u32 %v10690_v0, %v2213_v2  ;;  %v2214_v38 = vshrl.u32 %v6336_v16, %v2213_v2  ;;  %vm2231_vm7 = vcmp.lt.s32.totalorder %v8576_v56, 2 }
 0x361   :  { %v8587_v42 = vsel %vm8552_vm3, %v8296_v48, %v4631_v43  ;;  %v2217_v49 = vor.u32 %v2216_v10, %v2215_v53  ;;  %v2220_v62 = vor.u32 %v2219_v40, %v2218_v1  ;;  %v2223_v52 = vor.u32 %v2222_v24, %v2221_v23 }
 0x362   :  { %v4636_v21 = vmul.f32 %v8587_v42, %v8587_v42  ;;  %v2226_v29 = vor.u32 %v2225_v15, %v2224_v47  ;;  %v2229_v58 = vor.u32 %v2228_v28, %v2227_v31  ;;  %vm2232_vm8 = vcmp.lt.s32.totalorder %v8576_v56, 3 }
 0x363   :  { %vm2233_vm9 = vcmp.lt.s32.totalorder %v8576_v56, 4  ;;  %v2238_v5 = vsel %vm2230_vm5, %v2217_v49, %v2220_v62  ;;  %v2242_v61 = vsel %vm2230_vm5, %v2220_v62, %v2223_v52  ;;  %v2234_v2 = vsel %vm2230_vm5, %v2214_v38, %v2217_v49 }
 0x364   :  { %v4637_v9 = vmul.f32 -0.001358992, %v4636_v21  ;;  %v4644_v46 = vmul.f32 -0.00019511016, %v4636_v21  ;;  %v2235_v63 = vsel %vm2233_vm9, %v2223_v52, 2102212464  ;;  %vm4651_vm15 = vweird.f32 %v8296_v48 }
 0x365   :  { %v2239_v36 = vsel %vm2233_vm9, %v2226_v29, 920167782  ;;  %v2243_v55 = vsel %vm2233_vm9, %v2229_v58, 1326507024  ;;  %v2236_v43 = vsel %vm2232_vm8, %v2220_v62, %v2235_v63  ;;  %vm2363_vm10 = vcmp.gt.s32.totalorder %v2362_v13, 0 }
 0x366   :  { %v4638_v11 = vadd.f32 0.041655596, %v4637_v9  ;;  %v4645_v50 = vadd.f32 0.008332121, %v4644_v46  ;;  %v2240_v53 = vsel %vm2232_vm8, %v2223_v52, %v2239_v36  ;;  %v2244_v23 = vsel %vm2232_vm8, %v2226_v29, %v2243_v55 }
 0x367   :  { %v2241_v1 = vsel %vm2231_vm7, %v2238_v5, %v2240_v53  ;;  %v2245_v10 = vsel %vm2231_vm7, %v2242_v61, %v2244_v23  ;;  %v2248_v31 = vshrl.u32 %v8559_v44, 16  ;;  %v2360_v62 = vor.u32 8388608, %v8574_v41 }
 0x368   :  { %v4639_v17 = vmul.f32 %v4638_v11, %v4636_v21  ;;  %v4646_v3 = vmul.f32 %v4645_v50, %v4636_v21  ;;  %v2271_v40 = vand.u32 65535, %v2241_v1  ;;  %v2249_v24 = vand.u32 65535, %v2245_v10 }
 0x369   :  { %v2250_v15 = vshrl.u32 %v2245_v10, 16  ;;  %v2272_v28 = vshrl.u32 %v2241_v1, 16  ;;  %v8628_v9 = vsel %vm111_vm6, %v287_v27, 1.0  ;;  %v8633_v46 = vsel %vm2231_vm7, %v2234_v2, %v2236_v43 }
 0x36a   :  { %v4640_v47 = vadd.f32 -0.4999988, %v4639_v17  ;;  %v4647_v12 = vadd.f32 -0.16666654, %v4646_v3  ;;  %v2253_v29 = vmul.u32 %v2249_v24, %v2248_v31  ;;  %v2364_v58 = vsel %vm2363_vm10, %v2362_v13, 0 }
 0x36b   :  { %v2252_v52 = vmul.u32 %v2250_v15, %v8570_v51  ;;  %v2274_v50 = vmul.u32 %v2272_v28, %v8570_v51  ;;  %v2275_v63 = vmul.u32 %v2271_v40, %v2248_v31  ;;  %v2251_v5 = vmul.u32 %v2249_v24, %v8570_v51 }
 0x36c   :  { %v4641_v38 = vmul.f32 %v4640_v47, %v4636_v21  ;;  %v4648_v49 = vmul.f32 %v4647_v12, %v4636_v21  ;;  %v2254_v27 = vmul.u32 %v2250_v15, %v2248_v31  ;;  %v2273_v61 = vmul.u32 %v2271_v40, %v8570_v51 }
 0x36d   :  { %v2255_v36 = vshll.u32 %v2252_v52, 16  ;;  %v2276_v17 = vmul.u32 %v2272_v28, %v2248_v31  ;;  %v2277_v3 = vshll.u32 %v2274_v50, 16  ;;  %v2256_v2 = vshrl.u32 %v2252_v52, 16 }
 0x36e   :  { %v4642_v21 = vadd.f32 1.0, %v4641_v38  ;;  %v4649_v11 = vadd.f32 1.0, %v4648_v49  ;;  %v2257_v53 = vshll.u32 %v2253_v29, 16  ;;  %v2279_v23 = vshll.u32 %v2275_v63, 16 }
 0x36f   :  { %vm2259_vm0 = vc.u32 %v2251_v5, %v2255_v36  ;;  %v2261_v13 = vadd.s32 %v2255_v36, %v2251_v5  ;;  %vm2281_vm1 = vc.u32 %v2273_v61, %v2277_v3  ;;  %v2283_v10 = vadd.s32 %v2277_v3, %v2273_v61 }
 0x370   :  { %v4650_v56 = vmul.f32 %v4649_v11, %v8587_v42  ;;  %v4658_v55 = vxor.u32 2147483648, %v4642_v21  ;;  %v2260_v1 = vsel %vm2259_vm0, 1, %v6342_v57  ;;  %v2282_v12 = vsel %vm2281_vm1, 1, %v6342_v57 }
 0x371   :  { %v2262_v47 = vadd.s32 %v2260_v1, %v2254_v27  ;;  %vm2263_vm2 = vc.u32 %v2261_v13, %v2257_v53  ;;  %v2284_v31 = vadd.s32 %v2282_v12, %v2276_v17  ;;  %v2258_v15 = vshrl.u32 %v2253_v29, 16 }
 0x372   :  { %v4655_v43 = vxor.u32 2147483648, %v4650_v56  ;;  %v4659_v42 = vsel %vm4657_vm12, %v4658_v55, %v4650_v56  ;;  %v2264_v40 = vsel %vm2263_vm2, 1, %v6342_v57  ;;  %vm2285_vm3 = vc.u32 %v2283_v10, %v2279_v23 }
 0x373   :  { %v2266_v28 = vadd.s32 %v2264_v40, %v2262_v47  ;;  %v2278_v49 = vshrl.u32 %v2274_v50, 16  ;;  %v2286_v52 = vsel %vm2285_vm3, 1, %v6342_v57  ;;  %v2366_v11 = vand.u32 31, %v2364_v58 }
 0x374   :  { %v4656_v51 = vsel %vm4654_vm11, %v4642_v21, %v4655_v43  ;;  %v2280_v27 = vshrl.u32 %v2275_v63, 16  ;;  %v2288_v36 = vadd.s32 %v2286_v52, %v2284_v31  ;;  %v2287_v61 = vadd.s32 %v2283_v10, %v2279_v23 }
 0x375   :  { %v4660_v24 = vsel %vm4653_vm13, %v4656_v51, %v4659_v42  ;;  %v2267_v5 = vadd.s32 %v2266_v28, %v2256_v2  ;;  %v8654_v56 = vshrl.u32 %v2364_v58, 5  ;;  %v2367_v45 = vsub.s32 32, %v2366_v11 }
 0x376   :  { %v4661_v38 = vsel %vm4651_vm15, nan, %v4660_v24  ;;  %v2369_v29 = vshll.u32 %v6336_v16, %v2366_v11  ;;  %v2289_v17 = vadd.s32 %v2288_v36, %v2278_v49  ;;  %v2372_v48 = vshll.u32 %v6337_v18, %v2366_v11 }
 0x377   :  { %v5917_v21 = vmul.f32 %v8597_v35, %v4661_v38  ;;  %v2268_v55 = vadd.s32 %v2267_v5, %v2258_v15  ;;  %v2375_v50 = vshll.u32 %v6338_v22, %v2366_v11  ;;  %v2370_v3 = vshrl.u32 %v6337_v18, %v2367_v45 }
 0x378   :  { %v2373_v35 = vshrl.u32 %v6338_v22, %v2367_v45  ;;  %v2376_v63 = vshrl.u32 %v6339_v25, %v2367_v45  ;;  %v2378_v2 = vshll.u32 %v6339_v25, %v2366_v11  ;;  %v2290_v58 = vadd.s32 %v2289_v17, %v2280_v27 }
 0x379   :  { %5949 = vst [vmem:[#allocation2 + $0xb8] sm:$0xff] %v5917_v21  ;;  %vm2293_vm4 = vc.u32 %v2268_v55, %v2287_v61  ;;  %v2379_v53 = vshrl.u32 %v10689_v8, %v2367_v45  ;;  %v2381_v13 = vshll.u32 %v10689_v8, %v2366_v11  ;;  %v2371_v43 = vor.u32 %v2370_v3, %v2369_v29 }
 0x37a   :  { %v2374_v1 = vor.u32 %v2373_v35, %v2372_v48  ;;  %v2377_v23 = vor.u32 %v2376_v63, %v2375_v50  ;;  %v2382_v47 = vshrl.u32 %v10690_v0, %v2367_v45  ;;  %v2294_v12 = vadd.s32 1, %v2290_v58 }
 0x37b   :  { %v2380_v10 = vor.u32 %v2379_v53, %v2378_v2  ;;  %vm2384_vm14 = vcmp.lt.s32.totalorder %v8654_v56, 1  ;;  %v8669_v51 = vshll.u32 %v2360_v62, 8  ;;  %v2291_v42 = vmul.u32 %v8559_v44, %v8633_v46 }
 0x37c   :  { %v2383_v40 = vor.u32 %v2382_v47, %v2381_v13  ;;  %vm2387_vm5 = vcmp.lt.s32.totalorder %v8654_v56, 4  ;;  %v2392_v31 = vsel %vm2384_vm14, %v2371_v43, %v2374_v1  ;;  %v2295_v24 = vsel %vm2293_vm4, %v2294_v12, %v2290_v58 }
 0x37d   :  { %vm2386_vm6 = vcmp.lt.s32.totalorder %v8654_v56, 3  ;;  %v2393_v15 = vsel %vm2387_vm5, %v2380_v10, 920167782  ;;  %v2396_v41 = vsel %vm2384_vm14, %v2374_v1, %v2377_v23  ;;  %v2296_v62 = vadd.s32 %v2295_v24, %v2291_v42 }
 0x37e   :  { %vm2385_vm7 = vcmp.lt.s32.totalorder %v8654_v56, 2  ;;  %v2394_v44 = vsel %vm2386_vm6, %v2377_v23, %v2393_v15  ;;  %v2397_v46 = vsel %vm2387_vm5, %v2383_v40, 1326507024  ;;  %v2401_v49 = vand.u32 65535, %v8669_v51 }
 0x37f   :  { %v2395_v28 = vsel %vm2385_vm7, %v2392_v31, %v2394_v44  ;;  %v2398_v38 = vsel %vm2386_vm6, %v2380_v10, %v2397_v46  ;;  %v319_v52 = vmul.f32 %v8628_v9, %v8628_v9  ;;  %v2297_v11 = vadd.s32 536870912, %v2296_v62 }
 0x380   :  { %v2399_v21 = vsel %vm2385_vm7, %v2396_v41, %v2398_v38  ;;  %v2425_v5 = vand.u32 65535, %v2395_v28  ;;  %v2426_v27 = vshrl.u32 %v2395_v28, 16  ;;  %v2402_v36 = vshrl.u32 %v8669_v51, 16 }
 0x381   :  { %v2403_v29 = vand.u32 65535, %v2399_v21  ;;  %v2404_v17 = vshrl.u32 %v2399_v21, 16  ;;  %v8696_v48 = vshrl.u32 %v2297_v11, 30  ;;  %v169_v3 = vsub.f32 1.5, %v8565_v30 }
 0x382   :  { %v2428_v50 = vmul.u32 %v2426_v27, %v2401_v49  ;;  %v2389_v35 = vsel %vm2387_vm5, %v2377_v23, 2102212464  ;;  %v2368_v53 = vshrl.u32 %v6336_v16, %v2367_v45  ;;  %v2429_v13 = vmul.u32 %v2425_v5, %v2402_v36 }
 0x383   :  { %v2406_v63 = vmul.u32 %v2404_v17, %v2401_v49  ;;  %v2407_v2 = vmul.u32 %v2403_v29, %v2402_v36  ;;  %v2299_v58 = vshll.u32 %v8696_v48, 30  ;;  %v335_v47 = vmul.f32 %v319_v52, %v8450_v4 }
 0x384   :  { %v2292_v12 = vadd.s32 %v2287_v61, %v2268_v55  ;;  %v2405_v10 = vmul.u32 %v2403_v29, %v2401_v49  ;;  %v2431_v40 = vshll.u32 %v2428_v50, 16  ;;  %v2388_v30 = vsel %vm2384_vm14, %v2368_v53, %v2371_v43 }
 0x385   :  { %v2409_v42 = vshll.u32 %v2406_v63, 16  ;;  %v8704_v31 = vsub.s32 %v2296_v62, %v2299_v58  ;;  %v2390_v23 = vsel %vm2386_vm6, %v2374_v1, %v2389_v35  ;;  %v2427_v24 = vmul.u32 %v2425_v5, %v2401_v49 }
 0x386   :  { %v2408_v15 = vmul.u32 %v2404_v17, %v2402_v36  ;;  %v2411_v41 = vshll.u32 %v2407_v2, 16  ;;  %vm171_vm9 = vweird.f32 %v6499_v54  ;;  %v2433_v55 = vshll.u32 %v2429_v13, 16 }
 0x387   :  { %vm2413_vm8 = vc.u32 %v2405_v10, %v2409_v42  ;;  %v2415_v45 = vadd.s32 %v2409_v42, %v2405_v10  ;;  %vm2301_vm10 = vcmp.lt.s32.totalorder %v8704_v31, 0  ;;  %v2302_v4 = vsub.s32 0, %v8704_v31 }
 0x388   :  { %v2414_v61 = vsel %vm2413_vm8, 1, %v6342_v57  ;;  %vm2435_vm12 = vc.u32 %v2427_v24, %v2431_v40  ;;  %v2437_v43 = vadd.s32 %v2431_v40, %v2427_v24  ;;  %v2391_v44 = vsel %vm2385_vm7, %v2388_v30, %v2390_v23  ;;  %v509_v23 = vpop.f32.mrf.mxu3 }
 0x389   :  { %v2416_v62 = vadd.s32 %v2414_v61, %v2408_v15  ;;  %vm2417_vm11 = vc.u32 %v2415_v45, %v2411_v41  ;;  %v2303_v1 = vsel %vm2301_vm10, %v2302_v4, %v8704_v31  ;;  %v2430_v46 = vmul.u32 %v2426_v27, %v2402_v36  ;;  %v444_v36 = vpop.f32.mrf.mxu2 }
 0x38a   :  { %v533_v28 = vadd.f32 1.0, %v335_v47  ;;  %v2304_v38 = vclz %v2303_v1  ;;  %v2418_v49 = vsel %vm2417_vm11, 1, %v6342_v57  ;;  %v2436_v52 = vsel %vm2435_vm12, 1, %v6342_v57 }
 0x38b   :  { %vm2439_vm13 = vc.u32 %v2437_v43, %v2433_v55  ;;  %v2410_v11 = vshrl.u32 %v2406_v63, 16  ;;  %v2420_v21 = vadd.s32 %v2418_v49, %v2416_v62  ;;  %v2438_v5 = vadd.s32 %v2436_v52, %v2430_v46 }
 0x38c   :  { %v2440_v29 = vsel %vm2439_vm13, 1, %v6342_v57  ;;  %v6033_v17 = vadd.s32 4294967294, %v2304_v38  ;;  %v2412_v35 = vshrl.u32 %v2407_v2, 16  ;;  %v2432_v58 = vshrl.u32 %v2428_v50, 16 }
 0x38d   :  { %v549_v53 = vmul.f32 2.0, %v8628_v9  ;;  %v2421_v56 = vadd.s32 %v2420_v21, %v2410_v11  ;;  %v2434_v10 = vshrl.u32 %v2429_v13, 16  ;;  %v2442_v27 = vadd.s32 %v2440_v29, %v2438_v5 }
 0x38e   :  { %v661_v42 = vsub.f32 1.0, %v335_v47  ;;  %vm6034_vm15 = vcmp.lt.s32.totalorder %v6033_v17, 0  ;;  %v8721_v40 = vadd.s32 %v2437_v43, %v2433_v55  ;;  %vm172_vm0 = vweird.f32 %v8512_v19 }
 0x38f   :  { %v577_v30 = vmul.f32 %v549_v53, %v444_v36  ;;  %v2307_v63 = vsel %vm6034_vm15, 0, %v6033_v17  ;;  %v8724_v24 = vadd.s32 %v2421_v56, %v2412_v35  ;;  %v2443_v15 = vadd.s32 %v2442_v27, %v2432_v58  ;;  %vm8734_vm2 = vmor %vm171_vm9, %vm172_vm0 }
 0x390   :  { %v578_v2 = vmul.f32 %v549_v53, %v509_v23  ;;  %v2308_v50 = vsub.s32 32, %v2307_v63  ;;  %v2312_v41 = vsub.s32 4294967266, %v2307_v63  ;;  %v170_v13 = vmul.f32 %v8512_v19, %v169_v3  ;;  %v8743_v53 = vpop.xlane.xlu1 %91 }
 0x391   :  { %v609_v9 = vsub.f32 %v533_v28, %v577_v30  ;;  %v2309_v45 = vshll.u32 %v8704_v31, %v2307_v63  ;;  %v2444_v47 = vadd.s32 %v2443_v15, %v2434_v10  ;;  %6226 = vlog2.f32 %v661_v42 }
 0x392   :  { %v610_v4 = vsub.f32 %v533_v28, %v578_v2  ;;  %v2310_v61 = vshrl.u32 %v2292_v12, %v2308_v50  ;;  %v2313_v55 = vadd.s32 127, %v2312_v41  ;;  %vm2447_vm1 = vc.u32 %v8724_v24, %v8721_v40 }
 0x393   :  { %v641_v62 = vmax.f32 %v609_v9, 1e-12  ;;  %v2448_v3 = vadd.s32 1, %v2444_v47  ;;  %v2445_v28 = vmul.u32 %v8669_v51, %v2391_v44  ;;  %v174_v38 = vsel %vm8734_vm2, %v8512_v19, %v170_v13 }
 0x394   :  { %v642_v1 = vmax.f32 %v610_v4, 1e-12  ;;  %v2311_v31 = vor.u32 %v2310_v61, %v2309_v45  ;;  %v2314_v46 = vshll.u32 %v2313_v55, 23  ;;  %v280_v17 = vmul.f32 0.99999, %v174_v38 }
 0x395   :  { %6228 = vlog2.f32 %v641_v62  ;;  %v2449_v12 = vsel %vm2447_vm1, %v2448_v3, %v2444_v47  ;;  %v878_v35 = vmul.f32 7.5, %v8514_v26  ;;  %v2322_v44 = vsub.s32 4, %v8696_v48 }
 0x396   :  { %v2315_v49 = vor.u32 4788187, %v2314_v46  ;;  %v2450_v52 = vadd.s32 %v2449_v12, %v2445_v28  ;;  %6230 = vlog2.f32 %v642_v1  ;;  %v2318_v5 = vcvt.s32.f32 %v2311_v31  ;;  %v423_v46 = vpop.f32.mrf.mxu0 }
 0x397   :  { %v6227_v11 = vpop.eup %6226  ;;  %v879_v56 = vmul.f32 7.5, %v8521_v59  ;;  %vm104_vm3 = vcmp.gt.f32.partialorder %v6499_v54, 0.99998  ;;  %6232 = vrsqrt.f32 %v8743_v53  ;;  %v918_v26 = vmul.f32 1.442695, %v878_v35 }
 0x398   :  { %v2316_v21 = vand.u32 2147483647, %v2315_v49  ;;  %v2451_v29 = vadd.s32 536870912, %v2450_v52  ;;  %v690_v19 = vmul.f32 0.6931472, %v6227_v11  ;;  %v296_v30 = vsel %vm104_vm3, %v280_v17, 1.0 }
 0x399   :  { %vm2200_vm4 = vcmp.lt.s32.totalorder %v8527_v33, 0  ;;  %vm8757_vm14 = vcmp.le.f32.partialorder %v2198_v60, 0.7853982  ;;  %v920_v2 = vmul.f32 1.442695, %v879_v56  ;;  %v312_v45 = vmul.f32 %v296_v30, %v296_v30 }
 0x39a   :  { %v2319_v51 = vmul.f32 %v2318_v5, %v2316_v21  ;;  %v8747_v10 = vshrl.u32 %v2451_v29, 30  ;;  %v2323_v41 = vsel %vm2200_vm4, %v2322_v44, %v8696_v48  ;;  %6234 = vpow2.f32 %v918_v26 }
 0x39b   :  { %v6229_v58 = vpop.eup %6228  ;;  %v2325_v61 = vsel %vm8757_vm14, 0, %v2323_v41  ;;  %6236 = vpow2.f32 %v920_v2  ;;  %v8784_v31 = vmul.f32 %v312_v45, %v6499_v54  ;;  %v8786_v28 = vmul.f32 2.0, %v296_v30 }
 0x39c   :  { %v746_v27 = vmul.f32 0.6931472, %v6229_v58  ;;  %v2320_v36 = vxor.u32 2147483648, %v2319_v51  ;;  %v2453_v42 = vshll.u32 %v8747_v10, 30  ;;  %v6231_v23 = vpop.eup %6230  ;;  %v8791_v11 = vand.u32 3, %v2325_v61 }
 0x39d   :  { %v748_v4 = vmul.f32 0.6931472, %v6231_v23  ;;  %v8781_v3 = vpop.eup %6232  ;;  %vm2354_vm6 = vcmp.lt.s32.totalorder %v8542_v6, 0  ;;  %vm8797_vm7 = vcmp.le.f32.partialorder %v2352_v20, 0.7853982  ;;  %v563_v58 = vmul.f32 %v8786_v28, %v423_v46 }
 0x39e   :  { %v8753_v63 = vsub.f32 %v690_v19, %v746_v27  ;;  %v2321_v15 = vsel %vm2200_vm4, %v2320_v36, %v2319_v51  ;;  %v8761_v50 = vsub.s32 %v2450_v52, %v2453_v42  ;;  %v2476_v44 = vsub.s32 4, %v8747_v10 }
 0x39f   :  { %v8767_v9 = vsel %vm8757_vm14, %v8527_v33, %v2321_v15  ;;  %v8789_v52 = vsub.f32 %v690_v19, %v748_v4  ;;  %v8806_v19 = vadd.f32 1.0, %v8784_v31  ;;  %vm2344_vm9 = vcmp.eq.s32.totalorder %v8791_v11, 0 }
 0x3a0   :  { %v825_v13 = vmul.f32 %v6507_v32, %v8753_v63  ;;  %v2326_v60 = vmul.f32 %v8767_v9, %v8767_v9  ;;  %vm2455_vm5 = vcmp.lt.s32.totalorder %v8761_v50, 0  ;;  %v2456_v47 = vsub.s32 0, %v8761_v50  ;;  %v6235_v51 = vpop.eup %6234 }
 0x3a1   :  { %v826_v20 = vmul.f32 %v6509_v34, %v8789_v52  ;;  %v8810_v30 = vpop.eup %6236  ;;  %v2446_v23 = vadd.s32 %v8721_v40, %v8724_v24  ;;  %vm2343_vm10 = vcmp.lt.s32.totalorder %v8791_v11, 2  ;;  %v595_v45 = vsub.f32 %v8806_v19, %v563_v58 }
 0x3a2   :  { %v8776_v48 = vadd.f32 %v6513_v37, %v825_v13  ;;  %v2327_v55 = vmul.f32 -0.001358992, %v2326_v60  ;;  %v2334_v62 = vmul.f32 -0.00019511016, %v2326_v60  ;;  %v2457_v43 = vsel %vm2455_vm5, %v2456_v47, %v8761_v50 }
 0x3a3   :  { %v2458_v1 = vclz %v2457_v43  ;;  %vm2341_vm11 = vweird.f32 %v8527_v33  ;;  %v2477_v40 = vsel %vm2354_vm6, %v2476_v44, %v8747_v10  ;;  %v8823_v24 = vadd.f32 %v6517_v39, %v826_v20 }
 0x3a4   :  { %v2328_v12 = vadd.f32 0.041655596, %v2327_v55  ;;  %v2335_v38 = vadd.f32 0.008332121, %v2334_v62  ;;  %v4662_v49 = vand.u32 2147483647, %v8776_v48  ;;  %vm2495_vm14 = vweird.f32 %v8542_v6 }
 0x3a5   :  { %v6036_v21 = vadd.s32 4294967294, %v2458_v1  ;;  %v4665_v5 = vand.u32 2139095040, %v8776_v48  ;;  %vm2347_vm12 = vcmp.eq.s32.totalorder %v8791_v11, 2  ;;  %v4819_v44 = vand.u32 2139095040, %v8823_v24 }
 0x3a6   :  { %v2329_v29 = vmul.f32 %v2328_v12, %v2326_v60  ;;  %v2336_v17 = vmul.f32 %v2335_v38, %v2326_v60  ;;  %v4669_v35 = vand.u32 8388607, %v4662_v49  ;;  %v8827_v38 = vmax.f32 %v595_v45, 1e-12 }
 0x3a7   :  { %vm6037_vm8 = vcmp.lt.s32.totalorder %v6036_v21, 0  ;;  %v4666_v56 = vshrl.u32 %v4665_v5, 23  ;;  %v2479_v5 = vsel %vm8797_vm7, 0, %v2477_v40 }
 0x3a8   :  { %v2330_v27 = vadd.f32 -0.4999988, %v2329_v29  ;;  %v2337_v36 = vadd.f32 -0.16666654, %v2336_v17  ;;  %v2461_v42 = vsel %vm6037_vm8, 0, %v6036_v21  ;;  %v4670_v13 = vor.u32 8388608, %v4669_v35 }
 0x3a9   :  { %v2462_v26 = vsub.s32 32, %v2461_v42  ;;  %v2466_v59 = vsub.s32 4294967266, %v2461_v42  ;;  %v6080_v15 = vadd.s32 4294967169, %v4666_v56  ;;  %v2463_v47 = vshll.u32 %v8761_v50, %v2461_v42 }
 0x3aa   :  { %v2331_v2 = vmul.f32 %v2330_v27, %v2326_v60  ;;  %v2338_v41 = vmul.f32 %v2337_v36, %v2326_v60  ;;  %v8831_v10 = vshll.u32 %v4670_v13, 8  ;;  %6238 = vlog2.f32 %v8827_v38 }
 0x3ab   :  { %v2464_v4 = vshrl.u32 %v2446_v23, %v2462_v26  ;;  %v2467_v61 = vadd.s32 127, %v2466_v59  ;;  %v4672_v55 = vadd.s32 1, %v6080_v15 }
 0x3ac   :  { %v2332_v62 = vadd.f32 1.0, %v2331_v2  ;;  %v2339_v43 = vadd.f32 1.0, %v2338_v41 }
 0x3ad   :  { %v2465_v60 = vor.u32 %v2464_v4, %v2463_v47  ;;  %v2468_v1 = vshll.u32 %v2467_v61, 23  ;;  %vm4673_vm13 = vcmp.gt.s32.totalorder %v4672_v55, 0 }
 0x3ae   :  { %v2340_v46 = vmul.f32 %v2339_v43, %v8767_v9  ;;  %v2348_v50 = vxor.u32 2147483648, %v2332_v62  ;;  %v4674_v12 = vsel %vm4673_vm13, %v4672_v55, 0  ;;  %v8854_v43 = vand.u32 3, %v2479_v5 }
 0x3af   :  { %v2469_v21 = vor.u32 4788187, %v2468_v1  ;;  %v4676_v29 = vand.u32 31, %v4674_v12  ;;  %v2472_v35 = vcvt.s32.f32 %v2465_v60  ;;  %v8833_v58 = vshrl.u32 %v4674_v12, 5 }
 0x3b0   :  { %v2345_v17 = vxor.u32 2147483648, %v2340_v46  ;;  %v2349_v9 = vsel %vm2347_vm12, %v2348_v50, %v2340_v46  ;;  %v4816_v50 = vand.u32 2147483647, %v8823_v24  ;;  %vm2498_vm3 = vcmp.eq.s32.totalorder %v8854_v43, 0 }
 0x3b1   :  { %v2470_v56 = vand.u32 2147483647, %v2469_v21  ;;  %v4677_v27 = vsub.s32 32, %v4676_v29  ;;  %v4679_v36 = vshll.u32 %v6336_v16, %v4676_v29  ;;  %v4682_v20 = vshll.u32 %v6337_v18, %v4676_v29 }
 0x3b2   :  { %v2346_v42 = vsel %vm2344_vm9, %v2332_v62, %v2345_v17  ;;  %v4685_v23 = vshll.u32 %v6338_v22, %v4676_v29  ;;  %v4688_v26 = vshll.u32 %v6339_v25, %v4676_v29  ;;  %v4691_v41 = vshll.u32 %v10689_v8, %v4676_v29 }
 0x3b3   :  { %v2350_v59 = vsel %vm2343_vm10, %v2346_v42, %v2349_v9  ;;  %v2473_v15 = vmul.f32 %v2472_v35, %v2470_v56  ;;  %v4680_v2 = vshrl.u32 %v6337_v18, %v4677_v27  ;;  %v4683_v45 = vshrl.u32 %v6338_v22, %v4677_v27 }
 0x3b4   :  { %v2351_v13 = vsel %vm2341_vm11, nan, %v2350_v59  ;;  %v4686_v47 = vshrl.u32 %v6339_v25, %v4677_v27  ;;  %v4689_v4 = vshrl.u32 %v10689_v8, %v4677_v27  ;;  %v4692_v11 = vshrl.u32 %v10690_v0, %v4677_v27 }
 0x3b5   :  { %v5902_v61 = vmul.f32 %v6235_v51, %v2351_v13  ;;  %v2474_v55 = vxor.u32 2147483648, %v2473_v15  ;;  %v4681_v62 = vor.u32 %v4680_v2, %v4679_v36  ;;  %v4684_v40 = vor.u32 %v4683_v45, %v4682_v20 }
 0x3b6   :  { %v4687_v60 = vor.u32 %v4686_v47, %v4685_v23  ;;  %v4690_v1 = vor.u32 %v4689_v4, %v4688_v26  ;;  %v4693_v46 = vor.u32 %v4692_v11, %v4691_v41  ;;  %vm4694_vm15 = vcmp.lt.s32.totalorder %v8833_v58, 1 }
 0x3b7   :  { %5934 = vst [vmem:[#allocation2 + $0x40] sm:$0xff] %v5902_v61  ;;  %v2475_v33 = vsel %vm2354_vm6, %v2474_v55, %v2473_v15  ;;  %vm4697_vm0 = vcmp.lt.s32.totalorder %v8833_v58, 4  ;;  %v4702_v12 = vsel %vm4694_vm15, %v4681_v62, %v4684_v40  ;;  %v4711_v21 = vand.u32 65535, %v8831_v10 }
 0x3b8   :  { %v8863_v51 = vsel %vm8797_vm7, %v8542_v6, %v2475_v33  ;;  %vm4696_vm1 = vcmp.lt.s32.totalorder %v8833_v58, 3  ;;  %v4703_v29 = vsel %vm4697_vm0, %v4690_v1, 920167782  ;;  %v4820_v17 = vshrl.u32 %v4819_v44, 23 }
 0x3b9   :  { %v2480_v5 = vmul.f32 %v8863_v51, %v8863_v51  ;;  %vm4695_vm2 = vcmp.lt.s32.totalorder %v8833_v58, 2  ;;  %v4704_v54 = vsel %vm4696_vm1, %v4687_v60, %v4703_v29  ;;  %v4706_v35 = vsel %vm4694_vm15, %v4684_v40, %v4687_v60 }
 0x3ba   :  { %v4707_v9 = vsel %vm4697_vm0, %v4693_v46, 1326507024  ;;  %v4678_v42 = vshrl.u32 %v6336_v16, %v4677_v27  ;;  %v4705_v20 = vsel %vm4695_vm2, %v4702_v12, %v4704_v54  ;;  %v4699_v23 = vsel %vm4697_vm0, %v4687_v60, 2102212464 }
 0x3bb   :  { %v2481_v56 = vmul.f32 -0.001358992, %v2480_v5  ;;  %v2488_v36 = vmul.f32 -0.00019511016, %v2480_v5  ;;  %v4708_v44 = vsel %vm4696_vm1, %v4690_v1, %v4707_v9  ;;  %v4735_v26 = vand.u32 65535, %v4705_v20 }
 0x3bc   :  { %v4736_v59 = vshrl.u32 %v4705_v20, 16  ;;  %v4709_v41 = vsel %vm4695_vm2, %v4706_v35, %v4708_v44  ;;  %v4712_v13 = vshrl.u32 %v8831_v10, 16  ;;  %v4698_v45 = vsel %vm4694_vm15, %v4678_v42, %v4681_v62 }
 0x3bd   :  { %v2482_v15 = vadd.f32 0.041655596, %v2481_v56  ;;  %v2489_v2 = vadd.f32 0.008332121, %v2488_v36  ;;  %v4713_v27 = vand.u32 65535, %v4709_v41  ;;  %v4714_v47 = vshrl.u32 %v4709_v41, 16 }
 0x3be   :  { %v4738_v4 = vmul.u32 %v4736_v59, %v4711_v21  ;;  %v4700_v11 = vsel %vm4696_vm1, %v4684_v40, %v4699_v23  ;;  %v4739_v60 = vmul.u32 %v4735_v26, %v4712_v13  ;;  %v4737_v46 = vmul.u32 %v4735_v26, %v4711_v21 }
 0x3bf   :  { %v2483_v61 = vmul.f32 %v2482_v15, %v2480_v5  ;;  %v2490_v55 = vmul.f32 %v2489_v2, %v2480_v5  ;;  %v4716_v1 = vmul.u32 %v4714_v47, %v4711_v21  ;;  %v4717_v33 = vmul.u32 %v4713_v27, %v4712_v13 }
 0x3c0   :  { %v6083_v12 = vadd.s32 4294967169, %v4820_v17  ;;  %v4740_v35 = vmul.u32 %v4736_v59, %v4712_v13  ;;  %v4741_v9 = vshll.u32 %v4738_v4, 16  ;;  %v4715_v62 = vmul.u32 %v4713_v27, %v4711_v21 }
 0x3c1   :  { %v2484_v29 = vadd.f32 -0.4999988, %v2483_v61  ;;  %v2491_v54 = vadd.f32 -0.16666654, %v2490_v55  ;;  %v4718_v56 = vmul.u32 %v4714_v47, %v4712_v13  ;;  %v4719_v36 = vshll.u32 %v4716_v1, 16 }
 0x3c2   :  { %v4742_v42 = vshrl.u32 %v4738_v4, 16  ;;  %vm2497_vm4 = vcmp.lt.s32.totalorder %v8854_v43, 2  ;;  %v4721_v40 = vshll.u32 %v4717_v33, 16  ;;  %v4743_v23 = vshll.u32 %v4739_v60, 16 }
 0x3c3   :  { %v2485_v20 = vmul.f32 %v2484_v29, %v2480_v5  ;;  %v2492_v44 = vmul.f32 %v2491_v54, %v2480_v5  ;;  %vm4723_vm5 = vc.u32 %v4715_v62, %v4719_v36  ;;  %v4725_v17 = vadd.s32 %v4719_v36, %v4715_v62 }
 0x3c4   :  { %vm4745_vm6 = vc.u32 %v4737_v46, %v4741_v9  ;;  %v4747_v26 = vadd.s32 %v4741_v9, %v4737_v46  ;;  %v4724_v2 = vsel %vm4723_vm5, 1, %v6342_v57  ;;  %v4720_v61 = vshrl.u32 %v4716_v1, 16 }
 0x3c5   :  { %v2486_v59 = vadd.f32 1.0, %v2485_v20  ;;  %v2493_v15 = vadd.f32 1.0, %v2492_v44  ;;  %v4746_v21 = vsel %vm4745_vm6, 1, %v6342_v57  ;;  %v4726_v41 = vadd.s32 %v4724_v2, %v4718_v56 }
 0x3c6   :  { %vm4727_vm7 = vc.u32 %v4725_v17, %v4721_v40  ;;  %v4748_v13 = vadd.s32 %v4746_v21, %v4740_v35  ;;  %vm4749_vm8 = vc.u32 %v4747_v26, %v4743_v23  ;;  %v4826_v29 = vadd.s32 1, %v6083_v12 }
 0x3c7   :  { %v2494_v5 = vmul.f32 %v2493_v15, %v8863_v51  ;;  %v2502_v27 = vxor.u32 2147483648, %v2486_v59  ;;  %v4728_v47 = vsel %vm4727_vm7, 1, %v6342_v57  ;;  %v4750_v4 = vsel %vm4749_vm8, 1, %v6342_v57 }
 0x3c8   :  { %v4730_v55 = vadd.s32 %v4728_v47, %v4726_v41  ;;  %v4752_v46 = vadd.s32 %v4750_v4, %v4748_v13  ;;  %vm2501_vm9 = vcmp.eq.s32.totalorder %v8854_v43, 2  ;;  %v4722_v9 = vshrl.u32 %v4717_v33, 16 }
 0x3c9   :  { %v2499_v54 = vxor.u32 2147483648, %v2494_v5  ;;  %v4823_v62 = vand.u32 8388607, %v4816_v50  ;;  %v4744_v56 = vshrl.u32 %v4739_v60, 16  ;;  %vm4827_vm10 = vcmp.gt.s32.totalorder %v4826_v29, 0 }
 0x3ca   :  { %v4731_v35 = vadd.s32 %v4730_v55, %v4720_v61  ;;  %v4753_v36 = vadd.s32 %v4752_v46, %v4742_v42  ;;  %v2503_v20 = vsel %vm2501_vm9, %v2502_v27, %v2494_v5  ;;  %v4701_v1 = vsel %vm4695_vm2, %v4698_v45, %v4700_v11 }
 0x3cb   :  { %v2500_v51 = vsel %vm2498_vm3, %v2486_v59, %v2499_v54  ;;  %v4828_v44 = vsel %vm4827_vm10, %v4826_v29, 0  ;;  %v8908_v33 = vadd.s32 %v4747_v26, %v4743_v23  ;;  %v246_v60 = vmul.f32 %v8781_v3, %v8743_v53 }
 0x3cc   :  { %v2504_v12 = vsel %vm2497_vm4, %v2500_v51, %v2503_v20  ;;  %v8906_v40 = vadd.s32 %v4731_v35, %v4722_v9  ;;  %v4754_v17 = vadd.s32 %v4753_v36, %v4744_v56  ;;  %v4830_v59 = vand.u32 31, %v4828_v44  ;;  %v6239_v9 = vpop.eup %6238 }
 0x3cd   :  { %v2505_v42 = vsel %vm2495_vm14, nan, %v2504_v12  ;;  %v654_v15 = vsub.f32 1.0, %v8784_v31  ;;  %v4755_v45 = vmul.u32 %v8831_v10, %v4701_v1  ;;  %v4824_v11 = vor.u32 8388608, %v4823_v62 }
 0x3ce   :  { %v5903_v58 = vmul.f32 %v8810_v30, %v2505_v42  ;;  %vm4757_vm11 = vc.u32 %v8906_v40, %v8908_v33  ;;  %v4758_v43 = vadd.s32 1, %v4754_v17  ;;  %v8919_v23 = vshrl.u32 %v4828_v44, 5 }
 0x3cf   :  { %v8921_v26 = vsub.s32 32, %v4830_v59  ;;  %v4833_v2 = vshll.u32 %v6336_v16, %v4830_v59  ;;  %v4836_v31 = vshll.u32 %v6337_v18, %v4830_v59  ;;  %v4839_v30 = vshll.u32 %v6338_v22, %v4830_v59 }
 0x3d0   :  { %5935 = vst [vmem:[#allocation2 + $0x48] sm:$0xff] %v5903_v58  ;;  %v4759_v6 = vsel %vm4757_vm11, %v4758_v43, %v4754_v17  ;;  %v4842_v13 = vshll.u32 %v6339_v25, %v4830_v59  ;;  %v4845_v27 = vshll.u32 %v10689_v8, %v4830_v59  ;;  %6240 = vlog2.f32 %v654_v15 }
 0x3d1   :  { %v4760_v10 = vadd.s32 %v4759_v6, %v4755_v45  ;;  %v4834_v21 = vshrl.u32 %v6337_v18, %v8921_v26  ;;  %v4837_v41 = vshrl.u32 %v6338_v22, %v8921_v26  ;;  %v4840_v38 = vshrl.u32 %v6339_v25, %v8921_v26 }
 0x3d2   :  { %v4843_v5 = vshrl.u32 %v10689_v8, %v8921_v26  ;;  %v4846_v47 = vshrl.u32 %v10690_v0, %v8921_v26  ;;  %vm4848_vm12 = vcmp.lt.s32.totalorder %v8919_v23, 1  ;;  %vm4851_vm13 = vcmp.lt.s32.totalorder %v8919_v23, 4 }
 0x3d3   :  { %v4761_v4 = vadd.s32 536870912, %v4760_v10  ;;  %v8939_v61 = vor.u32 %v4834_v21, %v4833_v2  ;;  %v8941_v55 = vor.u32 %v4837_v41, %v4836_v31  ;;  %v4841_v46 = vor.u32 %v4840_v38, %v4839_v30 }
 0x3d4   :  { %v4844_v29 = vor.u32 %v4843_v5, %v4842_v13  ;;  %v4847_v54 = vor.u32 %v4846_v47, %v4845_v27  ;;  %v8951_v56 = vshll.u32 %v4824_v11, 8  ;;  %vm4850_vm15 = vcmp.lt.s32.totalorder %v8919_v23, 3 }
 0x3d5   :  { %v8944_v62 = vshrl.u32 %v4761_v4, 30  ;;  %v4856_v35 = vsel %vm4848_vm12, %v8939_v61, %v8941_v55  ;;  %v4860_v51 = vsel %vm4848_vm12, %v8941_v55, %v4841_v46  ;;  %vm4849_vm0 = vcmp.lt.s32.totalorder %v8919_v23, 2 }
 0x3d6   :  { %v4857_v36 = vsel %vm4851_vm13, %v4844_v29, 920167782  ;;  %v4861_v20 = vsel %vm4851_vm13, %v4847_v54, 1326507024  ;;  %v6241_v42 = vpop.eup %6240  ;;  %v247_v59 = vmul.f32 %v8781_v3, %v246_v60  ;;  %v4865_v45 = vand.u32 65535, %v8951_v56 }
 0x3d7   :  { %v4763_v1 = vshll.u32 %v8944_v62, 30  ;;  %v4858_v44 = vsel %vm4850_vm15, %v4841_v46, %v4857_v36  ;;  %v4862_v17 = vsel %vm4850_vm15, %v4844_v29, %v4861_v20  ;;  %v4866_v43 = vshrl.u32 %v8951_v56, 16 }
 0x3d8   :  { %v4859_v12 = vsel %vm4849_vm0, %v4856_v35, %v4858_v44  ;;  %v4863_v58 = vsel %vm4849_vm0, %v4860_v51, %v4862_v17  ;;  %v718_v2 = vmul.f32 0.6931472, %v6239_v9  ;;  %v8974_v38 = vmul.f32 0.5, %v247_v59 }
 0x3d9   :  { %v4764_v15 = vsub.s32 %v4760_v10, %v4763_v1  ;;  %v4867_v11 = vand.u32 65535, %v4863_v58  ;;  %v4868_v6 = vshrl.u32 %v4863_v58, 16  ;;  %v4889_v30 = vand.u32 65535, %v4859_v12 }
 0x3da   :  { %v4890_v21 = vshrl.u32 %v4859_v12, 16  ;;  %v4756_v60 = vadd.s32 %v8908_v33, %v8906_v40  ;;  %v8978_v5 = vmul.f32 0.6931472, %v6241_v42  ;;  %v4853_v47 = vsel %vm4851_vm13, %v4841_v46, 2102212464 }
 0x3db   :  { %vm4765_vm1 = vcmp.lt.s32.totalorder %v4764_v15, 0  ;;  %v4766_v31 = vsub.s32 0, %v4764_v15  ;;  %v4870_v41 = vmul.u32 %v4868_v6, %v4865_v45  ;;  %v4871_v13 = vmul.u32 %v4867_v11, %v4866_v43 }
 0x3dc   :  { %v4869_v4 = vmul.u32 %v4867_v11, %v4865_v45  ;;  %v4872_v54 = vmul.u32 %v4868_v6, %v4866_v43  ;;  %v4892_v9 = vmul.u32 %v4890_v21, %v4865_v45  ;;  %v4893_v35 = vmul.u32 %v4889_v30, %v4866_v43 }
 0x3dd   :  { %v4767_v10 = vsel %vm4765_vm1, %v4766_v31, %v4764_v15  ;;  %v4873_v29 = vshll.u32 %v4870_v41, 16  ;;  %v8983_v36 = vsub.f32 %v8978_v5, %v718_v2  ;;  %v4875_v20 = vshll.u32 %v4871_v13, 16 }
 0x3de   :  { %v4768_v27 = vclz %v4767_v10  ;;  %v4874_v40 = vshrl.u32 %v4870_v41, 16  ;;  %v4891_v44 = vmul.u32 %v4889_v30, %v4865_v45  ;;  %v4895_v12 = vshll.u32 %v4892_v9, 16 }
 0x3df   :  { %vm4877_vm2 = vc.u32 %v4869_v4, %v4873_v29  ;;  %v4879_v1 = vadd.s32 %v4873_v29, %v4869_v4  ;;  %v4897_v46 = vshll.u32 %v4893_v35, 16  ;;  %v4894_v31 = vmul.u32 %v4890_v21, %v4866_v43 }
 0x3e0   :  { %v6081_v51 = vadd.s32 4294967294, %v4768_v27  ;;  %v4878_v33 = vsel %vm4877_vm2, 1, %v6342_v57  ;;  %vm4899_vm14 = vc.u32 %v4891_v44, %v4895_v12  ;;  %v4901_v58 = vadd.s32 %v4895_v12, %v4891_v44  ;;  %v488_v44 = vpop.f32.mrf.mxu1 }
 0x3e1   :  { %v4880_v17 = vadd.s32 %v4878_v33, %v4872_v54  ;;  %vm4881_vm4 = vc.u32 %v4879_v1, %v4875_v20  ;;  %v4900_v41 = vsel %vm4899_vm14, 1, %v6342_v57  ;;  %v811_v45 = vmul.f32 %v6507_v32, %v8983_v36 }
 0x3e2   :  { %vm6082_vm3 = vcmp.lt.s32.totalorder %v6081_v51, 0  ;;  %v4882_v59 = vsel %vm4881_vm4, 1, %v6342_v57  ;;  %vm4903_vm5 = vc.u32 %v4901_v58, %v4897_v46  ;;  %v4902_v29 = vadd.s32 %v4900_v41, %v4894_v31 }
 0x3e3   :  { %v4771_v42 = vsel %vm6082_vm3, 0, %v6081_v51  ;;  %v4884_v2 = vadd.s32 %v4882_v59, %v4880_v17  ;;  %v4832_v54 = vshrl.u32 %v6336_v16, %v8921_v26  ;;  %v4876_v51 = vshrl.u32 %v4871_v13, 16 }
 0x3e4   :  { %v4772_v11 = vsub.s32 32, %v4771_v42  ;;  %v4776_v6 = vsub.s32 4294967266, %v4771_v42  ;;  %v4773_v10 = vshll.u32 %v4764_v15, %v4771_v42  ;;  %v4904_v20 = vsel %vm4903_vm5, 1, %v6342_v57 }
 0x3e5   :  { %v4885_v4 = vadd.s32 %v4884_v2, %v4874_v40  ;;  %v8994_v1 = vadd.f32 %v6513_v37, %v811_v45  ;;  %v4896_v21 = vshrl.u32 %v4892_v9, 16  ;;  %v4906_v33 = vadd.s32 %v4904_v20, %v4902_v29 }
 0x3e6   :  { %v4774_v30 = vshrl.u32 %v4756_v60, %v4772_v11  ;;  %v4777_v27 = vadd.s32 127, %v4776_v6  ;;  %v4852_v60 = vsel %vm4848_vm12, %v4832_v54, %v8939_v61  ;;  %v4854_v40 = vsel %vm4850_vm15, %v8941_v55, %v4853_v47  ;;  %v9019_v54 = vpop.xlane.xlu2 %94 }
 0x3e7   :  { %v4886_v26 = vadd.s32 %v4885_v4, %v4876_v51  ;;  %v2509_v13 = vand.u32 2139095040, %v8994_v1  ;;  %v4898_v17 = vshrl.u32 %v4893_v35, 16  ;;  %v4907_v42 = vadd.s32 %v4906_v33, %v4896_v21 }
 0x3e8   :  { %v4775_v15 = vor.u32 %v4774_v30, %v4773_v10  ;;  %v4778_v43 = vshll.u32 %v4777_v27, 23  ;;  %v4905_v59 = vadd.s32 %v4901_v58, %v4897_v46  ;;  %v2506_v11 = vand.u32 2147483647, %v8994_v1 }
 0x3e9   :  { %v2510_v9 = vshrl.u32 %v2509_v13, 23  ;;  %v564_v6 = vmul.f32 %v8786_v28, %v488_v44  ;;  %v4855_v61 = vsel %vm4849_vm0, %v4852_v60, %v4854_v40  ;;  %v4908_v10 = vadd.s32 %v4907_v42, %v4898_v17 }
 0x3ea   :  { %v4779_v12 = vor.u32 4788187, %v4778_v43  ;;  %v4782_v31 = vcvt.s32.f32 %v4775_v15  ;;  %v249_v55 = vsub.f32 1.5, %v8974_v38  ;;  %v4786_v47 = vsub.s32 4, %v8944_v62 }
 0x3eb   :  { %vm4911_vm6 = vc.u32 %v4886_v26, %v4905_v59  ;;  %v6038_v41 = vadd.s32 4294967169, %v2510_v9  ;;  %vm251_vm7 = vweird.f32 %v8743_v53  ;;  %v894_v35 = vmul.f32 7.5, %v8753_v63 }
 0x3ec   :  { %v4780_v2 = vand.u32 2147483647, %v4779_v12  ;;  %v4912_v58 = vadd.s32 1, %v4908_v10  ;;  %vm252_vm8 = vweird.f32 %v8781_v3  ;;  %v4909_v28 = vmul.u32 %v8951_v56, %v4855_v61 }
 0x3ed   :  { %v2513_v23 = vand.u32 8388607, %v2506_v11  ;;  %v2516_v45 = vadd.s32 1, %v6038_v41  ;;  %vm4664_vm9 = vcmp.lt.s32.totalorder %v8776_v48, 0  ;;  %v596_v27 = vsub.f32 %v8806_v19, %v564_v6  ;;  %vm9023_vm11 = vmor %vm251_vm7, %vm252_vm8 }
 0x3ee   :  { %v4783_v46 = vmul.f32 %v4782_v31, %v4780_v2  ;;  %v4913_v30 = vsel %vm4911_vm6, %v4912_v58, %v4908_v10  ;;  %v4787_v4 = vsel %vm4664_vm9, %v4786_v47, %v8944_v62  ;;  %v250_v63 = vmul.f32 %v8781_v3, %v249_v55 }
 0x3ef   :  { %v4914_v29 = vadd.s32 %v4913_v30, %v4909_v28  ;;  %vm2517_vm10 = vcmp.gt.s32.totalorder %v2516_v45, 0  ;;  %v950_v51 = vmul.f32 1.442695, %v894_v35  ;;  %vm9029_vm12 = vcmp.le.f32.partialorder %v4662_v49, 0.7853982 }
 0x3f0   :  { %v4784_v38 = vxor.u32 2147483648, %v4783_v46  ;;  %v2518_v62 = vsel %vm2517_vm10, %v2516_v45, 0  ;;  %v2514_v21 = vor.u32 8388608, %v2513_v23  ;;  %6242 = vrsqrt.f32 %v6938_v7 }
 0x3f1   :  { %v4915_v43 = vadd.s32 536870912, %v4914_v29  ;;  %v2520_v33 = vand.u32 31, %v2518_v62  ;;  %v4789_v44 = vsel %vm9029_vm12, 0, %v4787_v4  ;;  %v628_v60 = vmax.f32 %v596_v27, 1e-12 }
 0x3f2   :  { %v4785_v19 = vsel %vm4664_vm9, %v4784_v38, %v4783_v46  ;;  %6244 = vrsqrt.f32 %v9019_v54  ;;  %v254_v12 = vsel %vm9023_vm11, %v8781_v3, %v250_v63  ;;  %v9051_v9 = vand.u32 3, %v4789_v44 }
 0x3f3   :  { %v9036_v15 = vsel %vm9029_vm12, %v8776_v48, %v4785_v19  ;;  %v9044_v40 = vshrl.u32 %v4915_v43, 30  ;;  %v9046_v13 = vsub.s32 32, %v2520_v33  ;;  %6246 = vpow2.f32 %v950_v51 }
 0x3f4   :  { %v4790_v49 = vmul.f32 %v9036_v15, %v9036_v15  ;;  %v9053_v6 = vadd.s32 %v4905_v59, %v4886_v26  ;;  %v9056_v31 = vshll.u32 %v2514_v21, 8  ;;  %6248 = vlog2.f32 %v628_v60 }
 0x3f5   :  { %v4917_v2 = vshll.u32 %v9044_v40, 30  ;;  %v9058_v55 = vmul.f32 0.99999, %v254_v12  ;;  %v2524_v3 = vshrl.u32 %v6337_v18, %v9046_v13  ;;  %v2527_v41 = vshrl.u32 %v6338_v22, %v9046_v13 }
 0x3f6   :  { %v4791_v17 = vmul.f32 -0.001358992, %v4790_v49  ;;  %v4798_v42 = vmul.f32 -0.00019511016, %v4790_v49  ;;  %v2533_v26 = vshrl.u32 %v10689_v8, %v9046_v13  ;;  %v9068_v59 = vpop.eup %6242  ;;  %v2523_v58 = vshll.u32 %v6336_v16, %v2520_v33 }
 0x3f7   :  { %v9060_v47 = vsub.s32 %v4914_v29, %v4917_v2  ;;  %v2526_v28 = vshll.u32 %v6337_v18, %v2520_v33  ;;  %vm4811_vm13 = vcmp.eq.s32.totalorder %v9051_v9, 2  ;;  %v2530_v38 = vshrl.u32 %v6339_v25, %v9046_v13 }
 0x3f8   :  { %v4792_v61 = vadd.f32 0.041655596, %v4791_v17  ;;  %v4799_v10 = vadd.f32 0.008332121, %v4798_v42  ;;  %v9072_v23 = vpop.eup %6244  ;;  %v2532_v30 = vshll.u32 %v6339_v25, %v2520_v33  ;;  %v9080_v63 = vshrl.u32 %v2518_v62, 5 }
 0x3f9   :  { %vm4919_vm15 = vcmp.lt.s32.totalorder %v9060_v47, 0  ;;  %v4920_v45 = vsub.s32 0, %v9060_v47  ;;  %v6247_v27 = vpop.eup %6246  ;;  %v2529_v56 = vshll.u32 %v6338_v22, %v2520_v33  ;;  %vm4808_vm0 = vcmp.eq.s32.totalorder %v9051_v9, 0 }
 0x3fa   :  { %v4793_v35 = vmul.f32 %v4792_v61, %v4790_v49  ;;  %v4800_v46 = vmul.f32 %v4799_v10, %v4790_v49  ;;  %v2525_v20 = vor.u32 %v2524_v3, %v2523_v58  ;;  %v9085_v19 = vor.u32 %v2527_v41, %v2526_v28  ;;  %v9087_v21 = vpop.eup %6248 }
 0x3fb   :  { %v4921_v51 = vsel %vm4919_vm15, %v4920_v45, %v9060_v47  ;;  %v2534_v43 = vor.u32 %v2533_v26, %v2532_v30  ;;  %vm4807_vm1 = vcmp.lt.s32.totalorder %v9051_v9, 2  ;;  %v2536_v62 = vshrl.u32 %v10690_v0, %v9046_v13 }
 0x3fc   :  { %v4794_v4 = vadd.f32 -0.4999988, %v4793_v35  ;;  %v4801_v29 = vadd.f32 -0.16666654, %v4800_v46  ;;  %v4922_v12 = vclz %v4921_v51  ;;  %vm4805_vm2 = vweird.f32 %v8776_v48 }
 0x3fd   :  { %v2531_v17 = vor.u32 %v2530_v38, %v2529_v56  ;;  %v2535_v42 = vshll.u32 %v10689_v8, %v2520_v33  ;;  %v2555_v2 = vand.u32 65535, %v9056_v31  ;;  %v2556_v61 = vshrl.u32 %v9056_v31, 16 }
 0x3fe   :  { %v4795_v44 = vmul.f32 %v4794_v4, %v4790_v49  ;;  %v4802_v60 = vmul.f32 %v4801_v29, %v4790_v49  ;;  %v6084_v41 = vadd.s32 4294967294, %v4922_v12  ;;  %vm2541_vm3 = vcmp.lt.s32.totalorder %v9080_v63, 4 }
 0x3ff   :  { %vm112_vm4 = vcmp.gt.f32.partialorder %v8743_v53, 0.99998  ;;  %v2537_v49 = vor.u32 %v2536_v62, %v2535_v42  ;;  %vm2538_vm14 = vcmp.lt.s32.totalorder %v9080_v63, 1  ;;  %vm2540_vm5 = vcmp.lt.s32.totalorder %v9080_v63, 3 }
 0x400   :  { %v4796_v10 = vadd.f32 1.0, %v4795_v44  ;;  %v4803_v3 = vadd.f32 1.0, %v4802_v60  ;;  %v2547_v26 = vsel %vm2541_vm3, %v2534_v43, 920167782  ;;  %vm6085_vm6 = vcmp.lt.s32.totalorder %v6084_v41, 0 }
 0x401   :  { %v2546_v46 = vsel %vm2538_vm14, %v2525_v20, %v9085_v19  ;;  %v4925_v58 = vsel %vm6085_vm6, 0, %v6084_v41  ;;  %v2522_v28 = vshrl.u32 %v6336_v16, %v9046_v13  ;;  %vm2539_vm7 = vcmp.lt.s32.totalorder %v9080_v63, 2 }
 0x402   :  { %v4804_v33 = vmul.f32 %v4803_v3, %v9036_v15  ;;  %v4812_v35 = vxor.u32 2147483648, %v4796_v10  ;;  %v2548_v45 = vsel %vm2540_vm5, %v2531_v17, %v2547_v26  ;;  %v4926_v15 = vsub.s32 32, %v4925_v58 }
 0x403   :  { %v2550_v4 = vsel %vm2538_vm14, %v9085_v19, %v2531_v17  ;;  %v4927_v29 = vshll.u32 %v9060_v47, %v4925_v58  ;;  %v4930_v56 = vsub.s32 4294967266, %v4925_v58  ;;  %v2549_v13 = vsel %vm2539_vm7, %v2546_v46, %v2548_v45 }
 0x404   :  { %v4809_v38 = vxor.u32 2147483648, %v4804_v33  ;;  %v4813_v30 = vsel %vm4811_vm13, %v4812_v35, %v4804_v33  ;;  %v2551_v51 = vsel %vm2541_vm3, %v2537_v49, 1326507024  ;;  %v4928_v60 = vshrl.u32 %v9053_v6, %v4926_v15 }
 0x405   :  { %v2552_v12 = vsel %vm2540_vm5, %v2534_v43, %v2551_v51  ;;  %v2579_v62 = vand.u32 65535, %v2549_v13  ;;  %v4931_v47 = vadd.s32 127, %v4930_v56  ;;  %v2580_v41 = vshrl.u32 %v2549_v13, 16 }
 0x406   :  { %v4810_v44 = vsel %vm4808_vm0, %v4796_v10, %v4809_v38  ;;  %v2553_v3 = vsel %vm2539_vm7, %v2550_v4, %v2552_v12  ;;  %v4929_v26 = vor.u32 %v4928_v60, %v4927_v29  ;;  %v304_v43 = vsel %vm112_vm4, %v9058_v55, 1.0 }
 0x407   :  { %v4814_v42 = vsel %vm4807_vm1, %v4810_v44, %v4813_v30  ;;  %v2557_v33 = vand.u32 65535, %v2553_v3  ;;  %v2558_v10 = vshrl.u32 %v2553_v3, 16  ;;  %v4932_v6 = vshll.u32 %v4931_v47, 23 }
 0x408   :  { %v4815_v49 = vsel %vm4805_vm2, nan, %v4814_v42  ;;  %v2582_v46 = vmul.u32 %v2580_v41, %v2555_v2  ;;  %vm4818_vm8 = vcmp.lt.s32.totalorder %v8823_v24, 0  ;;  %v4940_v9 = vsub.s32 4, %v9044_v40 }
 0x409   :  { %v5918_v35 = vmul.f32 %v6247_v27, %v4815_v49  ;;  %v2542_v58 = vsel %vm2538_vm14, %v2522_v28, %v2525_v20  ;;  %v2560_v45 = vmul.u32 %v2558_v10, %v2555_v2  ;;  %v2561_v48 = vmul.u32 %v2557_v33, %v2556_v61 }
 0x40a   :  { %vm9141_vm9 = vcmp.le.f32.partialorder %v4816_v50, 0.7853982  ;;  %v4933_v38 = vor.u32 4788187, %v4932_v6  ;;  %v2543_v55 = vsel %vm2541_vm3, %v2531_v17, 2102212464  ;;  %v2581_v30 = vmul.u32 %v2579_v62, %v2555_v2 }
 0x40b   :  { %5950 = vst [vmem:[#allocation2 + $0xc0] sm:$0xff] %v5918_v35  ;;  %v2583_v15 = vmul.u32 %v2579_v62, %v2556_v61  ;;  %v4936_v4 = vcvt.s32.f32 %v4929_v26  ;;  %v2559_v29 = vmul.u32 %v2557_v33, %v2555_v2  ;;  %v2562_v56 = vmul.u32 %v2558_v10, %v2556_v61 }
 0x40c   :  { %v2563_v13 = vshll.u32 %v2560_v45, 16  ;;  %v4934_v20 = vand.u32 2147483647, %v4933_v38  ;;  %v2565_v28 = vshll.u32 %v2561_v48, 16  ;;  %v2584_v51 = vmul.u32 %v2580_v41, %v2556_v61 }
 0x40d   :  { %v2585_v44 = vshll.u32 %v2582_v46, 16  ;;  %v2587_v50 = vshll.u32 %v2583_v15, 16  ;;  %v720_v12 = vmul.f32 0.6931472, %v9087_v21  ;;  %v2564_v26 = vshrl.u32 %v2560_v45, 16 }
 0x40e   :  { %vm2567_vm10 = vc.u32 %v2559_v29, %v2563_v13  ;;  %v2569_v60 = vadd.s32 %v2563_v13, %v2559_v29  ;;  %v4937_v42 = vmul.f32 %v4936_v4, %v4934_v20  ;;  %v2586_v6 = vshrl.u32 %v2582_v46, 16 }
 0x40f   :  { %v2568_v47 = vsel %vm2567_vm10, 1, %v6342_v57  ;;  %vm2589_vm11 = vc.u32 %v2581_v30, %v2585_v44  ;;  %v2591_v17 = vadd.s32 %v2585_v44, %v2581_v30  ;;  %v9151_v62 = vsub.f32 %v8978_v5, %v720_v12 }
 0x410   :  { %v2570_v3 = vadd.s32 %v2568_v47, %v2562_v56  ;;  %vm2571_vm12 = vc.u32 %v2569_v60, %v2565_v28  ;;  %v2590_v2 = vsel %vm2589_vm11, 1, %v6342_v57  ;;  %v4938_v49 = vxor.u32 2147483648, %v4937_v42 }
 0x411   :  { %v2572_v61 = vsel %vm2571_vm12, 1, %v6342_v57  ;;  %v2592_v41 = vadd.s32 %v2590_v2, %v2584_v51  ;;  %vm2593_vm13 = vc.u32 %v2591_v17, %v2587_v50  ;;  %v812_v10 = vmul.f32 %v6509_v34, %v9151_v62 }
 0x412   :  { %v2574_v33 = vadd.s32 %v2572_v61, %v2570_v3  ;;  %v2594_v21 = vsel %vm2593_vm13, 1, %v6342_v57  ;;  %v4939_v35 = vsel %vm4818_vm8, %v4938_v49, %v4937_v42  ;;  %v2544_v5 = vsel %vm2540_vm5, %v9085_v19, %v2543_v55  ;;  %v447_v49 = vpop.f32.mrf.mxu2 }
 0x413   :  { %v2596_v38 = vadd.s32 %v2594_v21, %v2592_v41  ;;  %v4942_v30 = vsel %vm9141_vm9, %v8823_v24, %v4939_v35  ;;  %v2566_v45 = vshrl.u32 %v2561_v48, 16  ;;  %v9166_v29 = vadd.f32 %v6517_v39, %v812_v10 }
 0x414   :  { %v2575_v4 = vadd.s32 %v2574_v33, %v2564_v26  ;;  %v4944_v56 = vmul.f32 %v4942_v30, %v4942_v30  ;;  %v2588_v13 = vshrl.u32 %v2583_v15, 16  ;;  %v320_v28 = vmul.f32 %v304_v43, %v304_v43 }
 0x415   :  { %v2597_v20 = vadd.s32 %v2596_v38, %v2586_v6  ;;  %v895_v51 = vmul.f32 7.5, %v8789_v52  ;;  %v9171_v19 = vadd.s32 %v2591_v17, %v2587_v50  ;;  %v2663_v46 = vand.u32 2139095040, %v9166_v29 }
 0x416   :  { %v9169_v44 = vadd.s32 %v2575_v4, %v2566_v45  ;;  %v4945_v55 = vmul.f32 -0.001358992, %v4944_v56  ;;  %v4952_v60 = vmul.f32 -0.00019511016, %v4944_v56  ;;  %v2545_v48 = vsel %vm2539_vm7, %v2542_v58, %v2544_v5 }
 0x417   :  { %v2598_v12 = vadd.s32 %v2597_v20, %v2588_v13  ;;  %v4941_v15 = vsel %vm4818_vm8, %v4940_v9, %v9044_v40  ;;  %v2664_v52 = vshrl.u32 %v2663_v46, 23  ;;  %v550_v42 = vmul.f32 2.0, %v304_v43 }
 0x418   :  { %vm2601_vm15 = vc.u32 %v9169_v44, %v9171_v19  ;;  %v4946_v47 = vadd.f32 0.041655596, %v4945_v55  ;;  %v4953_v50 = vadd.f32 0.008332121, %v4952_v60  ;;  %v9182_v3 = vmul.f32 %v320_v28, %v8743_v53 }
 0x419   :  { %v2602_v17 = vadd.s32 1, %v2598_v12  ;;  %v176_v63 = vmul.f32 %v9068_v59, %v6938_v7  ;;  %v2599_v58 = vmul.u32 %v9056_v31, %v2545_v48  ;;  %v6041_v2 = vadd.s32 4294967169, %v2664_v52  ;;  %v512_v48 = vpop.f32.mrf.mxu3 }
 0x41a   :  { %v4943_v40 = vsel %vm9141_vm9, 0, %v4941_v15  ;;  %v4947_v9 = vmul.f32 %v4946_v47, %v4944_v56  ;;  %v4954_v61 = vmul.f32 %v4953_v50, %v4944_v56  ;;  %v952_v43 = vmul.f32 1.442695, %v895_v51 }
 0x41b   :  { %v2603_v41 = vsel %vm2601_vm15, %v2602_v17, %v2598_v12  ;;  %v2660_v33 = vand.u32 2147483647, %v9166_v29  ;;  %v2670_v21 = vadd.s32 1, %v6041_v2  ;;  %v9191_v35 = vadd.f32 1.0, %v9182_v3 }
 0x41c   :  { %v2604_v26 = vadd.s32 %v2603_v41, %v2599_v58  ;;  %v4948_v53 = vadd.f32 -0.4999988, %v4947_v9  ;;  %v4955_v10 = vadd.f32 -0.16666654, %v4954_v61  ;;  %v579_v5 = vmul.f32 %v550_v42, %v447_v49 }
 0x41d   :  { %v9194_v31 = vmul.f32 %v9068_v59, %v176_v63  ;;  %v4960_v6 = vand.u32 3, %v4943_v40  ;;  %vm2671_vm0 = vcmp.gt.s32.totalorder %v2670_v21, 0  ;;  %v9198_v38 = vmul.f32 %v9072_v23, %v9019_v54 }
 0x41e   :  { %v2605_v27 = vadd.s32 536870912, %v2604_v26  ;;  %v4949_v45 = vmul.f32 %v4948_v53, %v4944_v56  ;;  %v4956_v4 = vmul.f32 %v4955_v10, %v4944_v56  ;;  %v2672_v13 = vsel %vm2671_vm0, %v2670_v21, 0 }
 0x41f   :  { %6250 = vpow2.f32 %v952_v43  ;;  %v2667_v28 = vand.u32 8388607, %v2660_v33  ;;  %v2674_v51 = vand.u32 31, %v2672_v13  ;;  %vm4959_vm1 = vweird.f32 %v8823_v24 }
 0x420   :  { %v9200_v20 = vshrl.u32 %v2605_v27, 30  ;;  %v4950_v46 = vadd.f32 1.0, %v4949_v45  ;;  %v4957_v55 = vadd.f32 1.0, %v4956_v4  ;;  %v611_v60 = vsub.f32 %v9191_v35, %v579_v5 }
 0x421   :  { %vm4961_vm2 = vcmp.lt.s32.totalorder %v4960_v6, 2  ;;  %vm4962_vm3 = vcmp.eq.s32.totalorder %v4960_v6, 0  ;;  %v9207_v56 = vsub.s32 32, %v2674_v51  ;;  %vm4965_vm4 = vcmp.eq.s32.totalorder %v4960_v6, 2 }
 0x422   :  { %v2607_v12 = vshll.u32 %v9200_v20, 30  ;;  %v4958_v15 = vmul.f32 %v4957_v55, %v4942_v30  ;;  %v4966_v52 = vxor.u32 2147483648, %v4950_v46  ;;  %v662_v47 = vsub.f32 1.0, %v9182_v3 }
 0x423   :  { %v2668_v17 = vor.u32 8388608, %v2667_v28  ;;  %v2678_v63 = vshrl.u32 %v6337_v18, %v9207_v56  ;;  %v9214_v58 = vmul.f32 %v550_v42, %v512_v48  ;;  %v9216_v49 = vshrl.u32 %v2672_v13, 5 }
 0x424   :  { %v9210_v50 = vsub.s32 %v2604_v26, %v2607_v12  ;;  %v4963_v2 = vxor.u32 2147483648, %v4958_v15  ;;  %v2681_v40 = vshrl.u32 %v6338_v22, %v9207_v56  ;;  %v643_v9 = vmax.f32 %v611_v60, 1e-12 }
 0x425   :  { %v6251_v30 = vpop.eup %6250  ;;  %v2677_v61 = vshll.u32 %v6336_v16, %v2674_v51  ;;  %v2680_v41 = vshll.u32 %v6337_v18, %v2674_v51  ;;  %v4967_v42 = vsel %vm4965_vm4, %v4966_v52, %v4958_v15  ;;  %v2683_v26 = vshll.u32 %v6338_v22, %v2674_v51 }
 0x426   :  { %vm2609_vm14 = vcmp.lt.s32.totalorder %v9210_v50, 0  ;;  %v2610_v3 = vsub.s32 0, %v9210_v50  ;;  %v4964_v43 = vsel %vm4962_vm3, %v4950_v46, %v4963_v2  ;;  %v2684_v21 = vshrl.u32 %v6339_v25, %v9207_v56 }
 0x427   :  { %v4968_v53 = vsel %vm4961_vm2, %v4964_v43, %v4967_v42  ;;  %v9231_v5 = vor.u32 %v2678_v63, %v2677_v61  ;;  %v9233_v27 = vor.u32 %v2681_v40, %v2680_v41  ;;  %v2686_v28 = vshll.u32 %v6339_v25, %v2674_v51 }
 0x428   :  { %v2611_v10 = vsel %vm2609_vm14, %v2610_v3, %v9210_v50  ;;  %v4969_v45 = vsel %vm4959_vm1, nan, %v4968_v53  ;;  %v2685_v13 = vor.u32 %v2684_v21, %v2683_v26  ;;  %v2687_v55 = vshrl.u32 %v10689_v8, %v9207_v56 }
 0x429   :  { %v2612_v4 = vclz %v2611_v10  ;;  %v5919_v46 = vmul.f32 %v6251_v30, %v4969_v45  ;;  %v2689_v6 = vshll.u32 %v10689_v8, %v2674_v51  ;;  %v2690_v60 = vshrl.u32 %v10690_v0, %v9207_v56 }
 0x42a   :  { %v2600_v48 = vadd.s32 %v9171_v19, %v9169_v44  ;;  %v9245_v15 = vshll.u32 %v2668_v17, 8  ;;  %6252 = vlog2.f32 %v643_v9  ;;  %v2688_v24 = vor.u32 %v2687_v55, %v2686_v28 }
 0x42b   :  { %v6039_v12 = vadd.s32 4294967294, %v2612_v4  ;;  %5951 = vst [vmem:[#allocation2 + $0xc8] sm:$0xff] %v5919_v46  ;;  %v2691_v52 = vor.u32 %v2690_v60, %v2689_v6  ;;  %vm2692_vm5 = vcmp.lt.s32.totalorder %v9216_v49, 1  ;;  %6254 = vlog2.f32 %v662_v47 }
 0x42c   :  { %vm2695_vm7 = vcmp.lt.s32.totalorder %v9216_v49, 4  ;;  %v2700_v51 = vsel %vm2692_vm5, %v9231_v5, %v9233_v27  ;;  %v612_v44 = vsub.f32 %v9191_v35, %v9214_v58  ;;  %v2704_v63 = vsel %vm2692_vm5, %v9233_v27, %v2685_v13 }
 0x42d   :  { %vm6040_vm6 = vcmp.lt.s32.totalorder %v6039_v12, 0  ;;  %v2701_v17 = vsel %vm2695_vm7, %v2688_v24, 920167782  ;;  %v2705_v47 = vsel %vm2695_vm7, %v2691_v52, 1326507024  ;;  %vm2694_vm8 = vcmp.lt.s32.totalorder %v9216_v49, 3 }
 0x42e   :  { %v2615_v19 = vsel %vm6040_vm6, 0, %v6039_v12  ;;  %v2709_v9 = vand.u32 65535, %v9245_v15  ;;  %vm2693_vm9 = vcmp.lt.s32.totalorder %v9216_v49, 2  ;;  %v2702_v3 = vsel %vm2694_vm8, %v2685_v13, %v2701_v17 }
 0x42f   :  { %v2616_v2 = vsub.s32 32, %v2615_v19  ;;  %v2620_v40 = vsub.s32 4294967266, %v2615_v19  ;;  %v2617_v30 = vshll.u32 %v9210_v50, %v2615_v19  ;;  %v2706_v61 = vsel %vm2694_vm8, %v2688_v24, %v2705_v47 }
 0x430   :  { %v6253_v41 = vpop.eup %6252  ;;  %v2703_v26 = vsel %vm2693_vm9, %v2700_v51, %v2702_v3  ;;  %v2707_v21 = vsel %vm2693_vm9, %v2704_v63, %v2706_v61  ;;  %v2710_v50 = vshrl.u32 %v9245_v15, 16  ;;  %v2630_v55 = vsub.s32 4, %v9200_v20 }
 0x431   :  { %v2618_v43 = vshrl.u32 %v2600_v48, %v2616_v2  ;;  %v2621_v42 = vadd.s32 127, %v2620_v40  ;;  %v6255_v53 = vpop.eup %6254  ;;  %v2711_v10 = vand.u32 65535, %v2707_v21  ;;  %v2712_v45 = vshrl.u32 %v2707_v21, 16 }
 0x432   :  { %v2734_v4 = vshrl.u32 %v2703_v26, 16  ;;  %v2733_v6 = vand.u32 65535, %v2703_v26  ;;  %vm2508_vm10 = vcmp.lt.s32.totalorder %v8994_v1, 0  ;;  %v2676_v60 = vshrl.u32 %v6336_v16, %v9207_v56 }
 0x433   :  { %v2619_v28 = vor.u32 %v2618_v43, %v2617_v30  ;;  %v2622_v46 = vshll.u32 %v2621_v42, 23  ;;  %v2714_v48 = vmul.u32 %v2712_v45, %v2709_v9  ;;  %v2715_v12 = vmul.u32 %v2711_v10, %v2710_v50 }
 0x434   :  { %v750_v24 = vmul.f32 0.6931472, %v6253_v41  ;;  %vm9281_vm11 = vcmp.le.f32.partialorder %v2506_v11, 0.7853982  ;;  %v2697_v19 = vsel %vm2695_vm7, %v2685_v13, 2102212464  ;;  %v2736_v17 = vmul.u32 %v2734_v4, %v2709_v9 }
 0x435   :  { %v2623_v51 = vor.u32 4788187, %v2622_v46  ;;  %v9287_v63 = vmul.f32 0.6931472, %v6255_v53  ;;  %v2626_v47 = vcvt.s32.f32 %v2619_v28  ;;  %v2713_v2 = vmul.u32 %v2711_v10, %v2709_v9 }
 0x436   :  { %v2716_v40 = vmul.u32 %v2712_v45, %v2710_v50  ;;  %v2717_v56 = vshll.u32 %v2714_v48, 16  ;;  %v2735_v3 = vmul.u32 %v2733_v6, %v2709_v9  ;;  %v2737_v61 = vmul.u32 %v2733_v6, %v2710_v50 }
 0x437   :  { %v2624_v30 = vand.u32 2147483647, %v2623_v51  ;;  %v2739_v41 = vshll.u32 %v2736_v17, 16  ;;  %v2719_v43 = vshll.u32 %v2715_v12, 16  ;;  %v9290_v42 = vsub.f32 %v9287_v63, %v750_v24 }
 0x438   :  { %vm2721_vm12 = vc.u32 %v2713_v2, %v2717_v56  ;;  %v2723_v11 = vadd.s32 %v2717_v56, %v2713_v2  ;;  %v2738_v21 = vmul.u32 %v2734_v4, %v2710_v50  ;;  %v2741_v53 = vshll.u32 %v2737_v61, 16 }
 0x439   :  { %v2627_v26 = vmul.f32 %v2626_v47, %v2624_v30  ;;  %v2722_v13 = vsel %vm2721_vm12, 1, %v6342_v57  ;;  %vm2743_vm15 = vc.u32 %v2735_v3, %v2739_v41  ;;  %v2745_v10 = vadd.s32 %v2739_v41, %v2735_v3 }
 0x43a   :  { %v2724_v46 = vadd.s32 %v2722_v13, %v2716_v40  ;;  %vm2725_vm13 = vc.u32 %v2723_v11, %v2719_v43  ;;  %v2744_v28 = vsel %vm2743_vm15, 1, %v6342_v57  ;;  %v827_v6 = vmul.f32 %v6507_v32, %v9290_v42 }
 0x43b   :  { %v2628_v45 = vxor.u32 2147483648, %v2627_v26  ;;  %v2726_v9 = vsel %vm2725_vm13, 1, %v6342_v57  ;;  %v2718_v51 = vshrl.u32 %v2714_v48, 16  ;;  %v2746_v2 = vadd.s32 %v2744_v28, %v2738_v21 }
 0x43c   :  { %v2728_v24 = vadd.s32 %v2726_v9, %v2724_v46  ;;  %vm2747_vm0 = vc.u32 %v2745_v10, %v2741_v53  ;;  %v2720_v4 = vshrl.u32 %v2715_v12, 16  ;;  %v9301_v40 = vadd.f32 %v6513_v37, %v827_v6 }
 0x43d   :  { %v2629_v50 = vsel %vm2508_vm10, %v2628_v45, %v2627_v26  ;;  %v2748_v47 = vsel %vm2747_vm0, 1, %v6342_v57  ;;  %v2740_v3 = vshrl.u32 %v2736_v17, 16  ;;  %v2631_v48 = vsel %vm2508_vm10, %v2630_v55, %v9200_v20 }
 0x43e   :  { %v2632_v56 = vsel %vm9281_vm11, %v8994_v1, %v2629_v50  ;;  %v2729_v30 = vadd.s32 %v2728_v24, %v2718_v51  ;;  %v2750_v41 = vadd.s32 %v2748_v47, %v2746_v2  ;;  %v2696_v12 = vsel %vm2692_vm5, %v2676_v60, %v9231_v5 }
 0x43f   :  { %v2634_v43 = vmul.f32 %v2632_v56, %v2632_v56  ;;  %v2698_v11 = vsel %vm2694_vm8, %v9233_v27, %v2697_v19  ;;  %v2742_v13 = vshrl.u32 %v2737_v61, 16  ;;  %v4973_v46 = vand.u32 2139095040, %v9301_v40 }
 0x440   :  { %v2730_v26 = vadd.s32 %v2729_v30, %v2720_v4  ;;  %v2751_v21 = vadd.s32 %v2750_v41, %v2740_v3  ;;  %v2749_v9 = vadd.s32 %v2745_v10, %v2741_v53  ;;  %v644_v20 = vmax.f32 %v612_v44, 1e-12 }
 0x441   :  { %v2635_v17 = vmul.f32 -0.001358992, %v2634_v43  ;;  %v2642_v45 = vmul.f32 -0.00019511016, %v2634_v43  ;;  %v880_v55 = vmul.f32 7.5, %v8983_v36  ;;  %v2699_v5 = vsel %vm2693_vm9, %v2696_v12, %v2698_v11 }
 0x442   :  { %v2752_v60 = vadd.s32 %v2751_v21, %v2742_v13  ;;  %v4974_v28 = vshrl.u32 %v4973_v46, 23  ;;  %v9323_v27 = vmul.f32 0.5, %v9194_v31  ;;  %vm2755_vm1 = vc.u32 %v2730_v26, %v2749_v9 }
 0x443   :  { %v2636_v19 = vadd.f32 0.041655596, %v2635_v17  ;;  %v2643_v61 = vadd.f32 0.008332121, %v2642_v45  ;;  %v257_v53 = vmul.f32 %v9072_v23, %v9198_v38  ;;  %v2633_v35 = vsel %vm9281_vm11, 0, %v2631_v48 }
 0x444   :  { %v2756_v58 = vadd.s32 1, %v2752_v60  ;;  %v6086_v44 = vadd.s32 4294967169, %v4974_v28  ;;  %v2753_v49 = vmul.u32 %v9245_v15, %v2699_v5  ;;  %6256 = vlog2.f32 %v644_v20 }
 0x445   :  { %v2637_v36 = vmul.f32 %v2636_v19, %v2634_v43  ;;  %v2644_v10 = vmul.f32 %v2643_v61, %v2634_v43  ;;  %v922_v6 = vmul.f32 1.442695, %v880_v55  ;;  %v10669_v31 = vand.u32 2147483647, %v9301_v40 }
 0x446   :  { %v2757_v51 = vsel %vm2755_vm1, %v2756_v58, %v2752_v60  ;;  %v4980_v24 = vadd.s32 1, %v6086_v44  ;;  %v179_v38 = vsub.f32 1.5, %v9323_v27  ;;  %v2650_v47 = vand.u32 3, %v2633_v35 }
 0x447   :  { %v2638_v2 = vadd.f32 -0.4999988, %v2637_v36  ;;  %v2645_v50 = vadd.f32 -0.16666654, %v2644_v10  ;;  %v2758_v4 = vadd.s32 %v2757_v51, %v2753_v49  ;;  %v9332_v48 = vmul.f32 0.5, %v257_v53 }
 0x448   :  { %vm4981_vm2 = vcmp.gt.s32.totalorder %v4980_v24, 0  ;;  %6258 = vpow2.f32 %v922_v6  ;;  %v4977_v15 = vand.u32 8388607, %v10669_v31  ;;  %vm181_vm3 = vweird.f32 %v6938_v7 }
 0x449   :  { %v2639_v52 = vmul.f32 %v2638_v2, %v2634_v43  ;;  %v2646_v30 = vmul.f32 %v2645_v50, %v2634_v43  ;;  %v2759_v3 = vadd.s32 536870912, %v2758_v4  ;;  %v4982_v41 = vsel %vm4981_vm2, %v4980_v24, 0 }
 0x44a   :  { %v4984_v12 = vand.u32 31, %v4982_v41  ;;  %v6257_v11 = vpop.eup %6256  ;;  %vm2649_vm4 = vweird.f32 %v8994_v1  ;;  %vm2651_vm14 = vcmp.lt.s32.totalorder %v2650_v47, 2  ;;  %vm2652_vm5 = vcmp.eq.s32.totalorder %v2650_v47, 0 }
 0x44b   :  { %v2640_v13 = vadd.f32 1.0, %v2639_v52  ;;  %v2647_v21 = vadd.f32 1.0, %v2646_v30  ;;  %v9338_v46 = vshrl.u32 %v2759_v3, 30  ;;  %vm2655_vm6 = vcmp.eq.s32.totalorder %v2650_v47, 2 }
 0x44c   :  { %v9340_v43 = vsub.s32 32, %v4984_v12  ;;  %v2754_v20 = vadd.s32 %v2749_v9, %v2730_v26  ;;  %v4978_v5 = vor.u32 8388608, %v4977_v15  ;;  %v752_v27 = vmul.f32 0.6931472, %v6257_v11 }
 0x44d   :  { %v2648_v17 = vmul.f32 %v2647_v21, %v2632_v56  ;;  %v2656_v45 = vxor.u32 2147483648, %v2640_v13  ;;  %v2761_v55 = vshll.u32 %v9338_v46, 30  ;;  %v9349_v53 = vshrl.u32 %v4982_v41, 5 }
 0x44e   :  { %v4988_v60 = vshrl.u32 %v6337_v18, %v9340_v43  ;;  %v4991_v28 = vshrl.u32 %v6338_v22, %v9340_v43  ;;  %v4987_v35 = vshll.u32 %v6336_v16, %v4984_v12  ;;  %v6259_v56 = vpop.eup %6258  ;;  %v4990_v26 = vshll.u32 %v6337_v18, %v4984_v12 }
 0x44f   :  { %v2653_v19 = vxor.u32 2147483648, %v2648_v17  ;;  %v9347_v61 = vsub.s32 %v2758_v4, %v2761_v55  ;;  %v2657_v58 = vsel %vm2655_vm6, %v2656_v45, %v2648_v17  ;;  %v4993_v9 = vshll.u32 %v6338_v22, %v4984_v12 }
 0x450   :  { %v4994_v44 = vshrl.u32 %v6339_v25, %v9340_v43  ;;  %v9359_v49 = vor.u32 %v4988_v60, %v4987_v35  ;;  %v9362_v51 = vor.u32 %v4991_v28, %v4990_v26  ;;  %v4996_v24 = vshll.u32 %v6339_v25, %v4984_v12 }
 0x451   :  { %v2654_v36 = vsel %vm2652_vm5, %v2640_v13, %v2653_v19  ;;  %vm2763_vm7 = vcmp.lt.s32.totalorder %v9347_v61, 0  ;;  %v2764_v10 = vsub.s32 0, %v9347_v61  ;;  %v4997_v2 = vshrl.u32 %v10689_v8, %v9340_v43 }
 0x452   :  { %v2658_v6 = vsel %vm2651_vm14, %v2654_v36, %v2657_v58  ;;  %v9371_v52 = vmul.f32 %v9068_v59, %v179_v38  ;;  %vm182_vm8 = vweird.f32 %v9068_v59  ;;  %v4995_v3 = vor.u32 %v4994_v44, %v4993_v9 }
 0x453   :  { %v2659_v50 = vsel %vm2649_vm4, nan, %v2658_v6  ;;  %v2765_v4 = vsel %vm2763_vm7, %v2764_v10, %v9347_v61  ;;  %v4998_v41 = vor.u32 %v4997_v2, %v4996_v24  ;;  %v4999_v15 = vshll.u32 %v10689_v8, %v4984_v12  ;;  %vm9390_vm11 = vmor %vm181_vm3, %vm182_vm8 }
 0x454   :  { %v5904_v30 = vmul.f32 %v6259_v56, %v2659_v50  ;;  %v2766_v47 = vclz %v2765_v4  ;;  %v5000_v11 = vshrl.u32 %v10690_v0, %v9340_v43  ;;  %vm5002_vm9 = vcmp.lt.s32.totalorder %v9349_v53, 1 }
 0x455   :  { %v9378_v1 = vshll.u32 %v4978_v5, 8  ;;  %vm5005_vm10 = vcmp.lt.s32.totalorder %v9349_v53, 4  ;;  %v5010_v38 = vsel %vm5002_vm9, %v9359_v49, %v9362_v51  ;;  %v9386_v21 = vsub.f32 %v9287_v63, %v752_v27 }
 0x456   :  { %5936 = vst [vmem:[#allocation2 + $0x50] sm:$0xff] %v5904_v30  ;;  %v6042_v13 = vadd.s32 4294967294, %v2766_v47  ;;  %v5001_v17 = vor.u32 %v5000_v11, %v4999_v15  ;;  %vm5004_vm12 = vcmp.lt.s32.totalorder %v9349_v53, 3  ;;  %v5011_v45 = vsel %vm5005_vm10, %v4998_v41, 920167782 }
 0x457   :  { %v184_v55 = vsel %vm9390_vm11, %v9068_v59, %v9371_v52  ;;  %vm5003_vm15 = vcmp.lt.s32.totalorder %v9349_v53, 2  ;;  %v5012_v63 = vsel %vm5004_vm12, %v4995_v3, %v5011_v45  ;;  %v5014_v5 = vsel %vm5002_vm9, %v9362_v51, %v4995_v3 }
 0x458   :  { %vm6043_vm13 = vcmp.lt.s32.totalorder %v6042_v13, 0  ;;  %v5013_v28 = vsel %vm5003_vm15, %v5010_v38, %v5012_v63  ;;  %v5015_v27 = vsel %vm5005_vm10, %v5001_v17, 1326507024  ;;  %v5019_v19 = vand.u32 65535, %v9378_v1 }
 0x459   :  { %v2769_v60 = vsel %vm6043_vm13, 0, %v6042_v13  ;;  %v5016_v58 = vsel %vm5004_vm12, %v4998_v41, %v5015_v27  ;;  %v828_v26 = vmul.f32 %v6509_v34, %v9386_v21  ;;  %v5043_v36 = vand.u32 65535, %v5013_v28 }
 0x45a   :  { %v2770_v35 = vsub.s32 32, %v2769_v60  ;;  %v2774_v56 = vsub.s32 4294967266, %v2769_v60  ;;  %v2771_v9 = vshll.u32 %v9347_v61, %v2769_v60  ;;  %v5017_v44 = vsel %vm5003_vm15, %v5014_v5, %v5016_v58 }
 0x45b   :  { %v5044_v10 = vshrl.u32 %v5013_v28, 16  ;;  %vm2662_vm0 = vcmp.lt.s32.totalorder %v9166_v29, 0  ;;  %v5021_v2 = vand.u32 65535, %v5017_v44  ;;  %v5022_v50 = vshrl.u32 %v5017_v44, 16 }
 0x45c   :  { %v2772_v6 = vshrl.u32 %v2754_v20, %v2770_v35  ;;  %v2775_v24 = vadd.s32 127, %v2774_v56  ;;  %v2784_v4 = vsub.s32 4, %v9338_v46  ;;  %v4986_v30 = vshrl.u32 %v6336_v16, %v9340_v43 }
 0x45d   :  { %v5020_v47 = vshrl.u32 %v9378_v1, 16  ;;  %v5046_v41 = vmul.u32 %v5044_v10, %v5019_v19  ;;  %v5007_v11 = vsel %vm5005_vm10, %v4995_v3, 2102212464  ;;  %v5024_v13 = vmul.u32 %v5022_v50, %v5019_v19 }
 0x45e   :  { %v2773_v61 = vor.u32 %v2772_v6, %v2771_v9  ;;  %v2776_v15 = vshll.u32 %v2775_v24, 23  ;;  %v9427_v45 = vadd.f32 %v6517_v39, %v828_v26  ;;  %vm9431_vm1 = vcmp.le.f32.partialorder %v2660_v33, 0.7853982 }
 0x45f   :  { %v5025_v38 = vmul.u32 %v5021_v2, %v5020_v47  ;;  %v5047_v17 = vmul.u32 %v5043_v36, %v5020_v47  ;;  %v5049_v20 = vshll.u32 %v5046_v41, 16  ;;  %v5023_v5 = vmul.u32 %v5021_v2, %v5019_v19 }
 0x460   :  { %v2777_v43 = vor.u32 4788187, %v2776_v15  ;;  %v5027_v60 = vshll.u32 %v5024_v13, 16  ;;  %v5045_v28 = vmul.u32 %v5043_v36, %v5019_v19  ;;  %v2780_v27 = vcvt.s32.f32 %v2773_v61 }
 0x461   :  { %v5026_v35 = vmul.u32 %v5022_v50, %v5020_v47  ;;  %v5029_v3 = vshll.u32 %v5025_v38, 16  ;;  %v5048_v56 = vmul.u32 %v5044_v10, %v5020_v47  ;;  %v5051_v44 = vshll.u32 %v5047_v17, 16 }
 0x462   :  { %v2778_v58 = vand.u32 2147483647, %v2777_v43  ;;  %vm5031_vm2 = vc.u32 %v5023_v5, %v5027_v60  ;;  %v5033_v9 = vadd.s32 %v5027_v60, %v5023_v5  ;;  %vm5053_vm3 = vc.u32 %v5045_v28, %v5049_v20 }
 0x463   :  { %v5032_v26 = vsel %vm5031_vm2, 1, %v6342_v57  ;;  %v5054_v33 = vsel %vm5053_vm3, 1, %v6342_v57  ;;  %v5055_v6 = vadd.s32 %v5049_v20, %v5045_v28  ;;  %v2785_v19 = vsel %vm2662_vm0, %v2784_v4, %v9338_v46 }
 0x464   :  { %v2781_v24 = vmul.f32 %v2780_v27, %v2778_v58  ;;  %v5034_v31 = vadd.s32 %v5032_v26, %v5026_v35  ;;  %vm5035_vm4 = vc.u32 %v5033_v9, %v5029_v3  ;;  %v5056_v2 = vadd.s32 %v5054_v33, %v5048_v56 }
 0x465   :  { %v5006_v36 = vsel %vm5002_vm9, %v4986_v30, %v9359_v49  ;;  %v5036_v10 = vsel %vm5035_vm4, 1, %v6342_v57  ;;  %vm5057_vm14 = vc.u32 %v5055_v6, %v5051_v44  ;;  %v5028_v47 = vshrl.u32 %v5024_v13, 16 }
 0x466   :  { %v2782_v50 = vxor.u32 2147483648, %v2781_v24  ;;  %v5038_v61 = vadd.s32 %v5036_v10, %v5034_v31  ;;  %v5058_v15 = vsel %vm5057_vm14, 1, %v6342_v57  ;;  %v5008_v20 = vsel %vm5004_vm12, %v9362_v51, %v5007_v11 }
 0x467   :  { %v5050_v43 = vshrl.u32 %v5046_v41, 16  ;;  %v5060_v5 = vadd.s32 %v5058_v15, %v5056_v2  ;;  %v5127_v46 = vand.u32 2139095040, %v9427_v45  ;;  %v5030_v49 = vshrl.u32 %v5025_v38, 16 }
 0x468   :  { %v2783_v4 = vsel %vm2662_vm0, %v2782_v50, %v2781_v24  ;;  %v5039_v30 = vadd.s32 %v5038_v61, %v5028_v47  ;;  %v5052_v60 = vshrl.u32 %v5047_v17, 16  ;;  %v5124_v28 = vand.u32 2147483647, %v9427_v45 }
 0x469   :  { %v2786_v31 = vsel %vm9431_vm1, %v9166_v29, %v2783_v4  ;;  %v5061_v13 = vadd.s32 %v5060_v5, %v5050_v43  ;;  %v5128_v27 = vshrl.u32 %v5127_v46, 23  ;;  %v9457_v41 = vadd.s32 %v5055_v6, %v5051_v44 }
 0x46a   :  { %v2788_v35 = vmul.f32 %v2786_v31, %v2786_v31  ;;  %v9455_v51 = vadd.s32 %v5039_v30, %v5030_v49  ;;  %v281_v11 = vmul.f32 0.99999, %v184_v55  ;;  %v881_v38 = vmul.f32 7.5, %v9151_v62 }
 0x46b   :  { %v5009_v17 = vsel %vm5003_vm15, %v5006_v36, %v5008_v20  ;;  %v5062_v3 = vadd.s32 %v5061_v13, %v5052_v60  ;;  %v6089_v56 = vadd.s32 4294967169, %v5128_v27  ;;  %v2787_v58 = vsel %vm9431_vm1, 0, %v2785_v19 }
 0x46c   :  { %v2789_v9 = vmul.f32 -0.001358992, %v2788_v35  ;;  %v2796_v26 = vmul.f32 -0.00019511016, %v2788_v35  ;;  %vm5065_vm5 = vc.u32 %v9455_v51, %v9457_v41  ;;  %v5131_v59 = vand.u32 8388607, %v5124_v28 }
 0x46d   :  { %v5066_v12 = vadd.s32 1, %v5062_v3  ;;  %v5134_v52 = vadd.s32 1, %v6089_v56  ;;  %vm105_vm6 = vcmp.gt.f32.partialorder %v6938_v7, 0.99998  ;;  %v5063_v55 = vmul.u32 %v9378_v1, %v5009_v17 }
 0x46e   :  { %v2790_v62 = vadd.f32 0.041655596, %v2789_v9  ;;  %v2797_v53 = vadd.f32 0.008332121, %v2796_v26  ;;  %v297_v44 = vsel %vm105_vm6, %v281_v11, 1.0  ;;  %v2804_v63 = vand.u32 3, %v2787_v58 }
 0x46f   :  { %v924_v33 = vmul.f32 1.442695, %v881_v38  ;;  %v5067_v6 = vsel %vm5065_vm5, %v5066_v12, %v5062_v3  ;;  %vm5135_vm7 = vcmp.gt.s32.totalorder %v5134_v52, 0  ;;  %v5132_v10 = vor.u32 8388608, %v5131_v59 }
 0x470   :  { %v2791_v24 = vmul.f32 %v2790_v62, %v2788_v35  ;;  %v2798_v2 = vmul.f32 %v2797_v53, %v2788_v35  ;;  %v5068_v19 = vadd.s32 %v5067_v6, %v5063_v55  ;;  %v5136_v36 = vsel %vm5135_vm7, %v5134_v52, 0 }
 0x471   :  { %v5138_v50 = vand.u32 31, %v5136_v36  ;;  %v313_v47 = vmul.f32 %v297_v44, %v297_v44  ;;  %v259_v43 = vsub.f32 1.5, %v9332_v48  ;;  %6260 = vpow2.f32 %v924_v33 }
 0x472   :  { %v2792_v61 = vadd.f32 -0.4999988, %v2791_v24  ;;  %v2799_v15 = vadd.f32 -0.16666654, %v2798_v2  ;;  %v5069_v20 = vadd.s32 536870912, %v5068_v19  ;;  %vm2805_vm8 = vcmp.lt.s32.totalorder %v2804_v63, 2 }
 0x473   :  { %v9476_v5 = vsub.s32 32, %v5138_v50  ;;  %vm2806_vm9 = vcmp.eq.s32.totalorder %v2804_v63, 0  ;;  %vm2803_vm10 = vweird.f32 %v9166_v29  ;;  %vm2809_vm11 = vcmp.eq.s32.totalorder %v2804_v63, 2 }
 0x474   :  { %v2793_v1 = vmul.f32 %v2792_v61, %v2788_v35  ;;  %v2800_v46 = vmul.f32 %v2799_v15, %v2788_v35  ;;  %v9478_v4 = vshrl.u32 %v5069_v20, 30  ;;  %v9481_v49 = vshll.u32 %v5132_v10, 8 }
 0x475   :  { %v9484_v30 = vmul.f32 %v313_v47, %v6938_v7  ;;  %v9486_v60 = vmul.f32 2.0, %v297_v44  ;;  %v9489_v38 = vshrl.u32 %v5136_v36, 5  ;;  %v5142_v35 = vshrl.u32 %v6337_v18, %v9476_v5 }
 0x476   :  { %v2794_v13 = vadd.f32 1.0, %v2793_v1  ;;  %v2801_v27 = vadd.f32 1.0, %v2800_v46  ;;  %v5071_v11 = vshll.u32 %v9478_v4, 30  ;;  %v5145_v17 = vshrl.u32 %v6338_v22, %v9476_v5 }
 0x477   :  { %v5148_v3 = vshrl.u32 %v6339_v25, %v9476_v5  ;;  %v5151_v7 = vshrl.u32 %v10689_v8, %v9476_v5  ;;  %v5141_v26 = vshll.u32 %v6336_v16, %v5138_v50  ;;  %v6261_v12 = vpop.eup %6260  ;;  %v5144_v59 = vshll.u32 %v6337_v18, %v5138_v50 }
 0x478   :  { %v2802_v56 = vmul.f32 %v2801_v27, %v2786_v31  ;;  %v2810_v58 = vxor.u32 2147483648, %v2794_v13  ;;  %v5072_v9 = vsub.s32 %v5068_v19, %v5071_v11  ;;  %v5147_v52 = vshll.u32 %v6338_v22, %v5138_v50  ;;  %v426_v31 = vpop.f32.mrf.mxu0 }
 0x479   :  { %v5150_v62 = vshll.u32 %v6339_v25, %v5138_v50  ;;  %v5154_v53 = vshrl.u32 %v10690_v0, %v9476_v5  ;;  %v5153_v33 = vshll.u32 %v10689_v8, %v5138_v50  ;;  %v9506_v6 = vor.u32 %v5142_v35, %v5141_v26 }
 0x47a   :  { %v2807_v55 = vxor.u32 2147483648, %v2802_v56  ;;  %vm5073_vm12 = vcmp.lt.s32.totalorder %v5072_v9, 0  ;;  %v5074_v44 = vsub.s32 0, %v5072_v9  ;;  %v9508_v24 = vor.u32 %v5145_v17, %v5144_v59 }
 0x47b   :  { %v5149_v2 = vor.u32 %v5148_v3, %v5147_v52  ;;  %v5152_v19 = vor.u32 %v5151_v7, %v5150_v62  ;;  %v2811_v10 = vsel %vm2809_vm11, %v2810_v58, %v2802_v56  ;;  %v5155_v61 = vor.u32 %v5154_v53, %v5153_v33 }
 0x47c   :  { %v2808_v36 = vsel %vm2806_vm9, %v2794_v13, %v2807_v55  ;;  %v5075_v47 = vsel %vm5073_vm12, %v5074_v44, %v5072_v9  ;;  %v5064_v20 = vadd.s32 %v9457_v41, %v9455_v51  ;;  %v565_v50 = vmul.f32 %v9486_v60, %v426_v31 }
 0x47d   :  { %v2812_v15 = vsel %vm2805_vm8, %v2808_v36, %v2811_v10  ;;  %v5076_v1 = vclz %v5075_v47  ;;  %vm5156_vm13 = vcmp.lt.s32.totalorder %v9489_v38, 1  ;;  %v5173_v27 = vand.u32 65535, %v9481_v49 }
 0x47e   :  { %v2813_v46 = vsel %vm2803_vm10, nan, %v2812_v15  ;;  %v9521_v13 = vadd.f32 1.0, %v9484_v30  ;;  %vm5159_vm15 = vcmp.lt.s32.totalorder %v9489_v38, 4  ;;  %v5164_v51 = vsel %vm5156_vm13, %v9506_v6, %v9508_v24 }
 0x47f   :  { %v5905_v11 = vmul.f32 %v6261_v12, %v2813_v46  ;;  %v6087_v35 = vadd.s32 4294967294, %v5076_v1  ;;  %vm5158_vm0 = vcmp.lt.s32.totalorder %v9489_v38, 3  ;;  %v5165_v29 = vsel %vm5159_vm15, %v5152_v19, 920167782 }
 0x480   :  { %v5168_v41 = vsel %vm5156_vm13, %v9508_v24, %v5149_v2  ;;  %v5169_v63 = vsel %vm5159_vm15, %v5155_v61, 1326507024  ;;  %vm5157_vm2 = vcmp.lt.s32.totalorder %v9489_v38, 2  ;;  %v5166_v17 = vsel %vm5158_vm0, %v5149_v2, %v5165_v29 }
 0x481   :  { %5937 = vst [vmem:[#allocation2 + $0x58] sm:$0xff] %v5905_v11  ;;  %vm6088_vm1 = vcmp.lt.s32.totalorder %v6087_v35, 0  ;;  %v5170_v3 = vsel %vm5158_vm0, %v5152_v19, %v5169_v63  ;;  %v5167_v56 = vsel %vm5157_vm2, %v5164_v51, %v5166_v17  ;;  %v5174_v26 = vshrl.u32 %v9481_v49, 16 }
 0x482   :  { %v5079_v7 = vsel %vm6088_vm1, 0, %v6087_v35  ;;  %v5171_v58 = vsel %vm5157_vm2, %v5168_v41, %v5170_v3  ;;  %v597_v62 = vsub.f32 %v9521_v13, %v565_v50  ;;  %v5197_v55 = vand.u32 65535, %v5167_v56 }
 0x483   :  { %v5080_v12 = vsub.s32 32, %v5079_v7  ;;  %v5084_v59 = vsub.s32 4294967266, %v5079_v7  ;;  %v5175_v52 = vand.u32 65535, %v5171_v58  ;;  %v5176_v53 = vshrl.u32 %v5171_v58, 16 }
 0x484   :  { %v5198_v44 = vshrl.u32 %v5167_v56, 16  ;;  %v655_v33 = vsub.f32 1.0, %v9484_v30  ;;  %v5081_v31 = vshll.u32 %v5072_v9, %v5079_v7  ;;  %v5140_v47 = vshrl.u32 %v6336_v16, %v9476_v5 }
 0x485   :  { %v5082_v19 = vshrl.u32 %v5064_v20, %v5080_v12  ;;  %v5085_v36 = vadd.s32 127, %v5084_v59  ;;  %v5179_v10 = vmul.u32 %v5175_v52, %v5174_v26  ;;  %v5161_v61 = vsel %vm5159_vm15, %v5149_v2, 2102212464 }
 0x486   :  { %v5178_v15 = vmul.u32 %v5176_v53, %v5173_v27  ;;  %v5200_v1 = vmul.u32 %v5198_v44, %v5173_v27  ;;  %v5177_v50 = vmul.u32 %v5175_v52, %v5173_v27  ;;  %v629_v35 = vmax.f32 %v597_v62, 1e-12 }
 0x487   :  { %v5083_v46 = vor.u32 %v5082_v19, %v5081_v31  ;;  %v5086_v11 = vshll.u32 %v5085_v36, 23  ;;  %vm261_vm3 = vweird.f32 %v9019_v54  ;;  %vm262_vm4 = vweird.f32 %v9072_v23 }
 0x488   :  { %v5180_v30 = vmul.u32 %v5176_v53, %v5174_v26  ;;  %v5181_v9 = vshll.u32 %v5178_v15, 16  ;;  %v5199_v20 = vmul.u32 %v5197_v55, %v5173_v27  ;;  %v5201_v51 = vmul.u32 %v5197_v55, %v5174_v26  ;;  %vm9587_vm10 = vmor %vm261_vm3, %vm262_vm4 }
 0x489   :  { %v5087_v29 = vor.u32 4788187, %v5086_v11  ;;  %v5183_v41 = vshll.u32 %v5179_v10, 16  ;;  %v5202_v5 = vmul.u32 %v5198_v44, %v5174_v26  ;;  %v5203_v63 = vshll.u32 %v5200_v1, 16 }
 0x48a   :  { %v5090_v17 = vcvt.s32.f32 %v5083_v46  ;;  %vm5185_vm14 = vc.u32 %v5177_v50, %v5181_v9  ;;  %v5187_v2 = vadd.s32 %v5181_v9, %v5177_v50  ;;  %v5205_v3 = vshll.u32 %v5201_v51, 16 }
 0x48b   :  { %v5088_v7 = vand.u32 2147483647, %v5087_v29  ;;  %v5186_v56 = vsel %vm5185_vm14, 1, %v6342_v57  ;;  %vm5207_vm5 = vc.u32 %v5199_v20, %v5203_v63  ;;  %v5209_v58 = vadd.s32 %v5203_v63, %v5199_v20 }
 0x48c   :  { %v5188_v12 = vadd.s32 %v5186_v56, %v5180_v30  ;;  %vm5189_vm6 = vc.u32 %v5187_v2, %v5183_v41  ;;  %v5208_v59 = vsel %vm5207_vm5, 1, %v6342_v57  ;;  %6262 = vlog2.f32 %v655_v33 }
 0x48d   :  { %v5091_v27 = vmul.f32 %v5090_v17, %v5088_v7  ;;  %v5190_v52 = vsel %vm5189_vm6, 1, %v6342_v57  ;;  %v5210_v62 = vadd.s32 %v5208_v59, %v5202_v5  ;;  %vm5211_vm7 = vc.u32 %v5209_v58, %v5205_v3 }
 0x48e   :  { %v5182_v26 = vshrl.u32 %v5178_v15, 16  ;;  %v5192_v53 = vadd.s32 %v5190_v52, %v5188_v12  ;;  %v5212_v55 = vsel %vm5211_vm7, 1, %v6342_v57  ;;  %6264 = vlog2.f32 %v629_v35 }
 0x48f   :  { %vm4972_vm8 = vcmp.lt.s32.totalorder %v9301_v40, 0  ;;  %v5092_v44 = vxor.u32 2147483648, %v5091_v27  ;;  %v5204_v31 = vshrl.u32 %v5200_v1, 16  ;;  %v5214_v19 = vadd.s32 %v5212_v55, %v5210_v62 }
 0x490   :  { %v5160_v36 = vsel %vm5156_vm13, %v5140_v47, %v9506_v6  ;;  %v5162_v33 = vsel %vm5158_vm0, %v9508_v24, %v5161_v61  ;;  %v5184_v46 = vshrl.u32 %v5179_v10, 16  ;;  %v5193_v11 = vadd.s32 %v5192_v53, %v5182_v26  ;;  %v491_v10 = vpop.f32.mrf.mxu1 }
 0x491   :  { %v10736_v15 = vand.u32 2147483647, %v9301_v40  ;;  %v5093_v1 = vsel %vm4972_vm8, %v5092_v44, %v5091_v27  ;;  %v5206_v35 = vshrl.u32 %v5201_v51, 16  ;;  %v5215_v30 = vadd.s32 %v5214_v19, %v5204_v31 }
 0x492   :  { %v6263_v9 = vpop.eup %6262  ;;  %v9576_v47 = vadd.s32 %v5193_v11, %v5184_v46  ;;  %v9578_v24 = vadd.s32 %v5209_v58, %v5205_v3  ;;  %v260_v61 = vmul.f32 %v9072_v23, %v259_v43  ;;  %v5163_v29 = vsel %vm5157_vm2, %v5160_v36, %v5162_v33 }
 0x493   :  { %vm9567_vm9 = vcmp.le.f32.partialorder %v10736_v15, 0.7853982  ;;  %v5216_v41 = vadd.s32 %v5215_v30, %v5206_v35  ;;  %v5094_v63 = vsub.s32 4, %v9478_v4  ;;  %v566_v2 = vmul.f32 %v9486_v60, %v491_v10 }
 0x494   :  { %v5096_v6 = vsel %vm9567_vm9, %v9301_v40, %v5093_v1  ;;  %v6265_v5 = vpop.eup %6264  ;;  %vm5219_vm11 = vc.u32 %v9576_v47, %v9578_v24  ;;  %v5217_v3 = vmul.u32 %v9481_v49, %v5163_v29  ;;  %v9598_v7 = vmul.f32 0.6931472, %v6263_v9 }
 0x495   :  { %v5098_v51 = vmul.f32 %v5096_v6, %v5096_v6  ;;  %v5220_v17 = vadd.s32 1, %v5216_v41  ;;  %v722_v56 = vmul.f32 0.6931472, %v6265_v5  ;;  %v264_v38 = vsel %vm9587_vm10, %v9072_v23, %v260_v61 }
 0x496   :  { %v896_v58 = vmul.f32 7.5, %v9290_v42  ;;  %v5095_v52 = vsel %vm4972_vm8, %v5094_v63, %v9478_v4  ;;  %v598_v53 = vsub.f32 %v9521_v13, %v566_v2  ;;  %v289_v55 = vmul.f32 0.99999, %v264_v38 }
 0x497   :  { %v5099_v48 = vmul.f32 -0.001358992, %v5098_v51  ;;  %v5106_v43 = vmul.f32 -0.00019511016, %v5098_v51  ;;  %v5221_v27 = vsel %vm5219_vm11, %v5220_v17, %v5216_v41  ;;  %v9608_v60 = vsub.f32 %v9598_v7, %v722_v56 }
 0x498   :  { %v5222_v62 = vadd.s32 %v5221_v27, %v5217_v3  ;;  %v954_v42 = vmul.f32 1.442695, %v896_v58  ;;  %v5097_v36 = vsel %vm9567_vm9, 0, %v5095_v52  ;;  %vm113_vm12 = vcmp.gt.f32.partialorder %v9019_v54, 0.99998 }
 0x499   :  { %v5100_v12 = vadd.f32 0.041655596, %v5099_v48  ;;  %v5107_v59 = vadd.f32 0.008332121, %v5106_v43  ;;  %v813_v23 = vmul.f32 %v6507_v32, %v9608_v60  ;;  %v630_v11 = vmax.f32 %v598_v53, 1e-12 }
 0x49a   :  { %v5223_v44 = vadd.s32 536870912, %v5222_v62  ;;  %v305_v15 = vsel %vm113_vm12, %v289_v55, 1.0  ;;  %v5114_v9 = vand.u32 3, %v5097_v36  ;;  %6266 = vpow2.f32 %v954_v42 }
 0x49b   :  { %v5101_v49 = vmul.f32 %v5100_v12, %v5098_v51  ;;  %v5108_v26 = vmul.f32 %v5107_v59, %v5098_v51  ;;  %v9618_v33 = vadd.f32 %v6513_v37, %v813_v23  ;;  %v321_v61 = vmul.f32 %v305_v15, %v305_v15 }
 0x49c   :  { %v9615_v4 = vshrl.u32 %v5223_v44, 30  ;;  %6268 = vlog2.f32 %v630_v11  ;;  %vm5115_vm15 = vcmp.lt.s32.totalorder %v5114_v9, 2  ;;  %v897_v48 = vmul.f32 7.5, %v9386_v21 }
 0x49d   :  { %v5102_v31 = vadd.f32 -0.4999988, %v5101_v49  ;;  %v5109_v19 = vadd.f32 -0.16666654, %v5108_v26  ;;  %v2817_v10 = vand.u32 2139095040, %v9618_v33  ;;  %vm5116_vm0 = vcmp.eq.s32.totalorder %v5114_v9, 0 }
 0x49e   :  { %v5225_v1 = vshll.u32 %v9615_v4, 30  ;;  %v2814_v5 = vand.u32 2147483647, %v9618_v33  ;;  %vm5119_vm1 = vcmp.eq.s32.totalorder %v5114_v9, 2  ;;  %vm5113_vm2 = vweird.f32 %v9301_v40 }
 0x49f   :  { %v5103_v46 = vmul.f32 %v5102_v31, %v5098_v51  ;;  %v5110_v13 = vmul.f32 %v5109_v19, %v5098_v51  ;;  %v2818_v41 = vshrl.u32 %v2817_v10, 23  ;;  %6270 = vrsqrt.f32 %v7417_v14 }
 0x4a0   :  { %v9623_v50 = vsub.s32 %v5222_v62, %v5225_v1  ;;  %v6267_v58 = vpop.eup %6266  ;;  %v2821_v59 = vand.u32 8388607, %v2814_v5  ;;  %v5218_v49 = vadd.s32 %v9578_v24, %v9576_v47  ;;  %vm5126_vm4 = vcmp.lt.s32.totalorder %v9427_v45, 0 }
 0x4a1   :  { %v5104_v35 = vadd.f32 1.0, %v5103_v46  ;;  %v5111_v30 = vadd.f32 1.0, %v5110_v13  ;;  %v6044_v43 = vadd.s32 4294967169, %v2818_v41  ;;  %v9645_v55 = vmul.f32 2.0, %v305_v15 }
 0x4a2   :  { %vm5227_vm13 = vcmp.lt.s32.totalorder %v9623_v50, 0  ;;  %v5228_v51 = vsub.s32 0, %v9623_v50  ;;  %v6269_v21 = vpop.eup %6268  ;;  %v5248_v23 = vsub.s32 4, %v9615_v4  ;;  %v2822_v42 = vor.u32 8388608, %v2821_v59 }
 0x4a3   :  { %v5112_v20 = vmul.f32 %v5111_v30, %v5096_v6  ;;  %v5120_v29 = vxor.u32 2147483648, %v5104_v35  ;;  %v9631_v6 = vmul.f32 %v321_v61, %v9019_v54  ;;  %v2824_v38 = vadd.s32 1, %v6044_v43 }
 0x4a4   :  { %v5229_v17 = vsel %vm5227_vm13, %v5228_v51, %v9623_v50  ;;  %v9637_v54 = vmul.f32 1.442695, %v897_v48  ;;  %v724_v31 = vmul.f32 0.6931472, %v6269_v21  ;;  %vm9664_vm5 = vcmp.le.f32.partialorder %v5124_v28, 0.7853982 }
 0x4a5   :  { %v5117_v63 = vxor.u32 2147483648, %v5112_v20  ;;  %v5121_v3 = vsel %vm5119_vm1, %v5120_v29, %v5112_v20  ;;  %v5230_v56 = vclz %v5229_v17  ;;  %vm2825_vm3 = vcmp.gt.s32.totalorder %v2824_v38, 0  ;;  %v9654_v1 = vpop.eup %6270 }
 0x4a6   :  { %v2826_v26 = vsel %vm2825_vm3, %v2824_v38, 0  ;;  %v9643_v53 = vadd.f32 1.0, %v9631_v6  ;;  %v9675_v28 = vshll.u32 %v2822_v42, 8  ;;  %v9680_v59 = vsel %vm5126_vm4, %v5248_v23, %v9615_v4  ;;  %v450_v42 = vpop.f32.mrf.mxu2 }
 0x4a7   :  { %v5118_v2 = vsel %vm5116_vm0, %v5104_v35, %v5117_v63  ;;  %v6090_v52 = vadd.s32 4294967294, %v5230_v56  ;;  %v2828_v40 = vand.u32 31, %v2826_v26  ;;  %v9648_v46 = vshrl.u32 %v2826_v26, 5 }
 0x4a8   :  { %v5122_v12 = vsel %vm5115_vm15, %v5118_v2, %v5121_v3  ;;  %v9672_v56 = vsub.f32 %v9598_v7, %v724_v31  ;;  %v2863_v23 = vand.u32 65535, %v9675_v28  ;;  %6272 = vpow2.f32 %v9637_v54 }
 0x4a9   :  { %v5123_v27 = vsel %vm5113_vm2, nan, %v5122_v12  ;;  %vm6091_vm14 = vcmp.lt.s32.totalorder %v6090_v52, 0  ;;  %v2829_v47 = vsub.s32 32, %v2828_v40  ;;  %v2831_v13 = vshll.u32 %v6336_v16, %v2828_v40 }
 0x4aa   :  { %v5920_v62 = vmul.f32 %v6267_v58, %v5123_v27  ;;  %v5233_v44 = vsel %vm6091_vm14, 0, %v6090_v52  ;;  %v2834_v11 = vshll.u32 %v6337_v18, %v2828_v40  ;;  %v2837_v15 = vshll.u32 %v6338_v22, %v2828_v40 }
 0x4ab   :  { %v5234_v19 = vsub.s32 32, %v5233_v44  ;;  %v5238_v36 = vsub.s32 4294967266, %v5233_v44  ;;  %v5235_v24 = vshll.u32 %v9623_v50, %v5233_v44  ;;  %v2832_v9 = vshrl.u32 %v6337_v18, %v2829_v47 }
 0x4ac   :  { %5952 = vst [vmem:[#allocation2 + $0xd0] sm:$0xff] %v5920_v62  ;;  %v2840_v10 = vshll.u32 %v6339_v25, %v2828_v40  ;;  %v2835_v61 = vshrl.u32 %v6338_v22, %v2829_v47  ;;  %v2838_v20 = vshrl.u32 %v6339_v25, %v2829_v47  ;;  %v2841_v50 = vshrl.u32 %v10689_v8, %v2829_v47 }
 0x4ad   :  { %v5236_v35 = vshrl.u32 %v5218_v49, %v5234_v19  ;;  %v5239_v30 = vadd.s32 127, %v5238_v36  ;;  %v2843_v29 = vshll.u32 %v10689_v8, %v2828_v40  ;;  %v2833_v48 = vor.u32 %v2832_v9, %v2831_v13 }
 0x4ae   :  { %v2844_v43 = vshrl.u32 %v10690_v0, %v2829_v47  ;;  %v9669_v17 = vor.u32 %v2835_v61, %v2834_v11  ;;  %v2839_v2 = vor.u32 %v2838_v20, %v2837_v15  ;;  %v2842_v3 = vor.u32 %v2841_v50, %v2840_v10 }
 0x4af   :  { %v5237_v51 = vor.u32 %v5236_v35, %v5235_v24  ;;  %v5240_v63 = vshll.u32 %v5239_v30, 23  ;;  %vm2846_vm6 = vcmp.lt.s32.totalorder %v9648_v46, 1  ;;  %vm2849_vm7 = vcmp.lt.s32.totalorder %v9648_v46, 4 }
 0x4b0   :  { %v2845_v58 = vor.u32 %v2844_v43, %v2843_v29  ;;  %v2854_v21 = vsel %vm2846_vm6, %v2833_v48, %v9669_v17  ;;  %vm2848_vm8 = vcmp.lt.s32.totalorder %v9648_v46, 3  ;;  %v2855_v27 = vsel %vm2849_vm7, %v2842_v3, 920167782 }
 0x4b1   :  { %v5241_v38 = vor.u32 4788187, %v5240_v63  ;;  %v5244_v12 = vcvt.s32.f32 %v5237_v51  ;;  %v2858_v52 = vsel %vm2846_vm6, %v9669_v17, %v2839_v2  ;;  %vm2847_vm9 = vcmp.lt.s32.totalorder %v9648_v46, 2 }
 0x4b2   :  { %v2856_v4 = vsel %vm2848_vm8, %v2839_v2, %v2855_v27  ;;  %v2859_v62 = vsel %vm2849_vm7, %v2845_v58, 1326507024  ;;  %v814_v49 = vmul.f32 %v6509_v34, %v9672_v56  ;;  %v2864_v19 = vshrl.u32 %v9675_v28, 16 }
 0x4b3   :  { %v5242_v7 = vand.u32 2147483647, %v5241_v38  ;;  %v2857_v40 = vsel %vm2847_vm9, %v2854_v21, %v2856_v4  ;;  %v2860_v44 = vsel %vm2848_vm8, %v2842_v3, %v2859_v62  ;;  %v2830_v11 = vshrl.u32 %v6336_v16, %v2829_v47 }
 0x4b4   :  { %v2861_v31 = vsel %vm2847_vm9, %v2858_v52, %v2860_v44  ;;  %v2887_v36 = vand.u32 65535, %v2857_v40  ;;  %v2888_v24 = vshrl.u32 %v2857_v40, 16  ;;  %v5251_v30 = vsel %vm9664_vm5, 0, %v9680_v59 }
 0x4b5   :  { %v5245_v26 = vmul.f32 %v5244_v12, %v5242_v7  ;;  %v2865_v15 = vand.u32 65535, %v2861_v31  ;;  %v2866_v35 = vshrl.u32 %v2861_v31, 16  ;;  %v9712_v10 = vadd.f32 %v6517_v39, %v814_v49 }
 0x4b6   :  { %v2890_v9 = vmul.u32 %v2888_v24, %v2863_v23  ;;  %v9715_v61 = vmul.f32 %v9645_v55, %v450_v42  ;;  %v2850_v50 = vsel %vm2846_vm6, %v2830_v11, %v2833_v48  ;;  %v2889_v63 = vmul.u32 %v2887_v36, %v2863_v23 }
 0x4b7   :  { %v5246_v13 = vxor.u32 2147483648, %v5245_v26  ;;  %v2868_v47 = vmul.u32 %v2866_v35, %v2863_v23  ;;  %v2869_v29 = vmul.u32 %v2865_v15, %v2864_v19  ;;  %v2891_v43 = vmul.u32 %v2887_v36, %v2864_v19 }
 0x4b8   :  { %v2893_v3 = vshll.u32 %v2890_v9, 16  ;;  %v2851_v58 = vsel %vm2849_vm7, %v2839_v2, 2102212464  ;;  %v2867_v12 = vmul.u32 %v2865_v15, %v2863_v23  ;;  %v2870_v7 = vmul.u32 %v2866_v35, %v2864_v19 }
 0x4b9   :  { %v5247_v20 = vsel %vm5126_vm4, %v5246_v13, %v5245_v26  ;;  %v2871_v21 = vshll.u32 %v2868_v47, 16  ;;  %v2873_v27 = vshll.u32 %v2869_v29, 16  ;;  %v2892_v52 = vmul.u32 %v2888_v24, %v2864_v19 }
 0x4ba   :  { %v5250_v51 = vsel %vm9664_vm5, %v9427_v45, %v5247_v20  ;;  %vm2897_vm10 = vc.u32 %v2889_v63, %v2893_v3  ;;  %v2895_v26 = vshll.u32 %v2891_v43, 16  ;;  %v2899_v44 = vadd.s32 %v2893_v3, %v2889_v63 }
 0x4bb   :  { %v5252_v38 = vmul.f32 %v5250_v51, %v5250_v51  ;;  %vm2875_vm11 = vc.u32 %v2867_v12, %v2871_v21  ;;  %v2877_v62 = vadd.s32 %v2871_v21, %v2867_v12  ;;  %v2898_v40 = vsel %vm2897_vm10, 1, %v6342_v57 }
 0x4bc   :  { %v2876_v49 = vsel %vm2875_vm11, 1, %v6342_v57  ;;  %v2872_v2 = vshrl.u32 %v2868_v47, 16  ;;  %v2900_v13 = vadd.s32 %v2898_v40, %v2892_v52  ;;  %vm2901_vm13 = vc.u32 %v2899_v44, %v2895_v26 }
 0x4bd   :  { %v5253_v48 = vmul.f32 -0.001358992, %v5252_v38  ;;  %v5260_v4 = vmul.f32 -0.00019511016, %v5252_v38  ;;  %v2878_v36 = vadd.s32 %v2876_v49, %v2870_v7  ;;  %vm2879_vm12 = vc.u32 %v2877_v62, %v2873_v27 }
 0x4be   :  { %v2880_v23 = vsel %vm2879_vm12, 1, %v6342_v57  ;;  %v2902_v15 = vsel %vm2901_vm13, 1, %v6342_v57  ;;  %v2852_v35 = vsel %vm2848_vm8, %v9669_v17, %v2851_v58  ;;  %v2894_v20 = vshrl.u32 %v2890_v9, 16 }
 0x4bf   :  { %v5254_v42 = vadd.f32 0.041655596, %v5253_v48  ;;  %v5261_v31 = vadd.f32 0.008332121, %v5260_v4  ;;  %v2882_v11 = vadd.s32 %v2880_v23, %v2878_v36  ;;  %v2904_v63 = vadd.s32 %v2902_v15, %v2900_v13 }
 0x4c0   :  { %v2971_v3 = vand.u32 2139095040, %v9712_v10  ;;  %v2874_v47 = vshrl.u32 %v2869_v29, 16  ;;  %v2896_v27 = vshrl.u32 %v2891_v43, 16  ;;  %v613_v4 = vsub.f32 %v9643_v53, %v9715_v61 }
 0x4c1   :  { %v5255_v19 = vmul.f32 %v5254_v42, %v5252_v38  ;;  %v5262_v24 = vmul.f32 %v5261_v31, %v5252_v38  ;;  %v2883_v7 = vadd.s32 %v2882_v11, %v2872_v2  ;;  %v2905_v52 = vadd.s32 %v2904_v63, %v2894_v20 }
 0x4c2   :  { %v2972_v48 = vshrl.u32 %v2971_v3, 23  ;;  %v9738_v42 = vadd.s32 %v2899_v44, %v2895_v26  ;;  %v2853_v17 = vsel %vm2847_vm9, %v2850_v50, %v2852_v35  ;;  %v663_v29 = vsub.f32 1.0, %v9631_v6 }
 0x4c3   :  { %v5256_v12 = vadd.f32 -0.4999988, %v5255_v19  ;;  %v5263_v21 = vadd.f32 -0.16666654, %v5262_v24  ;;  %v9736_v40 = vadd.s32 %v2883_v7, %v2874_v47  ;;  %v2906_v9 = vadd.s32 %v2905_v52, %v2896_v27  ;;  %v6273_v24 = vpop.eup %6272 }
 0x4c4   :  { %v6047_v58 = vadd.s32 4294967169, %v2972_v48  ;;  %v2968_v61 = vand.u32 2147483647, %v9712_v10  ;;  %v2907_v6 = vmul.u32 %v9675_v28, %v2853_v17  ;;  %v645_v36 = vmax.f32 %v613_v4, 1e-12 }
 0x4c5   :  { %v5257_v62 = vmul.f32 %v5256_v12, %v5252_v38  ;;  %v5264_v49 = vmul.f32 %v5263_v21, %v5252_v38  ;;  %vm2909_vm15 = vc.u32 %v9736_v40, %v9738_v42  ;;  %v5268_v38 = vand.u32 3, %v5251_v30 }
 0x4c6   :  { %v2910_v46 = vadd.s32 1, %v2906_v9  ;;  %v2978_v50 = vadd.s32 1, %v6047_v58  ;;  %6274 = vlog2.f32 %v663_v29  ;;  %v2975_v54 = vand.u32 8388607, %v2968_v61 }
 0x4c7   :  { %v5258_v31 = vadd.f32 1.0, %v5257_v62  ;;  %v5265_v43 = vadd.f32 1.0, %v5264_v49  ;;  %vm5269_vm1 = vcmp.lt.s32.totalorder %v5268_v38, 2  ;;  %vm5270_vm2 = vcmp.eq.s32.totalorder %v5268_v38, 0 }
 0x4c8   :  { %v2911_v2 = vsel %vm2909_vm15, %v2910_v46, %v2906_v9  ;;  %vm2979_vm0 = vcmp.gt.s32.totalorder %v2978_v50, 0  ;;  %vm5273_vm3 = vcmp.eq.s32.totalorder %v5268_v38, 2  ;;  %6276 = vlog2.f32 %v645_v36 }
 0x4c9   :  { %v5266_v26 = vmul.f32 %v5265_v43, %v5250_v51  ;;  %v5274_v44 = vxor.u32 2147483648, %v5258_v31  ;;  %v2912_v13 = vadd.s32 %v2911_v2, %v2907_v6  ;;  %v2980_v19 = vsel %vm2979_vm0, %v2978_v50, 0 }
 0x4ca   :  { %v2982_v41 = vand.u32 31, %v2980_v19  ;;  %v186_v28 = vmul.f32 %v9654_v1, %v7417_v14  ;;  %vm5267_vm4 = vweird.f32 %v9427_v45  ;;  %v2976_v63 = vor.u32 8388608, %v2975_v54 }
 0x4cb   :  { %v5271_v23 = vxor.u32 2147483648, %v5266_v26  ;;  %v5275_v30 = vsel %vm5273_vm3, %v5274_v44, %v5266_v26  ;;  %v2913_v51 = vadd.s32 536870912, %v2912_v13  ;;  %v9773_v62 = vshrl.u32 %v2980_v19, 5 }
 0x4cc   :  { %v9757_v15 = vsub.s32 32, %v2982_v41  ;;  %v2985_v3 = vshll.u32 %v6336_v16, %v2982_v41  ;;  %v6275_v12 = vpop.eup %6274  ;;  %v2988_v7 = vshll.u32 %v6337_v18, %v2982_v41  ;;  %v2991_v52 = vshll.u32 %v6338_v22, %v2982_v41 }
 0x4cd   :  { %v5272_v59 = vsel %vm5270_vm2, %v5258_v31, %v5271_v23  ;;  %v9759_v20 = vshrl.u32 %v2913_v51, 30  ;;  %v2994_v49 = vshll.u32 %v6339_v25, %v2982_v41  ;;  %v2997_v17 = vshll.u32 %v10689_v8, %v2982_v41  ;;  %v515_v23 = vpop.f32.mrf.mxu3 }
 0x4ce   :  { %v5276_v11 = vsel %vm5269_vm1, %v5272_v59, %v5275_v30  ;;  %v2986_v47 = vshrl.u32 %v6337_v18, %v9757_v15  ;;  %v2989_v27 = vshrl.u32 %v6338_v22, %v9757_v15  ;;  %v2992_v48 = vshrl.u32 %v6339_v25, %v9757_v15  ;;  %v6277_v58 = vpop.eup %6276 }
 0x4cf   :  { %v5277_v35 = vsel %vm5267_vm4, nan, %v5276_v11  ;;  %v2915_v45 = vshll.u32 %v9759_v20, 30  ;;  %v2995_v4 = vshrl.u32 %v10689_v8, %v9757_v15  ;;  %v2998_v9 = vshrl.u32 %v10690_v0, %v9757_v15 }
 0x4d0   :  { %v5921_v21 = vmul.f32 %v6273_v24, %v5277_v35  ;;  %v9779_v31 = vor.u32 %v2986_v47, %v2985_v3  ;;  %v9781_v43 = vor.u32 %v2989_v27, %v2988_v7  ;;  %v9783_v38 = vor.u32 %v2992_v48, %v2991_v52 }
 0x4d1   :  { %v2916_v29 = vsub.s32 %v2912_v13, %v2915_v45  ;;  %v2996_v46 = vor.u32 %v2995_v4, %v2994_v49  ;;  %v2999_v50 = vor.u32 %v2998_v9, %v2997_v17  ;;  %v187_v26 = vmul.f32 %v9654_v1, %v186_v28 }
 0x4d2   :  { %5953 = vst [vmem:[#allocation2 + $0xd8] sm:$0xff] %v5921_v21  ;;  %vm3000_vm5 = vcmp.lt.s32.totalorder %v9773_v62, 1  ;;  %v9787_v6 = vshll.u32 %v2976_v63, 8  ;;  %v9789_v36 = vmul.f32 0.6931472, %v6275_v12  ;;  %vm3003_vm6 = vcmp.lt.s32.totalorder %v9773_v62, 4 }
 0x4d3   :  { %vm2917_vm14 = vcmp.lt.s32.totalorder %v2916_v29, 0  ;;  %v2918_v44 = vsub.s32 0, %v2916_v29  ;;  %v754_v2 = vmul.f32 0.6931472, %v6277_v58  ;;  %v3008_v54 = vsel %vm3000_vm5, %v9779_v31, %v9781_v43 }
 0x4d4   :  { %v3012_v19 = vsel %vm3000_vm5, %v9781_v43, %v9783_v38  ;;  %vm3002_vm7 = vcmp.lt.s32.totalorder %v9773_v62, 3  ;;  %v3009_v59 = vsel %vm3003_vm6, %v2996_v46, 920167782  ;;  %v3013_v30 = vsel %vm3003_vm6, %v2999_v50, 1326507024 }
 0x4d5   :  { %v2919_v13 = vsel %vm2917_vm14, %v2918_v44, %v2916_v29  ;;  %vm3001_vm8 = vcmp.lt.s32.totalorder %v9773_v62, 2  ;;  %v3010_v51 = vsel %vm3002_vm7, %v9783_v38, %v3009_v59  ;;  %v3014_v24 = vsel %vm3002_vm7, %v2996_v46, %v3013_v30 }
 0x4d6   :  { %v2920_v41 = vclz %v2919_v13  ;;  %v9812_v28 = vmul.f32 %v9645_v55, %v515_v23  ;;  %v3011_v35 = vsel %vm3001_vm8, %v3008_v54, %v3010_v51  ;;  %v3015_v63 = vsel %vm3001_vm8, %v3012_v19, %v3014_v24 }
 0x4d7   :  { %v3017_v3 = vand.u32 65535, %v9787_v6  ;;  %v3018_v12 = vshrl.u32 %v9787_v6, 16  ;;  %v3019_v21 = vand.u32 65535, %v3015_v63  ;;  %v3020_v47 = vshrl.u32 %v3015_v63, 16 }
 0x4d8   :  { %v6045_v11 = vadd.s32 4294967294, %v2920_v41  ;;  %v9821_v7 = vsub.f32 %v9789_v36, %v754_v2  ;;  %v9823_v27 = vmul.f32 0.5, %v187_v26  ;;  %v9826_v55 = vmul.f32 7.5, %v9608_v60 }
 0x4d9   :  { %v3042_v45 = vshrl.u32 %v3011_v35, 16  ;;  %v3022_v48 = vmul.u32 %v3020_v47, %v3017_v3  ;;  %v3023_v4 = vmul.u32 %v3019_v21, %v3018_v12  ;;  %v3041_v49 = vand.u32 65535, %v3011_v35 }
 0x4da   :  { %vm6046_vm9 = vcmp.lt.s32.totalorder %v6045_v11, 0  ;;  %v2908_v17 = vadd.s32 %v9738_v42, %v9736_v40  ;;  %v614_v46 = vsub.f32 %v9643_v53, %v9812_v28  ;;  %v3021_v26 = vmul.u32 %v3019_v21, %v3017_v3 }
 0x4db   :  { %v2923_v52 = vsel %vm6046_vm9, 0, %v6045_v11  ;;  %v3025_v44 = vshll.u32 %v3022_v48, 16  ;;  %v829_v60 = vmul.f32 %v6507_v32, %v9821_v7  ;;  %v3024_v13 = vmul.u32 %v3020_v47, %v3018_v12 }
 0x4dc   :  { %v2924_v9 = vsub.s32 32, %v2923_v52  ;;  %v2928_v58 = vsub.s32 4294967266, %v2923_v52  ;;  %v2925_v50 = vshll.u32 %v2916_v29, %v2923_v52  ;;  %v3044_v54 = vmul.u32 %v3042_v45, %v3017_v3 }
 0x4dd   :  { %v3027_v19 = vshll.u32 %v3023_v4, 16  ;;  %vm3029_vm10 = vc.u32 %v3021_v26, %v3025_v44  ;;  %v3031_v41 = vadd.s32 %v3025_v44, %v3021_v26  ;;  %v3045_v59 = vmul.u32 %v3041_v49, %v3018_v12 }
 0x4de   :  { %v2926_v2 = vshrl.u32 %v2908_v17, %v2924_v9  ;;  %v2929_v23 = vadd.s32 127, %v2928_v58  ;;  %v3030_v30 = vsel %vm3029_vm10, 1, %v6342_v57  ;;  %v3047_v51 = vshll.u32 %v3044_v54, 16 }
 0x4df   :  { %vm2816_vm11 = vcmp.lt.s32.totalorder %v9618_v33, 0  ;;  %v3026_v53 = vshrl.u32 %v3022_v48, 16  ;;  %v3032_v29 = vadd.s32 %v3030_v30, %v3024_v13  ;;  %vm3033_vm12 = vc.u32 %v3031_v41, %v3027_v19 }
 0x4e0   :  { %v2927_v40 = vor.u32 %v2926_v2, %v2925_v50  ;;  %v2930_v42 = vshll.u32 %v2929_v23, 23  ;;  %v3043_v24 = vmul.u32 %v3041_v49, %v3017_v3  ;;  %v3034_v11 = vsel %vm3033_vm12, 1, %v6342_v57 }
 0x4e1   :  { %v3046_v35 = vmul.u32 %v3042_v45, %v3018_v12  ;;  %v3049_v63 = vshll.u32 %v3045_v59, 16  ;;  %v3036_v21 = vadd.s32 %v3034_v11, %v3032_v29  ;;  %v9838_v52 = vadd.f32 %v6513_v37, %v829_v60 }
 0x4e2   :  { %v2931_v28 = vor.u32 4788187, %v2930_v42  ;;  %vm3051_vm13 = vc.u32 %v3043_v24, %v3047_v51  ;;  %v3053_v47 = vadd.s32 %v3047_v51, %v3043_v24  ;;  %v2934_v9 = vcvt.s32.f32 %v2927_v40 }
 0x4e3   :  { %v2984_v58 = vshrl.u32 %v6336_v16, %v9757_v15  ;;  %v3052_v48 = vsel %vm3051_vm13, 1, %v6342_v57  ;;  %v3005_v3 = vsel %vm3003_vm6, %v9783_v38, 2102212464  ;;  %v3037_v49 = vadd.s32 %v3036_v21, %v3026_v53 }
 0x4e4   :  { %v2932_v17 = vand.u32 2147483647, %v2931_v28  ;;  %v3054_v12 = vadd.s32 %v3052_v48, %v3046_v35  ;;  %vm3055_vm15 = vc.u32 %v3053_v47, %v3049_v63  ;;  %v2938_v50 = vsub.s32 4, %v9759_v20 }
 0x4e5   :  { %v3028_v26 = vshrl.u32 %v3023_v4, 16  ;;  %v3056_v44 = vsel %vm3055_vm15, 1, %v6342_v57  ;;  %v3048_v60 = vshrl.u32 %v3044_v54, 16  ;;  %v5281_v23 = vand.u32 2139095040, %v9838_v52 }
 0x4e6   :  { %v2935_v45 = vmul.f32 %v2934_v9, %v2932_v17  ;;  %v3058_v2 = vadd.s32 %v3056_v44, %v3054_v12  ;;  %v646_v15 = vmax.f32 %v614_v46, 1e-12  ;;  %v3004_v19 = vsel %vm3000_vm5, %v2984_v58, %v9779_v31 }
 0x4e7   :  { %v3006_v38 = vsel %vm3002_vm7, %v9781_v43, %v3005_v3  ;;  %v3038_v41 = vadd.s32 %v3037_v49, %v3028_v26  ;;  %v3050_v40 = vshrl.u32 %v3045_v59, 16  ;;  %v5278_v4 = vand.u32 2147483647, %v9838_v52 }
 0x4e8   :  { %v2936_v13 = vxor.u32 2147483648, %v2935_v45  ;;  %v3059_v42 = vadd.s32 %v3058_v2, %v3048_v60  ;;  %v5282_v30 = vshrl.u32 %v5281_v23, 23  ;;  %vm9858_vm0 = vcmp.le.f32.partialorder %v2814_v5, 0.7853982 }
 0x4e9   :  { %v2939_v31 = vsel %vm2816_vm11, %v2938_v50, %v9759_v20  ;;  %v3057_v43 = vadd.s32 %v3053_v47, %v3049_v63  ;;  %v3007_v51 = vsel %vm3001_vm8, %v3004_v19, %v3006_v38  ;;  %6278 = vlog2.f32 %v646_v15  ;;  %v9882_v47 = vpop.xlane.xlu0 %97 }
 0x4ea   :  { %v2937_v46 = vsel %vm2816_vm11, %v2936_v13, %v2935_v45  ;;  %v3060_v5 = vadd.s32 %v3059_v42, %v3050_v40  ;;  %v6092_v53 = vadd.s32 4294967169, %v5282_v30  ;;  %v5285_v20 = vand.u32 8388607, %v5278_v4 }
 0x4eb   :  { %v9870_v59 = vsel %vm9858_vm0, %v9618_v33, %v2937_v46  ;;  %vm3063_vm1 = vc.u32 %v3038_v41, %v3057_v43  ;;  %v2941_v11 = vsel %vm9858_vm0, 0, %v2939_v31  ;;  %v3061_v62 = vmul.u32 %v9787_v6, %v3007_v51 }
 0x4ec   :  { %v2942_v29 = vmul.f32 %v9870_v59, %v9870_v59  ;;  %v3064_v24 = vadd.s32 1, %v3060_v5  ;;  %v5288_v28 = vadd.s32 1, %v6092_v53  ;;  %v189_v21 = vsub.f32 1.5, %v9823_v27 }
 0x4ed   :  { %v926_v17 = vmul.f32 1.442695, %v9826_v55  ;;  %vm191_vm3 = vweird.f32 %v7417_v14  ;;  %v9886_v12 = vand.u32 3, %v2941_v11  ;;  %v5286_v45 = vor.u32 8388608, %v5285_v20 }
 0x4ee   :  { %v2943_v35 = vmul.f32 -0.001358992, %v2942_v29  ;;  %v2950_v63 = vmul.f32 -0.00019511016, %v2942_v29  ;;  %v3065_v9 = vsel %vm3063_vm1, %v3064_v24, %v3060_v5  ;;  %vm5289_vm2 = vcmp.gt.s32.totalorder %v5288_v28, 0 }
 0x4ef   :  { %v3066_v3 = vadd.s32 %v3065_v9, %v3061_v62  ;;  %v5290_v49 = vsel %vm5289_vm2, %v5288_v28, 0  ;;  %v6279_v26 = vpop.eup %6278  ;;  %6280 = vrsqrt.f32 %v9882_v47  ;;  %v9892_v60 = vmul.f32 %v9654_v1, %v189_v21 }
 0x4f0   :  { %v2944_v58 = vadd.f32 0.041655596, %v2943_v35  ;;  %v2951_v48 = vadd.f32 0.008332121, %v2950_v63  ;;  %v5292_v50 = vand.u32 31, %v5290_v49  ;;  %6282 = vpow2.f32 %v926_v17 }
 0x4f1   :  { %v3067_v44 = vadd.s32 536870912, %v3066_v3  ;;  %vm192_vm4 = vweird.f32 %v9654_v1  ;;  %v9895_v15 = vadd.s32 %v3057_v43, %v3038_v41  ;;  %vm2960_vm14 = vcmp.eq.s32.totalorder %v9886_v12, 0 }
 0x4f2   :  { %v2945_v6 = vmul.f32 %v2944_v58, %v2942_v29  ;;  %v2952_v27 = vmul.f32 %v2951_v48, %v2942_v29  ;;  %v9889_v55 = vsub.s32 32, %v5292_v50  ;;  %vm2963_vm5 = vcmp.eq.s32.totalorder %v9886_v12, 2  ;;  %vm9927_vm8 = vmor %vm191_vm3, %vm192_vm4 }
 0x4f3   :  { %v9897_v13 = vshrl.u32 %v3067_v44, 30  ;;  %v9905_v40 = vshll.u32 %v5286_v45, 8  ;;  %v756_v42 = vmul.f32 0.6931472, %v6279_v26  ;;  %vm2959_vm6 = vcmp.lt.s32.totalorder %v9886_v12, 2 }
 0x4f4   :  { %v2946_v2 = vadd.f32 -0.4999988, %v2945_v6  ;;  %v2953_v23 = vadd.f32 -0.16666654, %v2952_v27  ;;  %v5296_v19 = vshrl.u32 %v6337_v18, %v9889_v55  ;;  %v5299_v38 = vshrl.u32 %v6338_v22, %v9889_v55 }
 0x4f5   :  { %v3069_v41 = vshll.u32 %v9897_v13, 30  ;;  %v9909_v46 = vshrl.u32 %v5290_v49, 5  ;;  %vm2957_vm7 = vweird.f32 %v9618_v33  ;;  %v5295_v31 = vshll.u32 %v6336_v16, %v5292_v50  ;;  %v9917_v53 = vpop.eup %6280 }
 0x4f6   :  { %v2947_v30 = vmul.f32 %v2946_v2, %v2942_v29  ;;  %v2954_v54 = vmul.f32 %v2953_v23, %v2942_v29  ;;  %v5298_v43 = vshll.u32 %v6337_v18, %v5292_v50  ;;  %v5301_v51 = vshll.u32 %v6338_v22, %v5292_v50  ;;  %v6283_v35 = vpop.eup %6282 }
 0x4f7   :  { %v5305_v5 = vshrl.u32 %v10689_v8, %v9889_v55  ;;  %v9919_v20 = vsub.s32 %v3066_v3, %v3069_v41  ;;  %v5302_v28 = vshrl.u32 %v6339_v25, %v9889_v55  ;;  %v9931_v63 = vor.u32 %v5296_v19, %v5295_v31 }
 0x4f8   :  { %v2948_v29 = vadd.f32 1.0, %v2947_v30  ;;  %v2955_v24 = vadd.f32 1.0, %v2954_v54  ;;  %v9933_v62 = vor.u32 %v5299_v38, %v5298_v43  ;;  %v5304_v21 = vshll.u32 %v6339_v25, %v5292_v50 }
 0x4f9   :  { %v5308_v17 = vshrl.u32 %v10690_v0, %v9889_v55  ;;  %vm3071_vm9 = vcmp.lt.s32.totalorder %v9919_v20, 0  ;;  %v3072_v48 = vsub.s32 0, %v9919_v20  ;;  %v5307_v49 = vshll.u32 %v10689_v8, %v5292_v50 }
 0x4fa   :  { %v2956_v9 = vmul.f32 %v2955_v24, %v9870_v59  ;;  %v2964_v58 = vxor.u32 2147483648, %v2948_v29  ;;  %v5306_v3 = vor.u32 %v5305_v5, %v5304_v21  ;;  %v9943_v45 = vsub.f32 %v9789_v36, %v756_v42 }
 0x4fb   :  { %v194_v26 = vsel %vm9927_vm8, %v9654_v1, %v9892_v60  ;;  %v3073_v27 = vsel %vm3071_vm9, %v3072_v48, %v9919_v20  ;;  %v5303_v59 = vor.u32 %v5302_v28, %v5301_v51  ;;  %v5327_v44 = vand.u32 65535, %v9905_v40 }
 0x4fc   :  { %v2961_v6 = vxor.u32 2147483648, %v2956_v9  ;;  %v3074_v2 = vclz %v3073_v27  ;;  %v5309_v23 = vor.u32 %v5308_v17, %v5307_v49  ;;  %vm5310_vm10 = vcmp.lt.s32.totalorder %v9909_v46, 1 }
 0x4fd   :  { %v5328_v50 = vshrl.u32 %v9905_v40, 16  ;;  %v2965_v19 = vsel %vm2963_vm5, %v2964_v58, %v2956_v9  ;;  %vm5313_vm11 = vcmp.lt.s32.totalorder %v9909_v46, 4  ;;  %v5318_v1 = vsel %vm5310_vm10, %v9931_v63, %v9933_v62 }
 0x4fe   :  { %v2962_v36 = vsel %vm2960_vm14, %v2948_v29, %v2961_v6  ;;  %v6048_v38 = vadd.s32 4294967294, %v3074_v2  ;;  %vm5312_vm12 = vcmp.lt.s32.totalorder %v9909_v46, 3  ;;  %v5319_v42 = vsel %vm5313_vm11, %v5306_v3, 920167782 }
 0x4ff   :  { %v2966_v60 = vsel %vm2959_vm6, %v2962_v36, %v2965_v19  ;;  %vm5311_vm13 = vcmp.lt.s32.totalorder %v9909_v46, 2  ;;  %v5320_v54 = vsel %vm5312_vm12, %v5303_v59, %v5319_v42  ;;  %v830_v41 = vmul.f32 %v6509_v34, %v9943_v45 }
 0x500   :  { %v2967_v30 = vsel %vm2957_vm7, nan, %v2966_v60  ;;  %vm6049_vm15 = vcmp.lt.s32.totalorder %v6048_v38, 0  ;;  %v5321_v12 = vsel %vm5311_vm13, %v5318_v1, %v5320_v54  ;;  %v5322_v43 = vsel %vm5310_vm10, %v9933_v62, %v5303_v59 }
 0x501   :  { %v5906_v31 = vmul.f32 %v6283_v35, %v2967_v30  ;;  %v3077_v51 = vsel %vm6049_vm15, 0, %v6048_v38  ;;  %v5323_v33 = vsel %vm5313_vm11, %v5309_v23, 1326507024  ;;  %v5351_v5 = vand.u32 65535, %v5321_v12 }
 0x502   :  { %v5352_v29 = vshrl.u32 %v5321_v12, 16  ;;  %v3078_v24 = vsub.s32 32, %v3077_v51  ;;  %v3082_v28 = vsub.s32 4294967266, %v3077_v51  ;;  %v5324_v11 = vsel %vm5312_vm12, %v5306_v3, %v5323_v33 }
 0x503   :  { %5938 = vst [vmem:[#allocation2 + $0x60] sm:$0xff] %v5906_v31  ;;  %v282_v35 = vmul.f32 0.99999, %v194_v26  ;;  %v3079_v21 = vshll.u32 %v9919_v20, %v3077_v51  ;;  %v5325_v17 = vsel %vm5311_vm13, %v5322_v43, %v5324_v11  ;;  %v9986_v58 = vmul.u32 %v5351_v5, %v5328_v50 }
 0x504   :  { %v5354_v9 = vmul.u32 %v5352_v29, %v5327_v44  ;;  %v3080_v48 = vshrl.u32 %v9895_v15, %v3078_v24  ;;  %v3083_v49 = vadd.s32 127, %v3082_v28  ;;  %v5329_v6 = vand.u32 65535, %v5325_v17 }
 0x505   :  { %v5330_v27 = vshrl.u32 %v5325_v17, 16  ;;  %v5294_v2 = vshrl.u32 %v6336_v16, %v9889_v55  ;;  %v5353_v23 = vmul.u32 %v5351_v5, %v5327_v44  ;;  %v9992_v3 = vadd.f32 %v6517_v39, %v830_v41 }
 0x506   :  { %v5357_v36 = vshll.u32 %v5354_v9, 16  ;;  %vm2970_vm0 = vcmp.lt.s32.totalorder %v9712_v10, 0  ;;  %v3081_v20 = vor.u32 %v3080_v48, %v3079_v21  ;;  %v3084_v26 = vshll.u32 %v3083_v49, 23 }
 0x507   :  { %v5315_v19 = vsel %vm5313_vm11, %v5303_v59, 2102212464  ;;  %v5332_v1 = vmul.u32 %v5330_v27, %v5327_v44  ;;  %vm106_vm1 = vcmp.gt.f32.partialorder %v7417_v14, 0.99998  ;;  %v5333_v15 = vmul.u32 %v5329_v6, %v5328_v50 }
 0x508   :  { %v5356_v60 = vmul.u32 %v5352_v29, %v5328_v50  ;;  %v5359_v38 = vshll.u32 %v9986_v58, 16  ;;  %vm5361_vm2 = vc.u32 %v5353_v23, %v5357_v36  ;;  %vm10001_vm3 = vcmp.le.f32.partialorder %v2968_v61, 0.7853982 }
 0x509   :  { %v3085_v42 = vor.u32 4788187, %v3084_v26  ;;  %v5331_v30 = vmul.u32 %v5329_v6, %v5327_v44  ;;  %v5334_v54 = vmul.u32 %v5330_v27, %v5328_v50  ;;  %v5335_v41 = vshll.u32 %v5332_v1, 16 }
 0x50a   :  { %v3088_v31 = vcvt.s32.f32 %v3081_v20  ;;  %v5337_v59 = vshll.u32 %v5333_v15, 16  ;;  %v5362_v12 = vsel %vm5361_vm2, 1, %v6342_v57  ;;  %v5363_v43 = vadd.s32 %v5357_v36, %v5353_v23 }
 0x50b   :  { %v3086_v51 = vand.u32 2147483647, %v3085_v42  ;;  %vm5339_vm4 = vc.u32 %v5331_v30, %v5335_v41  ;;  %v5341_v33 = vadd.s32 %v5335_v41, %v5331_v30  ;;  %v5364_v5 = vadd.s32 %v5362_v12, %v5356_v60 }
 0x50c   :  { %v3092_v29 = vsub.s32 4, %v9897_v13  ;;  %v5314_v61 = vsel %vm5310_vm10, %v5294_v2, %v9931_v63  ;;  %v5340_v24 = vsel %vm5339_vm4, 1, %v6342_v57  ;;  %vm5365_vm14 = vc.u32 %v5363_v43, %v5359_v38 }
 0x50d   :  { %v3089_v44 = vmul.f32 %v3088_v31, %v3086_v51  ;;  %v5342_v50 = vadd.s32 %v5340_v24, %v5334_v54  ;;  %vm5343_vm5 = vc.u32 %v5341_v33, %v5337_v59  ;;  %v5366_v28 = vsel %vm5365_vm14, 1, %v6342_v57 }
 0x50e   :  { %v5316_v11 = vsel %vm5312_vm12, %v9933_v62, %v5315_v19  ;;  %v5344_v21 = vsel %vm5343_vm5, 1, %v6342_v57  ;;  %v5358_v17 = vshrl.u32 %v5354_v9, 16  ;;  %v5368_v48 = vadd.s32 %v5366_v28, %v5364_v5 }
 0x50f   :  { %v3090_v49 = vxor.u32 2147483648, %v3089_v44  ;;  %v5336_v6 = vshrl.u32 %v5332_v1, 16  ;;  %v5346_v27 = vadd.s32 %v5344_v21, %v5342_v50  ;;  %v5435_v63 = vand.u32 2139095040, %v9992_v3 }
 0x510   :  { %v3093_v2 = vsel %vm2970_vm0, %v3092_v29, %v9897_v13  ;;  %v5360_v23 = vshrl.u32 %v9986_v58, 16  ;;  %v5369_v36 = vadd.s32 %v5368_v48, %v5358_v17  ;;  %v298_v20 = vsel %vm106_vm1, %v282_v35, 1.0 }
 0x511   :  { %v3091_v62 = vsel %vm2970_vm0, %v3090_v49, %v3089_v44  ;;  %v5338_v9 = vshrl.u32 %v5333_v15, 16  ;;  %v5347_v26 = vadd.s32 %v5346_v27, %v5336_v6  ;;  %v5436_v19 = vshrl.u32 %v5435_v63, 23 }
 0x512   :  { %v3094_v1 = vsel %vm10001_vm3, %v9712_v10, %v3091_v62  ;;  %v5317_v60 = vsel %vm5311_vm13, %v5314_v61, %v5316_v11  ;;  %v5370_v13 = vadd.s32 %v5369_v36, %v5360_v23  ;;  %v5432_v58 = vand.u32 2147483647, %v9992_v3  ;;  %v429_v11 = vpop.f32.mrf.mxu0 }
 0x513   :  { %v3096_v42 = vmul.f32 %v3094_v1, %v3094_v1  ;;  %v5348_v30 = vadd.s32 %v5347_v26, %v5338_v9  ;;  %v5367_v54 = vadd.s32 %v5363_v43, %v5359_v38  ;;  %v6095_v35 = vadd.s32 4294967169, %v5436_v19 }
 0x514   :  { %v883_v41 = vmul.f32 7.5, %v9672_v56  ;;  %v3095_v15 = vsel %vm10001_vm3, 0, %v3093_v2  ;;  %v5374_v31 = vadd.s32 1, %v5370_v13  ;;  %v5371_v51 = vmul.u32 %v9905_v40, %v5317_v60 }
 0x515   :  { %v3097_v59 = vmul.f32 -0.001358992, %v3096_v42  ;;  %v3104_v12 = vmul.f32 -0.00019511016, %v3096_v42  ;;  %vm5373_vm6 = vc.u32 %v5348_v30, %v5367_v54  ;;  %v5439_v33 = vand.u32 8388607, %v5432_v58 }
 0x516   :  { %v5375_v46 = vsel %vm5373_vm6, %v5374_v31, %v5370_v13  ;;  %v5442_v5 = vadd.s32 1, %v6095_v35  ;;  %v314_v29 = vmul.f32 %v298_v20, %v298_v20  ;;  %v266_v38 = vmul.f32 %v9917_v53, %v9882_v47 }
 0x517   :  { %v3098_v43 = vadd.f32 0.041655596, %v3097_v59  ;;  %v3105_v56 = vadd.f32 0.008332121, %v3104_v12  ;;  %v5376_v61 = vadd.s32 %v5375_v46, %v5371_v51  ;;  %v928_v55 = vmul.f32 1.442695, %v883_v41 }
 0x518   :  { %v3112_v24 = vand.u32 3, %v3095_v15  ;;  %vm5443_vm7 = vcmp.gt.s32.totalorder %v5442_v5, 0  ;;  %v5440_v21 = vor.u32 8388608, %v5439_v33  ;;  %v330_v48 = vmul.f32 %v314_v29, %v7417_v14 }
 0x519   :  { %v3099_v44 = vmul.f32 %v3098_v43, %v3096_v42  ;;  %v3106_v50 = vmul.f32 %v3105_v56, %v3096_v42  ;;  %v5377_v28 = vadd.s32 536870912, %v5376_v61  ;;  %v5444_v40 = vsel %vm5443_vm7, %v5442_v5, 0 }
 0x51a   :  { %v5446_v17 = vand.u32 31, %v5444_v40  ;;  %v10040_v49 = vmul.f32 2.0, %v298_v20  ;;  %v10043_v6 = vmul.f32 %v9917_v53, %v266_v38  ;;  %6284 = vpow2.f32 %v928_v55 }
 0x51b   :  { %v3100_v27 = vadd.f32 -0.4999988, %v3099_v44  ;;  %v3107_v63 = vadd.f32 -0.16666654, %v3106_v50  ;;  %v10045_v2 = vshrl.u32 %v5377_v28, 30  ;;  %vm3114_vm8 = vcmp.eq.s32.totalorder %v3112_v24, 0 }
 0x51c   :  { %v10047_v23 = vsub.s32 32, %v5446_v17  ;;  %v10050_v36 = vmul.f32 %v10040_v49, %v429_v11  ;;  %vm3113_vm9 = vcmp.lt.s32.totalorder %v3112_v24, 2  ;;  %vm3117_vm10 = vcmp.eq.s32.totalorder %v3112_v24, 2 }
 0x51d   :  { %v3101_v62 = vmul.f32 %v3100_v27, %v3096_v42  ;;  %v3108_v9 = vmul.f32 %v3107_v63, %v3096_v42  ;;  %v5379_v14 = vshll.u32 %v10045_v2, 30  ;;  %vm3111_vm11 = vweird.f32 %v9712_v10 }
 0x51e   :  { %v5372_v20 = vadd.s32 %v5367_v54, %v5348_v30  ;;  %v10054_v26 = vshll.u32 %v5440_v21, 8  ;;  %v10056_v19 = vadd.f32 1.0, %v330_v48  ;;  %v656_v60 = vsub.f32 1.0, %v330_v48 }
 0x51f   :  { %v3102_v13 = vadd.f32 1.0, %v3101_v62  ;;  %v3109_v35 = vadd.f32 1.0, %v3108_v9  ;;  %v5380_v41 = vsub.s32 %v5376_v61, %v5379_v14  ;;  %v10058_v15 = vshrl.u32 %v5444_v40, 5 }
 0x520   :  { %v5450_v42 = vshrl.u32 %v6337_v18, %v10047_v23  ;;  %v5453_v31 = vshrl.u32 %v6338_v22, %v10047_v23  ;;  %v5456_v59 = vshrl.u32 %v6339_v25, %v10047_v23  ;;  %v599_v30 = vsub.f32 %v10056_v19, %v10050_v36  ;;  %v6285_v46 = vpop.eup %6284 }
 0x521   :  { %v3110_v54 = vmul.f32 %v3109_v35, %v3094_v1  ;;  %v3118_v12 = vxor.u32 2147483648, %v3102_v13  ;;  %vm5381_vm12 = vcmp.lt.s32.totalorder %v5380_v41, 0  ;;  %v5382_v51 = vsub.s32 0, %v5380_v41 }
 0x522   :  { %v5449_v33 = vshll.u32 %v6336_v16, %v5446_v17  ;;  %v5452_v5 = vshll.u32 %v6337_v18, %v5446_v17  ;;  %v5455_v29 = vshll.u32 %v6338_v22, %v5446_v17  ;;  %v5459_v38 = vshrl.u32 %v10689_v8, %v10047_v23 }
 0x523   :  { %v3115_v43 = vxor.u32 2147483648, %v3110_v54  ;;  %v5383_v56 = vsel %vm5381_vm12, %v5382_v51, %v5380_v41  ;;  %v5458_v61 = vshll.u32 %v6339_v25, %v5446_v17  ;;  %v5462_v1 = vshrl.u32 %v10690_v0, %v10047_v23 }
 0x524   :  { %v5384_v55 = vclz %v5383_v56  ;;  %v5451_v44 = vor.u32 %v5450_v42, %v5449_v33  ;;  %v10076_v50 = vor.u32 %v5453_v31, %v5452_v5  ;;  %v5461_v28 = vshll.u32 %v10689_v8, %v5446_v17 }
 0x525   :  { %v3116_v40 = vsel %vm3114_vm8, %v3102_v13, %v3115_v43  ;;  %v3119_v11 = vsel %vm3117_vm10, %v3118_v12, %v3110_v54  ;;  %v10081_v21 = vor.u32 %v5456_v59, %v5455_v29  ;;  %v5460_v48 = vor.u32 %v5459_v38, %v5458_v61 }
 0x526   :  { %v3120_v27 = vsel %vm3113_vm9, %v3116_v40, %v3119_v11  ;;  %v6093_v63 = vadd.s32 4294967294, %v5384_v55  ;;  %v5463_v36 = vor.u32 %v5462_v1, %v5461_v28  ;;  %6286 = vlog2.f32 %v656_v60 }
 0x527   :  { %v3121_v62 = vsel %vm3111_vm11, nan, %v3120_v27  ;;  %vm5464_vm13 = vcmp.lt.s32.totalorder %v10058_v15, 1  ;;  %vm5466_vm15 = vcmp.lt.s32.totalorder %v10058_v15, 3  ;;  %vm5467_vm0 = vcmp.lt.s32.totalorder %v10058_v15, 4 }
 0x528   :  { %v5907_v17 = vmul.f32 %v6285_v46, %v3121_v62  ;;  %vm6094_vm1 = vcmp.lt.s32.totalorder %v6093_v63, 0  ;;  %v5472_v9 = vsel %vm5464_vm13, %v5451_v44, %v10076_v50  ;;  %v5473_v24 = vsel %vm5467_vm0, %v5460_v48, 920167782 }
 0x529   :  { %v5387_v14 = vsel %vm6094_vm1, 0, %v6093_v63  ;;  %v5474_v10 = vsel %vm5466_vm15, %v10081_v21, %v5473_v24  ;;  %v5481_v60 = vand.u32 65535, %v10054_v26  ;;  %v5482_v13 = vshrl.u32 %v10054_v26, 16 }
 0x52a   :  { %5939 = vst [vmem:[#allocation2 + $0x68] sm:$0xff] %v5907_v17  ;;  %v5388_v35 = vsub.s32 32, %v5387_v14  ;;  %v5392_v42 = vsub.s32 4294967266, %v5387_v14  ;;  %vm5465_vm2 = vcmp.lt.s32.totalorder %v10058_v15, 2  ;;  %v5476_v31 = vsel %vm5464_vm13, %v10076_v50, %v10081_v21 }
 0x52b   :  { %v5389_v59 = vshll.u32 %v5380_v41, %v5387_v14  ;;  %v5475_v54 = vsel %vm5465_vm2, %v5472_v9, %v5474_v10  ;;  %v5477_v12 = vsel %vm5467_vm0, %v5463_v36, 1326507024  ;;  %v631_v51 = vmax.f32 %v599_v30, 1e-12 }
 0x52c   :  { %v6287_v46 = vpop.eup %6286  ;;  %v5390_v33 = vshrl.u32 %v5372_v20, %v5388_v35  ;;  %v5393_v5 = vadd.s32 127, %v5392_v42  ;;  %v5478_v29 = vsel %vm5466_vm15, %v5460_v48, %v5477_v12  ;;  %v5505_v38 = vand.u32 65535, %v5475_v54 }
 0x52d   :  { %v5448_v43 = vshrl.u32 %v6336_v16, %v10047_v23  ;;  %v5479_v41 = vsel %vm5465_vm2, %v5476_v31, %v5478_v29  ;;  %v5506_v56 = vshrl.u32 %v5475_v54, 16  ;;  %6288 = vlog2.f32 %v631_v51 }
 0x52e   :  { %v5391_v61 = vor.u32 %v5390_v33, %v5389_v59  ;;  %v5394_v1 = vshll.u32 %v5393_v5, 23  ;;  %v5483_v55 = vand.u32 65535, %v5479_v41  ;;  %v5484_v28 = vshrl.u32 %v5479_v41, 16 }
 0x52f   :  { %v10115_v30 = vmul.f32 0.5, %v10043_v6  ;;  %vm5280_vm3 = vcmp.lt.s32.totalorder %v9838_v52, 0  ;;  %v5508_v20 = vmul.u32 %v5506_v56, %v5481_v60  ;;  %v5509_v40 = vmul.u32 %v5505_v38, %v5482_v13 }
 0x530   :  { %vm10120_vm4 = vcmp.le.f32.partialorder %v5278_v4, 0.7853982  ;;  %v5395_v11 = vor.u32 4788187, %v5394_v1  ;;  %v5468_v48 = vsel %vm5464_vm13, %v5448_v43, %v5451_v44  ;;  %v5486_v27 = vmul.u32 %v5484_v28, %v5481_v60 }
 0x531   :  { %v10126_v63 = vmul.f32 0.6931472, %v6287_v46  ;;  %v5487_v36 = vmul.u32 %v5483_v55, %v5482_v13  ;;  %v5507_v6 = vmul.u32 %v5505_v38, %v5481_v60  ;;  %v5510_v62 = vmul.u32 %v5506_v56, %v5482_v13 }
 0x532   :  { %v5511_v17 = vshll.u32 %v5508_v20, 16  ;;  %v5396_v9 = vand.u32 2147483647, %v5395_v11  ;;  %v5398_v24 = vcvt.s32.f32 %v5391_v61  ;;  %v5485_v14 = vmul.u32 %v5483_v55, %v5481_v60 }
 0x533   :  { %v5489_v10 = vshll.u32 %v5486_v27, 16  ;;  %v6289_v35 = vpop.eup %6288  ;;  %v5488_v4 = vmul.u32 %v5484_v28, %v5482_v13  ;;  %v5491_v42 = vshll.u32 %v5487_v36, 16  ;;  %v5513_v31 = vshll.u32 %v5509_v40, 16  ;;  %v494_v13 = vpop.f32.mrf.mxu1 }
 0x534   :  { %vm5515_vm14 = vc.u32 %v5507_v6, %v5511_v17  ;;  %v5399_v59 = vmul.f32 %v5398_v24, %v5396_v9  ;;  %v5517_v51 = vadd.s32 %v5511_v17, %v5507_v6  ;;  %v726_v33 = vmul.f32 0.6931472, %v6289_v35 }
 0x535   :  { %vm5493_vm5 = vc.u32 %v5485_v14, %v5489_v10  ;;  %v5495_v54 = vadd.s32 %v5489_v10, %v5485_v14  ;;  %v5516_v44 = vsel %vm5515_vm14, 1, %v6342_v57  ;;  %v5469_v60 = vsel %vm5467_vm0, %v10081_v21, 2102212464 }
 0x536   :  { %v5494_v12 = vsel %vm5493_vm5, 1, %v6342_v57  ;;  %v5518_v46 = vadd.s32 %v5516_v44, %v5510_v62  ;;  %v5400_v5 = vxor.u32 2147483648, %v5399_v59  ;;  %v5512_v43 = vshrl.u32 %v5508_v20, 16 }
 0x537   :  { %v5496_v29 = vadd.s32 %v5494_v12, %v5488_v4  ;;  %vm5497_vm6 = vc.u32 %v5495_v54, %v5491_v42  ;;  %vm5519_vm7 = vc.u32 %v5517_v51, %v5513_v31  ;;  %v10135_v41 = vsub.f32 %v10126_v63, %v726_v33 }
 0x538   :  { %v5498_v38 = vsel %vm5497_vm6, 1, %v6342_v57  ;;  %v5401_v56 = vsel %vm5280_vm3, %v5400_v5, %v5399_v59  ;;  %v5490_v61 = vshrl.u32 %v5486_v27, 16  ;;  %v5520_v55 = vsel %vm5519_vm7, 1, %v6342_v57 }
 0x539   :  { %v5500_v1 = vadd.s32 %v5498_v38, %v5496_v29  ;;  %v5404_v21 = vsel %vm10120_vm4, %v9838_v52, %v5401_v56  ;;  %v5522_v28 = vadd.s32 %v5520_v55, %v5518_v46  ;;  %v815_v11 = vmul.f32 %v6507_v32, %v10135_v41 }
 0x53a   :  { %v568_v20 = vmul.f32 %v10040_v49, %v494_v13  ;;  %v5406_v6 = vmul.f32 %v5404_v21, %v5404_v21  ;;  %v5470_v62 = vsel %vm5466_vm15, %v10076_v50, %v5469_v60  ;;  %v5492_v17 = vshrl.u32 %v5487_v36, 16 }
 0x53b   :  { %v5501_v27 = vadd.s32 %v5500_v1, %v5490_v61  ;;  %v5402_v9 = vsub.s32 4, %v10045_v2  ;;  %v5514_v24 = vshrl.u32 %v5509_v40, 16  ;;  %v5523_v14 = vadd.s32 %v5522_v28, %v5512_v43 }
 0x53c   :  { %v10151_v10 = vadd.f32 %v6513_v37, %v815_v11  ;;  %v5407_v35 = vmul.f32 -0.001358992, %v5406_v6  ;;  %v5414_v4 = vmul.f32 -0.00019511016, %v5406_v6  ;;  %v10155_v59 = vadd.s32 %v5517_v51, %v5513_v31 }
 0x53d   :  { %v10153_v42 = vadd.s32 %v5501_v27, %v5492_v17  ;;  %v5471_v49 = vsel %vm5465_vm2, %v5468_v48, %v5470_v62  ;;  %v5524_v54 = vadd.s32 %v5523_v14, %v5514_v24  ;;  %v600_v50 = vsub.f32 %v10056_v19, %v568_v20 }
 0x53e   :  { %v5408_v36 = vadd.f32 0.041655596, %v5407_v35  ;;  %v5415_v44 = vadd.f32 0.008332121, %v5414_v4  ;;  %v269_v40 = vsub.f32 1.5, %v10115_v30  ;;  %v898_v12 = vmul.f32 7.5, %v9821_v7 }
 0x53f   :  { %vm5527_vm8 = vc.u32 %v10153_v42, %v10155_v59  ;;  %v5528_v46 = vadd.s32 1, %v5524_v54  ;;  %v3125_v33 = vand.u32 2139095040, %v10151_v10  ;;  %v5403_v15 = vsel %vm5280_vm3, %v5402_v9, %v10045_v2 }
 0x540   :  { %v5409_v48 = vmul.f32 %v5408_v36, %v5406_v6  ;;  %v5416_v31 = vmul.f32 %v5415_v44, %v5406_v6  ;;  %v5525_v19 = vmul.u32 %v10054_v26, %v5471_v49  ;;  %v3122_v5 = vand.u32 2147483647, %v10151_v10 }
 0x541   :  { %v5529_v51 = vsel %vm5527_vm8, %v5528_v46, %v5524_v54  ;;  %v3126_v60 = vshrl.u32 %v3125_v33, 23  ;;  %v632_v29 = vmax.f32 %v600_v50, 1e-12  ;;  %vm271_vm9 = vweird.f32 %v9882_v47 }
 0x542   :  { %v5410_v30 = vadd.f32 -0.4999988, %v5409_v48  ;;  %v5417_v7 = vadd.f32 -0.16666654, %v5416_v31  ;;  %v5530_v13 = vadd.s32 %v5529_v51, %v5525_v19  ;;  %vm272_vm10 = vweird.f32 %v9917_v53 }
 0x543   :  { %v5405_v38 = vsel %vm10120_vm4, 0, %v5403_v15  ;;  %v6050_v2 = vadd.s32 4294967169, %v3126_v60  ;;  %v270_v43 = vmul.f32 %v9917_v53, %v269_v40  ;;  %v958_v56 = vmul.f32 1.442695, %v898_v12  ;;  %vm10179_vm11 = vmor %vm271_vm9, %vm272_vm10 }
 0x544   :  { %v5411_v26 = vmul.f32 %v5410_v30, %v5406_v6  ;;  %v5418_v61 = vmul.f32 %v5417_v7, %v5406_v6  ;;  %v5531_v1 = vadd.s32 536870912, %v5530_v13  ;;  %v3129_v55 = vand.u32 8388607, %v3122_v5 }
 0x545   :  { %v3132_v28 = vadd.s32 1, %v6050_v2  ;;  %6290 = vlog2.f32 %v632_v29  ;;  %v5422_v62 = vand.u32 3, %v5405_v38  ;;  %v274_v6 = vsel %vm10179_vm11, %v9917_v53, %v270_v43 }
 0x546   :  { %v5412_v23 = vadd.f32 1.0, %v5411_v26  ;;  %v5419_v20 = vadd.f32 1.0, %v5418_v61  ;;  %v10183_v17 = vshrl.u32 %v5531_v1, 30  ;;  %6292 = vpow2.f32 %v958_v56 }
 0x547   :  { %vm3133_vm12 = vcmp.gt.s32.totalorder %v3132_v28, 0  ;;  %vm5421_vm13 = vweird.f32 %v9838_v52  ;;  %v10191_v14 = vmul.f32 7.5, %v9943_v45  ;;  %v3130_v35 = vor.u32 8388608, %v3129_v55 }
 0x548   :  { %v5420_v27 = vmul.f32 %v5419_v20, %v5404_v21  ;;  %v5428_v9 = vxor.u32 2147483648, %v5412_v23  ;;  %v5533_v24 = vshll.u32 %v10183_v17, 30  ;;  %v3134_v4 = vsel %vm3133_vm12, %v3132_v28, 0 }
 0x549   :  { %vm5423_vm15 = vcmp.lt.s32.totalorder %v5422_v62, 2  ;;  %v290_v50 = vmul.f32 0.99999, %v274_v6  ;;  %vm5424_vm0 = vcmp.eq.s32.totalorder %v5422_v62, 0  ;;  %vm5427_vm1 = vcmp.eq.s32.totalorder %v5422_v62, 2 }
 0x54a   :  { %v5425_v49 = vxor.u32 2147483648, %v5420_v27  ;;  %v5534_v54 = vsub.s32 %v5530_v13, %v5533_v24  ;;  %v3136_v53 = vand.u32 31, %v3134_v4  ;;  %vm114_vm2 = vcmp.gt.f32.partialorder %v9882_v47, 0.99998 }
 0x54b   :  { %v6291_v36 = vpop.eup %6290  ;;  %v5429_v44 = vsel %vm5427_vm1, %v5428_v9, %v5420_v27  ;;  %v5526_v45 = vadd.s32 %v10155_v59, %v10153_v42  ;;  %v10196_v33 = vshll.u32 %v3130_v35, 8  ;;  %v10200_v51 = vsel %vm114_vm2, %v290_v50, 1.0 }
 0x54c   :  { %v5426_v21 = vsel %vm5424_vm0, %v5412_v23, %v5425_v49  ;;  %vm5535_vm3 = vcmp.lt.s32.totalorder %v5534_v54, 0  ;;  %v5536_v40 = vsub.s32 0, %v5534_v54  ;;  %v3137_v46 = vsub.s32 32, %v3136_v53  ;;  %v6293_v15 = vpop.eup %6292 }
 0x54d   :  { %v5430_v12 = vsel %vm5423_vm15, %v5426_v21, %v5429_v44  ;;  %v728_v19 = vmul.f32 0.6931472, %v6291_v36  ;;  %v10202_v30 = vshrl.u32 %v3134_v4, 5  ;;  %v3139_v7 = vshll.u32 %v6336_v16, %v3136_v53 }
 0x54e   :  { %v5431_v48 = vsel %vm5421_vm13, nan, %v5430_v12  ;;  %v5537_v31 = vsel %vm5535_vm3, %v5536_v40, %v5534_v54  ;;  %v3140_v13 = vshrl.u32 %v6337_v18, %v3137_v46  ;;  %v3142_v42 = vshll.u32 %v6337_v18, %v3136_v53 }
 0x54f   :  { %v5922_v60 = vmul.f32 %v6293_v15, %v5431_v48  ;;  %v5538_v29 = vclz %v5537_v31  ;;  %v3143_v59 = vshrl.u32 %v6338_v22, %v3137_v46  ;;  %v3146_v38 = vshrl.u32 %v6339_v25, %v3137_v46 }
 0x550   :  { %v3145_v2 = vshll.u32 %v6338_v22, %v3136_v53  ;;  %v3148_v43 = vshll.u32 %v6339_v25, %v3136_v53  ;;  %v3149_v56 = vshrl.u32 %v10689_v8, %v3137_v46  ;;  %v3141_v26 = vor.u32 %v3140_v13, %v3139_v7 }
 0x551   :  { %5954 = vst [vmem:[#allocation2 + $0xe0] sm:$0xff] %v5922_v60  ;;  %v6096_v52 = vadd.s32 4294967294, %v5538_v29  ;;  %v10212_v61 = vor.u32 %v3143_v59, %v3142_v42  ;;  %v3151_v1 = vshll.u32 %v10689_v8, %v3136_v53  ;;  %v3152_v55 = vshrl.u32 %v10690_v0, %v3137_v46 }
 0x552   :  { %v3147_v28 = vor.u32 %v3146_v38, %v3145_v2  ;;  %v3150_v11 = vor.u32 %v3149_v56, %v3148_v43  ;;  %v10218_v23 = vmul.f32 %v10200_v51, %v10200_v51  ;;  %vm3154_vm14 = vcmp.lt.s32.totalorder %v10202_v30, 1 }
 0x553   :  { %vm6097_vm4 = vcmp.lt.s32.totalorder %v6096_v52, 0  ;;  %v3153_v62 = vor.u32 %v3152_v55, %v3151_v1  ;;  %v10222_v6 = vsub.f32 %v10126_v63, %v728_v19  ;;  %vm3155_vm5 = vcmp.lt.s32.totalorder %v10202_v30, 2 }
 0x554   :  { %v5541_v20 = vsel %vm6097_vm4, 0, %v6096_v52  ;;  %vm3157_vm6 = vcmp.lt.s32.totalorder %v10202_v30, 4  ;;  %vm3156_vm7 = vcmp.lt.s32.totalorder %v10202_v30, 3  ;;  %v3162_v35 = vsel %vm3154_vm14, %v3141_v26, %v10212_v61 }
 0x555   :  { %v5542_v27 = vsub.s32 32, %v5541_v20  ;;  %v5546_v9 = vsub.s32 4294967266, %v5541_v20  ;;  %v5543_v24 = vshll.u32 %v5534_v54, %v5541_v20  ;;  %v3163_v4 = vsel %vm3157_vm6, %v3150_v11, 920167782 }
 0x556   :  { %v3164_v63 = vsel %vm3156_vm7, %v3147_v28, %v3163_v4  ;;  %v3166_v36 = vsel %vm3154_vm14, %v10212_v61, %v3147_v28  ;;  %v3167_v53 = vsel %vm3157_vm6, %v3153_v62, 1326507024  ;;  %v3171_v21 = vand.u32 65535, %v10196_v33 }
 0x557   :  { %v5544_v49 = vshrl.u32 %v5526_v45, %v5542_v27  ;;  %v5547_v50 = vadd.s32 127, %v5546_v9  ;;  %v3165_v54 = vsel %vm3155_vm5, %v3162_v35, %v3164_v63  ;;  %v816_v44 = vmul.f32 %v6509_v34, %v10222_v6 }
 0x558   :  { %v3168_v45 = vsel %vm3156_vm7, %v3150_v11, %v3167_v53  ;;  %v3195_v15 = vand.u32 65535, %v3165_v54  ;;  %vm5434_vm8 = vcmp.lt.s32.totalorder %v9992_v3, 0  ;;  %v3138_v48 = vshrl.u32 %v6336_v16, %v3137_v46 }
 0x559   :  { %v5545_v40 = vor.u32 %v5544_v49, %v5543_v24  ;;  %v5548_v12 = vshll.u32 %v5547_v50, 23  ;;  %v3169_v31 = vsel %vm3155_vm5, %v3166_v36, %v3168_v45  ;;  %v3172_v19 = vshrl.u32 %v10196_v33, 16 }
 0x55a   :  { %v3196_v60 = vshrl.u32 %v3165_v54, 16  ;;  %vm10253_vm9 = vcmp.le.f32.partialorder %v5432_v58, 0.7853982  ;;  %v5556_v13 = vsub.s32 4, %v10183_v17  ;;  %v3173_v42 = vand.u32 65535, %v3169_v31 }
 0x55b   :  { %v5549_v7 = vor.u32 4788187, %v5548_v12  ;;  %v3174_v59 = vshrl.u32 %v3169_v31, 16  ;;  %v3158_v46 = vsel %vm3154_vm14, %v3138_v48, %v3141_v26  ;;  %v3199_v52 = vmul.u32 %v3195_v15, %v3172_v19 }
 0x55c   :  { %v3198_v38 = vmul.u32 %v3196_v60, %v3171_v21  ;;  %v10261_v2 = vadd.f32 %v6517_v39, %v816_v44  ;;  %v5552_v56 = vcvt.s32.f32 %v5545_v40  ;;  %v3177_v58 = vmul.u32 %v3173_v42, %v3172_v19 }
 0x55d   :  { %v5550_v43 = vand.u32 2147483647, %v5549_v7  ;;  %v3176_v1 = vmul.u32 %v3174_v59, %v3171_v21  ;;  %v3159_v55 = vsel %vm3157_vm6, %v3147_v28, 2102212464  ;;  %v3197_v11 = vmul.u32 %v3195_v15, %v3171_v21 }
 0x55e   :  { %v3200_v20 = vmul.u32 %v3196_v60, %v3172_v19  ;;  %v3201_v62 = vshll.u32 %v3198_v38, 16  ;;  %v3175_v9 = vmul.u32 %v3173_v42, %v3171_v21  ;;  %v3178_v24 = vmul.u32 %v3174_v59, %v3172_v19 }
 0x55f   :  { %v5553_v27 = vmul.f32 %v5552_v56, %v5550_v43  ;;  %v3179_v35 = vshll.u32 %v3176_v1, 16  ;;  %v3181_v26 = vshll.u32 %v3177_v58, 16  ;;  %v3203_v4 = vshll.u32 %v3199_v52, 16 }
 0x560   :  { %vm3205_vm10 = vc.u32 %v3197_v11, %v3201_v62  ;;  %v3207_v49 = vadd.s32 %v3201_v62, %v3197_v11  ;;  %v3160_v28 = vsel %vm3156_vm7, %v10212_v61, %v3159_v55  ;;  %v3202_v15 = vshrl.u32 %v3198_v38, 16 }
 0x561   :  { %v5554_v50 = vxor.u32 2147483648, %v5553_v27  ;;  %vm3183_vm11 = vc.u32 %v3175_v9, %v3179_v35  ;;  %v3185_v63 = vadd.s32 %v3179_v35, %v3175_v9  ;;  %v3206_v36 = vsel %vm3205_vm10, 1, %v6342_v57 }
 0x562   :  { %v3184_v54 = vsel %vm3183_vm11, 1, %v6342_v57  ;;  %v3208_v53 = vadd.s32 %v3206_v36, %v3200_v20  ;;  %vm3209_vm12 = vc.u32 %v3207_v49, %v3203_v4  ;;  %v3180_v31 = vshrl.u32 %v3176_v1, 16 }
 0x563   :  { %v5555_v21 = vsel %vm5434_vm8, %v5554_v50, %v5553_v27  ;;  %v3186_v44 = vadd.s32 %v3184_v54, %v3178_v24  ;;  %vm3187_vm13 = vc.u32 %v3185_v63, %v3181_v26  ;;  %v3210_v40 = vsel %vm3209_vm12, 1, %v6342_v57 }
 0x564   :  { %v5558_v12 = vsel %vm10253_vm9, %v9992_v3, %v5555_v21  ;;  %v3188_v45 = vsel %vm3187_vm13, 1, %v6342_v57  ;;  %v3212_v48 = vadd.s32 %v3210_v40, %v3208_v53  ;;  %v3279_v60 = vand.u32 2139095040, %v10261_v2 }
 0x565   :  { %v5560_v61 = vmul.f32 %v5558_v12, %v5558_v12  ;;  %v3190_v19 = vadd.s32 %v3188_v45, %v3186_v44  ;;  %v5557_v7 = vsel %vm5434_vm8, %v5556_v13, %v10183_v17  ;;  %v3182_v42 = vshrl.u32 %v3177_v58, 16  ;;  %v453_v13 = vpop.f32.mrf.mxu2 }
 0x566   :  { %v3204_v59 = vshrl.u32 %v3199_v52, 16  ;;  %v3213_v43 = vadd.s32 %v3212_v48, %v3202_v15  ;;  %v3280_v20 = vshrl.u32 %v3279_v60, 23  ;;  %v3161_v38 = vsel %vm3155_vm5, %v3158_v46, %v3160_v28 }
 0x567   :  { %v5561_v56 = vmul.f32 -0.001358992, %v5560_v61  ;;  %v5568_v55 = vmul.f32 -0.00019511016, %v5560_v61  ;;  %v3191_v11 = vadd.s32 %v3190_v19, %v3180_v31  ;;  %v10283_v62 = vadd.s32 %v3207_v49, %v3203_v4 }
 0x568   :  { %v3214_v1 = vadd.s32 %v3213_v43, %v3204_v59  ;;  %v338_v27 = vmul.f32 %v10218_v23, %v9882_v47  ;;  %v6053_v17 = vadd.s32 4294967169, %v3280_v20  ;;  %v5559_v52 = vsel %vm10253_vm9, 0, %v5557_v7 }
 0x569   :  { %v5562_v9 = vadd.f32 0.041655596, %v5561_v56  ;;  %v5569_v24 = vadd.f32 0.008332121, %v5568_v55  ;;  %v10287_v35 = vadd.s32 %v3191_v11, %v3182_v42  ;;  %v3276_v26 = vand.u32 2147483647, %v10261_v2 }
 0x56a   :  { %v3218_v58 = vadd.s32 1, %v3214_v1  ;;  %v552_v30 = vmul.f32 2.0, %v10200_v51  ;;  %v3215_v49 = vmul.u32 %v10196_v33, %v3161_v38  ;;  %v960_v47 = vmul.f32 1.442695, %v10191_v14 }
 0x56b   :  { %v5563_v46 = vmul.f32 %v5562_v9, %v5560_v61  ;;  %v5570_v4 = vmul.f32 %v5569_v24, %v5560_v61  ;;  %vm3217_vm15 = vc.u32 %v10287_v35, %v10283_v62  ;;  %v3286_v50 = vadd.s32 1, %v6053_v17 }
 0x56c   :  { %v3219_v23 = vsel %vm3217_vm15, %v3218_v58, %v3214_v1  ;;  %v583_v63 = vmul.f32 %v552_v30, %v453_v13  ;;  %v5576_v54 = vand.u32 3, %v5559_v52  ;;  %v3283_v53 = vand.u32 8388607, %v3276_v26  ;;  %v518_v13 = vpop.f32.mrf.mxu3 }
 0x56d   :  { %v5564_v36 = vadd.f32 -0.4999988, %v5563_v46  ;;  %v5571_v29 = vadd.f32 -0.16666654, %v5570_v4  ;;  %v3220_v28 = vadd.s32 %v3219_v23, %v3215_v49  ;;  %vm3287_vm0 = vcmp.gt.s32.totalorder %v3286_v50, 0 }
 0x56e   :  { %v10299_v51 = vadd.f32 1.0, %v338_v27  ;;  %v3288_v40 = vsel %vm3287_vm0, %v3286_v50, 0  ;;  %6294 = vpow2.f32 %v960_v47  ;;  %v664_v15 = vsub.f32 1.0, %v338_v27 }
 0x56f   :  { %v5565_v21 = vmul.f32 %v5564_v36, %v5560_v61  ;;  %v5572_v33 = vmul.f32 %v5571_v29, %v5560_v61  ;;  %v3221_v44 = vadd.s32 536870912, %v3220_v28  ;;  %v3290_v45 = vand.u32 31, %v3288_v40 }
 0x570   :  { %v615_v14 = vsub.f32 %v10299_v51, %v583_v63  ;;  %vm5575_vm1 = vweird.f32 %v9992_v3  ;;  %vm5577_vm2 = vcmp.lt.s32.totalorder %v5576_v54, 2  ;;  %vm5578_vm3 = vcmp.eq.s32.totalorder %v5576_v54, 0 }
 0x571   :  { %v5566_v48 = vadd.f32 1.0, %v5565_v21  ;;  %v5573_v31 = vadd.f32 1.0, %v5572_v33  ;;  %v10303_v19 = vshrl.u32 %v3221_v44, 30  ;;  %vm5581_vm4 = vcmp.eq.s32.totalorder %v5576_v54, 2 }
 0x572   :  { %v10305_v60 = vsub.s32 32, %v3290_v45  ;;  %v3284_v59 = vor.u32 8388608, %v3283_v53  ;;  %v647_v55 = vmax.f32 %v615_v14, 1e-12  ;;  %6296 = vlog2.f32 %v664_v15 }
 0x573   :  { %v5574_v7 = vmul.f32 %v5573_v31, %v5558_v12  ;;  %v5582_v61 = vxor.u32 2147483648, %v5566_v48  ;;  %v3223_v42 = vshll.u32 %v10303_v19, 30  ;;  %v10314_v38 = vshrl.u32 %v3288_v40, 5 }
 0x574   :  { %v3294_v43 = vshrl.u32 %v6337_v18, %v10305_v60  ;;  %v3297_v56 = vshrl.u32 %v6338_v22, %v10305_v60  ;;  %v3293_v1 = vshll.u32 %v6336_v16, %v3290_v45  ;;  %v6295_v12 = vpop.eup %6294  ;;  %v3296_v9 = vshll.u32 %v6337_v18, %v3290_v45 }
 0x575   :  { %v5579_v11 = vxor.u32 2147483648, %v5574_v7  ;;  %v10312_v20 = vsub.s32 %v3220_v28, %v3223_v42  ;;  %v5583_v27 = vsel %vm5581_vm4, %v5582_v61, %v5574_v7  ;;  %v3299_v24 = vshll.u32 %v6338_v22, %v3290_v45 }
 0x576   :  { %v3300_v17 = vshrl.u32 %v6339_v25, %v10305_v60  ;;  %v10324_v46 = vor.u32 %v3294_v43, %v3293_v1  ;;  %v10327_v49 = vor.u32 %v3297_v56, %v3296_v9  ;;  %v3302_v47 = vshll.u32 %v6339_v25, %v3290_v45 }
 0x577   :  { %v5580_v52 = vsel %vm5578_vm3, %v5566_v48, %v5579_v11  ;;  %vm3225_vm14 = vcmp.lt.s32.totalorder %v10312_v20, 0  ;;  %v3226_v58 = vsub.s32 0, %v10312_v20  ;;  %v3303_v23 = vshrl.u32 %v10689_v8, %v10305_v60 }
 0x578   :  { %v5584_v4 = vsel %vm5577_vm2, %v5580_v52, %v5583_v27  ;;  %v10335_v36 = vshll.u32 %v3284_v59, 8  ;;  %v584_v29 = vmul.f32 %v552_v30, %v518_v13  ;;  %v6297_v28 = vpop.eup %6296  ;;  %v10337_v54 = vor.u32 %v3300_v17, %v3299_v24 }
 0x579   :  { %v5585_v50 = vsel %vm5575_vm1, nan, %v5584_v4  ;;  %v3227_v63 = vsel %vm3225_vm14, %v3226_v58, %v10312_v20  ;;  %v3304_v33 = vor.u32 %v3303_v23, %v3302_v47  ;;  %v3216_v44 = vadd.s32 %v10283_v62, %v10287_v35 }
 0x57a   :  { %v5923_v53 = vmul.f32 %v6295_v12, %v5585_v50  ;;  %v3228_v21 = vclz %v3227_v63  ;;  %v3305_v40 = vshll.u32 %v10689_v8, %v3290_v45  ;;  %v3306_v3 = vshrl.u32 %v10690_v0, %v10305_v60 }
 0x57b   :  { %vm3308_vm5 = vcmp.lt.s32.totalorder %v10314_v38, 1  ;;  %vm3311_vm6 = vcmp.lt.s32.totalorder %v10314_v38, 4  ;;  %6298 = vlog2.f32 %v647_v55  ;;  %vm3310_vm7 = vcmp.lt.s32.totalorder %v10314_v38, 3 }
 0x57c   :  { %5955 = vst [vmem:[#allocation2 + $0xe8] sm:$0xff] %v5923_v53  ;;  %v6051_v14 = vadd.s32 4294967294, %v3228_v21  ;;  %v3316_v30 = vsel %vm3308_vm5, %v10324_v46, %v10327_v49  ;;  %v3307_v15 = vor.u32 %v3306_v3, %v3305_v40  ;;  %v3317_v62 = vsel %vm3311_vm6, %v3304_v33, 920167782 }
 0x57d   :  { %v3325_v35 = vand.u32 65535, %v10335_v36  ;;  %vm3309_vm9 = vcmp.lt.s32.totalorder %v10314_v38, 2  ;;  %v3318_v45 = vsel %vm3310_vm7, %v10337_v54, %v3317_v62  ;;  %v3320_v48 = vsel %vm3308_vm5, %v10327_v49, %v10337_v54 }
 0x57e   :  { %vm6052_vm8 = vcmp.lt.s32.totalorder %v6051_v14, 0  ;;  %v3319_v7 = vsel %vm3309_vm9, %v3316_v30, %v3318_v45  ;;  %v3321_v61 = vsel %vm3311_vm6, %v3307_v15, 1326507024  ;;  %v616_v42 = vsub.f32 %v10299_v51, %v584_v29 }
 0x57f   :  { %v3231_v31 = vsel %vm6052_vm8, 0, %v6051_v14  ;;  %v3322_v56 = vsel %vm3310_vm7, %v3304_v33, %v3321_v61  ;;  %v3326_v55 = vshrl.u32 %v10335_v36, 16  ;;  %v3349_v12 = vand.u32 65535, %v3319_v7 }
 0x580   :  { %v3232_v59 = vsub.s32 32, %v3231_v31  ;;  %v3236_v43 = vsub.s32 4294967266, %v3231_v31  ;;  %v3233_v11 = vshll.u32 %v10312_v20, %v3231_v31  ;;  %v3323_v1 = vsel %vm3309_vm9, %v3320_v48, %v3322_v56 }
 0x581   :  { %v3350_v27 = vshrl.u32 %v3319_v7, 16  ;;  %v6299_v9 = vpop.eup %6298  ;;  %v3327_v13 = vand.u32 65535, %v3323_v1  ;;  %v3328_v52 = vshrl.u32 %v3323_v1, 16  ;;  %v3353_v58 = vmul.u32 %v3349_v12, %v3326_v55 }
 0x582   :  { %v3234_v24 = vshrl.u32 %v3216_v44, %v3232_v59  ;;  %v3237_v17 = vadd.s32 127, %v3236_v43  ;;  %v10373_v4 = vmul.f32 0.6931472, %v6297_v28  ;;  %v648_v47 = vmax.f32 %v616_v42, 1e-12 }
 0x583   :  { %v3352_v51 = vmul.u32 %v3350_v27, %v3325_v35  ;;  %v3292_v20 = vshrl.u32 %v6336_v16, %v10305_v60  ;;  %v3330_v63 = vmul.u32 %v3328_v52, %v3325_v35  ;;  %vm3124_vm10 = vcmp.lt.s32.totalorder %v10151_v10, 0 }
 0x584   :  { %v3235_v23 = vor.u32 %v3234_v24, %v3233_v11  ;;  %v3238_v50 = vshll.u32 %v3237_v17, 23  ;;  %v3331_v29 = vmul.u32 %v3327_v13, %v3326_v55  ;;  %v3351_v53 = vmul.u32 %v3349_v12, %v3325_v35 }
 0x585   :  { %v3355_v21 = vshll.u32 %v3352_v51, 16  ;;  %v758_v33 = vmul.f32 0.6931472, %v6299_v9  ;;  %vm10380_vm11 = vcmp.le.f32.partialorder %v3122_v5, 0.7853982  ;;  %v3329_v40 = vmul.u32 %v3327_v13, %v3325_v35 }
 0x586   :  { %v3239_v28 = vor.u32 4788187, %v3238_v50  ;;  %v3333_v3 = vshll.u32 %v3330_v63, 16  ;;  %v3354_v14 = vmul.u32 %v3350_v27, %v3326_v55  ;;  %v3242_v30 = vcvt.s32.f32 %v3235_v23 }
 0x587   :  { %v3332_v15 = vmul.u32 %v3328_v52, %v3326_v55  ;;  %v3335_v60 = vshll.u32 %v3331_v29, 16  ;;  %v3357_v62 = vshll.u32 %v3353_v58, 16  ;;  %vm3359_vm13 = vc.u32 %v3351_v53, %v3355_v21 }
 0x588   :  { %v3240_v45 = vand.u32 2147483647, %v3239_v28  ;;  %vm3337_vm12 = vc.u32 %v3329_v40, %v3333_v3  ;;  %v3339_v48 = vadd.s32 %v3333_v3, %v3329_v40  ;;  %v3360_v7 = vsel %vm3359_vm13, 1, %v6342_v57 }
 0x589   :  { %v3338_v31 = vsel %vm3337_vm12, 1, %v6342_v57  ;;  %v3361_v5 = vadd.s32 %v3355_v21, %v3351_v53  ;;  %v10387_v61 = vsub.f32 %v10373_v4, %v758_v33  ;;  %v3362_v59 = vadd.s32 %v3360_v7, %v3354_v14 }
 0x58a   :  { %v3243_v42 = vmul.f32 %v3242_v30, %v3240_v45  ;;  %v3340_v35 = vadd.s32 %v3338_v31, %v3332_v15  ;;  %vm3341_vm15 = vc.u32 %v3339_v48, %v3335_v60  ;;  %v3313_v43 = vsel %vm3311_vm6, %v10337_v54, 2102212464 }
 0x58b   :  { %v3342_v56 = vsel %vm3341_vm15, 1, %v6342_v57  ;;  %vm3363_vm0 = vc.u32 %v3361_v5, %v3357_v62  ;;  %v831_v55 = vmul.f32 %v6507_v32, %v10387_v61  ;;  %v3334_v1 = vshrl.u32 %v3330_v63, 16 }
 0x58c   :  { %v3244_v11 = vxor.u32 2147483648, %v3243_v42  ;;  %v3344_v12 = vadd.s32 %v3342_v56, %v3340_v35  ;;  %v3364_v27 = vsel %vm3363_vm0, 1, %v6342_v57  ;;  %v3312_v9 = vsel %vm3308_vm5, %v3292_v20, %v10324_v46 }
 0x58d   :  { %v3356_v24 = vshrl.u32 %v3352_v51, 16  ;;  %v3366_v17 = vadd.s32 %v3364_v27, %v3362_v59  ;;  %v10400_v13 = vadd.f32 %v6513_v37, %v831_v55  ;;  %v3314_v32 = vsel %vm3310_vm7, %v10327_v49, %v3313_v43 }
 0x58e   :  { %v3245_v54 = vsel %vm3124_vm10, %v3244_v11, %v3243_v42  ;;  %v3336_v52 = vshrl.u32 %v3331_v29, 16  ;;  %v3345_v23 = vadd.s32 %v3344_v12, %v3334_v1  ;;  %v3246_v50 = vsub.s32 4, %v10303_v19 }
 0x58f   :  { %v3248_v46 = vsel %vm10380_vm11, %v10151_v10, %v3245_v54  ;;  %v3358_v51 = vshrl.u32 %v3353_v58, 16  ;;  %v3367_v20 = vadd.s32 %v3366_v17, %v3356_v24  ;;  %v10413_v53 = vadd.s32 %v3361_v5, %v3357_v62 }
 0x590   :  { %v3250_v63 = vmul.f32 %v3248_v46, %v3248_v46  ;;  %v10411_v37 = vadd.s32 %v3345_v23, %v3336_v52  ;;  %v5589_v21 = vand.u32 2139095040, %v10400_v13  ;;  %v3315_v49 = vsel %vm3309_vm9, %v3312_v9, %v3314_v32 }
 0x591   :  { %v3368_v29 = vadd.s32 %v3367_v20, %v3358_v51  ;;  %6300 = vlog2.f32 %v648_v47  ;;  %v3247_v58 = vsel %vm3124_vm10, %v3246_v50, %v10303_v19  ;;  %v3369_v15 = vmul.u32 %v10335_v36, %v3315_v49 }
 0x592   :  { %v3251_v33 = vmul.f32 -0.001358992, %v3250_v63  ;;  %v3258_v28 = vmul.f32 -0.00019511016, %v3250_v63  ;;  %vm3371_vm1 = vc.u32 %v10411_v37, %v10413_v53  ;;  %v5590_v3 = vshrl.u32 %v5589_v21, 23 }
 0x593   :  { %v3372_v40 = vadd.s32 1, %v3368_v29  ;;  %v884_v38 = vmul.f32 7.5, %v10135_v41  ;;  %v3249_v45 = vsel %vm10380_vm11, 0, %v3247_v58  ;;  %v5586_v7 = vand.u32 2147483647, %v10400_v13 }
 0x594   :  { %v3252_v14 = vadd.f32 0.041655596, %v3251_v33  ;;  %v3259_v30 = vadd.f32 0.008332121, %v3258_v28  ;;  %v6098_v62 = vadd.s32 4294967169, %v5590_v3  ;;  %v3266_v56 = vand.u32 3, %v3249_v45 }
 0x595   :  { %v3373_v60 = vsel %vm3371_vm1, %v3372_v40, %v3368_v29  ;;  %v930_v43 = vmul.f32 1.442695, %v884_v38  ;;  %v5593_v44 = vand.u32 8388607, %v5586_v7  ;;  %vm3265_vm3 = vweird.f32 %v10151_v10 }
 0x596   :  { %v3253_v48 = vmul.f32 %v3252_v14, %v3250_v63  ;;  %v3260_v31 = vmul.f32 %v3259_v30, %v3250_v63  ;;  %v3374_v47 = vadd.s32 %v3373_v60, %v3369_v15  ;;  %v5596_v5 = vadd.s32 1, %v6098_v62 }
 0x597   :  { %v6301_v19 = vpop.eup %6300  ;;  %6302 = vpow2.f32 %v930_v43  ;;  %vm3267_vm4 = vcmp.lt.s32.totalorder %v3266_v56, 2  ;;  %vm3268_vm14 = vcmp.eq.s32.totalorder %v3266_v56, 0  ;;  %vm3271_vm5 = vcmp.eq.s32.totalorder %v3266_v56, 2 }
 0x598   :  { %v3254_v42 = vadd.f32 -0.4999988, %v3253_v48  ;;  %v3261_v35 = vadd.f32 -0.16666654, %v3260_v31  ;;  %v3375_v59 = vadd.s32 536870912, %v3374_v47  ;;  %vm5597_vm2 = vcmp.gt.s32.totalorder %v5596_v5, 0 }
 0x599   :  { %v5598_v11 = vsel %vm5597_vm2, %v5596_v5, 0  ;;  %v760_v12 = vmul.f32 0.6931472, %v6301_v19  ;;  %v5594_v23 = vor.u32 8388608, %v5593_v44  ;;  %vm3278_vm12 = vcmp.lt.s32.totalorder %v10261_v2, 0 }
 0x59a   :  { %v3255_v36 = vmul.f32 %v3254_v42, %v3250_v63  ;;  %v3262_v41 = vmul.f32 %v3261_v35, %v3250_v63  ;;  %v10428_v55 = vshrl.u32 %v3375_v59, 30  ;;  %v5600_v1 = vand.u32 31, %v5598_v11 }
 0x59b   :  { %v10439_v51 = vsub.f32 %v10373_v4, %v760_v12  ;;  %v10451_v15 = vshrl.u32 %v5598_v11, 5  ;;  %v3370_v42 = vadd.s32 %v10413_v53, %v10411_v37  ;;  %v10465_v59 = vshll.u32 %v5594_v23, 8 }
 0x59c   :  { %v3256_v27 = vadd.f32 1.0, %v3255_v36  ;;  %v3263_v9 = vadd.f32 1.0, %v3262_v41  ;;  %v3377_v24 = vshll.u32 %v10428_v55, 30  ;;  %v10434_v17 = vsub.s32 32, %v5600_v1 }
 0x59d   :  { %v5606_v29 = vshll.u32 %v6337_v18, %v5600_v1  ;;  %v5612_v40 = vshll.u32 %v6339_v25, %v5600_v1  ;;  %v6303_v3 = vpop.eup %6302  ;;  %v5609_v38 = vshll.u32 %v6338_v22, %v5600_v1  ;;  %v5615_v5 = vshll.u32 %v10689_v8, %v5600_v1 }
 0x59e   :  { %v3264_v54 = vmul.f32 %v3263_v9, %v3248_v46  ;;  %v3272_v32 = vxor.u32 2147483648, %v3256_v27  ;;  %v3378_v52 = vsub.s32 %v3374_v47, %v3377_v24  ;;  %v5604_v50 = vshrl.u32 %v6337_v18, %v10434_v17 }
 0x59f   :  { %v5607_v21 = vshrl.u32 %v6338_v22, %v10434_v17  ;;  %v5603_v46 = vshll.u32 %v6336_v16, %v5600_v1  ;;  %v5610_v33 = vshrl.u32 %v6339_v25, %v10434_v17  ;;  %v5613_v4 = vshrl.u32 %v10689_v8, %v10434_v17 }
 0x5a0   :  { %v3269_v20 = vxor.u32 2147483648, %v3264_v54  ;;  %vm3379_vm6 = vcmp.lt.s32.totalorder %v3378_v52, 0  ;;  %v3380_v63 = vsub.s32 0, %v3378_v52  ;;  %v3273_v49 = vsel %vm3271_vm5, %v3272_v32, %v3264_v54 }
 0x5a1   :  { %v10456_v62 = vor.u32 %v5604_v50, %v5603_v46  ;;  %v10458_v45 = vor.u32 %v5607_v21, %v5606_v29  ;;  %v5614_v48 = vor.u32 %v5613_v4, %v5612_v40  ;;  %v5616_v19 = vshrl.u32 %v10690_v0, %v10434_v17 }
 0x5a2   :  { %v3270_v28 = vsel %vm3268_vm14, %v3256_v27, %v3269_v20  ;;  %v3381_v58 = vsel %vm3379_vm6, %v3380_v63, %v3378_v52  ;;  %v5611_v35 = vor.u32 %v5610_v33, %v5609_v38  ;;  %vm5618_vm8 = vcmp.lt.s32.totalorder %v10451_v15, 1 }
 0x5a3   :  { %v3274_v14 = vsel %vm3267_vm4, %v3270_v28, %v3273_v49  ;;  %v3382_v30 = vclz %v3381_v58  ;;  %v5617_v10 = vor.u32 %v5616_v19, %v5615_v5  ;;  %vm5621_vm9 = vcmp.lt.s32.totalorder %v10451_v15, 4 }
 0x5a4   :  { %v3275_v60 = vsel %vm3265_vm3, nan, %v3274_v14  ;;  %v5626_v56 = vsel %vm5618_vm8, %v10456_v62, %v10458_v45  ;;  %v5627_v36 = vsel %vm5621_vm9, %v5614_v48, 920167782  ;;  %v832_v37 = vmul.f32 %v6509_v34, %v10439_v51 }
 0x5a5   :  { %v5908_v31 = vmul.f32 %v6303_v3, %v3275_v60  ;;  %v6054_v47 = vadd.s32 4294967294, %v3382_v30  ;;  %vm5619_vm10 = vcmp.lt.s32.totalorder %v10451_v15, 2  ;;  %vm5620_vm11 = vcmp.lt.s32.totalorder %v10451_v15, 3 }
 0x5a6   :  { %v5628_v44 = vsel %vm5620_vm11, %v5611_v35, %v5627_v36  ;;  %v5630_v1 = vsel %vm5618_vm8, %v10458_v45, %v5611_v35  ;;  %v5631_v12 = vsel %vm5621_vm9, %v5617_v10, 1326507024  ;;  %v5635_v32 = vand.u32 65535, %v10465_v59 }
 0x5a7   :  { %5940 = vst [vmem:[#allocation2 + $0x70] sm:$0xff] %v5908_v31  ;;  %vm6055_vm7 = vcmp.lt.s32.totalorder %v6054_v47, 0  ;;  %v5629_v34 = vsel %vm5619_vm10, %v5626_v56, %v5628_v44  ;;  %v5632_v24 = vsel %vm5620_vm11, %v5614_v48, %v5631_v12  ;;  %v5636_v49 = vshrl.u32 %v10465_v59, 16 }
 0x5a8   :  { %v3385_v43 = vsel %vm6055_vm7, 0, %v6054_v47  ;;  %v5633_v54 = vsel %vm5619_vm10, %v5630_v1, %v5632_v24  ;;  %v5660_v23 = vshrl.u32 %v5629_v34, 16  ;;  %v10496_v29 = vadd.f32 %v6517_v39, %v832_v37 }
 0x5a9   :  { %v3386_v53 = vsub.s32 32, %v3385_v43  ;;  %v3390_v41 = vsub.s32 4294967266, %v3385_v43  ;;  %v3387_v11 = vshll.u32 %v3378_v52, %v3385_v43  ;;  %v5659_v52 = vand.u32 65535, %v5629_v34 }
 0x5aa   :  { %v5637_v63 = vand.u32 65535, %v5633_v54  ;;  %v5638_v21 = vshrl.u32 %v5633_v54, 16  ;;  %v5662_v46 = vmul.u32 %v5660_v23, %v5635_v32  ;;  %vm10500_vm13 = vcmp.le.f32.partialorder %v3276_v26, 0.7853982 }
 0x5ab   :  { %v3388_v27 = vshrl.u32 %v3370_v42, %v3386_v53  ;;  %v3391_v9 = vadd.s32 127, %v3390_v41  ;;  %v3400_v58 = vsub.s32 4, %v10428_v55  ;;  %v5602_v40 = vshrl.u32 %v6336_v16, %v10434_v17 }
 0x5ac   :  { %v5640_v4 = vmul.u32 %v5638_v21, %v5635_v32  ;;  %v5641_v3 = vmul.u32 %v5637_v63, %v5636_v49  ;;  %v5661_v14 = vmul.u32 %v5659_v52, %v5635_v32  ;;  %v5663_v30 = vmul.u32 %v5659_v52, %v5636_v49 }
 0x5ad   :  { %v3389_v50 = vor.u32 %v3388_v27, %v3387_v11  ;;  %v3392_v20 = vshll.u32 %v3391_v9, 23  ;;  %v5665_v38 = vshll.u32 %v5662_v46, 16  ;;  %v5639_v48 = vmul.u32 %v5637_v63, %v5635_v32 }
 0x5ae   :  { %v5643_v31 = vshll.u32 %v5640_v4, 16  ;;  %v5642_v47 = vmul.u32 %v5638_v21, %v5636_v49  ;;  %v5645_v26 = vshll.u32 %v5641_v3, 16  ;;  %v5664_v5 = vmul.u32 %v5660_v23, %v5636_v49 }
 0x5af   :  { %v3393_v28 = vor.u32 4788187, %v3392_v20  ;;  %v3396_v39 = vcvt.s32.f32 %v3389_v50  ;;  %vm5669_vm15 = vc.u32 %v5661_v14, %v5665_v38  ;;  %v5667_v43 = vshll.u32 %v5663_v30, 16 }
 0x5b0   :  { %vm5647_vm0 = vc.u32 %v5639_v48, %v5643_v31  ;;  %v5649_v42 = vadd.s32 %v5643_v31, %v5639_v48  ;;  %v5670_v10 = vsel %vm5669_vm15, 1, %v6342_v57  ;;  %v5671_v56 = vadd.s32 %v5665_v38, %v5661_v14 }
 0x5b1   :  { %v3394_v60 = vand.u32 2147483647, %v3393_v28  ;;  %v5648_v17 = vsel %vm5647_vm0, 1, %v6342_v57  ;;  %v5672_v36 = vadd.s32 %v5670_v10, %v5664_v5  ;;  %v5623_v53 = vsel %vm5621_vm9, %v5611_v35, 2102212464 }
 0x5b2   :  { %v5650_v41 = vadd.s32 %v5648_v17, %v5642_v47  ;;  %vm5651_vm1 = vc.u32 %v5649_v42, %v5645_v26  ;;  %v5622_v11 = vsel %vm5618_vm8, %v5602_v40, %v10456_v62  ;;  %v5644_v44 = vshrl.u32 %v5640_v4, 16 }
 0x5b3   :  { %v3397_v19 = vmul.f32 %v3396_v39, %v3394_v60  ;;  %v5652_v1 = vsel %vm5651_vm1, 1, %v6342_v57  ;;  %vm5673_vm2 = vc.u32 %v5671_v56, %v5667_v43  ;;  %v5743_v34 = vand.u32 2139095040, %v10496_v29 }
 0x5b4   :  { %v5654_v27 = vadd.s32 %v5652_v1, %v5650_v41  ;;  %v5674_v9 = vsel %vm5673_vm2, 1, %v6342_v57  ;;  %v5624_v62 = vsel %vm5620_vm11, %v10458_v45, %v5623_v53  ;;  %v5666_v24 = vshrl.u32 %v5662_v46, 16 }
 0x5b5   :  { %v3398_v37 = vxor.u32 2147483648, %v3397_v19  ;;  %v5676_v54 = vadd.s32 %v5674_v9, %v5672_v36  ;;  %v5646_v52 = vshrl.u32 %v5641_v3, 16  ;;  %v5744_v50 = vshrl.u32 %v5743_v34, 23 }
 0x5b6   :  { %v5655_v23 = vadd.s32 %v5654_v27, %v5644_v44  ;;  %v3401_v20 = vsel %vm3278_vm12, %v3400_v58, %v10428_v55  ;;  %v5668_v63 = vshrl.u32 %v5663_v30, 16  ;;  %v10528_v21 = vadd.s32 %v5671_v56, %v5667_v43 }
 0x5b7   :  { %v3399_v12 = vsel %vm3278_vm12, %v3398_v37, %v3397_v19  ;;  %v5677_v49 = vadd.s32 %v5676_v54, %v5666_v24  ;;  %v6101_v14 = vadd.s32 4294967169, %v5744_v50  ;;  %v885_v45 = vmul.f32 7.5, %v10222_v6 }
 0x5b8   :  { %v3402_v35 = vsel %vm10500_vm13, %v10261_v2, %v3399_v12  ;;  %v10530_v4 = vadd.s32 %v5655_v23, %v5646_v52  ;;  %v5625_v46 = vsel %vm5619_vm10, %v5622_v11, %v5624_v62  ;;  %v3403_v38 = vsel %vm10500_vm13, 0, %v3401_v20 }
 0x5b9   :  { %v3404_v32 = vmul.f32 %v3402_v35, %v3402_v35  ;;  %v5678_v3 = vadd.s32 %v5677_v49, %v5668_v63  ;;  %v5740_v30 = vand.u32 2147483647, %v10496_v29  ;;  %v5750_v39 = vadd.s32 1, %v6101_v14 }
 0x5ba   :  { %vm5681_vm3 = vc.u32 %v10530_v4, %v10528_v21  ;;  %v5679_v6 = vmul.u32 %v10465_v59, %v5625_v46  ;;  %v932_v47 = vmul.f32 1.442695, %v885_v45  ;;  %v3420_v15 = vand.u32 3, %v3403_v38 }
 0x5bb   :  { %v3405_v28 = vmul.f32 -0.001358992, %v3404_v32  ;;  %v3412_v40 = vmul.f32 -0.00019511016, %v3404_v32  ;;  %v5682_v58 = vadd.s32 1, %v5678_v3  ;;  %vm5751_vm4 = vcmp.gt.s32.totalorder %v5750_v39, 0 }
 0x5bc   :  { %v5752_v42 = vsel %vm5751_vm4, %v5750_v39, 0  ;;  %v5747_v10 = vand.u32 8388607, %v5740_v30  ;;  %6304 = vpow2.f32 %v932_v47  ;;  %vm3421_vm14 = vcmp.lt.s32.totalorder %v3420_v15, 2 }
 0x5bd   :  { %v3406_v60 = vadd.f32 0.041655596, %v3405_v28  ;;  %v3413_v55 = vadd.f32 0.008332121, %v3412_v40  ;;  %v5683_v26 = vsel %vm5681_vm3, %v5682_v58, %v5678_v3  ;;  %v5754_v17 = vand.u32 31, %v5752_v42 }
 0x5be   :  { %v5684_v19 = vadd.s32 %v5683_v26, %v5679_v6  ;;  %vm3422_vm5 = vcmp.eq.s32.totalorder %v3420_v15, 0  ;;  %vm3425_vm6 = vcmp.eq.s32.totalorder %v3420_v15, 2  ;;  %v5748_v11 = vor.u32 8388608, %v5747_v10 }
 0x5bf   :  { %v3407_v48 = vmul.f32 %v3406_v60, %v3404_v32  ;;  %v3414_v31 = vmul.f32 %v3413_v55, %v3404_v32  ;;  %v10543_v37 = vsub.s32 32, %v5754_v17  ;;  %v10552_v34 = vshrl.u32 %v5752_v42, 5 }
 0x5c0   :  { %v5685_v36 = vadd.s32 536870912, %v5684_v19  ;;  %v5757_v62 = vshll.u32 %v6336_v16, %v5754_v17  ;;  %v5760_v24 = vshll.u32 %v6337_v18, %v5754_v17  ;;  %v5763_v50 = vshll.u32 %v6338_v22, %v5754_v17 }
 0x5c1   :  { %v3408_v5 = vadd.f32 -0.4999988, %v3407_v48  ;;  %v3415_v33 = vadd.f32 -0.16666654, %v3414_v31  ;;  %v5758_v44 = vshrl.u32 %v6337_v18, %v10543_v37  ;;  %v5761_v1 = vshrl.u32 %v6338_v22, %v10543_v37 }
 0x5c2   :  { %v10545_v41 = vshrl.u32 %v5685_v36, 30  ;;  %v5764_v54 = vshrl.u32 %v6339_v25, %v10543_v37  ;;  %v6305_v20 = vpop.eup %6304  ;;  %v5770_v18 = vshrl.u32 %v10690_v0, %v10543_v37  ;;  %v5769_v45 = vshll.u32 %v10689_v8, %v5754_v17 }
 0x5c3   :  { %v3409_v43 = vmul.f32 %v3408_v5, %v3404_v32  ;;  %v3416_v56 = vmul.f32 %v3415_v33, %v3404_v32  ;;  %v5767_v32 = vshrl.u32 %v10689_v8, %v10543_v37  ;;  %v10563_v49 = vor.u32 %v5758_v44, %v5757_v62 }
 0x5c4   :  { %v5687_v9 = vshll.u32 %v10545_v41, 30  ;;  %v10565_v28 = vor.u32 %v5761_v1, %v5760_v24  ;;  %vm3419_vm8 = vweird.f32 %v10261_v2  ;;  %v5771_v60 = vor.u32 %v5770_v18, %v5769_v45 }
 0x5c5   :  { %v3410_v59 = vadd.f32 1.0, %v3409_v43  ;;  %v3417_v53 = vadd.f32 1.0, %v3416_v56  ;;  %vm5772_vm9 = vcmp.lt.s32.totalorder %v10552_v34, 1  ;;  %v10574_v0 = vshll.u32 %v5748_v11, 8 }
 0x5c6   :  { %v5688_v23 = vsub.s32 %v5684_v19, %v5687_v9  ;;  %vm5775_vm10 = vcmp.lt.s32.totalorder %v10552_v34, 4  ;;  %v5780_v8 = vsel %vm5772_vm9, %v10563_v49, %v10565_v28  ;;  %vm5774_vm11 = vcmp.lt.s32.totalorder %v10552_v34, 3 }
 0x5c7   :  { %v3418_v12 = vmul.f32 %v3417_v53, %v3402_v35  ;;  %v3426_v27 = vxor.u32 2147483648, %v3410_v59  ;;  %v5766_v35 = vshll.u32 %v6339_v25, %v5754_v17  ;;  %v5765_v25 = vor.u32 %v5764_v54, %v5763_v50 }
 0x5c8   :  { %vm5689_vm7 = vcmp.lt.s32.totalorder %v5688_v23, 0  ;;  %v5690_v14 = vsub.s32 0, %v5688_v23  ;;  %v5680_v31 = vadd.s32 %v10528_v21, %v10530_v4  ;;  %vm5773_vm12 = vcmp.lt.s32.totalorder %v10552_v34, 2 }
 0x5c9   :  { %v3423_v52 = vxor.u32 2147483648, %v3418_v12  ;;  %v3427_v63 = vsel %vm3425_vm6, %v3426_v27, %v3418_v12  ;;  %v5768_v46 = vor.u32 %v5767_v32, %v5766_v35  ;;  %v5784_v48 = vsel %vm5772_vm9, %v10565_v28, %v5765_v25 }
 0x5ca   :  { %v5691_v38 = vsel %vm5689_vm7, %v5690_v14, %v5688_v23  ;;  %v5785_v47 = vsel %vm5775_vm10, %v5771_v60, 1326507024  ;;  %v5789_v5 = vand.u32 65535, %v10574_v0  ;;  %v5790_v17 = vshrl.u32 %v10574_v0, 16 }
 0x5cb   :  { %v3424_v40 = vsel %vm3422_vm5, %v3410_v59, %v3423_v52  ;;  %v5692_v58 = vclz %v5691_v38  ;;  %v5781_v39 = vsel %vm5775_vm10, %v5768_v46, 920167782  ;;  %v5786_v26 = vsel %vm5774_vm11, %v5768_v46, %v5785_v47 }
 0x5cc   :  { %v3428_v22 = vsel %vm3421_vm14, %v3424_v40, %v3427_v63  ;;  %v5782_v6 = vsel %vm5774_vm11, %v5765_v25, %v5781_v39  ;;  %v5787_v21 = vsel %vm5773_vm12, %v5784_v48, %v5786_v26  ;;  %v5756_v12 = vshrl.u32 %v6336_v16, %v10543_v37 }
 0x5cd   :  { %v3429_v3 = vsel %vm3419_vm8, nan, %v3428_v22  ;;  %v6099_v2 = vadd.s32 4294967294, %v5692_v58  ;;  %v5783_v15 = vsel %vm5773_vm12, %v5780_v8, %v5782_v6  ;;  %v5791_v43 = vand.u32 65535, %v5787_v21 }
 0x5ce   :  { %v5909_v55 = vmul.f32 %v6305_v20, %v3429_v3  ;;  %v5813_v4 = vand.u32 65535, %v5783_v15  ;;  %v5814_v19 = vshrl.u32 %v5783_v15, 16  ;;  %v5792_v36 = vshrl.u32 %v5787_v21, 16 }
 0x5cf   :  { %vm6100_vm13 = vcmp.lt.s32.totalorder %v6099_v2, 0  ;;  %v5795_v44 = vmul.u32 %v5791_v43, %v5790_v17  ;;  %v5777_v54 = vsel %vm5775_vm10, %v5765_v25, 2102212464  ;;  %v5793_v52 = vmul.u32 %v5791_v43, %v5789_v5 }
 0x5d0   :  { %5941 = vst [vmem:[#allocation2 + $0x78] sm:$0xff] %v5909_v55  ;;  %v5695_v33 = vsel %vm6100_vm13, 0, %v6099_v2  ;;  %v5816_v59 = vmul.u32 %v5814_v19, %v5789_v5  ;;  %v5817_v1 = vmul.u32 %v5813_v4, %v5790_v17  ;;  %v5794_v27 = vmul.u32 %v5792_v36, %v5789_v5 }
 0x5d1   :  { %v5696_v42 = vsub.s32 32, %v5695_v33  ;;  %v5700_v10 = vsub.s32 4294967266, %v5695_v33  ;;  %v5697_v56 = vshll.u32 %v5688_v23, %v5695_v33  ;;  %v5815_v32 = vmul.u32 %v5813_v4, %v5789_v5 }
 0x5d2   :  { %v5819_v9 = vshll.u32 %v5816_v59, 16  ;;  %v5796_v50 = vmul.u32 %v5792_v36, %v5790_v17  ;;  %v5797_v23 = vshll.u32 %v5794_v27, 16  ;;  %v5818_v35 = vmul.u32 %v5814_v19, %v5790_v17 }
 0x5d3   :  { %v5698_v53 = vshrl.u32 %v5680_v31, %v5696_v42  ;;  %v5701_v11 = vadd.s32 127, %v5700_v10  ;;  %v5799_v63 = vshll.u32 %v5795_v44, 16  ;;  %v5821_v18 = vshll.u32 %v5817_v1, 16 }
 0x5d4   :  { %vm5823_vm15 = vc.u32 %v5815_v32, %v5819_v9  ;;  %vm5801_vm0 = vc.u32 %v5793_v52, %v5797_v23  ;;  %v5803_v40 = vadd.s32 %v5797_v23, %v5793_v52  ;;  %v5825_v37 = vadd.s32 %v5819_v9, %v5815_v32 }
 0x5d5   :  { %v5699_v62 = vor.u32 %v5698_v53, %v5697_v56  ;;  %v5702_v24 = vshll.u32 %v5701_v11, 23  ;;  %v5824_v16 = vsel %vm5823_vm15, 1, %v6342_v57  ;;  %v5802_v22 = vsel %vm5801_vm0, 1, %v6342_v57 }
 0x5d6   :  { %v5826_v46 = vadd.s32 %v5824_v16, %v5818_v35  ;;  %v5776_v25 = vsel %vm5772_vm9, %v5756_v12, %v10563_v49  ;;  %v5804_v3 = vadd.s32 %v5802_v22, %v5796_v50  ;;  %vm5805_vm1 = vc.u32 %v5803_v40, %v5799_v63 }
 0x5d7   :  { %v5703_v20 = vor.u32 4788187, %v5702_v24  ;;  %v5706_v45 = vcvt.s32.f32 %v5699_v62  ;;  %vm5827_vm2 = vc.u32 %v5825_v37, %v5821_v18  ;;  %v5778_v60 = vsel %vm5774_vm11, %v10565_v28, %v5777_v54 }
 0x5d8   :  { %v5806_v55 = vsel %vm5805_vm1, 1, %v6342_v57  ;;  %v5828_v58 = vsel %vm5827_vm2, 1, %v6342_v57  ;;  %v5798_v8 = vshrl.u32 %v5794_v27, 16  ;;  %v5820_v39 = vshrl.u32 %v5816_v59, 16 }
 0x5d9   :  { %v5704_v14 = vand.u32 2147483647, %v5703_v20  ;;  %v5808_v2 = vadd.s32 %v5806_v55, %v5804_v3  ;;  %v5830_v48 = vadd.s32 %v5828_v58, %v5826_v46  ;;  %vm5588_vm3 = vcmp.lt.s32.totalorder %v10400_v13, 0 }
 0x5da   :  { %v5800_v49 = vshrl.u32 %v5795_v44, 16  ;;  %v5822_v47 = vshrl.u32 %v5817_v1, 16  ;;  %vm10619_vm4 = vcmp.le.f32.partialorder %v5586_v7, 0.7853982  ;;  %v5779_v28 = vsel %vm5773_vm12, %v5776_v25, %v5778_v60 }
 0x5db   :  { %v5707_v38 = vmul.f32 %v5706_v45, %v5704_v14  ;;  %v5809_v6 = vadd.s32 %v5808_v2, %v5798_v8  ;;  %v5831_v15 = vadd.s32 %v5830_v48, %v5820_v39  ;;  %v5829_v21 = vadd.s32 %v5825_v37, %v5821_v18 }
 0x5dc   :  { %v5833_v17 = vmul.u32 %v10574_v0, %v5779_v28  ;;  %v5710_v43 = vsub.s32 4, %v10545_v41  ;;  %v900_v53 = vmul.f32 7.5, %v10387_v61  ;;  %vm5729_vm9 = vweird.f32 %v10400_v13 }
 0x5dd   :  { %v5708_v31 = vxor.u32 2147483648, %v5707_v38  ;;  %v5810_v33 = vadd.s32 %v5809_v6, %v5800_v49  ;;  %v5832_v4 = vadd.s32 %v5831_v15, %v5822_v47  ;;  %vm5742_vm11 = vcmp.lt.s32.totalorder %v10496_v29, 0 }
 0x5de   :  { %v5711_v12 = vsel %vm5588_vm3, %v5710_v43, %v10545_v41  ;;  %v962_v24 = vmul.f32 1.442695, %v900_v53  ;;  %vm10642_vm12 = vcmp.le.f32.partialorder %v5740_v30, 0.7853982  ;;  %vm5883_vm1 = vweird.f32 %v10496_v29 }
 0x5df   :  { %v5709_v57 = vsel %vm5588_vm3, %v5708_v31, %v5707_v38  ;;  %vm5835_vm14 = vc.u32 %v5810_v33, %v5829_v21  ;;  %v5836_v42 = vadd.s32 1, %v5832_v4  ;;  %v5713_v0 = vsel %vm10619_vm4, 0, %v5711_v12 }
 0x5e0   :  { %v5712_v5 = vsel %vm10619_vm4, %v10400_v13, %v5709_v57  ;;  %6306 = vpow2.f32 %v962_v24  ;;  %v5730_v35 = vand.u32 3, %v5713_v0  ;;  %v5834_v60 = vadd.s32 %v5829_v21, %v5810_v33 }
 0x5e1   :  { %v5714_v19 = vmul.f32 %v5712_v5, %v5712_v5  ;;  %v5837_v56 = vsel %vm5835_vm14, %v5836_v42, %v5832_v4 }
 0x5e2   :  { %v5838_v59 = vadd.s32 %v5837_v56, %v5833_v17  ;;  %vm5732_vm6 = vcmp.eq.s32.totalorder %v5730_v35, 0  ;;  %vm5735_vm7 = vcmp.eq.s32.totalorder %v5730_v35, 2  ;;  %vm5731_vm8 = vcmp.lt.s32.totalorder %v5730_v35, 2 }
 0x5e3   :  { %v5715_v7 = vmul.f32 -0.001358992, %v5714_v19  ;;  %v5722_v10 = vmul.f32 -0.00019511016, %v5714_v19 }
 0x5e4   :  { %v5839_v1 = vadd.s32 536870912, %v5838_v59 }
 0x5e5   :  { %v5716_v36 = vadd.f32 0.041655596, %v5715_v7  ;;  %v5723_v34 = vadd.f32 0.008332121, %v5722_v10  ;;  %v901_v7 = vmul.f32 7.5, %v10439_v51 }
 0x5e6   :  { %v5840_v62 = vshrl.u32 %v5839_v1, 30  ;;  %v6307_v45 = vpop.eup %6306 }
 0x5e7   :  { %v5717_v11 = vmul.f32 %v5716_v36, %v5714_v19  ;;  %v5724_v44 = vmul.f32 %v5723_v34, %v5714_v19  ;;  %v964_v36 = vmul.f32 1.442695, %v901_v7 }
 0x5e8   :  { %v5841_v52 = vshll.u32 %v5840_v62, 30  ;;  %v5864_v4 = vsub.s32 4, %v5840_v62 }
 0x5e9   :  { %v5718_v27 = vadd.f32 -0.4999988, %v5717_v11  ;;  %v5725_v9 = vadd.f32 -0.16666654, %v5724_v44  ;;  %6308 = vpow2.f32 %v964_v36 }
 0x5ea   :  { %v5842_v61 = vsub.s32 %v5838_v59, %v5841_v52  ;;  %v5865_v43 = vsel %vm5742_vm11, %v5864_v4, %v5840_v62 }
 0x5eb   :  { %v5719_v54 = vmul.f32 %v5718_v27, %v5714_v19  ;;  %v5726_v32 = vmul.f32 %v5725_v9, %v5714_v19  ;;  %v5867_v34 = vsel %vm10642_vm12, 0, %v5865_v43 }
 0x5ec   :  { %vm5843_vm5 = vcmp.lt.s32.totalorder %v5842_v61, 0  ;;  %v5844_v18 = vsub.s32 0, %v5842_v61  ;;  %v5884_v1 = vand.u32 3, %v5867_v34 }
 0x5ed   :  { %v5720_v50 = vadd.f32 1.0, %v5719_v54  ;;  %v5727_v23 = vadd.f32 1.0, %v5726_v32 }
 0x5ee   :  { %v5845_v40 = vsel %vm5843_vm5, %v5844_v18, %v5842_v61  ;;  %vm5886_vm13 = vcmp.eq.s32.totalorder %v5884_v1, 0  ;;  %vm5889_vm15 = vcmp.eq.s32.totalorder %v5884_v1, 2  ;;  %vm5885_vm0 = vcmp.lt.s32.totalorder %v5884_v1, 2 }
 0x5ef   :  { %v5728_v20 = vmul.f32 %v5727_v23, %v5712_v5  ;;  %v5736_v63 = vxor.u32 2147483648, %v5720_v50  ;;  %v5846_v16 = vclz %v5845_v40  ;;  %v6309_v0 = vpop.eup %6308 }
 0x5f1   :  { %v5733_v41 = vxor.u32 2147483648, %v5728_v20  ;;  %v5737_v14 = vsel %vm5735_vm7, %v5736_v63, %v5728_v20  ;;  %v6102_v46 = vadd.s32 4294967294, %v5846_v16 }
 0x5f3   :  { %v5734_v37 = vsel %vm5732_vm6, %v5720_v50, %v5733_v41  ;;  %vm6103_vm10 = vcmp.lt.s32.totalorder %v6102_v46, 0 }
 0x5f4   :  { %v5738_v22 = vsel %vm5731_vm8, %v5734_v37, %v5737_v14  ;;  %v5849_v38 = vsel %vm6103_vm10, 0, %v6102_v46 }
 0x5f5   :  { %v5739_v25 = vsel %vm5729_vm9, nan, %v5738_v22  ;;  %v5850_v55 = vsub.s32 32, %v5849_v38  ;;  %v5854_v58 = vsub.s32 4294967266, %v5849_v38  ;;  %v5851_v8 = vshll.u32 %v5842_v61, %v5849_v38 }
 0x5f6   :  { %v5924_v3 = vmul.f32 %v6307_v45, %v5739_v25 }
 0x5f7   :  { %v5852_v2 = vshrl.u32 %v5834_v60, %v5850_v55  ;;  %v5855_v39 = vadd.s32 127, %v5854_v58 }
 0x5f8   :  { %5956 = vst [vmem:[#allocation2 + $0xf0] sm:$0xff] %v5924_v3 }
 0x5f9   :  { %v5853_v48 = vor.u32 %v5852_v2, %v5851_v8  ;;  %v5856_v31 = vshll.u32 %v5855_v39, 23 }
 0x5fb   :  { %v5857_v49 = vor.u32 4788187, %v5856_v31  ;;  %v5860_v47 = vcvt.s32.f32 %v5853_v48 }
 0x5fd   :  { %v5858_v6 = vand.u32 2147483647, %v5857_v49 }
 0x5ff   :  { %v5861_v15 = vmul.f32 %v5860_v47, %v5858_v6 }
 0x601   :  { %v5862_v13 = vxor.u32 2147483648, %v5861_v15 }
 0x603   :  { %v5863_v57 = vsel %vm5742_vm11, %v5862_v13, %v5861_v15 }
 0x604   :  { %v5866_v28 = vsel %vm10642_vm12, %v10496_v29, %v5863_v57 }
 0x605   :  { %v5868_v5 = vmul.f32 %v5866_v28, %v5866_v28 }
 0x607   :  { %v5869_v33 = vmul.f32 -0.001358992, %v5868_v5  ;;  %v5876_v21 = vmul.f32 -0.00019511016, %v5868_v5 }
 0x609   :  { %v5870_v19 = vadd.f32 0.041655596, %v5869_v33  ;;  %v5877_v42 = vadd.f32 0.008332121, %v5876_v21 }
 0x60b   :  { %v5871_v10 = vmul.f32 %v5870_v19, %v5868_v5  ;;  %v5878_v17 = vmul.f32 %v5877_v42, %v5868_v5 }
 0x60d   :  { %v5872_v30 = vadd.f32 -0.4999988, %v5871_v10  ;;  %v5879_v56 = vadd.f32 -0.16666654, %v5878_v17 }
 0x60f   :  { %v5873_v59 = vmul.f32 %v5872_v30, %v5868_v5  ;;  %v5880_v53 = vmul.f32 %v5879_v56, %v5868_v5 }
 0x611   :  { %v5874_v11 = vadd.f32 1.0, %v5873_v59  ;;  %v5881_v44 = vadd.f32 1.0, %v5880_v53 }
 0x613   :  { %v5882_v12 = vmul.f32 %v5881_v44, %v5866_v28  ;;  %v5890_v27 = vxor.u32 2147483648, %v5874_v11 }
 0x615   :  { %v5887_v9 = vxor.u32 2147483648, %v5882_v12  ;;  %v5891_v62 = vsel %vm5889_vm15, %v5890_v27, %v5882_v12 }
 0x617   :  { %v5888_v51 = vsel %vm5886_vm13, %v5874_v11, %v5887_v9 }
 0x618   :  { %v5892_v24 = vsel %vm5885_vm0, %v5888_v51, %v5891_v62 }
 0x619   :  { %v5893_v54 = vsel %vm5883_vm1, nan, %v5892_v24 }
 0x61a   :  { %v5925_v32 = vmul.f32 %v6309_v0, %v5893_v54 }
 0x61c   :  { %5957 = vst [vmem:[#allocation2 + $0xf8] sm:$0xff] %v5925_v32 }
 0x61d   :  { %5970 = dma.vmem_to_hbm [thread:$0]  %s5963_s3, 4096, %s5965_s6, [#allocation3], %s6344_s7, %s6344_s7, %s6345_s8  }
 0x61e   :  { %6334 = dma.done.wait [#allocation3], 4096  }
 0x61f   :  { %6335 = vsyncadd [#allocation3], 4294963200 }
 0x620   :  { %5975 = vsyncpa [#allocation3], 1 }

</bundles_post_ra>
